<compile_context>
chip_gen: v5e
topology: v5e:2x2
jax: 0.10.0
libtpu: 0.0.40
codegen_flags: <defaults>
</compile_context>

<pallas_src>
import jax
import jax.numpy as jnp
from jax.experimental import pallas as pl
from jax.experimental.pallas import tpu as pltpu

D1, D2, D3, LATENT = 512, 512, 256, 2
TB = 128          # batch tile (MXU M dimension)
HEAD_PAD = 128    # fused mean|logvar head padded to a full lane width


def _round_up(n, m):
    return ((n + m - 1) // m) * m


# -----------------------------------------------------------------------------
# Kernel
# -----------------------------------------------------------------------------
def vae_kernel(
    x_ref, eps_ref,
    w1, b1, w2, b2, w3, b3,                    # encoder (weights bf16, biases f32)
    wmv, bmv,                                  # fused mean|logvar head (padded to 128 lanes)
    wd1, bd1, wd2, bd2, wd3, bd3, wd4, bd4,    # decoder
    xhat_ref, ml_ref,
):
    f32 = jnp.float32
    bf16 = jnp.bfloat16

    def linear(h, w_ref, b_ref):
        # bf16 operands on the MXU, f32 accumulation, f32 bias add.
        return jnp.dot(h.astype(bf16), w_ref[...],
                       preferred_element_type=f32) + b_ref[...]

    def lrelu(v):
        return jnp.where(v > 0, v, 0.2 * v)

    x = x_ref[...].astype(f32)

    # ----- encoder -----
    h = lrelu(linear(x, w1, b1))
    h = lrelu(linear(h, w2, b2))
    h = lrelu(linear(h, w3, b3))

    # ----- fused mean|logvar head (single matmul, lane-dense output) -----
    ml = linear(h, wmv, bmv)                  # [TB, HEAD_PAD]; cols 0:2 mean, 2:4 logvar
    mean = ml[:, :LATENT]                     # [TB, 2]
    logvar = ml[:, LATENT:2 * LATENT]         # [TB, 2]

    # ----- reparameterization: z = mean + exp(0.5*logvar) * eps -----
    std = jnp.exp(0.5 * logvar)
    z = mean + std * eps_ref[...].astype(f32)  # [TB, 2]

    # ----- decoder -----
    # First layer has K = 2: do it on the VPU with broadcast FMAs, keep MXU free.
    wd1_f = wd1[...].astype(f32)               # [2, D3]
    d = z[:, 0:1] * wd1_f[0:1, :] + z[:, 1:2] * wd1_f[1:2, :] + bd1[...]
    d = lrelu(d)

    d = lrelu(linear(d, wd2, bd2))
    d = lrelu(linear(d, wd3, bd3))
    logits = linear(d, wd4, bd4)
    x_hat = jax.nn.sigmoid(logits)

    xhat_ref[...] = x_hat.astype(xhat_ref.dtype)
    ml_ref[...] = ml.astype(ml_ref.dtype)


# -----------------------------------------------------------------------------
# Wrapper
# -----------------------------------------------------------------------------
@jax.jit
def conv_vae_forward(x, eps, packed_params):
    """x: [B, input_dim] f32, eps: [B, LATENT] f32, packed_params from pack_params()."""
    B, input_dim = x.shape
    id_pad = packed_params[0].shape[0]          # padded input/output feature dim
    b_pad = pl.cdiv(B, TB) * TB

    xp = jnp.pad(x, ((0, b_pad - B), (0, id_pad - input_dim)))
    epsp = jnp.pad(eps, ((0, b_pad - B), (0, 0)))

    grid = (b_pad // TB,)

    def batch_map(i):
        return (i, 0)

    def const_map(i):
        return (0, 0)

    in_specs = [
        pl.BlockSpec((TB, id_pad), batch_map),     # x tile
        pl.BlockSpec((TB, LATENT), batch_map),     # eps tile
    ]
    # Weights/biases: full-size blocks, constant index -> DMA'd once, VMEM-resident.
    in_specs += [pl.BlockSpec(p.shape, const_map) for p in packed_params]

    out_specs = (
        pl.BlockSpec((TB, id_pad), batch_map),     # x_hat (lane-dense)
        pl.BlockSpec((TB, HEAD_PAD), batch_map),   # fused mean|logvar (lane-dense)
    )
    out_shape = (
        jax.ShapeDtypeStruct((b_pad, id_pad), jnp.float32),
        jax.ShapeDtypeStruct((b_pad, HEAD_PAD), jnp.float32),
    )

    flops = 2 * b_pad * (id_pad * D1 + D1 * D2 + D2 * D3 + D3 * HEAD_PAD
                         + LATENT * D3 + D3 * D2 + D2 * D1 + D1 * id_pad)
    transcendentals = b_pad * (LATENT + id_pad)    # exp for std + sigmoid
    bytes_accessed = (
        xp.size * 4 + epsp.size * 4
        + sum(int(p.size) * p.dtype.itemsize for p in packed_params)
        + b_pad * id_pad * 4 + b_pad * HEAD_PAD * 4
    )

    xhat_p, ml_p = pl.pallas_call(
        vae_kernel,
        grid=grid,
        out_shape=out_shape,
        in_specs=in_specs,
        out_specs=out_specs,
        compiler_params=pltpu.CompilerParams(
            dimension_semantics=("parallel",),
            vmem_limit_bytes=16 << 20,
        ),
        cost_estimate=pl.CostEstimate(
            flops=flops,
            transcendentals=transcendentals,
            bytes_accessed=bytes_accessed,
        ),
    )(xp, epsp, *packed_params)

    x_hat = xhat_p[:B, :input_dim]
    mean = ml_p[:B, :LATENT]
    logvar = ml_p[:B, LATENT:2 * LATENT]
    return x_hat, mean, logvar


# -----------------------------------------------------------------------------
# Parameter handling
# -----------------------------------------------------------------------------
def init_params(key, input_dim):
    """Mimics nn.Linear default init: U(-1/sqrt(fan_in), +1/sqrt(fan_in)).
    Weights stored [in, out] so the kernel computes x @ W + b (same math as PyTorch)."""
    dims = [
        (input_dim, D1), (D1, D2), (D2, D3),                 # encoder
        (D3, LATENT), (D3, LATENT),                          # mean, logvar heads
        (LATENT, D3), (D3, D2), (D2, D1), (D1, input_dim),   # decoder
    ]
    params = []
    for i, (fan_in, fan_out) in enumerate(dims):
        kw, kb = jax.random.split(jax.random.fold_in(key, i))
        bound = 1.0 / (fan_in ** 0.5)
        w = jax.random.uniform(kw, (fan_in, fan_out), jnp.float32, -bound, bound)
        b = jax.random.uniform(kb, (1, fan_out), jnp.float32, -bound, bound)
        params.extend([w, b])
    return tuple(params)


def pack_params(params, input_dim):
    """Fuse heads, pad input/output feature dims to a lane multiple, cast weights to bf16."""
    (w1, b1, w2, b2, w3, b3, wm, bm, wv, bv,
     wd1, bd1, wd2, bd2, wd3, bd3, wd4, bd4) = params
    id_pad = _round_up(input_dim, 128)
    bf = jnp.bfloat16

    # encoder first layer: pad the input dim with zero rows (zero-padded x cols contribute 0)
    w1p = jnp.pad(w1, ((0, id_pad - input_dim), (0, 0))).astype(bf)

    # fused mean|logvar head, zero-padded to 128 output lanes
    wmv = jnp.concatenate([wm, wv], axis=1)                       # [D3, 4]
    wmvp = jnp.pad(wmv, ((0, 0), (0, HEAD_PAD - 2 * LATENT))).astype(bf)
    bmv = jnp.concatenate([bm, bv], axis=1)
    bmvp = jnp.pad(bmv, ((0, 0), (0, HEAD_PAD - 2 * LATENT)))

    # decoder last layer: pad the output dim with zero cols (sliced off after the call)
    wd4p = jnp.pad(wd4, ((0, 0), (0, id_pad - input_dim))).astype(bf)
    bd4p = jnp.pad(bd4, ((0, 0), (0, id_pad - input_dim)))

    return (
        w1p, b1, w2.astype(bf), b2, w3.astype(bf), b3,
        wmvp, bmvp,
        wd1.astype(bf), bd1, wd2.astype(bf), bd2, wd3.astype(bf), bd3,
        wd4p, bd4p,
    )


# -----------------------------------------------------------------------------
# Pure-JAX reference (mirrors the kernel's bf16 matmul rounding)
# -----------------------------------------------------------------------------
def reference_forward(x, eps, params):
    (w1, b1, w2, b2, w3, b3, wm, bm, wv, bv,
     wd1, bd1, wd2, bd2, wd3, bd3, wd4, bd4) = params
    bf = lambda a: a.astype(jnp.bfloat16)

    def lin(h, w, b):
        return jnp.dot(bf(h), bf(w), preferred_element_type=jnp.float32) + b

    lr = lambda v: jnp.where(v > 0, v, 0.2 * v)
    h = lr(lin(x, w1, b1))
    h = lr(lin(h, w2, b2))
    h = lr(lin(h, w3, b3))
    mean = lin(h, wm, bm)
    logvar = lin(h, wv, bv)
    z = mean + jnp.exp(0.5 * logvar) * eps
    d = lr(z @ bf(wd1).astype(jnp.float32) + bd1)   # matches kernel's f32 VPU path
    d = lr(lin(d, wd2, bd2))
    d = lr(lin(d, wd3, bd3))
    x_hat = jax.nn.sigmoid(lin(d, wd4, bd4))
    return x_hat, mean, logvar


if __name__ == "__main__":
    key = jax.random.PRNGKey(0)
    k_x, k_eps, k_p = jax.random.split(key, 3)

    # Small test shapes: exercises batch padding (200 -> 256, grid of 2 tiles)
    # and feature padding (64 -> 128).
    B, INPUT_DIM = 200, 64
    x = jax.random.uniform(k_x, (B, INPUT_DIM), jnp.float32)    # image-like inputs in [0,1)
    eps = jax.random.normal(k_eps, (B, LATENT), jnp.float32)    # reparameterization noise

    params = init_params(k_p, INPUT_DIM)
    packed = pack_params(params, INPUT_DIM)

    x_hat, mean, logvar = conv_vae_forward(x, eps, packed)
    jax.block_until_ready((x_hat, mean, logvar))

    # sanity check vs pure-JAX reference (bf16 matmul path => loosened tolerance)
    rx, rm, rl = reference_forward(x, eps, params)
    assert x_hat.shape == (B, INPUT_DIM) and mean.shape == (B, LATENT) and logvar.shape == (B, LATENT)
    assert jnp.allclose(mean, rm, atol=2e-2, rtol=2e-2), "mean mismatch"
    assert jnp.allclose(logvar, rl, atol=2e-2, rtol=2e-2), "logvar mismatch"
    assert jnp.allclose(x_hat, rx, atol=2e-2, rtol=2e-2), "x_hat mismatch"

    print("KERNEL_OK")
</pallas_src>

<mosaic_0001>
module attributes {stable_mosaic.version = 11 : i64} {
  func.func @vae_kernel(%arg0: i32, %arg1: memref<128x128xf32, #tpu.memory_space<vmem>>, %arg2: memref<128x2xf32, #tpu.memory_space<vmem>>, %arg3: memref<128x512xbf16, #tpu.memory_space<vmem>>, %arg4: memref<1x512xf32, #tpu.memory_space<vmem>>, %arg5: memref<512x512xbf16, #tpu.memory_space<vmem>>, %arg6: memref<1x512xf32, #tpu.memory_space<vmem>>, %arg7: memref<512x256xbf16, #tpu.memory_space<vmem>>, %arg8: memref<1x256xf32, #tpu.memory_space<vmem>>, %arg9: memref<256x128xbf16, #tpu.memory_space<vmem>>, %arg10: memref<1x128xf32, #tpu.memory_space<vmem>>, %arg11: memref<2x256xbf16, #tpu.memory_space<vmem>>, %arg12: memref<1x256xf32, #tpu.memory_space<vmem>>, %arg13: memref<256x512xbf16, #tpu.memory_space<vmem>>, %arg14: memref<1x512xf32, #tpu.memory_space<vmem>>, %arg15: memref<512x512xbf16, #tpu.memory_space<vmem>>, %arg16: memref<1x512xf32, #tpu.memory_space<vmem>>, %arg17: memref<512x128xbf16, #tpu.memory_space<vmem>>, %arg18: memref<1x128xf32, #tpu.memory_space<vmem>>, %arg19: memref<128x128xf32, #tpu.memory_space<vmem>>, %arg20: memref<128x128xf32, #tpu.memory_space<vmem>>) attributes {dimension_semantics = [#tpu.dimension_semantics<parallel>], iteration_bounds = array<i64: 2>, scalar_prefetch = 0 : i64, scratch_operands = 0 : i64, tpu.core_type = #tpu.core_type<tc>, window_params = [{transform_indices = @transform_0, window_bounds = array<i64: 128, 128>}, {transform_indices = @transform_1, window_bounds = array<i64: 128, 2>}, {pipeline_mode = #tpu.pipeline_mode<synchronous>, transform_indices = @transform_2, window_bounds = array<i64: 128, 512>}, {pipeline_mode = #tpu.pipeline_mode<synchronous>, transform_indices = @transform_3, window_bounds = array<i64: 1, 512>}, {pipeline_mode = #tpu.pipeline_mode<synchronous>, transform_indices = @transform_4, window_bounds = array<i64: 512, 512>}, {pipeline_mode = #tpu.pipeline_mode<synchronous>, transform_indices = @transform_5, window_bounds = array<i64: 1, 512>}, {pipeline_mode = #tpu.pipeline_mode<synchronous>, transform_indices = @transform_6, window_bounds = array<i64: 512, 256>}, {pipeline_mode = #tpu.pipeline_mode<synchronous>, transform_indices = @transform_7, window_bounds = array<i64: 1, 256>}, {pipeline_mode = #tpu.pipeline_mode<synchronous>, transform_indices = @transform_8, window_bounds = array<i64: 256, 128>}, {pipeline_mode = #tpu.pipeline_mode<synchronous>, transform_indices = @transform_9, window_bounds = array<i64: 1, 128>}, {pipeline_mode = #tpu.pipeline_mode<synchronous>, transform_indices = @transform_10, window_bounds = array<i64: 2, 256>}, {pipeline_mode = #tpu.pipeline_mode<synchronous>, transform_indices = @transform_11, window_bounds = array<i64: 1, 256>}, {pipeline_mode = #tpu.pipeline_mode<synchronous>, transform_indices = @transform_12, window_bounds = array<i64: 256, 512>}, {pipeline_mode = #tpu.pipeline_mode<synchronous>, transform_indices = @transform_13, window_bounds = array<i64: 1, 512>}, {pipeline_mode = #tpu.pipeline_mode<synchronous>, transform_indices = @transform_14, window_bounds = array<i64: 512, 512>}, {pipeline_mode = #tpu.pipeline_mode<synchronous>, transform_indices = @transform_15, window_bounds = array<i64: 1, 512>}, {pipeline_mode = #tpu.pipeline_mode<synchronous>, transform_indices = @transform_16, window_bounds = array<i64: 512, 128>}, {pipeline_mode = #tpu.pipeline_mode<synchronous>, transform_indices = @transform_17, window_bounds = array<i64: 1, 128>}, {transform_indices = @transform_18, window_bounds = array<i64: 128, 128>}, {transform_indices = @transform_19, window_bounds = array<i64: 128, 128>}]} {
    %c0 = arith.constant 0 : index
    %c0_0 = arith.constant 0 : index
    %0 = vector.load %arg1[%c0, %c0_0] : memref<128x128xf32, #tpu.memory_space<vmem>>, vector<128x128xf32>
    %1 = arith.truncf %0 : vector<128x128xf32> to vector<128x128xbf16>
    %c0_1 = arith.constant 0 : index
    %c0_2 = arith.constant 0 : index
    %2 = vector.load %arg3[%c0_1, %c0_2] : memref<128x512xbf16, #tpu.memory_space<vmem>>, vector<128x512xbf16>
    %cst = arith.constant dense<0.000000e+00> : vector<128x512xf32>
    %3 = tpu.matmul %1, %2, %cst {dimension_numbers = #tpu.dot_dimension_numbers<[1], [0], [0], [1], [0, 0, 1, 1], [], []>} : vector<128x128xbf16>, vector<128x512xbf16>, vector<128x512xf32> -> vector<128x512xf32>
    %c0_3 = arith.constant 0 : index
    %c0_4 = arith.constant 0 : index
    %4 = vector.load %arg4[%c0_3, %c0_4] : memref<1x512xf32, #tpu.memory_space<vmem>>, vector<1x512xf32>
    %5 = vector.broadcast %4 : vector<1x512xf32> to vector<128x512xf32>
    %6 = arith.addf %3, %5 : vector<128x512xf32>
    %cst_5 = arith.constant 0.000000e+00 : f32
    %7 = vector.broadcast %cst_5 : f32 to vector<128x512xf32>
    %8 = arith.cmpf ogt, %6, %7 : vector<128x512xf32>
    %cst_6 = arith.constant 2.000000e-01 : f32
    %9 = vector.broadcast %cst_6 : f32 to vector<128x512xf32>
    %10 = arith.mulf %9, %6 : vector<128x512xf32>
    %11 = arith.select %8, %6, %10 : vector<128x512xi1>, vector<128x512xf32>
    %12 = arith.truncf %11 : vector<128x512xf32> to vector<128x512xbf16>
    %c0_7 = arith.constant 0 : index
    %c0_8 = arith.constant 0 : index
    %13 = vector.load %arg5[%c0_7, %c0_8] : memref<512x512xbf16, #tpu.memory_space<vmem>>, vector<512x512xbf16>
    %cst_9 = arith.constant dense<0.000000e+00> : vector<128x512xf32>
    %14 = tpu.matmul %12, %13, %cst_9 {dimension_numbers = #tpu.dot_dimension_numbers<[1], [0], [0], [1], [0, 0, 1, 1], [], []>} : vector<128x512xbf16>, vector<512x512xbf16>, vector<128x512xf32> -> vector<128x512xf32>
    %c0_10 = arith.constant 0 : index
    %c0_11 = arith.constant 0 : index
    %15 = vector.load %arg6[%c0_10, %c0_11] : memref<1x512xf32, #tpu.memory_space<vmem>>, vector<1x512xf32>
    %16 = vector.broadcast %15 : vector<1x512xf32> to vector<128x512xf32>
    %17 = arith.addf %14, %16 : vector<128x512xf32>
    %cst_12 = arith.constant 0.000000e+00 : f32
    %18 = vector.broadcast %cst_12 : f32 to vector<128x512xf32>
    %19 = arith.cmpf ogt, %17, %18 : vector<128x512xf32>
    %cst_13 = arith.constant 2.000000e-01 : f32
    %20 = vector.broadcast %cst_13 : f32 to vector<128x512xf32>
    %21 = arith.mulf %20, %17 : vector<128x512xf32>
    %22 = arith.select %19, %17, %21 : vector<128x512xi1>, vector<128x512xf32>
    %23 = arith.truncf %22 : vector<128x512xf32> to vector<128x512xbf16>
    %c0_14 = arith.constant 0 : index
    %c0_15 = arith.constant 0 : index
    %24 = vector.load %arg7[%c0_14, %c0_15] : memref<512x256xbf16, #tpu.memory_space<vmem>>, vector<512x256xbf16>
    %cst_16 = arith.constant dense<0.000000e+00> : vector<128x256xf32>
    %25 = tpu.matmul %23, %24, %cst_16 {dimension_numbers = #tpu.dot_dimension_numbers<[1], [0], [0], [1], [0, 0, 1, 1], [], []>} : vector<128x512xbf16>, vector<512x256xbf16>, vector<128x256xf32> -> vector<128x256xf32>
    %c0_17 = arith.constant 0 : index
    %c0_18 = arith.constant 0 : index
    %26 = vector.load %arg8[%c0_17, %c0_18] : memref<1x256xf32, #tpu.memory_space<vmem>>, vector<1x256xf32>
    %27 = vector.broadcast %26 : vector<1x256xf32> to vector<128x256xf32>
    %28 = arith.addf %25, %27 : vector<128x256xf32>
    %cst_19 = arith.constant 0.000000e+00 : f32
    %29 = vector.broadcast %cst_19 : f32 to vector<128x256xf32>
    %30 = arith.cmpf ogt, %28, %29 : vector<128x256xf32>
    %cst_20 = arith.constant 2.000000e-01 : f32
    %31 = vector.broadcast %cst_20 : f32 to vector<128x256xf32>
    %32 = arith.mulf %31, %28 : vector<128x256xf32>
    %33 = arith.select %30, %28, %32 : vector<128x256xi1>, vector<128x256xf32>
    %34 = arith.truncf %33 : vector<128x256xf32> to vector<128x256xbf16>
    %c0_21 = arith.constant 0 : index
    %c0_22 = arith.constant 0 : index
    %35 = vector.load %arg9[%c0_21, %c0_22] : memref<256x128xbf16, #tpu.memory_space<vmem>>, vector<256x128xbf16>
    %cst_23 = arith.constant dense<0.000000e+00> : vector<128x128xf32>
    %36 = tpu.matmul %34, %35, %cst_23 {dimension_numbers = #tpu.dot_dimension_numbers<[1], [0], [0], [1], [0, 0, 1, 1], [], []>} : vector<128x256xbf16>, vector<256x128xbf16>, vector<128x128xf32> -> vector<128x128xf32>
    %c0_24 = arith.constant 0 : index
    %c0_25 = arith.constant 0 : index
    %37 = vector.load %arg10[%c0_24, %c0_25] : memref<1x128xf32, #tpu.memory_space<vmem>>, vector<1x128xf32>
    %38 = vector.broadcast %37 : vector<1x128xf32> to vector<128x128xf32>
    %39 = arith.addf %36, %38 : vector<128x128xf32>
    %40 = vector.extract_strided_slice %39 {offsets = [0, 0], sizes = [128, 2], strides = [1, 1]} : vector<128x128xf32> to vector<128x2xf32>
    %41 = vector.extract_strided_slice %39 {offsets = [0, 2], sizes = [128, 2], strides = [1, 1]} : vector<128x128xf32> to vector<128x2xf32>
    %cst_26 = arith.constant 5.000000e-01 : f32
    %42 = vector.broadcast %cst_26 : f32 to vector<128x2xf32>
    %43 = arith.mulf %42, %41 : vector<128x2xf32>
    %44 = math.exp %43 : vector<128x2xf32>
    %c0_27 = arith.constant 0 : index
    %c0_28 = arith.constant 0 : index
    %45 = vector.load %arg2[%c0_27, %c0_28] : memref<128x2xf32, #tpu.memory_space<vmem>>, vector<128x2xf32>
    %46 = arith.mulf %44, %45 : vector<128x2xf32>
    %47 = arith.addf %40, %46 : vector<128x2xf32>
    %c0_29 = arith.constant 0 : index
    %c0_30 = arith.constant 0 : index
    %48 = vector.load %arg11[%c0_29, %c0_30] : memref<2x256xbf16, #tpu.memory_space<vmem>>, vector<2x256xbf16>
    %49 = arith.extf %48 : vector<2x256xbf16> to vector<2x256xf32>
    %50 = vector.extract_strided_slice %47 {offsets = [0, 0], sizes = [128, 1], strides = [1, 1]} : vector<128x2xf32> to vector<128x1xf32>
    %51 = vector.extract_strided_slice %49 {offsets = [0, 0], sizes = [1, 256], strides = [1, 1]} : vector<2x256xf32> to vector<1x256xf32>
    %52 = vector.broadcast %50 : vector<128x1xf32> to vector<128x256xf32>
    %53 = vector.broadcast %51 : vector<1x256xf32> to vector<128x256xf32>
    %54 = arith.mulf %52, %53 : vector<128x256xf32>
    %55 = vector.extract_strided_slice %47 {offsets = [0, 1], sizes = [128, 1], strides = [1, 1]} : vector<128x2xf32> to vector<128x1xf32>
    %56 = vector.extract_strided_slice %49 {offsets = [1, 0], sizes = [1, 256], strides = [1, 1]} : vector<2x256xf32> to vector<1x256xf32>
    %57 = vector.broadcast %55 : vector<128x1xf32> to vector<128x256xf32>
    %58 = vector.broadcast %56 : vector<1x256xf32> to vector<128x256xf32>
    %59 = arith.mulf %57, %58 : vector<128x256xf32>
    %60 = arith.addf %54, %59 : vector<128x256xf32>
    %c0_31 = arith.constant 0 : index
    %c0_32 = arith.constant 0 : index
    %61 = vector.load %arg12[%c0_31, %c0_32] : memref<1x256xf32, #tpu.memory_space<vmem>>, vector<1x256xf32>
    %62 = vector.broadcast %61 : vector<1x256xf32> to vector<128x256xf32>
    %63 = arith.addf %60, %62 : vector<128x256xf32>
    %cst_33 = arith.constant 0.000000e+00 : f32
    %64 = vector.broadcast %cst_33 : f32 to vector<128x256xf32>
    %65 = arith.cmpf ogt, %63, %64 : vector<128x256xf32>
    %cst_34 = arith.constant 2.000000e-01 : f32
    %66 = vector.broadcast %cst_34 : f32 to vector<128x256xf32>
    %67 = arith.mulf %66, %63 : vector<128x256xf32>
    %68 = arith.select %65, %63, %67 : vector<128x256xi1>, vector<128x256xf32>
    %69 = arith.truncf %68 : vector<128x256xf32> to vector<128x256xbf16>
    %c0_35 = arith.constant 0 : index
    %c0_36 = arith.constant 0 : index
    %70 = vector.load %arg13[%c0_35, %c0_36] : memref<256x512xbf16, #tpu.memory_space<vmem>>, vector<256x512xbf16>
    %cst_37 = arith.constant dense<0.000000e+00> : vector<128x512xf32>
    %71 = tpu.matmul %69, %70, %cst_37 {dimension_numbers = #tpu.dot_dimension_numbers<[1], [0], [0], [1], [0, 0, 1, 1], [], []>} : vector<128x256xbf16>, vector<256x512xbf16>, vector<128x512xf32> -> vector<128x512xf32>
    %c0_38 = arith.constant 0 : index
    %c0_39 = arith.constant 0 : index
    %72 = vector.load %arg14[%c0_38, %c0_39] : memref<1x512xf32, #tpu.memory_space<vmem>>, vector<1x512xf32>
    %73 = vector.broadcast %72 : vector<1x512xf32> to vector<128x512xf32>
    %74 = arith.addf %71, %73 : vector<128x512xf32>
    %cst_40 = arith.constant 0.000000e+00 : f32
    %75 = vector.broadcast %cst_40 : f32 to vector<128x512xf32>
    %76 = arith.cmpf ogt, %74, %75 : vector<128x512xf32>
    %cst_41 = arith.constant 2.000000e-01 : f32
    %77 = vector.broadcast %cst_41 : f32 to vector<128x512xf32>
    %78 = arith.mulf %77, %74 : vector<128x512xf32>
    %79 = arith.select %76, %74, %78 : vector<128x512xi1>, vector<128x512xf32>
    %80 = arith.truncf %79 : vector<128x512xf32> to vector<128x512xbf16>
    %c0_42 = arith.constant 0 : index
    %c0_43 = arith.constant 0 : index
    %81 = vector.load %arg15[%c0_42, %c0_43] : memref<512x512xbf16, #tpu.memory_space<vmem>>, vector<512x512xbf16>
    %cst_44 = arith.constant dense<0.000000e+00> : vector<128x512xf32>
    %82 = tpu.matmul %80, %81, %cst_44 {dimension_numbers = #tpu.dot_dimension_numbers<[1], [0], [0], [1], [0, 0, 1, 1], [], []>} : vector<128x512xbf16>, vector<512x512xbf16>, vector<128x512xf32> -> vector<128x512xf32>
    %c0_45 = arith.constant 0 : index
    %c0_46 = arith.constant 0 : index
    %83 = vector.load %arg16[%c0_45, %c0_46] : memref<1x512xf32, #tpu.memory_space<vmem>>, vector<1x512xf32>
    %84 = vector.broadcast %83 : vector<1x512xf32> to vector<128x512xf32>
    %85 = arith.addf %82, %84 : vector<128x512xf32>
    %cst_47 = arith.constant 0.000000e+00 : f32
    %86 = vector.broadcast %cst_47 : f32 to vector<128x512xf32>
    %87 = arith.cmpf ogt, %85, %86 : vector<128x512xf32>
    %cst_48 = arith.constant 2.000000e-01 : f32
    %88 = vector.broadcast %cst_48 : f32 to vector<128x512xf32>
    %89 = arith.mulf %88, %85 : vector<128x512xf32>
    %90 = arith.select %87, %85, %89 : vector<128x512xi1>, vector<128x512xf32>
    %91 = arith.truncf %90 : vector<128x512xf32> to vector<128x512xbf16>
    %c0_49 = arith.constant 0 : index
    %c0_50 = arith.constant 0 : index
    %92 = vector.load %arg17[%c0_49, %c0_50] : memref<512x128xbf16, #tpu.memory_space<vmem>>, vector<512x128xbf16>
    %cst_51 = arith.constant dense<0.000000e+00> : vector<128x128xf32>
    %93 = tpu.matmul %91, %92, %cst_51 {dimension_numbers = #tpu.dot_dimension_numbers<[1], [0], [0], [1], [0, 0, 1, 1], [], []>} : vector<128x512xbf16>, vector<512x128xbf16>, vector<128x128xf32> -> vector<128x128xf32>
    %c0_52 = arith.constant 0 : index
    %c0_53 = arith.constant 0 : index
    %94 = vector.load %arg18[%c0_52, %c0_53] : memref<1x128xf32, #tpu.memory_space<vmem>>, vector<1x128xf32>
    %95 = vector.broadcast %94 : vector<1x128xf32> to vector<128x128xf32>
    %96 = arith.addf %93, %95 : vector<128x128xf32>
    %97 = arith.negf %96 : vector<128x128xf32>
    %98 = math.exp %97 : vector<128x128xf32>
    %cst_54 = arith.constant 1.000000e+00 : f32
    %99 = vector.broadcast %cst_54 : f32 to vector<128x128xf32>
    %100 = arith.addf %99, %98 : vector<128x128xf32>
    %101 = arith.divf %99, %100 : vector<128x128xf32>
    %c0_55 = arith.constant 0 : index
    %c0_56 = arith.constant 0 : index
    %102 = vector.load %arg19[%c0_55, %c0_56] : memref<128x128xf32, #tpu.memory_space<vmem>>, vector<128x128xf32>
    tpu.vector_store %arg19[%c0_55, %c0_56], %101 {strides = array<i32>} : memref<128x128xf32, #tpu.memory_space<vmem>>, vector<128x128xf32>,
    %c0_57 = arith.constant 0 : index
    %c0_58 = arith.constant 0 : index
    %103 = vector.load %arg20[%c0_57, %c0_58] : memref<128x128xf32, #tpu.memory_space<vmem>>, vector<128x128xf32>
    tpu.vector_store %arg20[%c0_57, %c0_58], %39 {strides = array<i32>} : memref<128x128xf32, #tpu.memory_space<vmem>>, vector<128x128xf32>,
    return
  }
  func.func @transform_0(%arg0: i32) -> (i32, i32) {
    %c0_i32 = arith.constant 0 : i32
    %c0_i32_0 = arith.constant 0 : i32
    return %arg0, %c0_i32 : i32, i32
  }
  func.func @transform_1(%arg0: i32) -> (i32, i32) {
    %c0_i32 = arith.constant 0 : i32
    %c0_i32_0 = arith.constant 0 : i32
    return %arg0, %c0_i32 : i32, i32
  }
  func.func @transform_2(%arg0: i32) -> (i32, i32) {
    %c0_i32 = arith.constant 0 : i32
    %c0_i32_0 = arith.constant 0 : i32
    %c0_i32_1 = arith.constant 0 : i32
    return %c0_i32, %c0_i32_0 : i32, i32
  }
  func.func @transform_3(%arg0: i32) -> (i32, i32) {
    %c0_i32 = arith.constant 0 : i32
    %c0_i32_0 = arith.constant 0 : i32
    %c0_i32_1 = arith.constant 0 : i32
    return %c0_i32, %c0_i32_0 : i32, i32
  }
  func.func @transform_4(%arg0: i32) -> (i32, i32) {
    %c0_i32 = arith.constant 0 : i32
    %c0_i32_0 = arith.constant 0 : i32
    %c0_i32_1 = arith.constant 0 : i32
    return %c0_i32, %c0_i32_0 : i32, i32
  }
  func.func @transform_5(%arg0: i32) -> (i32, i32) {
    %c0_i32 = arith.constant 0 : i32
    %c0_i32_0 = arith.constant 0 : i32
    %c0_i32_1 = arith.constant 0 : i32
    return %c0_i32, %c0_i32_0 : i32, i32
  }
  func.func @transform_6(%arg0: i32) -> (i32, i32) {
    %c0_i32 = arith.constant 0 : i32
    %c0_i32_0 = arith.constant 0 : i32
    %c0_i32_1 = arith.constant 0 : i32
    return %c0_i32, %c0_i32_0 : i32, i32
  }
  func.func @transform_7(%arg0: i32) -> (i32, i32) {
    %c0_i32 = arith.constant 0 : i32
    %c0_i32_0 = arith.constant 0 : i32
    %c0_i32_1 = arith.constant 0 : i32
    return %c0_i32, %c0_i32_0 : i32, i32
  }
  func.func @transform_8(%arg0: i32) -> (i32, i32) {
    %c0_i32 = arith.constant 0 : i32
    %c0_i32_0 = arith.constant 0 : i32
    %c0_i32_1 = arith.constant 0 : i32
    return %c0_i32, %c0_i32_0 : i32, i32
  }
  func.func @transform_9(%arg0: i32) -> (i32, i32) {
    %c0_i32 = arith.constant 0 : i32
    %c0_i32_0 = arith.constant 0 : i32
    %c0_i32_1 = arith.constant 0 : i32
    return %c0_i32, %c0_i32_0 : i32, i32
  }
  func.func @transform_10(%arg0: i32) -> (i32, i32) {
    %c0_i32 = arith.constant 0 : i32
    %c0_i32_0 = arith.constant 0 : i32
    %c0_i32_1 = arith.constant 0 : i32
    return %c0_i32, %c0_i32_0 : i32, i32
  }
  func.func @transform_11(%arg0: i32) -> (i32, i32) {
    %c0_i32 = arith.constant 0 : i32
    %c0_i32_0 = arith.constant 0 : i32
    %c0_i32_1 = arith.constant 0 : i32
    return %c0_i32, %c0_i32_0 : i32, i32
  }
  func.func @transform_12(%arg0: i32) -> (i32, i32) {
    %c0_i32 = arith.constant 0 : i32
    %c0_i32_0 = arith.constant 0 : i32
    %c0_i32_1 = arith.constant 0 : i32
    return %c0_i32, %c0_i32_0 : i32, i32
  }
  func.func @transform_13(%arg0: i32) -> (i32, i32) {
    %c0_i32 = arith.constant 0 : i32
    %c0_i32_0 = arith.constant 0 : i32
    %c0_i32_1 = arith.constant 0 : i32
    return %c0_i32, %c0_i32_0 : i32, i32
  }
  func.func @transform_14(%arg0: i32) -> (i32, i32) {
    %c0_i32 = arith.constant 0 : i32
    %c0_i32_0 = arith.constant 0 : i32
    %c0_i32_1 = arith.constant 0 : i32
    return %c0_i32, %c0_i32_0 : i32, i32
  }
  func.func @transform_15(%arg0: i32) -> (i32, i32) {
    %c0_i32 = arith.constant 0 : i32
    %c0_i32_0 = arith.constant 0 : i32
    %c0_i32_1 = arith.constant 0 : i32
    return %c0_i32, %c0_i32_0 : i32, i32
  }
  func.func @transform_16(%arg0: i32) -> (i32, i32) {
    %c0_i32 = arith.constant 0 : i32
    %c0_i32_0 = arith.constant 0 : i32
    %c0_i32_1 = arith.constant 0 : i32
    return %c0_i32, %c0_i32_0 : i32, i32
  }
  func.func @transform_17(%arg0: i32) -> (i32, i32) {
    %c0_i32 = arith.constant 0 : i32
    %c0_i32_0 = arith.constant 0 : i32
    %c0_i32_1 = arith.constant 0 : i32
    return %c0_i32, %c0_i32_0 : i32, i32
  }
  func.func @transform_18(%arg0: i32) -> (i32, i32) {
    %c0_i32 = arith.constant 0 : i32
    %c0_i32_0 = arith.constant 0 : i32
    return %arg0, %c0_i32 : i32, i32
  }
  func.func @transform_19(%arg0: i32) -> (i32, i32) {
    %c0_i32 = arith.constant 0 : i32
    %c0_i32_0 = arith.constant 0 : i32
    return %arg0, %c0_i32 : i32, i32
  }
}

</mosaic_0001>

<bundles_post_ra>
// kernel: conv_vae_forward.1
= control target key start
LH: loop header
LB: loop body
LE: loop exit
PB: predicated region body
PF: predicated region fallthrough
CT: control target
= control target key end

     0   :  { %s14714_s0 = inlined_call_operand.vmem [shape: f32[256,128], index: 0, kind: input, shape index: {}]   ;;  %s14715_s1 = inlined_call_operand.vmem [shape: f32[256,2], index: 1, kind: input, shape index: {}]   ;;  %s14716_s2 = inlined_call_operand.vmem [shape: bf16[128,512], index: 2, kind: input, shape index: {}]   ;;  %s14717_s3 = inlined_call_operand.vmem [shape: f32[1,512], index: 3, kind: input, shape index: {}]   ;;  %s14718_s4 = inlined_call_operand.vmem [shape: bf16[512,512], index: 4, kind: input, shape index: {}]   ;;  %s14719_s5 = inlined_call_operand.vmem [shape: f32[1,512], index: 5, kind: input, shape index: {}]   ;;  %s14720_s6 = inlined_call_operand.hbm [shape: bf16[512,256], index: 6, kind: input, shape index: {}]   ;;  %s14721_s7 = inlined_call_operand.vmem [shape: f32[1,256], index: 7, kind: input, shape index: {}]   ;;  %s14722_s8 = inlined_call_operand.vmem [shape: bf16[256,128], index: 8, kind: input, shape index: {}]   ;;  %s14723_s9 = inlined_call_operand.vmem [shape: f32[1,128], index: 9, kind: input, shape index: {}]   ;;  %s14724_s10 = inlined_call_operand.vmem [shape: bf16[2,256], index: 10, kind: input, shape index: {}]   ;;  %s14725_s11 = inlined_call_operand.vmem [shape: f32[1,256], index: 11, kind: input, shape index: {}]   ;;  %s14726_s12 = inlined_call_operand.hbm [shape: bf16[256,512], index: 12, kind: input, shape index: {}]   ;;  %s14727_s13 = inlined_call_operand.vmem [shape: f32[1,512], index: 13, kind: input, shape index: {}]   ;;  %s14728_s14 = inlined_call_operand.hbm [shape: bf16[512,512], index: 14, kind: input, shape index: {}]   ;;  %s14729_s15 = inlined_call_operand.vmem [shape: f32[1,512], index: 15, kind: input, shape index: {}]   ;;  %s14730_s16 = inlined_call_operand.hbm [shape: bf16[512,128], index: 16, kind: input, shape index: {}]   ;;  %s14731_s17 = inlined_call_operand.vmem [shape: f32[1,128], index: 17, kind: input, shape index: {}]   ;;  %s14732_s18 = inlined_call_operand.vmem [shape: f32[256,128], index: 18, kind: output, shape index: {0}]   ;;  %s14733_s19 = inlined_call_operand.vmem [shape: f32[256,128], index: 19, kind: output, shape index: {1}]  }
   0x1   :  { %14766 = sst [smem:[#allocation30_spill]] %s14714_s0 }
   0x2   :  { %14767 = sst [smem:[#allocation31_spill]] %s14715_s1 }
   0x3   :  { %14768 = sst [smem:[#allocation32_spill]] %s14716_s2 }
   0x4   :  { %14769 = sst [smem:[#allocation33_spill]] %s14717_s3 }
   0x5   :  { %14770 = sst [smem:[#allocation34_spill]] %s14720_s6 }
   0x6   :  { %14771 = sst [smem:[#allocation35_spill]] %s14726_s12 }
   0x7   :  { %14772 = sst [smem:[#allocation36_spill]] %s14729_s15 }
   0x8   :  { %14773 = sst [smem:[#allocation37_spill]] %s14731_s17 }
   0x9   :  { %14774 = sst [smem:[#allocation38_spill]] %s14732_s18 }
   0xa   :  { %25 = vsyncpa [#allocation3], 0 }
   0xb   :  { %26 = vsyncpa [#allocation5], 0 }
   0xc   :  { %27 = vsyncpa [#allocation8], 0  ;;  %s11437_s0 = smov 0  }
   0xd LB: > { %s14775_s12 = sld [smem:[#allocation35_spill]]  ;;  %s14735_s1 = sadd.s32 4294967295, %s11321_s0   ;;  %s11321_s0 = sphi %s11437_s0, %s33_s0  }
   0xe   : > { %p8627_p0 = scmp.ge.s32.totalorder %s11321_s0, 1  ;;  %p478_p1 = scmp.lt.s32.totalorder %s11321_s0, 3 }
   0xf   : > { %p11450_p2 = scmp.eq.s32.totalorder %s14735_s1, 0  ;;  %s11323_s23 = smov [#allocation4]  }
  0x10   : > { %p11454_p3 = pnand %p8627_p0, %p478_p1  ;;  %s532_s24 = sshll.u32 %s11323_s23, 4  ;;  %s533_s24 = int_to_ptr.vmem [resolvable:$true] %s532_s24 }
  0x11   : > { %s14778_s6 = sld [smem:[#allocation34_spill]]  ;;  %s11324_s28 = smov [#allocation2]  }
  0x12   : > { %p11016_p4 = pneg %p11454_p3  ;;  %s503_s29 = sshll.u32 %s11324_s28, 4  ;;  %s504_s29 = int_to_ptr.vmem [resolvable:$true] %s503_s29 }
  0x13   : > { %s530_s21 = sshll.u32 %s14775_s12, 4  ;;  %s11325_s30 = smov 256   ;;  %s531_s21 = int_to_ptr.hbm [resolvable:$true] %s530_s21 }
  0x14   : > { %p11465_p5 = pnand %p11450_p2, %p11016_p4  ;;  %s11326_s20 = smov 16  }
  0x15   : > { %s547_s25 = sshll.u32 %s14728_s14, 4  ;;  %s11327_s3 = smov 128   ;;  %s548_s25 = int_to_ptr.hbm [resolvable:$true] %s547_s25 }
  0x16   : > { %11022 = dma.hbm_to_vmem [thread:$0]  (!%p11465_p5), %s531_s21, 8192, %s533_s24, [#allocation5], %s11325_s30, %s11325_s30, %s11326_s20  }
  0x17   : > { %s501_s26 = sshll.u32 %s14778_s6, 4  ;;  %s11328_s6 = smov 8   ;;  %s502_s26 = int_to_ptr.hbm [resolvable:$true] %s501_s26 }
  0x18   : > { %11019 = dma.hbm_to_vmem [thread:$0]  (!%p11465_p5), %s502_s26, 8192, %s504_s29, [#allocation3], %s11327_s3, %s11327_s3, %s11328_s6  }
  0x19   : > { %s11329_s12 = smov [#allocation6]   ;;  %s564_s28 = sshll.u32 %s14730_s16, 4  ;;  %s565_s28 = int_to_ptr.hbm [resolvable:$true] %s564_s28 }
  0x1a   : > { %s549_s18 = sshll.u32 %s11329_s12, 4  ;;  %s11330_s21 = smov [#allocation7]   ;;  %s550_s18 = int_to_ptr.vmem [resolvable:$true] %s549_s18 }
  0x1b   : > { %11025 = dma.hbm_to_vmem [thread:$0]  (!%p11465_p5), %s548_s25, 16384, %s550_s18, [#allocation5], %s11325_s30, %s11325_s30, %s11326_s20  }
  0x1c   : > { %s566_s24 = sshll.u32 %s11330_s21, 4  ;;  %s11331_s1 = smov 64   ;;  %s567_s24 = int_to_ptr.vmem [resolvable:$true] %s566_s24 }
  0x1d   : > { %s11332_s23 = smov 4   ;;  %603 = sbr.rel (%p11454_p3) target bundleno = 2711 (0xa97), region = 92 }
  0x1e   : > { %11028 = dma.hbm_to_vmem [thread:$0]  (!%p11465_p5), %s565_s28, 4096, %s567_s24, [#allocation8], %s11331_s1, %s11331_s1, %s11332_s23  }
  0x22   : > { %11308 = dma.done.wait (%p11450_p2), [#allocation3], 8192  }
  0x23   : > { %11310 = vsyncadd (%p11450_p2), [#allocation3], 4294959104 }
  0x24   : > { %11312 = dma.done.wait (%p11450_p2), [#allocation5], 24576  }
  0x25   : > { %11314 = vsyncadd (%p11450_p2), [#allocation5], 4294942720 }
  0x26   : > { %11316 = dma.done.wait (%p11450_p2), [#allocation8], 4096  }
  0x27   : > { %11318 = vsyncadd (%p11450_p2), [#allocation8], 4294963200  ;;  %s14780_s15 = sld [smem:[#allocation32_spill]]  ;;  %s14781_s20 = sadd.s32 4294967295, %s11321_s0  }
  0x28   : > { %s8638_s25 = sshll.u32 %s14781_s20, 4  ;;  %s14782_s29 = sld [smem:[#allocation30_spill]] }
  0x29   : > { %p686_p6 = scmp.lt.s32.totalorder %s8638_s25, 31  ;;  %s14783_s12 = sld [smem:[#allocation33_spill]] }
  0x2a   : > { %s14800_s3 = sld [smem:[#allocation31_spill]]  ;;  %s11333_s21 = smov 2  }
  0x2b   : > { %s14866_s25 = smov (!%p686_p6, %s8638_s25), 31  ;;  %s11334_s18 = smov 126  }
  0x2c   : > { %s11571_s24 = sshll.u32 %s14866_s25, 3 }
  0x2d   : > { %v8760_v0 = vld [vmem:[%s14780_s15 + $0xe0] sm:$0xf]  ;;  %v10550_v1 = vld [vmem:[%s14780_s15 + $0xec] sm:$0xf0]  ;;  %v10548_v2 = vld [vmem:[%s14780_s15 + $0xe4] sm:$0xf]  ;;  %s13533_s17 = scalar_lea.vmem %s14733_s19, %s11571_s24 }
  0x2e   : > { %v8761_v3 = vor.u32 %v10550_v1, %v8760_v0  ;;  %v8762_v4 = vld [vmem:[%s14780_s15 + $0xf0] sm:$0xf0]  ;;  %v8744_v5 = vld [vmem:[%s14780_s15 + $0xc0] sm:$0xf]  ;;  %v10546_v6 = vld [vmem:[%s14780_s15 + $0xcc] sm:$0xf0]  ;;  %s11589_s30 = scalar_lea.vmem %s14782_s29, %s11571_s24 }
  0x2f   : > { %v8765_v7 = vor.u32 %v10548_v2, %v8762_v4  ;;  %v10544_v8 = vld [vmem:[%s14780_s15 + $0xc4] sm:$0xf]  ;;  %v8746_v9 = vld [vmem:[%s14780_s15 + $0xd0] sm:$0xf0]  ;;  %v8745_v10 = vor.u32 %v10546_v6, %v8744_v5  ;;  %v8728_v12 = vld [vmem:[%s14780_s15 + $0xa0] sm:$0xf] }
  0x30   : > { %935 = vmatpush.bf16.msra.mxu0 %v8761_v3  ;;  %10984 = vmatpush.bf16.msra.mxu2 %v8761_v3  ;;  %v8749_v11 = vor.u32 %v10544_v8, %v8746_v9  ;;  %v10542_v13 = vld [vmem:[%s14780_s15 + $0xac] sm:$0xf0]  ;;  %v10540_v14 = vld [vmem:[%s14780_s15 + $0xa4] sm:$0xf]  ;;  %v8730_v15 = vld [vmem:[%s14780_s15 + $0xb0] sm:$0xf0]  ;;  %s13473_s28 = scalar_lea.vmem %s14800_s3, %s11571_s24 }
  0x31   : > { %984 = vmatpush.bf16.msra.mxu1 %v8765_v7  ;;  %10992 = vmatpush.bf16.msra.mxu3 %v8765_v7  ;;  %v8729_v16 = vor.u32 %v10542_v13, %v8728_v12  ;;  %v8733_v17 = vor.u32 %v10540_v14, %v8730_v15  ;;  %v8712_v18 = vld [vmem:[%s14780_s15 + $0x80] sm:$0xf]  ;;  %v10538_v19 = vld [vmem:[%s14780_s15 + $0x8c] sm:$0xf0]  ;;  %v10536_v20 = vld [vmem:[%s14780_s15 + $0x84] sm:$0xf] }
  0x32   : > { %v8714_v21 = vld [vmem:[%s14780_s15 + $0x90] sm:$0xf0]  ;;  %v8713_v22 = vor.u32 %v10538_v19, %v8712_v18  ;;  %v8696_v24 = vld [vmem:[%s14780_s15 + $0x60] sm:$0xf]  ;;  %v10534_v25 = vld [vmem:[%s14780_s15 + $0x6c] sm:$0xf0] }
  0x33   : > { %v8717_v23 = vor.u32 %v10536_v20, %v8714_v21  ;;  %v10532_v26 = vld [vmem:[%s14780_s15 + $0x64] sm:$0xf]  ;;  %v8698_v27 = vld [vmem:[%s14780_s15 + $0x70] sm:$0xf0]  ;;  %v8697_v28 = vor.u32 %v10534_v25, %v8696_v24  ;;  %v8680_v30 = vld [vmem:[%s14780_s15 + $0x40] sm:$0xf] }
  0x34   : > { %936 = vmatpush.bf16.msra.mxu0 %v8745_v10  ;;  %10985 = vmatpush.bf16.msra.mxu2 %v8745_v10  ;;  %v8701_v29 = vor.u32 %v10532_v26, %v8698_v27  ;;  %v10530_v31 = vld [vmem:[%s14780_s15 + $0x4c] sm:$0xf0]  ;;  %v10528_v32 = vld [vmem:[%s14780_s15 + $0x44] sm:$0xf]  ;;  %v8682_v33 = vld [vmem:[%s14780_s15 + $0x50] sm:$0xf0] }
  0x35   : > { %985 = vmatpush.bf16.msra.mxu1 %v8749_v11  ;;  %10993 = vmatpush.bf16.msra.mxu3 %v8749_v11  ;;  %v8681_v34 = vor.u32 %v10530_v31, %v8680_v30  ;;  %v8685_v35 = vor.u32 %v10528_v32, %v8682_v33  ;;  %v8664_v36 = vld [vmem:[%s14780_s15 + $0x20] sm:$0xf]  ;;  %v10526_v37 = vld [vmem:[%s14780_s15 + $0x2c] sm:$0xf0]  ;;  %v10524_v38 = vld [vmem:[%s14780_s15 + $0x24] sm:$0xf] }
  0x36   : > { %v8666_v39 = vld [vmem:[%s14780_s15 + $0x30] sm:$0xf0]  ;;  %v8665_v40 = vor.u32 %v10526_v37, %v8664_v36  ;;  %v8648_v42 = vld [vmem:[%s14780_s15] sm:$0xf]  ;;  %v10522_v43 = vld [vmem:[%s14780_s15 + $0xc] sm:$0xf0] }
  0x37   : > { %v8669_v41 = vor.u32 %v10524_v38, %v8666_v39  ;;  %v10520_v44 = vld [vmem:[%s14780_s15 + $0x4] sm:$0xf]  ;;  %v8650_v45 = vld [vmem:[%s14780_s15 + $0x10] sm:$0xf0]  ;;  %v8768_v47 = vld [vmem:[%s14780_s15 + $0xe8] sm:$0xf]  ;;  %v8649_v51 = vor.u32 %v10522_v43, %v8648_v42 }
  0x38   : > { %937 = vmatpush.bf16.msra.mxu0 %v8729_v16  ;;  %10986 = vmatpush.bf16.msra.mxu2 %v8729_v16  ;;  %v709_v46 = vld [vmem:[%s11589_s30] sm:$0xff]  ;;  %v10551_v48 = vld [vmem:[%s14780_s15 + $0xf4] sm:$0xf0]  ;;  %v10549_v49 = vld [vmem:[%s14780_s15 + $0xec] sm:$0xf]  ;;  %v8653_v55 = vor.u32 %v10520_v44, %v8650_v45 }
  0x39   : > { %986 = vmatpush.bf16.msra.mxu1 %v8733_v17  ;;  %10994 = vmatpush.bf16.msra.mxu3 %v8733_v17  ;;  %v8770_v50 = vld [vmem:[%s14780_s15 + $0xf8] sm:$0xf0]  ;;  %v710_v52 = vld [vmem:[%s11589_s30 + $0x8] sm:$0xff]  ;;  %v717_v53 = vld [vmem:[%s11589_s30 + $0x40] sm:$0xff]  ;;  %v8769_v56 = vor.u32 %v10551_v48, %v8768_v47 }
  0x3a   : > { %v718_v54 = vld [vmem:[%s11589_s30 + $0x48] sm:$0xff]  ;;  %v8773_v57 = vor.u32 %v10549_v49, %v8770_v50  ;;  %v11622_v59 = vpack.c.bf16 %v710_v52, %v709_v46  ;;  %v10547_v61 = vld [vmem:[%s14780_s15 + $0xd4] sm:$0xf0]  ;;  %v8754_v63 = vld [vmem:[%s14780_s15 + $0xd8] sm:$0xf0] }
  0x3b   : > { %v8752_v58 = vld [vmem:[%s14780_s15 + $0xc8] sm:$0xf]  ;;  %v11624_v60 = vpack.c.bf16 %v718_v54, %v717_v53  ;;  %v10545_v62 = vld [vmem:[%s14780_s15 + $0xcc] sm:$0xf]  ;;  %v10543_v3 = vld [vmem:[%s14780_s15 + $0xb4] sm:$0xf0] }
  0x3c   : > { %938 = vmatpush.bf16.msra.mxu0 %v8713_v22  ;;  %10987 = vmatpush.bf16.msra.mxu2 %v8713_v22  ;;  %v8753_v0 = vor.u32 %v10547_v61, %v8752_v58  ;;  %v8757_v1 = vor.u32 %v10545_v62, %v8754_v63  ;;  %v8736_v2 = vld [vmem:[%s14780_s15 + $0xa8] sm:$0xf]  ;;  %v10541_v4 = vld [vmem:[%s14780_s15 + $0xac] sm:$0xf]  ;;  %v8738_v5 = vld [vmem:[%s14780_s15 + $0xb8] sm:$0xf0] }
  0x3d   : > { %987 = vmatpush.bf16.msra.mxu1 %v8717_v23  ;;  %10995 = vmatpush.bf16.msra.mxu3 %v8717_v23  ;;  %v8737_v6 = vor.u32 %v10543_v3, %v8736_v2  ;;  %v8741_v7 = vor.u32 %v10541_v4, %v8738_v5  ;;  %v8720_v8 = vld [vmem:[%s14780_s15 + $0x88] sm:$0xf]  ;;  %v10539_v9 = vld [vmem:[%s14780_s15 + $0x94] sm:$0xf0]  ;;  %v10537_v10 = vld [vmem:[%s14780_s15 + $0x8c] sm:$0xf] }
  0x3e   : > { %v8722_v11 = vld [vmem:[%s14780_s15 + $0x98] sm:$0xf0]  ;;  %v711_v12 = vld [vmem:[%s11589_s30 + $0x10] sm:$0xff]  ;;  %v8721_v13 = vor.u32 %v10539_v9, %v8720_v8  ;;  %v8704_v15 = vld [vmem:[%s14780_s15 + $0x68] sm:$0xf] }
  0x3f   : > { %v8725_v14 = vor.u32 %v10537_v10, %v8722_v11  ;;  %v10535_v16 = vld [vmem:[%s14780_s15 + $0x74] sm:$0xf0]  ;;  %v10533_v17 = vld [vmem:[%s14780_s15 + $0x6c] sm:$0xf]  ;;  %v8706_v18 = vld [vmem:[%s14780_s15 + $0x78] sm:$0xf0] }
  0x40   : > { %939 = vmatpush.bf16.msra.mxu0 %v8697_v28  ;;  %10988 = vmatpush.bf16.msra.mxu2 %v8697_v28  ;;  %v712_v19 = vld [vmem:[%s11589_s30 + $0x18] sm:$0xff]  ;;  %v719_v20 = vld [vmem:[%s11589_s30 + $0x50] sm:$0xff]  ;;  %v8705_v22 = vor.u32 %v10535_v16, %v8704_v15  ;;  %v8709_v23 = vor.u32 %v10533_v17, %v8706_v18  ;;  %v8688_v24 = vld [vmem:[%s14780_s15 + $0x48] sm:$0xf] }
  0x41   : > { %988 = vmatpush.bf16.msra.mxu1 %v8701_v29  ;;  %10996 = vmatpush.bf16.msra.mxu3 %v8701_v29  ;;  %v720_v21 = vld [vmem:[%s11589_s30 + $0x58] sm:$0xff]  ;;  %v11682_v25 = vpack.c.bf16 %v712_v19, %v711_v12  ;;  %v10529_v28 = vld [vmem:[%s14780_s15 + $0x4c] sm:$0xf]  ;;  %v8672_v32 = vld [vmem:[%s14780_s15 + $0x28] sm:$0xf] }
  0x42   : > { %v11684_v26 = vpack.c.bf16 %v720_v21, %v719_v20  ;;  %v10531_v27 = vld [vmem:[%s14780_s15 + $0x54] sm:$0xf0]  ;;  %v8690_v29 = vld [vmem:[%s14780_s15 + $0x58] sm:$0xf0]  ;;  %v8656_v38 = vld [vmem:[%s14780_s15 + $0x8] sm:$0xf] }
  0x43   : > { %v8689_v30 = vor.u32 %v10531_v27, %v8688_v24  ;;  %v8693_v31 = vor.u32 %v10529_v28, %v8690_v29  ;;  %v10527_v33 = vld [vmem:[%s14780_s15 + $0x34] sm:$0xf0]  ;;  %v713_v44 = vld [vmem:[%s11589_s30 + $0x20] sm:$0xff]  ;;  %v714_v45 = vld [vmem:[%s11589_s30 + $0x28] sm:$0xff] }
  0x44   : > { %940 = vmatpush.bf16.msra.mxu0 %v8681_v34  ;;  %10989 = vmatpush.bf16.msra.mxu2 %v8681_v34  ;;  %v10525_v34 = vld [vmem:[%s14780_s15 + $0x2c] sm:$0xf]  ;;  %v8673_v36 = vor.u32 %v10527_v33, %v8672_v32  ;;  %v10523_v39 = vld [vmem:[%s14780_s15 + $0x14] sm:$0xf0]  ;;  %v721_v46 = vld [vmem:[%s11589_s30 + $0x60] sm:$0xff]  ;;  %v11727_v48 = vpack.c.bf16 %v714_v45, %v713_v44 }
  0x45   : > { %989 = vmatpush.bf16.msra.mxu1 %v8685_v35  ;;  %10997 = vmatpush.bf16.msra.mxu3 %v8685_v35  ;;  %v8674_v35 = vld [vmem:[%s14780_s15 + $0x38] sm:$0xf0]  ;;  %v8657_v42 = vor.u32 %v10523_v39, %v8656_v38  ;;  %v722_v47 = vld [vmem:[%s11589_s30 + $0x68] sm:$0xff]  ;;  %v715_v50 = vld [vmem:[%s11589_s30 + $0x30] sm:$0xff] }
  0x46   : > { %v8677_v37 = vor.u32 %v10525_v34, %v8674_v35  ;;  %v11729_v49 = vpack.c.bf16 %v722_v47, %v721_v46  ;;  %v723_v52 = vld [vmem:[%s11589_s30 + $0x70] sm:$0xff]  ;;  %v724_v53 = vld [vmem:[%s11589_s30 + $0x78] sm:$0xff]  ;;  %v9272_v58 = vld [vmem:[%s14718_s4 + $0x3e0] sm:$0xf] }
  0x47   : > { %v10678_v62 = vld [vmem:[%s14718_s4 + $0x3ec] sm:$0xf0]  ;;  %v9256_v2 = vld [vmem:[%s14718_s4 + $0x3c0] sm:$0xf] }
  0x48   : > { %941 = vmatpush.bf16.msra.mxu0 %v8665_v40  ;;  %10990 = vmatpush.bf16.msra.mxu2 %v8665_v40  ;;  %v10521_v40 = vld [vmem:[%s14780_s15 + $0xc] sm:$0xf]  ;;  %v9273_v63 = vor.u32 %v10678_v62, %v9272_v58  ;;  %v10674_v4 = vld [vmem:[%s14718_s4 + $0x3cc] sm:$0xf0]  ;;  %v9016_v8 = vld [vmem:[%s14718_s4 + $0x1e0] sm:$0xf] }
  0x49   : > { %990 = vmatpush.bf16.msra.mxu1 %v8669_v41  ;;  %10998 = vmatpush.bf16.msra.mxu3 %v8669_v41  ;;  %v8658_v41 = vld [vmem:[%s14780_s15 + $0x18] sm:$0xf0]  ;;  %v10582_v5 = vld [vmem:[%s14718_s4 + $0xec] sm:$0xf0]  ;;  %v8872_v11 = vld [vmem:[%s14718_s4 + $0xc0] sm:$0xf] }
  0x4a   : > { %v8661_v43 = vor.u32 %v10521_v40, %v8658_v41  ;;  %v10614_v9 = vld [vmem:[%s14718_s4 + $0x1ec] sm:$0xf0]  ;;  %v9112_v16 = vld [vmem:[%s14718_s4 + $0x2a0] sm:$0xf] }
  0x4b   : > { %v9017_v10 = vor.u32 %v10614_v9, %v9016_v8  ;;  %v10578_v12 = vld [vmem:[%s14718_s4 + $0xcc] sm:$0xf0]  ;;  %v9240_v20 = vld [vmem:[%s14718_s4 + $0x3a0] sm:$0xf] }
  0x4c   : > { %942 = vmatpush.bf16.msra.mxu0 %v8649_v51  ;;  %10991 = vmatpush.bf16.msra.mxu2 %v8649_v51  ;;  %v716_v51 = vld [vmem:[%s11589_s30 + $0x38] sm:$0xff]  ;;  %v10610_v15 = vld [vmem:[%s14718_s4 + $0x1cc] sm:$0xf0]  ;;  %v8968_v32 = vld [vmem:[%s14718_s4 + $0x180] sm:$0xf]  ;;  %s14864_s30 = sld [smem:[#allocation38_spill]] }
  0x4d   : > { %991 = vmatpush.bf16.msra.mxu1 %v8653_v55  ;;  %10999 = vmatpush.bf16.msra.mxu3 %v8653_v55  ;;  %v11739_v54 = vpack.c.bf16 %v716_v51, %v715_v50  ;;  %v11741_v55 = vpack.c.bf16 %v724_v53, %v723_v52  ;;  %v10638_v17 = vld [vmem:[%s14718_s4 + $0x2ac] sm:$0xf0]  ;;  %v8952_v38 = vld [vmem:[%s14718_s4 + $0x160] sm:$0xf] }
  0x4e   : > { %v9113_v19 = vor.u32 %v10638_v17, %v9112_v16  ;;  %v10670_v21 = vld [vmem:[%s14718_s4 + $0x3ac] sm:$0xf0]  ;;  %v8936_v44 = vld [vmem:[%s14718_s4 + $0x140] sm:$0xf] }
  0x4f   : > { %943 = vmatmul.bf16.vlgmr.msra.gmra.mxu0 %v11622_v59  ;;  %963 = vmatmul.bf16.vlgmr.msra.gmra.mxu2 %v11624_v60  ;;  %v10574_v24 = vld [vmem:[%s14718_s4 + $0xac] sm:$0xf0]  ;;  %v8792_v50 = vld [vmem:[%s14718_s4 + $0x20] sm:$0xf] }
  0x50   : > { %1033 = vmatpush.bf16.msrb.mxu2 %v8769_v56  ;;  %992 = vmatmul.bf16.vlgmr.msra.gmra.mxu1 %v11622_v59  ;;  %v9144_v56 = vld [vmem:[%s14718_s4 + $0x2e0] sm:$0xf]  ;;  %v10606_v27 = vld [vmem:[%s14718_s4 + $0x1ac] sm:$0xf0] }
  0x51   : > { %1082 = vmatpush.bf16.msrb.mxu3 %v8773_v57  ;;  %v10646_v57 = vld [vmem:[%s14718_s4 + $0x2ec] sm:$0xf0]  ;;  %2182 = vmatpush.bf16.msrb.mxu1 %v9017_v10  ;;  %v9096_v62 = vld [vmem:[%s14718_s4 + $0x280] sm:$0xf] }
  0x52   : > { %1012 = vmatmul.bf16.vlgmr.msra.gmra.mxu3 %v11624_v60  ;;  %v9145_v61 = vor.u32 %v10646_v57, %v9144_v56  ;;  %v10602_v33 = vld [vmem:[%s14718_s4 + $0x18c] sm:$0xf0]  ;;  %v8776_v57 = vld [vmem:[%s14718_s4] sm:$0xf]  ;;  %s14680_s26 = scalar_lea.vmem %s14864_s30, %s11571_s24 }
  0x53   : > { %v8969_v35 = vor.u32 %v10602_v33, %v8968_v32  ;;  %v10598_v40 = vld [vmem:[%s14718_s4 + $0x16c] sm:$0xf0]  ;;  %v11908_v9 = vld [vmem:[%s14783_s12] sm:$0xf] }
  0x54   : > { %1034 = vmatpush.bf16.msrb.mxu2 %v8753_v0  ;;  %v9128_v0 = vld [vmem:[%s14718_s4 + $0x2c0] sm:$0xf]  ;;  %v8953_v41 = vor.u32 %v10598_v40, %v8952_v38  ;;  %v10594_v46 = vld [vmem:[%s14718_s4 + $0x14c] sm:$0xf0] }
  0x55   : > { %1083 = vmatpush.bf16.msrb.mxu3 %v8757_v1  ;;  %v10642_v1 = vld [vmem:[%s14718_s4 + $0x2cc] sm:$0xf0]  ;;  %v8937_v47 = vor.u32 %v10594_v46, %v8936_v44  ;;  %v9208_v10 = vld [vmem:[%s14718_s4 + $0x360] sm:$0xf] }
  0x56   : > { %v9129_v3 = vor.u32 %v10642_v1, %v9128_v0  ;;  %v10558_v51 = vld [vmem:[%s14718_s4 + $0x2c] sm:$0xf0]  ;;  %v9064_v32 = vld [vmem:[%s14718_s4 + $0x240] sm:$0xf] }
  0x57   : > { %v8793_v52 = vor.u32 %v10558_v51, %v8792_v50  ;;  %v10590_v53 = vld [vmem:[%s14718_s4 + $0x12c] sm:$0xf0] }
  0x58   : > { %1035 = vmatpush.bf16.msrb.mxu2 %v8737_v6  ;;  %v9257_v6 = vor.u32 %v10674_v4, %v9256_v2  ;;  %v10554_v58 = vld [vmem:[%s14718_s4 + $0xc] sm:$0xf0]  ;;  %v9224_v4 = vld [vmem:[%s14718_s4 + $0x380] sm:$0xf] }
  0x59   : > { %1084 = vmatpush.bf16.msrb.mxu3 %v8741_v7  ;;  %v8777_v0 = vor.u32 %v10554_v58, %v8776_v57  ;;  %v10586_v1 = vld [vmem:[%s14718_s4 + $0x10c] sm:$0xf0] }
  0x5a   : > { %v10658_v44 = vld [vmem:[%s14718_s4 + $0x34c] sm:$0xf0] }
  0x5c   : > { %1036 = vmatpush.bf16.msrb.mxu2 %v8721_v13  ;;  %v9000_v13 = vld [vmem:[%s14718_s4 + $0x1c0] sm:$0xf] }
  0x5d   : > { %1085 = vmatpush.bf16.msrb.mxu3 %v8725_v14  ;;  %v8873_v14 = vor.u32 %v10578_v12, %v8872_v11  ;;  %v9001_v18 = vor.u32 %v10610_v15, %v9000_v13  ;;  %v11917_v13 = vperm.slane %v11908_v9, 0  ;;  %v11920_v15 = vperm.slane %v11908_v9, 1 }
  0x5f   : > { %948 = vmatmul.bf16.gmra.mxu0 %v11682_v25  ;;  %968 = vmatmul.bf16.gmra.mxu2 %v11684_v26 }
  0x60   : > { %1037 = vmatpush.bf16.msrb.mxu2 %v8705_v22  ;;  %997 = vmatmul.bf16.gmra.mxu1 %v11682_v25  ;;  %v8856_v22 = vld [vmem:[%s14718_s4 + $0xa0] sm:$0xf] }
  0x61   : > { %1086 = vmatpush.bf16.msrb.mxu3 %v8709_v23  ;;  %v9241_v23 = vor.u32 %v10670_v21, %v9240_v20  ;;  %2183 = vmatpush.bf16.msrb.mxu1 %v9001_v18  ;;  %v8857_v28 = vor.u32 %v10574_v24, %v8856_v22 }
  0x62   : > { %1017 = vmatmul.bf16.gmra.mxu3 %v11684_v26 }
  0x64   : > { %1038 = vmatpush.bf16.msrb.mxu2 %v8689_v30  ;;  %v8840_v30 = vld [vmem:[%s14718_s4 + $0x80] sm:$0xf] }
  0x65   : > { %1087 = vmatpush.bf16.msrb.mxu3 %v8693_v31  ;;  %v10570_v31 = vld [vmem:[%s14718_s4 + $0x8c] sm:$0xf0] }
  0x66   : > { %v8841_v34 = vor.u32 %v10570_v31, %v8840_v30 }
  0x68   : > { %1039 = vmatpush.bf16.msrb.mxu2 %v8673_v36  ;;  %v8824_v36 = vld [vmem:[%s14718_s4 + $0x60] sm:$0xf] }
  0x69   : > { %1088 = vmatpush.bf16.msrb.mxu3 %v8677_v37  ;;  %v10566_v37 = vld [vmem:[%s14718_s4 + $0x6c] sm:$0xf0] }
  0x6a   : > { %v8825_v39 = vor.u32 %v10566_v37, %v8824_v36 }
  0x6c   : > { %1040 = vmatpush.bf16.msrb.mxu2 %v8657_v42  ;;  %v8808_v42 = vld [vmem:[%s14718_s4 + $0x40] sm:$0xf] }
  0x6d   : > { %1089 = vmatpush.bf16.msrb.mxu3 %v8661_v43  ;;  %v10562_v43 = vld [vmem:[%s14718_s4 + $0x4c] sm:$0xf0] }
  0x6e   : > { %v8809_v45 = vor.u32 %v10562_v43, %v8808_v42  ;;  %v9192_v43 = vld [vmem:[%s14718_s4 + $0x340] sm:$0xf] }
  0x6f   : > { %953 = vmatmul.bf16.gmra.mxu0 %v11727_v48  ;;  %973 = vmatmul.bf16.gmra.mxu2 %v11729_v49  ;;  %v9193_v50 = vor.u32 %v10658_v44, %v9192_v43 }
  0x70   : > { %1002 = vmatmul.bf16.gmra.mxu1 %v11727_v48  ;;  %2231 = vmatpush.bf16.msra.mxu2 %v9145_v61  ;;  %v8904_v61 = vld [vmem:[%s14718_s4 + $0x100] sm:$0xf] }
  0x71   : > { %2280 = vmatpush.bf16.msra.mxu3 %v9273_v63  ;;  %v10634_v63 = vld [vmem:[%s14718_s4 + $0x28c] sm:$0xf0] }
  0x72   : > { %1022 = vmatmul.bf16.gmra.mxu3 %v11729_v49  ;;  %v9097_v2 = vor.u32 %v10634_v63, %v9096_v62 }
  0x74   : > { %2232 = vmatpush.bf16.msra.mxu2 %v9129_v3  ;;  %v8905_v3 = vor.u32 %v10586_v1, %v8904_v61 }
  0x75   : > { %2281 = vmatpush.bf16.msra.mxu3 %v9257_v6  ;;  %v9080_v6 = vld [vmem:[%s14718_s4 + $0x260] sm:$0xf] }
  0x78   : > { %2233 = vmatpush.bf16.msra.mxu2 %v9113_v19 }
  0x79   : > { %2282 = vmatpush.bf16.msra.mxu3 %v9241_v23 }
  0x7c   : > { %2234 = vmatpush.bf16.msra.mxu2 %v9097_v2 }
  0x7f   : > { %958 = vmatmul.bf16.gmra.mxu0 %v11739_v54  ;;  %978 = vmatmul.bf16.gmra.mxu2 %v11741_v55 }
  0x80   : > { %1007 = vmatmul.bf16.gmra.mxu1 %v11739_v54 }
  0x82   : > { %1027 = vmatmul.bf16.gmra.mxu3 %v11741_v55 }
  0x8f   : > { %1041 = vmatmul.bf16.vlgmr.msrb.gmra.mxu2 %v11622_v59 }
  0x92   : > { %1090 = vmatmul.bf16.vlgmr.msrb.gmra.mxu3 %v11622_v59  ;;  %v8888_v59 = vld [vmem:[%s14718_s4 + $0xe0] sm:$0xf] }
  0x93   : > { %v8889_v7 = vor.u32 %v10582_v5, %v8888_v59  ;;  %v10666_v59 = vld [vmem:[%s14718_s4 + $0x38c] sm:$0xf0] }
  0x94   : > { %v9225_v5 = vor.u32 %v10666_v59, %v9224_v4 }
  0x95   : > { %2133 = vmatpush.bf16.msrb.mxu0 %v8889_v7  ;;  %v10630_v7 = vld [vmem:[%s14718_s4 + $0x26c] sm:$0xf0] }
  0x96   : > { %2283 = vmatpush.bf16.msra.mxu3 %v9225_v5  ;;  %v9081_v8 = vor.u32 %v10630_v7, %v9080_v6 }
  0x98   : > { %2235 = vmatpush.bf16.msra.mxu2 %v9081_v8 }
  0x99   : > { %2134 = vmatpush.bf16.msrb.mxu0 %v8873_v14 }
  0x9d   : > { %2135 = vmatpush.bf16.msrb.mxu0 %v8857_v28 }
  0x9f   : > { %1046 = vmatmul.bf16.gmra.mxu2 %v11682_v25 }
  0xa1   : > { %2136 = vmatpush.bf16.msrb.mxu0 %v8841_v34  ;;  %v10626_v34 = vld [vmem:[%s14718_s4 + $0x24c] sm:$0xf0] }
  0xa2   : > { %1095 = vmatmul.bf16.gmra.mxu3 %v11682_v25  ;;  %v8984_v25 = vld [vmem:[%s14718_s4 + $0x1a0] sm:$0xf]  ;;  %v9065_v38 = vor.u32 %v10626_v34, %v9064_v32 }
  0xa3   : > { %v8985_v29 = vor.u32 %v10606_v27, %v8984_v25 }
  0xa4   : > { %2236 = vmatpush.bf16.msra.mxu2 %v9065_v38 }
  0xa5   : > { %2184 = vmatpush.bf16.msrb.mxu1 %v8985_v29  ;;  %2137 = vmatpush.bf16.msrb.mxu0 %v8825_v39 }
  0xa9   : > { %2185 = vmatpush.bf16.msrb.mxu1 %v8969_v35  ;;  %2138 = vmatpush.bf16.msrb.mxu0 %v8809_v45 }
  0xad   : > { %2186 = vmatpush.bf16.msrb.mxu1 %v8953_v41  ;;  %2139 = vmatpush.bf16.msrb.mxu0 %v8793_v52 }
  0xaf   : > { %1051 = vmatmul.bf16.gmra.mxu2 %v11727_v48 }
  0xb1   : > { %2187 = vmatpush.bf16.msrb.mxu1 %v8937_v47  ;;  %2140 = vmatpush.bf16.msrb.mxu0 %v8777_v0 }
  0xb2   : > { %1100 = vmatmul.bf16.gmra.mxu3 %v11727_v48  ;;  %v8920_v48 = vld [vmem:[%s14718_s4 + $0x120] sm:$0xf] }
  0xb3   : > { %v8921_v56 = vor.u32 %v10590_v53, %v8920_v48 }
  0xb5   : > { %2188 = vmatpush.bf16.msrb.mxu1 %v8921_v56 }
  0xb9   : > { %2189 = vmatpush.bf16.msrb.mxu1 %v8905_v3 }
  0xbf   : > { %1056 = vmatmul.bf16.gmra.mxu2 %v11739_v54 }
  0xc2   : > { %1105 = vmatmul.bf16.gmra.mxu3 %v11739_v54  ;;  %v10662_v54 = vld [vmem:[%s14718_s4 + $0x36c] sm:$0xf0] }
  0xc3   : > { %v9209_v12 = vor.u32 %v10662_v54, %v9208_v10 }
  0xc5   : > { %2284 = vmatpush.bf16.msra.mxu3 %v9209_v12 }
  0xc9   : > { %2285 = vmatpush.bf16.msra.mxu3 %v9193_v50 }
  0xcc   : > { %v944_v11 = vpop.f32.mrf.mxu0 }
  0xcd   : > { %v993_v14 = vpop.f32.mrf.mxu1  ;;  %v945_v16 = vadd.f32 %v944_v11, %v11917_v13 }
  0xce   : > { %v994_v17 = vadd.f32 %v993_v14, %v11920_v15  ;;  %v9048_v14 = vld [vmem:[%s14718_s4 + $0x220] sm:$0xf] }
  0xcf   : > { %1061 = vmatmul.bf16.gmra.mxu2 %v11624_v60  ;;  %v1195_v19 = vmul.f32 0.2, %v945_v16  ;;  %vm1131_vm0 = vcmp.gt.f32.partialorder %v945_v16, 0.0 }
  0xd0   : > { %v1196_v22 = vmul.f32 0.2, %v994_v17  ;;  %vm1132_vm1 = vcmp.gt.f32.partialorder %v994_v17, 0.0 }
  0xd1   : > { %v1259_v29 = vsel %vm1131_vm0, %v945_v16, %v1195_v19 }
  0xd2   : > { %1110 = vmatmul.bf16.gmra.mxu3 %v11624_v60  ;;  %v964_v18 = vpop.f32.mrf.mxu2  ;;  %v1260_v60 = vsel %vm1132_vm1, %v994_v17, %v1196_v22  ;;  %v10622_v17 = vld [vmem:[%s14718_s4 + $0x22c] sm:$0xf0] }
  0xd3   : > { %v965_v20 = vadd.f32 %v964_v18, %v11917_v13 }
  0xd4   : > { %v946_v24 = vpop.f32.mrf.mxu0 }
  0xd5   : > { %v1013_v21 = vpop.f32.mrf.mxu3  ;;  %v947_v25 = vadd.f32 %v946_v24, %v11917_v13  ;;  %v995_v27 = vpop.f32.mrf.mxu1  ;;  %v1227_v39 = vmul.f32 0.2, %v965_v20  ;;  %vm1163_vm4 = vcmp.gt.f32.partialorder %v965_v20, 0.0 }
  0xd6   : > { %v1014_v23 = vadd.f32 %v1013_v21, %v11920_v15  ;;  %v996_v28 = vadd.f32 %v995_v27, %v11920_v15  ;;  %v9049_v21 = vor.u32 %v10622_v17, %v9048_v14  ;;  %v9176_v27 = vld [vmem:[%s14718_s4 + $0x320] sm:$0xf] }
  0xd7   : > { %vm1135_vm2 = vcmp.gt.f32.partialorder %v947_v25, 0.0  ;;  %v1199_v30 = vmul.f32 0.2, %v947_v25  ;;  %v1291_v53 = vsel %vm1163_vm4, %v965_v20, %v1227_v39 }
  0xd8   : > { %vm1136_vm3 = vcmp.gt.f32.partialorder %v996_v28, 0.0  ;;  %v1200_v31 = vmul.f32 0.2, %v996_v28  ;;  %v1228_v45 = vmul.f32 0.2, %v1014_v23  ;;  %vm1164_vm5 = vcmp.gt.f32.partialorder %v1014_v23, 0.0  ;;  %2237 = vmatpush.bf16.msra.mxu2 %v9049_v21 }
  0xd9   : > { %v1263_v33 = vsel %vm1135_vm2, %v947_v25, %v1199_v30 }
  0xda   : > { %v11936_v35 = vpack.c.bf16 %v1263_v33, %v1259_v29  ;;  %v1264_v36 = vsel %vm1136_vm3, %v996_v28, %v1200_v31  ;;  %v966_v37 = vpop.f32.mrf.mxu2  ;;  %v1292_v58 = vsel %vm1164_vm5, %v1014_v23, %v1228_v45  ;;  %v10654_v28 = vld [vmem:[%s14718_s4 + $0x32c] sm:$0xf0] }
  0xdb   : > { %v11938_v40 = vpack.c.bf16 %v1264_v36, %v1260_v60  ;;  %v967_v41 = vadd.f32 %v966_v37, %v11917_v13  ;;  %v9177_v31 = vor.u32 %v10654_v28, %v9176_v27 }
  0xdc   : > { %v949_v47 = vpop.f32.mrf.mxu0  ;;  %2141 = vmatmul.bf16.vlgmr.msrb.gmra.mxu0 %v11936_v35 }
  0xdd   : > { %v1015_v42 = vpop.f32.mrf.mxu3  ;;  %vm1167_vm6 = vcmp.gt.f32.partialorder %v967_v41, 0.0  ;;  %v1231_v51 = vmul.f32 0.2, %v967_v41  ;;  %v998_v48 = vpop.f32.mrf.mxu1  ;;  %2190 = vmatmul.bf16.vlgmr.msrb.gmra.mxu1 %v11938_v40  ;;  %v950_v57 = vadd.f32 %v949_v47, %v11917_v13  ;;  %2286 = vmatpush.bf16.msra.mxu3 %v9177_v31 }
  0xde   : > { %v1016_v46 = vadd.f32 %v1015_v42, %v11920_v15  ;;  %v999_v63 = vadd.f32 %v998_v48, %v11920_v15 }
  0xdf   : > { %v1295_v56 = vsel %vm1167_vm6, %v967_v41, %v1231_v51  ;;  %1066 = vmatmul.bf16.gmra.mxu2 %v11684_v26  ;;  %v1203_v2 = vmul.f32 0.2, %v950_v57  ;;  %vm1139_vm8 = vcmp.gt.f32.partialorder %v950_v57, 0.0 }
  0xe0   : > { %vm1168_vm7 = vcmp.gt.f32.partialorder %v1016_v46, 0.0  ;;  %v1232_v52 = vmul.f32 0.2, %v1016_v46  ;;  %v11952_v61 = vpack.c.bf16 %v1295_v56, %v1291_v53  ;;  %v1204_v59 = vmul.f32 0.2, %v999_v63 }
  0xe1   : > { %vm1140_vm9 = vcmp.gt.f32.partialorder %v999_v63, 0.0  ;;  %v1267_v54 = vsel %vm1139_vm8, %v950_v57, %v1203_v2 }
  0xe2   : > { %v1296_v62 = vsel %vm1168_vm7, %v1016_v46, %v1232_v52  ;;  %1115 = vmatmul.bf16.gmra.mxu3 %v11684_v26  ;;  %v969_v1 = vpop.f32.mrf.mxu2  ;;  %v1268_v11 = vsel %vm1140_vm9, %v999_v63, %v1204_v59  ;;  %v10650_v59 = vld [vmem:[%s14718_s4 + $0x30c] sm:$0xf0] }
  0xe3   : > { %v11956_v0 = vpack.c.bf16 %v1296_v62, %v1292_v58  ;;  %v970_v3 = vadd.f32 %v969_v1, %v11917_v13  ;;  %v9032_v1 = vld [vmem:[%s14718_s4 + $0x200] sm:$0xf] }
  0xe4   : > { %v951_v6 = vpop.f32.mrf.mxu0 }
  0xe5   : > { %v1018_v4 = vpop.f32.mrf.mxu3  ;;  %v952_v7 = vadd.f32 %v951_v6, %v11917_v13  ;;  %v1000_v8 = vpop.f32.mrf.mxu1  ;;  %v1235_v22 = vmul.f32 0.2, %v970_v3  ;;  %vm1171_vm12 = vcmp.gt.f32.partialorder %v970_v3, 0.0 }
  0xe6   : > { %v1019_v5 = vadd.f32 %v1018_v4, %v11920_v15  ;;  %v1001_v10 = vadd.f32 %v1000_v8, %v11920_v15  ;;  %v9160_v4 = vld [vmem:[%s14718_s4 + $0x300] sm:$0xf] }
  0xe7   : > { %vm1143_vm10 = vcmp.gt.f32.partialorder %v952_v7, 0.0  ;;  %v1207_v26 = vmul.f32 0.2, %v952_v7  ;;  %v1299_v36 = vsel %vm1171_vm12, %v970_v3, %v1235_v22  ;;  %v10618_v3 = vld [vmem:[%s14718_s4 + $0x20c] sm:$0xf0] }
  0xe8   : > { %vm1144_vm11 = vcmp.gt.f32.partialorder %v1001_v10, 0.0  ;;  %v1208_v12 = vmul.f32 0.2, %v1001_v10  ;;  %v1236_v29 = vmul.f32 0.2, %v1019_v5  ;;  %vm1172_vm13 = vcmp.gt.f32.partialorder %v1019_v5, 0.0 }
  0xe9   : > { %v1271_v16 = vsel %vm1143_vm10, %v952_v7, %v1207_v26  ;;  %v9033_v8 = vor.u32 %v10618_v3, %v9032_v1  ;;  %v9274_v1 = vld [vmem:[%s14718_s4 + $0x3f0] sm:$0xf0] }
  0xea   : > { %v11968_v18 = vpack.c.bf16 %v1271_v16, %v1267_v54  ;;  %v1272_v19 = vsel %vm1144_vm11, %v1001_v10, %v1208_v12  ;;  %v971_v20 = vpop.f32.mrf.mxu2  ;;  %v1300_v39 = vsel %vm1172_vm13, %v1019_v5, %v1236_v29  ;;  %v9161_v10 = vor.u32 %v10650_v59, %v9160_v4 }
  0xeb   : > { %v11970_v23 = vpack.c.bf16 %v1272_v19, %v1268_v11  ;;  %v972_v24 = vadd.f32 %v971_v20, %v11917_v13  ;;  %2238 = vmatpush.bf16.msra.mxu2 %v9033_v8  ;;  %v9018_v8 = vld [vmem:[%s14718_s4 + $0x1f0] sm:$0xf0] }
  0xec   : > { %v954_v60 = vpop.f32.mrf.mxu0  ;;  %2146 = vmatmul.bf16.gmra.mxu0 %v11968_v18  ;;  %2287 = vmatpush.bf16.msra.mxu3 %v9161_v10 }
  0xed   : > { %v1020_v25 = vpop.f32.mrf.mxu3  ;;  %vm1175_vm14 = vcmp.gt.f32.partialorder %v972_v24, 0.0  ;;  %v1239_v32 = vmul.f32 0.2, %v972_v24  ;;  %v1003_v33 = vpop.f32.mrf.mxu1  ;;  %2195 = vmatmul.bf16.gmra.mxu1 %v11970_v23  ;;  %v955_v38 = vadd.f32 %v954_v60, %v11917_v13 }
  0xee   : > { %v1021_v30 = vadd.f32 %v1020_v25, %v11920_v15  ;;  %v1004_v43 = vadd.f32 %v1003_v33, %v11920_v15 }
  0xef   : > { %v1303_v37 = vsel %vm1175_vm14, %v972_v24, %v1239_v32  ;;  %1071 = vmatmul.bf16.gmra.mxu2 %v11729_v49  ;;  %v1211_v46 = vmul.f32 0.2, %v955_v38  ;;  %vm1147_vm0 = vcmp.gt.f32.partialorder %v955_v38, 0.0 }
  0xf0   : > { %vm1176_vm15 = vcmp.gt.f32.partialorder %v1021_v30, 0.0  ;;  %v1240_v34 = vmul.f32 0.2, %v1021_v30  ;;  %v11984_v41 = vpack.c.bf16 %v1303_v37, %v1299_v36  ;;  %v1212_v51 = vmul.f32 0.2, %v1004_v43 }
  0xf1   : > { %vm1148_vm1 = vcmp.gt.f32.partialorder %v1004_v43, 0.0  ;;  %v1275_v58 = vsel %vm1147_vm0, %v955_v38, %v1211_v46 }
  0xf2   : > { %v1304_v42 = vsel %vm1176_vm15, %v1021_v30, %v1240_v34  ;;  %1120 = vmatmul.bf16.gmra.mxu3 %v11729_v49  ;;  %v974_v45 = vpop.f32.mrf.mxu2  ;;  %v1276_v62 = vsel %vm1148_vm1, %v1004_v43, %v1212_v51 }
  0xf3   : > { %v11988_v44 = vpack.c.bf16 %v1304_v42, %v1300_v39  ;;  %v975_v47 = vadd.f32 %v974_v45, %v11917_v13 }
  0xf4   : > { %v956_v52 = vpop.f32.mrf.mxu0 }
  0xf5   : > { %v1023_v50 = vpop.f32.mrf.mxu3  ;;  %v957_v53 = vadd.f32 %v956_v52, %v11917_v13  ;;  %v1005_v56 = vpop.f32.mrf.mxu1  ;;  %v1243_v54 = vmul.f32 0.2, %v975_v47  ;;  %vm1179_vm4 = vcmp.gt.f32.partialorder %v975_v47, 0.0  ;;  %v10580_v52 = vld [vmem:[%s14718_s4 + $0xe4] sm:$0xf] }
  0xf6   : > { %v1024_v48 = vadd.f32 %v1023_v50, %v11920_v15  ;;  %v1006_v57 = vadd.f32 %v1005_v56, %v11920_v15  ;;  %v10644_v50 = vld [vmem:[%s14718_s4 + $0x2e4] sm:$0xf] }
  0xf7   : > { %vm1151_vm2 = vcmp.gt.f32.partialorder %v957_v53, 0.0  ;;  %v1215_v49 = vmul.f32 0.2, %v957_v53  ;;  %v1307_v22 = vsel %vm1179_vm4, %v975_v47, %v1243_v54 }
  0xf8   : > { %vm1152_vm3 = vcmp.gt.f32.partialorder %v1006_v57, 0.0  ;;  %v1216_v63 = vmul.f32 0.2, %v1006_v57  ;;  %v1244_v14 = vmul.f32 0.2, %v1024_v48  ;;  %vm1180_vm5 = vcmp.gt.f32.partialorder %v1024_v48, 0.0 }
  0xf9   : > { %v1279_v2 = vsel %vm1151_vm2, %v957_v53, %v1215_v49  ;;  %v8890_v53 = vld [vmem:[%s14718_s4 + $0xf0] sm:$0xf0] }
  0xfa   : > { %v12006_v5 = vpack.c.bf16 %v1279_v2, %v1275_v58  ;;  %v1280_v6 = vsel %vm1152_vm3, %v1006_v57, %v1216_v63  ;;  %v976_v7 = vpop.f32.mrf.mxu2  ;;  %v1308_v27 = vsel %vm1180_vm5, %v1024_v48, %v1244_v14  ;;  %v9146_v48 = vld [vmem:[%s14718_s4 + $0x2f0] sm:$0xf0]  ;;  %v10676_v63 = vld [vmem:[%s14718_s4 + $0x3e4] sm:$0xf] }
  0xfb   : > { %v12008_v26 = vpack.c.bf16 %v1280_v6, %v1276_v62  ;;  %v977_v11 = vadd.f32 %v976_v7, %v11917_v13  ;;  %v9149_v49 = vor.u32 %v10644_v50, %v9146_v48  ;;  %v8893_v62 = vor.u32 %v10580_v52, %v8890_v53  ;;  %v10612_v2 = vld [vmem:[%s14718_s4 + $0x1e4] sm:$0xf] }
  0xfc   : > { %v959_v17 = vpop.f32.mrf.mxu0  ;;  %2151 = vmatmul.bf16.gmra.mxu0 %v12006_v5  ;;  %v9277_v7 = vor.u32 %v10676_v63, %v9274_v1 }
  0xfd   : > { %v1025_v12 = vpop.f32.mrf.mxu3  ;;  %vm1183_vm6 = vcmp.gt.f32.partialorder %v977_v11, 0.0  ;;  %v1247_v19 = vmul.f32 0.2, %v977_v11  ;;  %v1008_v20 = vpop.f32.mrf.mxu1  ;;  %2200 = vmatmul.bf16.gmra.mxu1 %v12008_v26  ;;  %v960_v25 = vadd.f32 %v959_v17, %v11917_v13  ;;  %2427 = vmatpush.bf16.msrb.mxu2 %v9149_v49 }
  0xfe   : > { %v1026_v16 = vadd.f32 %v1025_v12, %v11920_v15  ;;  %v1009_v30 = vadd.f32 %v1008_v20, %v11920_v15  ;;  %2329 = vmatpush.bf16.msra.mxu0 %v8893_v62  ;;  %2476 = vmatpush.bf16.msrb.mxu3 %v9277_v7 }
  0xff   : > { %v1311_v24 = vsel %vm1183_vm6, %v977_v11, %v1247_v19  ;;  %1076 = vmatmul.bf16.gmra.mxu2 %v11741_v55  ;;  %v1219_v32 = vmul.f32 0.2, %v960_v25  ;;  %vm1155_vm8 = vcmp.gt.f32.partialorder %v960_v25, 0.0  ;;  %v9021_v11 = vor.u32 %v10612_v2, %v9018_v8  ;;  %v8986_v8 = vld [vmem:[%s14718_s4 + $0x1b0] sm:$0xf0] }
 0x100   : > { %vm1184_vm7 = vcmp.gt.f32.partialorder %v1026_v16, 0.0  ;;  %v1248_v21 = vmul.f32 0.2, %v1026_v16  ;;  %v12016_v28 = vpack.c.bf16 %v1311_v24, %v1307_v22  ;;  %v1220_v36 = vmul.f32 0.2, %v1009_v30 }
 0x101   : > { %vm1156_vm9 = vcmp.gt.f32.partialorder %v1009_v30, 0.0  ;;  %v1283_v45 = vsel %vm1155_vm8, %v960_v25, %v1219_v32  ;;  %2378 = vmatpush.bf16.msra.mxu1 %v9021_v11  ;;  %v12063_v22 = vperm.slane %v11908_v9, 2  ;;  %v12066_v25 = vperm.slane %v11908_v9, 3  ;;  %v10576_v32 = vld [vmem:[%s14718_s4 + $0xc4] sm:$0xf] }
 0x102   : > { %v1312_v29 = vsel %vm1184_vm7, %v1026_v16, %v1248_v21  ;;  %1125 = vmatmul.bf16.gmra.mxu3 %v11741_v55  ;;  %v979_v31 = vpop.f32.mrf.mxu2  ;;  %v1284_v46 = vsel %vm1156_vm9, %v1009_v30, %v1220_v36  ;;  %v10640_v30 = vld [vmem:[%s14718_s4 + $0x2c4] sm:$0xf]  ;;  %v8874_v9 = vld [vmem:[%s14718_s4 + $0xd0] sm:$0xf0] }
 0x103   : > { %v12020_v60 = vpack.c.bf16 %v1312_v29, %v1308_v27  ;;  %v980_v33 = vadd.f32 %v979_v31, %v11917_v13  ;;  %v9130_v31 = vld [vmem:[%s14718_s4 + $0x2d0] sm:$0xf0]  ;;  %v10568_v11 = vld [vmem:[%s14718_s4 + $0x84] sm:$0xf] }
 0x104   : > { %v961_v38 = vpop.f32.mrf.mxu0  ;;  %v9258_v36 = vld [vmem:[%s14718_s4 + $0x3d0] sm:$0xf0] }
 0x105   : > { %v1028_v34 = vpop.f32.mrf.mxu3  ;;  %v962_v39 = vadd.f32 %v961_v38, %v11917_v13  ;;  %v1010_v42 = vpop.f32.mrf.mxu1  ;;  %v1251_v3 = vmul.f32 0.2, %v980_v33  ;;  %vm1187_vm12 = vcmp.gt.f32.partialorder %v980_v33, 0.0  ;;  %v8877_v38 = vor.u32 %v10576_v32, %v8874_v9 }
 0x106   : > { %v1029_v37 = vadd.f32 %v1028_v34, %v11920_v15  ;;  %v1011_v43 = vadd.f32 %v1010_v42, %v11920_v15  ;;  %v10672_v34 = vld [vmem:[%s14718_s4 + $0x3c4] sm:$0xf] }
 0x107   : > { %vm1159_vm10 = vcmp.gt.f32.partialorder %v962_v39, 0.0  ;;  %v1223_v55 = vmul.f32 0.2, %v962_v39  ;;  %v1315_v14 = vsel %vm1187_vm12, %v980_v33, %v1251_v3  ;;  %v9133_v33 = vor.u32 %v10640_v30, %v9130_v31  ;;  %v10608_v42 = vld [vmem:[%s14718_s4 + $0x1c4] sm:$0xf]  ;;  %2330 = vmatpush.bf16.msra.mxu0 %v8877_v38 }
 0x108   : > { %vm1160_vm11 = vcmp.gt.f32.partialorder %v1011_v43, 0.0  ;;  %v1224_v47 = vmul.f32 0.2, %v1011_v43  ;;  %v1252_v10 = vmul.f32 0.2, %v1029_v37  ;;  %vm1188_vm13 = vcmp.gt.f32.partialorder %v1029_v37, 0.0 }
 0x109   : > { %v1287_v51 = vsel %vm1159_vm10, %v962_v39, %v1223_v55  ;;  %v9261_v39 = vor.u32 %v10672_v34, %v9258_v36  ;;  %2428 = vmatpush.bf16.msrb.mxu2 %v9133_v33  ;;  %v10572_v3 = vld [vmem:[%s14718_s4 + $0xa4] sm:$0xf] }
 0x10a   : > { %v12038_v56 = vpack.c.bf16 %v1287_v51, %v1283_v45  ;;  %v1288_v57 = vsel %vm1160_vm11, %v1011_v43, %v1224_v47  ;;  %v981_v58 = vpop.f32.mrf.mxu2  ;;  %v1316_v17 = vsel %vm1188_vm13, %v1029_v37, %v1252_v10  ;;  %v9002_v43 = vld [vmem:[%s14718_s4 + $0x1d0] sm:$0xf0]  ;;  %v10564_v36 = vld [vmem:[%s14718_s4 + $0x64] sm:$0xf] }
 0x10b   : > { %v12049_v4 = vpack.c.bf16 %v1288_v57, %v1284_v46  ;;  %v982_v59 = vadd.f32 %v981_v58, %v11917_v13  ;;  %v9005_v47 = vor.u32 %v10608_v42, %v9002_v43  ;;  %2477 = vmatpush.bf16.msrb.mxu3 %v9261_v39  ;;  %v10596_v38 = vld [vmem:[%s14718_s4 + $0x164] sm:$0xf] }
 0x10c   : > { %2156 = vmatmul.bf16.gmra.mxu0 %v12038_v56 }
 0x10d   : > { %v1030_v6 = vpop.f32.mrf.mxu3  ;;  %vm1191_vm14 = vcmp.gt.f32.partialorder %v982_v59, 0.0  ;;  %v1255_v12 = vmul.f32 0.2, %v982_v59  ;;  %2205 = vmatmul.bf16.gmra.mxu1 %v12049_v4 }
 0x10e   : > { %v1031_v54 = vadd.f32 %v1030_v6, %v11920_v15  ;;  %2379 = vmatpush.bf16.msra.mxu1 %v9005_v47  ;;  %v10604_v6 = vld [vmem:[%s14718_s4 + $0x1a4] sm:$0xf] }
 0x10f   : > { %v1319_v16 = vsel %vm1191_vm14, %v982_v59, %v1255_v12  ;;  %v8858_v59 = vld [vmem:[%s14718_s4 + $0xb0] sm:$0xf0]  ;;  %v8989_v10 = vor.u32 %v10604_v6, %v8986_v8  ;;  %v10556_v8 = vld [vmem:[%s14718_s4 + $0x24] sm:$0xf] }
 0x110   : > { %vm1192_vm15 = vcmp.gt.f32.partialorder %v1031_v54, 0.0  ;;  %v1256_v13 = vmul.f32 0.2, %v1031_v54  ;;  %v12058_v19 = vpack.c.bf16 %v1319_v16, %v1315_v14  ;;  %v8861_v7 = vor.u32 %v10572_v3, %v8858_v59  ;;  %v8842_v12 = vld [vmem:[%s14718_s4 + $0x90] sm:$0xf0] }
 0x111   : > { %v10636_v16 = vld [vmem:[%s14718_s4 + $0x2a4] sm:$0xf] }
 0x112   : > { %v1320_v15 = vsel %vm1192_vm15, %v1031_v54, %v1256_v13  ;;  %v1042_v21 = vpop.f32.mrf.mxu2  ;;  %2331 = vmatpush.bf16.msra.mxu0 %v8861_v7  ;;  %2380 = vmatpush.bf16.msra.mxu1 %v8989_v10  ;;  %v10600_v13 = vld [vmem:[%s14718_s4 + $0x184] sm:$0xf]  ;;  %v8794_v10 = vld [vmem:[%s14718_s4 + $0x30] sm:$0xf0] }
 0x113   : > { %v12060_v20 = vpack.c.bf16 %v1320_v15, %v1316_v17  ;;  %v1043_v27 = vadd.f32 %v1042_v21, %v12063_v22  ;;  %v9114_v17 = vld [vmem:[%s14718_s4 + $0x2b0] sm:$0xf0]  ;;  %v10668_v15 = vld [vmem:[%s14718_s4 + $0x3a4] sm:$0xf]  ;;  %v8845_v21 = vor.u32 %v10568_v11, %v8842_v12  ;;  %v8797_v11 = vor.u32 %v10556_v8, %v8794_v10 }
 0x114   : > { %v8922_v12 = vld [vmem:[%s14718_s4 + $0x130] sm:$0xf0] }
 0x115   : > { %v1091_v24 = vpop.f32.mrf.mxu3  ;;  %v1197_v45 = vmul.f32 0.2, %v1043_v27  ;;  %vm1133_vm0 = vcmp.gt.f32.partialorder %v1043_v27, 0.0  ;;  %v9210_v8 = vld [vmem:[%s14718_s4 + $0x370] sm:$0xf0] }
 0x116   : > { %v1092_v29 = vadd.f32 %v1091_v24, %v12066_v25  ;;  %v9117_v24 = vor.u32 %v10636_v16, %v9114_v17  ;;  %2332 = vmatpush.bf16.msra.mxu0 %v8845_v21  ;;  %v10552_v16 = vld [vmem:[%s14718_s4 + $0x4] sm:$0xf]  ;;  %v8778_v17 = vld [vmem:[%s14718_s4 + $0x10] sm:$0xf0] }
 0x117   : > { %v1261_v53 = vsel %vm1133_vm0, %v1043_v27, %v1197_v45  ;;  %v9242_v27 = vld [vmem:[%s14718_s4 + $0x3b0] sm:$0xf0] }
 0x118   : > { %v1198_v50 = vmul.f32 0.2, %v1092_v29  ;;  %vm1134_vm1 = vcmp.gt.f32.partialorder %v1092_v29, 0.0  ;;  %v9245_v32 = vor.u32 %v10668_v15, %v9242_v27  ;;  %2429 = vmatpush.bf16.msrb.mxu2 %v9117_v24  ;;  %v8954_v45 = vld [vmem:[%s14718_s4 + $0x170] sm:$0xf0] }
 0x119   : > { %v8957_v47 = vor.u32 %v10596_v38, %v8954_v45  ;;  %v10584_v15 = vld [vmem:[%s14718_s4 + $0x104] sm:$0xf]  ;;  %v9098_v27 = vld [vmem:[%s14718_s4 + $0x290] sm:$0xf0] }
 0x11a   : > { %v1044_v37 = vpop.f32.mrf.mxu2  ;;  %v1262_v58 = vsel %vm1134_vm1, %v1092_v29, %v1198_v50  ;;  %v8970_v29 = vld [vmem:[%s14718_s4 + $0x190] sm:$0xf0]  ;;  %2478 = vmatpush.bf16.msrb.mxu3 %v9245_v32  ;;  %v10632_v24 = vld [vmem:[%s14718_s4 + $0x284] sm:$0xf] }
 0x11b   : > { %v1045_v55 = vadd.f32 %v1044_v37, %v12063_v22  ;;  %v8973_v33 = vor.u32 %v10600_v13, %v8970_v29  ;;  %v8826_v37 = vld [vmem:[%s14718_s4 + $0x70] sm:$0xf0]  ;;  %v10664_v29 = vld [vmem:[%s14718_s4 + $0x384] sm:$0xf] }
 0x11c   : > { %2161 = vmatmul.bf16.gmra.mxu0 %v11952_v61  ;;  %v8829_v43 = vor.u32 %v10564_v36, %v8826_v37  ;;  %v9226_v32 = vld [vmem:[%s14718_s4 + $0x390] sm:$0xf0] }
 0x11d   : > { %v1093_v46 = vpop.f32.mrf.mxu3  ;;  %vm1137_vm2 = vcmp.gt.f32.partialorder %v1045_v55, 0.0  ;;  %v1201_v48 = vmul.f32 0.2, %v1045_v55  ;;  %2210 = vmatmul.bf16.gmra.mxu1 %v11956_v0 }
 0x11e   : > { %v1094_v51 = vadd.f32 %v1093_v46, %v12066_v25  ;;  %2381 = vmatpush.bf16.msra.mxu1 %v8973_v33  ;;  %2333 = vmatpush.bf16.msra.mxu0 %v8829_v43  ;;  %v8906_v33 = vld [vmem:[%s14718_s4 + $0x110] sm:$0xf0] }
 0x11f   : > { %v1265_v57 = vsel %vm1137_vm2, %v1045_v55, %v1201_v48  ;;  %v10560_v48 = vld [vmem:[%s14718_s4 + $0x44] sm:$0xf]  ;;  %v8909_v36 = vor.u32 %v10584_v15, %v8906_v33 }
 0x120   : > { %vm1138_vm3 = vcmp.gt.f32.partialorder %v1094_v51, 0.0  ;;  %v1202_v52 = vmul.f32 0.2, %v1094_v51  ;;  %v12098_v49 = vpack.c.bf16 %v1265_v57, %v1261_v53  ;;  %v10592_v53 = vld [vmem:[%s14718_s4 + $0x144] sm:$0xf] }
 0x122   : > { %v1266_v62 = vsel %vm1138_vm3, %v1094_v51, %v1202_v52  ;;  %v1047_v1 = vpop.f32.mrf.mxu2  ;;  %2239 = vmatmul.bf16.vlgmr.msra.gmra.mxu2 %v12098_v49  ;;  %v8810_v52 = vld [vmem:[%s14718_s4 + $0x50] sm:$0xf0]  ;;  %2382 = vmatpush.bf16.msra.mxu1 %v8957_v47 }
 0x123   : > { %v12100_v63 = vpack.c.bf16 %v1266_v62, %v1262_v58  ;;  %v1048_v54 = vadd.f32 %v1047_v1, %v12063_v22  ;;  %v8813_v1 = vor.u32 %v10560_v48, %v8810_v52 }
 0x125   : > { %v1096_v2 = vpop.f32.mrf.mxu3  ;;  %2288 = vmatmul.bf16.vlgmr.msra.gmra.mxu3 %v12100_v63  ;;  %v1205_v30 = vmul.f32 0.2, %v1048_v54  ;;  %vm1141_vm4 = vcmp.gt.f32.partialorder %v1048_v54, 0.0  ;;  %2334 = vmatpush.bf16.msra.mxu0 %v8813_v1 }
 0x126   : > { %v1097_v14 = vadd.f32 %v1096_v2, %v12066_v25  ;;  %v8938_v2 = vld [vmem:[%s14718_s4 + $0x150] sm:$0xf0] }
 0x127   : > { %v1269_v50 = vsel %vm1141_vm4, %v1048_v54, %v1205_v30  ;;  %v8941_v6 = vor.u32 %v10592_v53, %v8938_v2  ;;  %v10588_v54 = vld [vmem:[%s14718_s4 + $0x124] sm:$0xf]  ;;  %v8781_v30 = vor.u32 %v10552_v16, %v8778_v17 }
 0x128   : > { %v1206_v39 = vmul.f32 0.2, %v1097_v14  ;;  %vm1142_vm5 = vcmp.gt.f32.partialorder %v1097_v14, 0.0  ;;  %v8925_v13 = vor.u32 %v10588_v54, %v8922_v12  ;;  %v10628_v2 = vld [vmem:[%s14718_s4 + $0x264] sm:$0xf] }
 0x129   : > { %2383 = vmatpush.bf16.msra.mxu1 %v8941_v6  ;;  %2335 = vmatpush.bf16.msra.mxu0 %v8797_v11  ;;  %v10660_v6 = vld [vmem:[%s14718_s4 + $0x364] sm:$0xf] }
 0x12a   : > { %v1049_v31 = vpop.f32.mrf.mxu2  ;;  %v1270_v57 = vsel %vm1142_vm5, %v1097_v14, %v1206_v39  ;;  %v9213_v54 = vor.u32 %v10660_v6, %v9210_v8 }
 0x12b   : > { %v1050_v9 = vadd.f32 %v1049_v31, %v12063_v22  ;;  %v9101_v31 = vor.u32 %v10632_v24, %v9098_v27 }
 0x12c   : > { %2166 = vmatmul.bf16.gmra.mxu0 %v11984_v41 }
 0x12d   : > { %v1098_v34 = vpop.f32.mrf.mxu3  ;;  %vm1145_vm6 = vcmp.gt.f32.partialorder %v1050_v9, 0.0  ;;  %v1209_v55 = vmul.f32 0.2, %v1050_v9  ;;  %2215 = vmatmul.bf16.gmra.mxu1 %v11988_v44  ;;  %2430 = vmatpush.bf16.msrb.mxu2 %v9101_v31 }
 0x12e   : > { %v1099_v42 = vadd.f32 %v1098_v34, %v12066_v25  ;;  %v9229_v34 = vor.u32 %v10664_v29, %v9226_v32  ;;  %2384 = vmatpush.bf16.msra.mxu1 %v8925_v13  ;;  %2336 = vmatpush.bf16.msra.mxu0 %v8781_v30 }
 0x12f   : > { %v1273_v51 = vsel %vm1145_vm6, %v1050_v9, %v1209_v55 }
 0x130   : > { %vm1146_vm7 = vcmp.gt.f32.partialorder %v1099_v42, 0.0  ;;  %v1210_v46 = vmul.f32 0.2, %v1099_v42  ;;  %v12168_v58 = vpack.c.bf16 %v1273_v51, %v1269_v50  ;;  %2479 = vmatpush.bf16.msrb.mxu3 %v9229_v34 }
 0x132   : > { %v1274_v62 = vsel %vm1146_vm7, %v1099_v42, %v1210_v46  ;;  %v1052_v59 = vpop.f32.mrf.mxu2  ;;  %2244 = vmatmul.bf16.gmra.mxu2 %v12168_v58  ;;  %2385 = vmatpush.bf16.msra.mxu1 %v8909_v36 }
 0x133   : > { %v12173_v3 = vpack.c.bf16 %v1274_v62, %v1270_v57  ;;  %v1053_v14 = vadd.f32 %v1052_v59, %v12063_v22  ;;  %v9082_v59 = vld [vmem:[%s14718_s4 + $0x270] sm:$0xf0] }
 0x134   : > { %2480 = vmatpush.bf16.msrb.mxu3 %v9213_v54 }
 0x135   : > { %v1101_v7 = vpop.f32.mrf.mxu3  ;;  %2293 = vmatmul.bf16.gmra.mxu3 %v12173_v3  ;;  %v1213_v37 = vmul.f32 0.2, %v1053_v14  ;;  %vm1149_vm8 = vcmp.gt.f32.partialorder %v1053_v14, 0.0 }
 0x136   : > { %v1102_v21 = vadd.f32 %v1101_v7, %v12066_v25  ;;  %v9085_v7 = vor.u32 %v10628_v2, %v9082_v59 }
 0x137   : > { %v1277_v46 = vsel %vm1149_vm8, %v1053_v14, %v1213_v37 }
 0x138   : > { %v1214_v42 = vmul.f32 0.2, %v1102_v21  ;;  %vm1150_vm9 = vcmp.gt.f32.partialorder %v1102_v21, 0.0  ;;  %2431 = vmatpush.bf16.msrb.mxu2 %v9085_v7 }
 0x13a   : > { %v1054_v9 = vpop.f32.mrf.mxu2  ;;  %v1278_v50 = vsel %vm1150_vm9, %v1102_v21, %v1214_v42  ;;  %v10656_v42 = vld [vmem:[%s14718_s4 + $0x344] sm:$0xf] }
 0x13b   : > { %v1055_v38 = vadd.f32 %v1054_v9, %v12063_v22  ;;  %v12252_v9 = vld [vmem:[%s14719_s5] sm:$0xf] }
 0x13c   : > { %2171 = vmatmul.bf16.gmra.mxu0 %v12016_v28  ;;  %v12255_v34 = vperm.slane %v12252_v9, 0 }
 0x13d   : > { %v1103_v39 = vpop.f32.mrf.mxu3  ;;  %vm1153_vm10 = vcmp.gt.f32.partialorder %v1055_v38, 0.0  ;;  %v1217_v45 = vmul.f32 0.2, %v1055_v38  ;;  %2220 = vmatmul.bf16.gmra.mxu1 %v12020_v60 }
 0x13e   : > { %v1104_v43 = vadd.f32 %v1103_v39, %v12066_v25  ;;  %v9066_v39 = vld [vmem:[%s14718_s4 + $0x250] sm:$0xf0] }
 0x13f   : > { %v1281_v47 = vsel %vm1153_vm10, %v1055_v38, %v1217_v45  ;;  %v10624_v38 = vld [vmem:[%s14718_s4 + $0x244] sm:$0xf] }
 0x140   : > { %vm1154_vm11 = vcmp.gt.f32.partialorder %v1104_v43, 0.0  ;;  %v1218_v55 = vmul.f32 0.2, %v1104_v43  ;;  %v12219_v51 = vpack.c.bf16 %v1281_v47, %v1277_v46  ;;  %v9069_v45 = vor.u32 %v10624_v38, %v9066_v39  ;;  %v9178_v39 = vld [vmem:[%s14718_s4 + $0x330] sm:$0xf0] }
 0x142   : > { %v1282_v48 = vsel %vm1154_vm11, %v1104_v43, %v1218_v55  ;;  %v1057_v53 = vpop.f32.mrf.mxu2  ;;  %2249 = vmatmul.bf16.gmra.mxu2 %v12219_v51  ;;  %v9194_v55 = vld [vmem:[%s14718_s4 + $0x350] sm:$0xf0] }
 0x143   : > { %v12221_v52 = vpack.c.bf16 %v1282_v48, %v1278_v50  ;;  %v1058_v62 = vadd.f32 %v1057_v53, %v12063_v22  ;;  %v9197_v48 = vor.u32 %v10656_v42, %v9194_v55  ;;  %2432 = vmatpush.bf16.msrb.mxu2 %v9069_v45 }
 0x145   : > { %v1106_v57 = vpop.f32.mrf.mxu3  ;;  %2298 = vmatmul.bf16.gmra.mxu3 %v12221_v52  ;;  %v1221_v11 = vmul.f32 0.2, %v1058_v62  ;;  %vm1157_vm12 = vcmp.gt.f32.partialorder %v1058_v62, 0.0 }
 0x146   : > { %v1107_v1 = vadd.f32 %v1106_v57, %v12066_v25  ;;  %2481 = vmatpush.bf16.msrb.mxu3 %v9197_v48 }
 0x147   : > { %v1285_v21 = vsel %vm1157_vm12, %v1058_v62, %v1221_v11 }
 0x148   : > { %v1222_v14 = vmul.f32 0.2, %v1107_v1  ;;  %vm1158_vm13 = vcmp.gt.f32.partialorder %v1107_v1, 0.0 }
 0x14a   : > { %v1059_v10 = vpop.f32.mrf.mxu2  ;;  %v1286_v27 = vsel %vm1158_vm13, %v1107_v1, %v1222_v14 }
 0x14b   : > { %v1060_v12 = vadd.f32 %v1059_v10, %v12063_v22 }
 0x14c   : > { %2176 = vmatmul.bf16.gmra.mxu0 %v12058_v19 }
 0x14d   : > { %v1108_v13 = vpop.f32.mrf.mxu3  ;;  %vm1161_vm14 = vcmp.gt.f32.partialorder %v1060_v12, 0.0  ;;  %v1225_v17 = vmul.f32 0.2, %v1060_v12  ;;  %2225 = vmatmul.bf16.gmra.mxu1 %v12060_v20 }
 0x14e   : > { %v1109_v16 = vadd.f32 %v1108_v13, %v12066_v25 }
 0x14f   : > { %v1289_v24 = vsel %vm1161_vm14, %v1060_v12, %v1225_v17 }
 0x150   : > { %vm1162_vm15 = vcmp.gt.f32.partialorder %v1109_v16, 0.0  ;;  %v1226_v15 = vmul.f32 0.2, %v1109_v16  ;;  %v12243_v29 = vpack.c.bf16 %v1289_v24, %v1285_v21 }
 0x152   : > { %v1290_v30 = vsel %vm1162_vm15, %v1109_v16, %v1226_v15  ;;  %v1062_v32 = vpop.f32.mrf.mxu2  ;;  %2254 = vmatmul.bf16.gmra.mxu2 %v12243_v29 }
 0x153   : > { %v12245_v31 = vpack.c.bf16 %v1290_v30, %v1286_v27  ;;  %v1063_v36 = vadd.f32 %v1062_v32, %v12063_v22  ;;  %v10620_v32 = vld [vmem:[%s14718_s4 + $0x224] sm:$0xf] }
 0x155   : > { %v1111_v33 = vpop.f32.mrf.mxu3  ;;  %2303 = vmatmul.bf16.gmra.mxu3 %v12245_v31  ;;  %v1229_v53 = vmul.f32 0.2, %v1063_v36  ;;  %vm1165_vm0 = vcmp.gt.f32.partialorder %v1063_v36, 0.0 }
 0x156   : > { %v1112_v37 = vadd.f32 %v1111_v33, %v12066_v25  ;;  %v9050_v33 = vld [vmem:[%s14718_s4 + $0x230] sm:$0xf0] }
 0x157   : > { %v1293_v8 = vsel %vm1165_vm0, %v1063_v36, %v1229_v53  ;;  %v10652_v36 = vld [vmem:[%s14718_s4 + $0x324] sm:$0xf]  ;;  %v9053_v38 = vor.u32 %v10620_v32, %v9050_v33 }
 0x158   : > { %v1230_v1 = vmul.f32 0.2, %v1112_v37  ;;  %vm1166_vm1 = vcmp.gt.f32.partialorder %v1112_v37, 0.0  ;;  %v9181_v55 = vor.u32 %v10652_v36, %v9178_v39  ;;  %v10648_v32 = vld [vmem:[%s14718_s4 + $0x304] sm:$0xf] }
 0x159   : > { %v2142_v43 = vpop.f32.mrf.mxu0  ;;  %2433 = vmatpush.bf16.msrb.mxu2 %v9053_v38  ;;  %v9162_v36 = vld [vmem:[%s14718_s4 + $0x310] sm:$0xf0] }
 0x15a   : > { %v2143_v46 = vadd.f32 %v2142_v43, %v12255_v34  ;;  %v2191_v47 = vpop.f32.mrf.mxu1  ;;  %v1064_v50 = vpop.f32.mrf.mxu2  ;;  %v1294_v54 = vsel %vm1166_vm1, %v1112_v37, %v1230_v1  ;;  %2482 = vmatpush.bf16.msrb.mxu3 %v9181_v55 }
 0x15b   : > { %v1065_v57 = vadd.f32 %v1064_v50, %v12063_v22 }
 0x15c   : > { %v12273_v2 = vadd.f32 %v2191_v47, %v2143_v46  ;;  %2337 = vmatmul.bf16.vlgmr.msra.gmra.mxu0 %v11936_v35 }
 0x15d   : > { %v1113_v62 = vpop.f32.mrf.mxu3  ;;  %vm1169_vm2 = vcmp.gt.f32.partialorder %v1065_v57, 0.0  ;;  %v1233_v6 = vmul.f32 0.2, %v1065_v57  ;;  %2386 = vmatmul.bf16.vlgmr.msra.gmra.mxu1 %v11938_v40 }
 0x15e   : > { %v1114_v59 = vadd.f32 %v1113_v62, %v12066_v25 }
 0x15f   : > { %v1297_v10 = vsel %vm1169_vm2, %v1065_v57, %v1233_v6 }
 0x160   : > { %vm1170_vm3 = vcmp.gt.f32.partialorder %v1114_v59, 0.0  ;;  %v1234_v7 = vmul.f32 0.2, %v1114_v59  ;;  %v12278_v11 = vpack.c.bf16 %v1297_v10, %v1293_v8 }
 0x161   : > { %v2144_v14 = vpop.f32.mrf.mxu0 }
 0x162   : > { %v1298_v12 = vsel %vm1170_vm3, %v1114_v59, %v1234_v7  ;;  %v2145_v16 = vadd.f32 %v2144_v14, %v12255_v34  ;;  %v2193_v17 = vpop.f32.mrf.mxu1  ;;  %v1067_v15 = vpop.f32.mrf.mxu2  ;;  %2259 = vmatmul.bf16.gmra.mxu2 %v12278_v11 }
 0x163   : > { %v12280_v13 = vpack.c.bf16 %v1298_v12, %v1294_v54  ;;  %v1068_v27 = vadd.f32 %v1067_v15, %v12063_v22 }
 0x164   : > { %v12285_v24 = vadd.f32 %v2193_v17, %v2145_v16 }
 0x165   : > { %v1116_v21 = vpop.f32.mrf.mxu3  ;;  %2308 = vmatmul.bf16.gmra.mxu3 %v12280_v13  ;;  %v1237_v46 = vmul.f32 0.2, %v1068_v27  ;;  %vm1173_vm4 = vcmp.gt.f32.partialorder %v1068_v27, 0.0 }
 0x166   : > { %v1117_v30 = vadd.f32 %v1116_v21, %v12066_v25 }
 0x167   : > { %v1301_v59 = vsel %vm1173_vm4, %v1068_v27, %v1237_v46  ;;  %v10616_v27 = vld [vmem:[%s14718_s4 + $0x204] sm:$0xf] }
 0x168   : > { %v1238_v48 = vmul.f32 0.2, %v1117_v30  ;;  %vm1174_vm5 = vcmp.gt.f32.partialorder %v1117_v30, 0.0 }
 0x169   : > { %v2147_v37 = vpop.f32.mrf.mxu0 }
 0x16a   : > { %v2148_v42 = vadd.f32 %v2147_v37, %v12255_v34  ;;  %v2196_v43 = vpop.f32.mrf.mxu1  ;;  %v1069_v45 = vpop.f32.mrf.mxu2  ;;  %v1302_v7 = vsel %vm1174_vm5, %v1117_v30, %v1238_v48  ;;  %v9034_v30 = vld [vmem:[%s14718_s4 + $0x210] sm:$0xf0]  ;;  %v9165_v37 = vor.u32 %v10648_v32, %v9162_v36  ;;  %v9152_v36 = vld [vmem:[%s14718_s4 + $0x2e8] sm:$0xf] }
 0x16b   : > { %v1070_v47 = vadd.f32 %v1069_v45, %v12063_v22  ;;  %v9037_v33 = vor.u32 %v10616_v27, %v9034_v30 }
 0x16c   : > { %v12303_v53 = vadd.f32 %v2196_v43, %v2148_v42  ;;  %2342 = vmatmul.bf16.gmra.mxu0 %v11968_v18  ;;  %2483 = vmatpush.bf16.msrb.mxu3 %v9165_v37  ;;  %v10647_v37 = vld [vmem:[%s14718_s4 + $0x2f4] sm:$0xf0] }
 0x16d   : > { %v1118_v50 = vpop.f32.mrf.mxu3  ;;  %vm1177_vm6 = vcmp.gt.f32.partialorder %v1070_v47, 0.0  ;;  %v1241_v62 = vmul.f32 0.2, %v1070_v47  ;;  %2391 = vmatmul.bf16.gmra.mxu1 %v11970_v23  ;;  %2434 = vmatpush.bf16.msrb.mxu2 %v9037_v33 }
 0x16e   : > { %v1119_v57 = vadd.f32 %v1118_v50, %v12066_v25 }
 0x16f   : > { %v1305_v6 = vsel %vm1177_vm6, %v1070_v47, %v1241_v62 }
 0x170   : > { %vm1178_vm7 = vcmp.gt.f32.partialorder %v1119_v57, 0.0  ;;  %v1242_v1 = vmul.f32 0.2, %v1119_v57  ;;  %v12308_v8 = vpack.c.bf16 %v1305_v6, %v1301_v59 }
 0x171   : > { %v2149_v12 = vpop.f32.mrf.mxu0 }
 0x172   : > { %v1306_v10 = vsel %vm1178_vm7, %v1119_v57, %v1242_v1  ;;  %v2150_v14 = vadd.f32 %v2149_v12, %v12255_v34  ;;  %v2198_v16 = vpop.f32.mrf.mxu1  ;;  %v1072_v17 = vpop.f32.mrf.mxu2  ;;  %2264 = vmatmul.bf16.gmra.mxu2 %v12308_v8 }
 0x173   : > { %v12310_v54 = vpack.c.bf16 %v1306_v10, %v1302_v7  ;;  %v1073_v38 = vadd.f32 %v1072_v17, %v12063_v22 }
 0x174   : > { %v12315_v21 = vadd.f32 %v2198_v16, %v2150_v14 }
 0x175   : > { %v1121_v15 = vpop.f32.mrf.mxu3  ;;  %2313 = vmatmul.bf16.gmra.mxu3 %v12310_v54  ;;  %v1245_v46 = vmul.f32 0.2, %v1073_v38  ;;  %vm1181_vm8 = vcmp.gt.f32.partialorder %v1073_v38, 0.0 }
 0x176   : > { %v1122_v39 = vadd.f32 %v1121_v15, %v12066_v25 }
 0x177   : > { %v1309_v6 = vsel %vm1181_vm8, %v1073_v38, %v1245_v46  ;;  %v8896_v38 = vld [vmem:[%s14718_s4 + $0xe8] sm:$0xf]  ;;  %v10679_v46 = vld [vmem:[%s14718_s4 + $0x3f4] sm:$0xf0] }
 0x178   : > { %v1246_v48 = vmul.f32 0.2, %v1122_v39  ;;  %vm1182_vm9 = vcmp.gt.f32.partialorder %v1122_v39, 0.0 }
 0x179   : > { %v2152_v42 = vpop.f32.mrf.mxu0 }
 0x17a   : > { %v2153_v43 = vadd.f32 %v2152_v42, %v12255_v34  ;;  %v2201_v45 = vpop.f32.mrf.mxu1  ;;  %v1074_v55 = vpop.f32.mrf.mxu2  ;;  %v1310_v10 = vsel %vm1182_vm9, %v1122_v39, %v1246_v48  ;;  %v9153_v39 = vor.u32 %v10647_v37, %v9152_v36  ;;  %v10583_v42 = vld [vmem:[%s14718_s4 + $0xf4] sm:$0xf0] }
 0x17b   : > { %v1075_v47 = vadd.f32 %v1074_v55, %v12063_v22 }
 0x17c   : > { %v12333_v57 = vadd.f32 %v2201_v45, %v2153_v43  ;;  %2347 = vmatmul.bf16.gmra.mxu0 %v12006_v5  ;;  %v8897_v43 = vor.u32 %v10583_v42, %v8896_v38  ;;  %v9280_v45 = vld [vmem:[%s14718_s4 + $0x3e8] sm:$0xf]  ;;  %2623 = vmatpush.bf16.msra.mxu2 %v9153_v39 }
 0x17d   : > { %v1123_v50 = vpop.f32.mrf.mxu3  ;;  %vm1185_vm10 = vcmp.gt.f32.partialorder %v1075_v47, 0.0  ;;  %v1249_v1 = vmul.f32 0.2, %v1075_v47  ;;  %2396 = vmatmul.bf16.gmra.mxu1 %v12008_v26 }
 0x17e   : > { %v1124_v62 = vadd.f32 %v1123_v50, %v12066_v25  ;;  %2525 = vmatpush.bf16.msrb.mxu0 %v8897_v43  ;;  %v9281_v50 = vor.u32 %v10679_v46, %v9280_v45 }
 0x17f   : > { %v1313_v7 = vsel %vm1185_vm10, %v1075_v47, %v1249_v1 }
 0x180   : > { %vm1186_vm11 = vcmp.gt.f32.partialorder %v1124_v62, 0.0  ;;  %v1250_v59 = vmul.f32 0.2, %v1124_v62  ;;  %v12338_v12 = vpack.c.bf16 %v1313_v7, %v1309_v6  ;;  %2672 = vmatpush.bf16.msra.mxu3 %v9281_v50 }
 0x181   : > { %v2154_v17 = vpop.f32.mrf.mxu0 }
 0x182   : > { %v1314_v14 = vsel %vm1186_vm11, %v1124_v62, %v1250_v59  ;;  %v2155_v15 = vadd.f32 %v2154_v17, %v12255_v34  ;;  %v2203_v27 = vpop.f32.mrf.mxu1  ;;  %v1077_v30 = vpop.f32.mrf.mxu2  ;;  %2269 = vmatmul.bf16.gmra.mxu2 %v12338_v12 }
 0x183   : > { %v12340_v16 = vpack.c.bf16 %v1314_v14, %v1310_v10  ;;  %v1078_v55 = vadd.f32 %v1077_v30, %v12063_v22  ;;  %v10615_v30 = vld [vmem:[%s14718_s4 + $0x1f4] sm:$0xf0] }
 0x184   : > { %v12345_v33 = vadd.f32 %v2203_v27, %v2155_v15  ;;  %v9024_v27 = vld [vmem:[%s14718_s4 + $0x1e8] sm:$0xf] }
 0x185   : > { %v1126_v32 = vpop.f32.mrf.mxu3  ;;  %2318 = vmatmul.bf16.gmra.mxu3 %v12340_v16  ;;  %vm1189_vm12 = vcmp.gt.f32.partialorder %v1078_v55, 0.0  ;;  %v1253_v6 = vmul.f32 0.2, %v1078_v55 }
 0x186   : > { %v1127_v47 = vadd.f32 %v1126_v32, %v12066_v25 }
 0x188   : > { %v1254_v14 = vmul.f32 0.2, %v1127_v47  ;;  %vm1190_vm13 = vcmp.gt.f32.partialorder %v1127_v47, 0.0 }
 0x189   : > { %v2157_v48 = vpop.f32.mrf.mxu0 }
 0x18a   : > { %v2158_v62 = vadd.f32 %v2157_v48, %v12255_v34  ;;  %v2206_v1 = vpop.f32.mrf.mxu1  ;;  %v1079_v59 = vpop.f32.mrf.mxu2  ;;  %v1318_v38 = vsel %vm1190_vm13, %v1127_v47, %v1254_v14  ;;  %v10643_v47 = vld [vmem:[%s14718_s4 + $0x2d4] sm:$0xf0] }
 0x18b   : > { %v1080_v7 = vadd.f32 %v1079_v59, %v12063_v22  ;;  %v9025_v22 = vor.u32 %v10615_v30, %v9024_v27  ;;  %v10579_v59 = vld [vmem:[%s14718_s4 + $0xd4] sm:$0xf0] }
 0x18c   : > { %v12369_v17 = vadd.f32 %v2206_v1, %v2158_v62  ;;  %2352 = vmatmul.bf16.gmra.mxu0 %v12038_v56  ;;  %v8880_v62 = vld [vmem:[%s14718_s4 + $0xc8] sm:$0xf] }
 0x18d   : > { %v1128_v10 = vpop.f32.mrf.mxu3  ;;  %vm1193_vm14 = vcmp.gt.f32.partialorder %v1080_v7, 0.0  ;;  %v1257_v32 = vmul.f32 0.2, %v1080_v7  ;;  %2401 = vmatmul.bf16.gmra.mxu1 %v12049_v4 }
 0x18e   : > { %v1129_v15 = vadd.f32 %v1128_v10, %v12066_v25  ;;  %v1317_v25 = vsel %vm1189_vm12, %v1078_v55, %v1253_v6  ;;  %2574 = vmatpush.bf16.msrb.mxu1 %v9025_v22  ;;  %v9136_v55 = vld [vmem:[%s14718_s4 + $0x2c8] sm:$0xf]  ;;  %v8881_v10 = vor.u32 %v10579_v59, %v8880_v62  ;;  %v10611_v22 = vld [vmem:[%s14718_s4 + $0x1d4] sm:$0xf0] }
 0x18f   : > { %v1321_v37 = vsel %vm1193_vm14, %v1080_v7, %v1257_v32  ;;  %v9137_v1 = vor.u32 %v10643_v47, %v9136_v55  ;;  %v9264_v6 = vld [vmem:[%s14718_s4 + $0x3c8] sm:$0xf]  ;;  %v10675_v7 = vld [vmem:[%s14718_s4 + $0x3d4] sm:$0xf0] }
 0x190   : > { %vm1194_vm15 = vcmp.gt.f32.partialorder %v1129_v15, 0.0  ;;  %v1258_v36 = vmul.f32 0.2, %v1129_v15  ;;  %v12381_v39 = vpack.c.bf16 %v1321_v37, %v1317_v25  ;;  %v9265_v14 = vor.u32 %v10675_v7, %v9264_v6  ;;  %2526 = vmatpush.bf16.msrb.mxu0 %v8881_v10  ;;  %v9008_v32 = vld [vmem:[%s14718_s4 + $0x1c8] sm:$0xf] }
 0x191   : > { %v2159_v45 = vpop.f32.mrf.mxu0  ;;  %2624 = vmatpush.bf16.msra.mxu2 %v9137_v1  ;;  %v9120_v47 = vld [vmem:[%s14718_s4 + $0x2a8] sm:$0xf]  ;;  %v10639_v62 = vld [vmem:[%s14718_s4 + $0x2b4] sm:$0xf0] }
 0x192   : > { %v1322_v42 = vsel %vm1194_vm15, %v1129_v15, %v1258_v36  ;;  %v2160_v46 = vadd.f32 %v2159_v45, %v12255_v34  ;;  %v2208_v50 = vpop.f32.mrf.mxu1  ;;  %2274 = vmatmul.bf16.gmra.mxu2 %v12381_v39  ;;  %2673 = vmatpush.bf16.msra.mxu3 %v9265_v14  ;;  %v9009_v36 = vor.u32 %v10611_v22, %v9008_v32  ;;  %v8864_v45 = vld [vmem:[%s14718_s4 + $0xa8] sm:$0xf]  ;;  %v10671_v10 = vld [vmem:[%s14718_s4 + $0x3b4] sm:$0xf0] }
 0x193   : > { %v12383_v43 = vpack.c.bf16 %v1322_v42, %v1318_v38  ;;  %v9248_v59 = vld [vmem:[%s14718_s4 + $0x3a8] sm:$0xf]  ;;  %v9121_v7 = vor.u32 %v10639_v62, %v9120_v47  ;;  %v10607_v14 = vld [vmem:[%s14718_s4 + $0x1b4] sm:$0xf0] }
 0x194   : > { %v12388_v48 = vadd.f32 %v2208_v50, %v2160_v46  ;;  %2575 = vmatpush.bf16.msrb.mxu1 %v9009_v36  ;;  %v10575_v46 = vld [vmem:[%s14718_s4 + $0xb4] sm:$0xf0]  ;;  %v8992_v50 = vld [vmem:[%s14718_s4 + $0x1a8] sm:$0xf] }
 0x195   : > { %2323 = vmatmul.bf16.gmra.mxu3 %v12383_v43  ;;  %v8865_v1 = vor.u32 %v10575_v46, %v8864_v45  ;;  %v8993_v32 = vor.u32 %v10607_v14, %v8992_v50  ;;  %2625 = vmatpush.bf16.msra.mxu2 %v9121_v7  ;;  %v8848_v22 = vld [vmem:[%s14718_s4 + $0x88] sm:$0xf]  ;;  %v10571_v36 = vld [vmem:[%s14718_s4 + $0x94] sm:$0xf0] }
 0x196   : > { %v8832_v62 = vld [vmem:[%s14718_s4 + $0x68] sm:$0xf] }
 0x197   : > { %2527 = vmatpush.bf16.msrb.mxu0 %v8865_v1  ;;  %v10567_v1 = vld [vmem:[%s14718_s4 + $0x74] sm:$0xf0] }
 0x198   : > { %2576 = vmatpush.bf16.msrb.mxu1 %v8993_v32  ;;  %v8833_v7 = vor.u32 %v10567_v1, %v8832_v62  ;;  %v8816_v32 = vld [vmem:[%s14718_s4 + $0x48] sm:$0xf] }
 0x199   : > { %v2162_v15 = vpop.f32.mrf.mxu0  ;;  %v8800_v1 = vld [vmem:[%s14718_s4 + $0x28] sm:$0xf] }
 0x19a   : > { %v2163_v27 = vadd.f32 %v2162_v15, %v12255_v34  ;;  %v2211_v30 = vpop.f32.mrf.mxu1 }
 0x19c   : > { %v12415_v25 = vadd.f32 %v2211_v30, %v2163_v27  ;;  %2357 = vmatmul.bf16.gmra.mxu0 %v11952_v61  ;;  %v9249_v30 = vor.u32 %v10671_v10, %v9248_v59  ;;  %v8960_v59 = vld [vmem:[%s14718_s4 + $0x168] sm:$0xf]  ;;  %v10599_v10 = vld [vmem:[%s14718_s4 + $0x174] sm:$0xf0] }
 0x19d   : > { %2406 = vmatmul.bf16.gmra.mxu1 %v11956_v0 }
 0x19e   : > { %2674 = vmatpush.bf16.msra.mxu3 %v9249_v30 }
 0x1a1   : > { %v2164_v37 = vpop.f32.mrf.mxu0 }
 0x1a2   : > { %v2165_v38 = vadd.f32 %v2164_v37, %v12255_v34  ;;  %v2213_v42 = vpop.f32.mrf.mxu1  ;;  %2435 = vmatmul.bf16.vlgmr.msrb.gmra.mxu2 %v12098_v49  ;;  %v8976_v37 = vld [vmem:[%s14718_s4 + $0x188] sm:$0xf] }
 0x1a4   : > { %v12431_v55 = vadd.f32 %v2213_v42, %v2165_v38  ;;  %v10603_v42 = vld [vmem:[%s14718_s4 + $0x194] sm:$0xf0] }
 0x1a5   : > { %2484 = vmatmul.bf16.vlgmr.msrb.gmra.mxu3 %v12100_v63  ;;  %v2240_v6 = vpop.f32.mrf.mxu2  ;;  %v8977_v46 = vor.u32 %v10603_v42, %v8976_v37 }
 0x1a6   : > { %v2241_v15 = vadd.f32 %v2240_v6, %v12273_v2  ;;  %v8849_v2 = vor.u32 %v10571_v36, %v8848_v22  ;;  %v10563_v22 = vld [vmem:[%s14718_s4 + $0x54] sm:$0xf0]  ;;  %v8944_v36 = vld [vmem:[%s14718_s4 + $0x148] sm:$0xf] }
 0x1a7   : > { %2577 = vmatpush.bf16.msrb.mxu1 %v8977_v46  ;;  %v8817_v42 = vor.u32 %v10563_v22, %v8816_v32  ;;  %v9232_v32 = vld [vmem:[%s14718_s4 + $0x388] sm:$0xf] }
 0x1a8   : > { %v2289_v27 = vpop.f32.mrf.mxu3  ;;  %2528 = vmatpush.bf16.msrb.mxu0 %v8849_v2 }
 0x1a9   : > { %v2290_v38 = vadd.f32 %v2289_v27, %v2241_v15  ;;  %v2167_v45 = vpop.f32.mrf.mxu0  ;;  %v8961_v15 = vor.u32 %v10599_v10, %v8960_v59  ;;  %v10559_v59 = vld [vmem:[%s14718_s4 + $0x34] sm:$0xf0] }
 0x1aa   : > { %v2168_v50 = vadd.f32 %v2167_v45, %v12255_v34  ;;  %v2216_v47 = vpop.f32.mrf.mxu1  ;;  %v8801_v22 = vor.u32 %v10559_v59, %v8800_v1  ;;  %v8912_v1 = vld [vmem:[%s14718_s4 + $0x108] sm:$0xf] }
 0x1ab   : > { %v2981_v37 = vmul.f32 0.2, %v2290_v38  ;;  %2578 = vmatpush.bf16.msrb.mxu1 %v8961_v15  ;;  %vm2917_vm0 = vcmp.gt.f32.partialorder %v2290_v38, 0.0 }
 0x1ac   : > { %v12471_v6 = vadd.f32 %v2216_v47, %v2168_v50  ;;  %2362 = vmatmul.bf16.gmra.mxu0 %v11984_v41 }
 0x1ad   : > { %2411 = vmatmul.bf16.gmra.mxu1 %v11988_v44  ;;  %v2242_v14 = vpop.f32.mrf.mxu2  ;;  %2529 = vmatpush.bf16.msrb.mxu0 %v8833_v7  ;;  %v8928_v7 = vld [vmem:[%s14718_s4 + $0x128] sm:$0xf]  ;;  %v3045_v10 = vsel %vm2917_vm0, %v2290_v38, %v2981_v37 }
 0x1ae   : > { %v2243_v27 = vadd.f32 %v2242_v14, %v12285_v24  ;;  %v10595_v24 = vld [vmem:[%s14718_s4 + $0x154] sm:$0xf0] }
 0x1af   : > { %v8945_v46 = vor.u32 %v10595_v24, %v8944_v36 }
 0x1b0   : > { %v2291_v30 = vpop.f32.mrf.mxu3 }
 0x1b1   : > { %v2292_v2 = vadd.f32 %v2291_v30, %v2243_v27  ;;  %v2169_v45 = vpop.f32.mrf.mxu0  ;;  %2530 = vmatpush.bf16.msrb.mxu0 %v8817_v42  ;;  %2579 = vmatpush.bf16.msrb.mxu1 %v8945_v46  ;;  %v9104_v27 = vld [vmem:[%s14718_s4 + $0x288] sm:$0xf]  ;;  %v10635_v30 = vld [vmem:[%s14718_s4 + $0x294] sm:$0xf0] }
 0x1b2   : > { %v2170_v47 = vadd.f32 %v2169_v45, %v12255_v34  ;;  %v2218_v62 = vpop.f32.mrf.mxu1  ;;  %2440 = vmatmul.bf16.gmra.mxu2 %v12168_v58  ;;  %v9105_v37 = vor.u32 %v10635_v30, %v9104_v27  ;;  %v10591_v42 = vld [vmem:[%s14718_s4 + $0x134] sm:$0xf0] }
 0x1b3   : > { %vm2921_vm1 = vcmp.gt.f32.partialorder %v2292_v2, 0.0  ;;  %v2985_v50 = vmul.f32 0.2, %v2292_v2 }
 0x1b4   : > { %v12503_v15 = vadd.f32 %v2218_v62, %v2170_v47  ;;  %2626 = vmatpush.bf16.msra.mxu2 %v9105_v37  ;;  %v8784_v47 = vld [vmem:[%s14718_s4 + $0x8] sm:$0xf]  ;;  %v10555_v62 = vld [vmem:[%s14718_s4 + $0x14] sm:$0xf0] }
 0x1b5   : > { %2489 = vmatmul.bf16.gmra.mxu3 %v12173_v3  ;;  %v3049_v14 = vsel %vm2921_vm1, %v2292_v2, %v2985_v50  ;;  %v2245_v38 = vpop.f32.mrf.mxu2  ;;  %v10667_v2 = vld [vmem:[%s14718_s4 + $0x394] sm:$0xf0]  ;;  %2531 = vmatpush.bf16.msrb.mxu0 %v8801_v22  ;;  %v8929_v50 = vor.u32 %v10591_v42, %v8928_v7 }
 0x1b6   : > { %v12514_v36 = vpack.c.bf16 %v3049_v14, %v3045_v10  ;;  %v2246_v24 = vadd.f32 %v2245_v38, %v12303_v53  ;;  %v9233_v46 = vor.u32 %v10667_v2, %v9232_v32  ;;  %v8785_v53 = vor.u32 %v10555_v62, %v8784_v47  ;;  %v10587_v7 = vld [vmem:[%s14718_s4 + $0x114] sm:$0xf0] }
 0x1b7   : > { %2580 = vmatpush.bf16.msrb.mxu1 %v8929_v50  ;;  %v8913_v14 = vor.u32 %v10587_v7, %v8912_v1  ;;  %v10631_v62 = vld [vmem:[%s14718_s4 + $0x274] sm:$0xf0]  ;;  %v9216_v1 = vld [vmem:[%s14718_s4 + $0x368] sm:$0xf] }
 0x1b8   : > { %v2294_v45 = vpop.f32.mrf.mxu3  ;;  %2675 = vmatpush.bf16.msra.mxu3 %v9233_v46 }
 0x1b9   : > { %v2295_v59 = vadd.f32 %v2294_v45, %v2246_v24  ;;  %v2172_v10 = vpop.f32.mrf.mxu0  ;;  %2532 = vmatpush.bf16.msrb.mxu0 %v8785_v53 }
 0x1ba   : > { %v2173_v27 = vadd.f32 %v2172_v10, %v12255_v34  ;;  %v2221_v30 = vpop.f32.mrf.mxu1 }
 0x1bb   : > { %2581 = vmatpush.bf16.msrb.mxu1 %v8913_v14  ;;  %v2989_v2 = vmul.f32 0.2, %v2295_v59  ;;  %vm2925_vm2 = vcmp.gt.f32.partialorder %v2295_v59, 0.0 }
 0x1bc   : > { %v12536_v32 = vadd.f32 %v2221_v30, %v2173_v27  ;;  %2367 = vmatmul.bf16.gmra.mxu0 %v12016_v28  ;;  %v10663_v27 = vld [vmem:[%s14718_s4 + $0x374] sm:$0xf0] }
 0x1bd   : > { %2416 = vmatmul.bf16.gmra.mxu1 %v12020_v60  ;;  %v2247_v22 = vpop.f32.mrf.mxu2  ;;  %v3053_v53 = vsel %vm2925_vm2, %v2295_v59, %v2989_v2 }
 0x1be   : > { %v2248_v38 = vadd.f32 %v2247_v22, %v12315_v21  ;;  %v9088_v21 = vld [vmem:[%s14718_s4 + $0x268] sm:$0xf] }
 0x1bf   : > { %v9089_v14 = vor.u32 %v10631_v62, %v9088_v21 }
 0x1c0   : > { %v2296_v37 = vpop.f32.mrf.mxu3 }
 0x1c1   : > { %v2297_v42 = vadd.f32 %v2296_v37, %v2248_v38  ;;  %v2174_v24 = vpop.f32.mrf.mxu0  ;;  %v9217_v37 = vor.u32 %v10663_v27, %v9216_v1  ;;  %2627 = vmatpush.bf16.msra.mxu2 %v9089_v14  ;;  %v10627_v27 = vld [vmem:[%s14718_s4 + $0x254] sm:$0xf0] }
 0x1c2   : > { %v2175_v46 = vadd.f32 %v2174_v24, %v12255_v34  ;;  %v2223_v50 = vpop.f32.mrf.mxu1  ;;  %2445 = vmatmul.bf16.gmra.mxu2 %v12219_v51 }
 0x1c3   : > { %vm2929_vm3 = vcmp.gt.f32.partialorder %v2297_v42, 0.0  ;;  %v2993_v45 = vmul.f32 0.2, %v2297_v42  ;;  %2676 = vmatpush.bf16.msra.mxu3 %v9217_v37 }
 0x1c4   : > { %v12544_v47 = vadd.f32 %v2223_v50, %v2175_v46 }
 0x1c5   : > { %2494 = vmatmul.bf16.gmra.mxu3 %v12221_v52  ;;  %v3057_v7 = vsel %vm2929_vm3, %v2297_v42, %v2993_v45  ;;  %v2250_v10 = vpop.f32.mrf.mxu2 }
 0x1c6   : > { %v12558_v30 = vpack.c.bf16 %v3057_v7, %v3053_v53  ;;  %v2251_v22 = vadd.f32 %v2250_v10, %v12333_v57 }
 0x1c8   : > { %14784 = vst [vmem:[#allocation12_spill] sm:$0xff] %v12558_v30  ;;  %v2299_v38 = vpop.f32.mrf.mxu3 }
 0x1c9   : > { %v2300_v24 = vadd.f32 %v2299_v38, %v2251_v22  ;;  %v2177_v46 = vpop.f32.mrf.mxu0  ;;  %v9200_v22 = vld [vmem:[%s14718_s4 + $0x348] sm:$0xf] }
 0x1ca   : > { %v2178_v50 = vadd.f32 %v2177_v46, %v12255_v34  ;;  %v2226_v59 = vpop.f32.mrf.mxu1 }
 0x1cb   : > { %v2997_v57 = vmul.f32 0.2, %v2300_v24  ;;  %vm2933_vm4 = vcmp.gt.f32.partialorder %v2300_v24, 0.0 }
 0x1cc   : > { %v12562_v2 = vadd.f32 %v2226_v59, %v2178_v50  ;;  %2372 = vmatmul.bf16.gmra.mxu0 %v12058_v19  ;;  %v10659_v50 = vld [vmem:[%s14718_s4 + $0x354] sm:$0xf0] }
 0x1cd   : > { %2421 = vmatmul.bf16.gmra.mxu1 %v12060_v20  ;;  %v2252_v42 = vpop.f32.mrf.mxu2 }
 0x1ce   : > { %v2253_v45 = vadd.f32 %v2252_v42, %v12345_v33  ;;  %v9072_v33 = vld [vmem:[%s14718_s4 + $0x248] sm:$0xf] }
 0x1cf   : > { %v9073_v46 = vor.u32 %v10627_v27, %v9072_v33 }
 0x1d0   : > { %v2301_v21 = vpop.f32.mrf.mxu3 }
 0x1d1   : > { %v2302_v62 = vadd.f32 %v2301_v21, %v2253_v45  ;;  %v2179_v1 = vpop.f32.mrf.mxu0  ;;  %v12588_v21 = vperm.slane %v12252_v9, 1  ;;  %2628 = vmatpush.bf16.msra.mxu2 %v9073_v46 }
 0x1d2   : > { %v2180_v7 = vadd.f32 %v2179_v1, %v12255_v34  ;;  %v2228_v10 = vpop.f32.mrf.mxu1  ;;  %2450 = vmatmul.bf16.gmra.mxu2 %v12243_v29  ;;  %v3061_v34 = vsel %vm2933_vm4, %v2300_v24, %v2997_v57  ;;  %v9201_v1 = vor.u32 %v10659_v50, %v9200_v22  ;;  %v10623_v50 = vld [vmem:[%s14718_s4 + $0x234] sm:$0xf0] }
 0x1d3   : > { %vm2937_vm5 = vcmp.gt.f32.partialorder %v2302_v62, 0.0  ;;  %v3001_v53 = vmul.f32 0.2, %v2302_v62 }
 0x1d4   : > { %v12570_v14 = vadd.f32 %v2228_v10, %v2180_v7  ;;  %2677 = vmatpush.bf16.msra.mxu3 %v9201_v1 }
 0x1d5   : > { %2499 = vmatmul.bf16.gmra.mxu3 %v12245_v31  ;;  %v3065_v38 = vsel %vm2937_vm5, %v2302_v62, %v3001_v53  ;;  %v2255_v37 = vpop.f32.mrf.mxu2 }
 0x1d6   : > { %v12584_v59 = vpack.c.bf16 %v3065_v38, %v3061_v34  ;;  %v2256_v42 = vadd.f32 %v2255_v37, %v12369_v17 }
 0x1d8   : > { %14785 = vst [vmem:[#allocation13_spill] sm:$0xff] %v12584_v59  ;;  %v2304_v45 = vpop.f32.mrf.mxu3 }
 0x1d9   : > { %v2305_v7 = vadd.f32 %v2304_v45, %v2256_v42  ;;  %v2338_v24 = vpop.f32.mrf.mxu0  ;;  %v9184_v42 = vld [vmem:[%s14718_s4 + $0x328] sm:$0xf] }
 0x1da   : > { %v2339_v57 = vadd.f32 %v2338_v24, %v12588_v21  ;;  %v2387_v62 = vpop.f32.mrf.mxu1 }
 0x1db   : > { %v3005_v9 = vmul.f32 0.2, %v2305_v7  ;;  %vm2941_vm6 = vcmp.gt.f32.partialorder %v2305_v7, 0.0 }
 0x1dc   : > { %v12591_v53 = vadd.f32 %v2387_v62, %v2339_v57  ;;  %2533 = vmatmul.bf16.vlgmr.msrb.gmra.mxu0 %v11936_v35  ;;  %v10655_v62 = vld [vmem:[%s14718_s4 + $0x334] sm:$0xf0] }
 0x1dd   : > { %2582 = vmatmul.bf16.vlgmr.msrb.gmra.mxu1 %v11938_v40  ;;  %v2257_v10 = vpop.f32.mrf.mxu2  ;;  %v3069_v45 = vsel %vm2941_vm6, %v2305_v7, %v3005_v9 }
 0x1de   : > { %v2258_v17 = vadd.f32 %v2257_v10, %v12388_v48  ;;  %v9056_v48 = vld [vmem:[%s14718_s4 + $0x228] sm:$0xf] }
 0x1df   : > { %v9057_v57 = vor.u32 %v10623_v50, %v9056_v48 }
 0x1e0   : > { %v2306_v33 = vpop.f32.mrf.mxu3 }
 0x1e1   : > { %v2307_v27 = vadd.f32 %v2306_v33, %v2258_v17  ;;  %v2340_v22 = vpop.f32.mrf.mxu0  ;;  %2629 = vmatpush.bf16.msra.mxu2 %v9057_v57  ;;  %v10619_v57 = vld [vmem:[%s14718_s4 + $0x214] sm:$0xf0] }
 0x1e2   : > { %v2341_v38 = vadd.f32 %v2340_v22, %v12588_v21  ;;  %v2389_v37 = vpop.f32.mrf.mxu1  ;;  %2455 = vmatmul.bf16.gmra.mxu2 %v12278_v11  ;;  %v9185_v22 = vor.u32 %v10655_v62, %v9184_v42  ;;  %v9168_v62 = vld [vmem:[%s14718_s4 + $0x308] sm:$0xf] }
 0x1e3   : > { %vm2945_vm7 = vcmp.gt.f32.partialorder %v2307_v27, 0.0  ;;  %v3009_v34 = vmul.f32 0.2, %v2307_v27 }
 0x1e4   : > { %v12599_v46 = vadd.f32 %v2389_v37, %v2341_v38  ;;  %2678 = vmatpush.bf16.msra.mxu3 %v9185_v22 }
 0x1e5   : > { %2504 = vmatmul.bf16.gmra.mxu3 %v12280_v13  ;;  %v3073_v1 = vsel %vm2945_vm7, %v2307_v27, %v3009_v34  ;;  %v2260_v24 = vpop.f32.mrf.mxu2 }
 0x1e6   : > { %v12613_v10 = vpack.c.bf16 %v3073_v1, %v3069_v45  ;;  %v2261_v17 = vadd.f32 %v2260_v24, %v12415_v25 }
 0x1e8   : > { %14786 = vst [vmem:[#allocation14_spill] sm:$0xff] %v12613_v10  ;;  %v2309_v33 = vpop.f32.mrf.mxu3 }
 0x1e9   : > { %v2310_v38 = vadd.f32 %v2309_v33, %v2261_v17  ;;  %v2343_v37 = vpop.f32.mrf.mxu0 }
 0x1ea   : > { %v2344_v59 = vadd.f32 %v2343_v37, %v12588_v21  ;;  %v2392_v7 = vpop.f32.mrf.mxu1 }
 0x1eb   : > { %v3013_v25 = vmul.f32 0.2, %v2310_v38  ;;  %vm2949_vm8 = vcmp.gt.f32.partialorder %v2310_v38, 0.0 }
 0x1ec   : > { %v12617_v9 = vadd.f32 %v2392_v7, %v2344_v59  ;;  %2538 = vmatmul.bf16.gmra.mxu0 %v11968_v18  ;;  %v10651_v7 = vld [vmem:[%s14718_s4 + $0x314] sm:$0xf0] }
 0x1ed   : > { %2587 = vmatmul.bf16.gmra.mxu1 %v11970_v23  ;;  %v2262_v27 = vpop.f32.mrf.mxu2  ;;  %v3077_v17 = vsel %vm2949_vm8, %v2310_v38, %v3013_v25 }
 0x1ee   : > { %v2263_v34 = vadd.f32 %v2262_v27, %v12431_v55  ;;  %v9040_v55 = vld [vmem:[%s14718_s4 + $0x208] sm:$0xf] }
 0x1ef   : > { %v9041_v37 = vor.u32 %v10619_v57, %v9040_v55 }
 0x1f0   : > { %v2311_v48 = vpop.f32.mrf.mxu3 }
 0x1f1   : > { %v2312_v50 = vadd.f32 %v2311_v48, %v2263_v34  ;;  %v2345_v42 = vpop.f32.mrf.mxu0  ;;  %2630 = vmatpush.bf16.msra.mxu2 %v9041_v37  ;;  %v9154_v37 = vld [vmem:[%s14718_s4 + $0x2f8] sm:$0xf0] }
 0x1f2   : > { %v2346_v1 = vadd.f32 %v2345_v42, %v12588_v21  ;;  %v2394_v24 = vpop.f32.mrf.mxu1  ;;  %2460 = vmatmul.bf16.gmra.mxu2 %v12308_v8  ;;  %v9169_v42 = vor.u32 %v10651_v7, %v9168_v62  ;;  %v10581_v7 = vld [vmem:[%s14718_s4 + $0xec] sm:$0xf] }
 0x1f3   : > { %vm2953_vm9 = vcmp.gt.f32.partialorder %v2312_v50, 0.0  ;;  %v3017_v45 = vmul.f32 0.2, %v2312_v50 }
 0x1f4   : > { %v12625_v59 = vadd.f32 %v2394_v24, %v2346_v1  ;;  %2679 = vmatpush.bf16.msra.mxu3 %v9169_v42 }
 0x1f5   : > { %2509 = vmatmul.bf16.gmra.mxu3 %v12310_v54  ;;  %v3081_v33 = vsel %vm2953_vm9, %v2312_v50, %v3017_v45  ;;  %v2265_v22 = vpop.f32.mrf.mxu2 }
 0x1f6   : > { %v12639_v27 = vpack.c.bf16 %v3081_v33, %v3077_v17  ;;  %v2266_v34 = vadd.f32 %v2265_v22, %v12471_v6 }
 0x1f8   : > { %14787 = vst [vmem:[#allocation15_spill] sm:$0xff] %v12639_v27  ;;  %v2314_v48 = vpop.f32.mrf.mxu3 }
 0x1f9   : > { %v2315_v1 = vadd.f32 %v2314_v48, %v2266_v34  ;;  %v2348_v24 = vpop.f32.mrf.mxu0 }
 0x1fa   : > { %v2349_v10 = vadd.f32 %v2348_v24, %v12588_v21  ;;  %v2397_v38 = vpop.f32.mrf.mxu1 }
 0x1fb   : > { %v3021_v6 = vmul.f32 0.2, %v2315_v1  ;;  %vm2957_vm10 = vcmp.gt.f32.partialorder %v2315_v1, 0.0 }
 0x1fc   : > { %v12643_v25 = vadd.f32 %v2397_v38, %v2349_v10  ;;  %2543 = vmatmul.bf16.gmra.mxu0 %v12006_v5  ;;  %v8898_v38 = vld [vmem:[%s14718_s4 + $0xf8] sm:$0xf0] }
 0x1fd   : > { %2592 = vmatmul.bf16.gmra.mxu1 %v12008_v26  ;;  %v2267_v50 = vpop.f32.mrf.mxu2  ;;  %v3085_v34 = vsel %vm2957_vm10, %v2315_v1, %v3021_v6  ;;  %v8901_v6 = vor.u32 %v10581_v7, %v8898_v38 }
 0x1fe   : > { %v2268_v45 = vadd.f32 %v2267_v50, %v12503_v15  ;;  %v10645_v15 = vld [vmem:[%s14718_s4 + $0x2ec] sm:$0xf] }
 0x1ff   : > { %v9157_v24 = vor.u32 %v10645_v15, %v9154_v37  ;;  %v10677_v50 = vld [vmem:[%s14718_s4 + $0x3ec] sm:$0xf]  ;;  %2721 = vmatpush.bf16.msra.mxu0 %v8901_v6 }
 0x200   : > { %v2316_v55 = vpop.f32.mrf.mxu3 }
 0x201   : > { %v2317_v57 = vadd.f32 %v2316_v55, %v2268_v45  ;;  %v2350_v62 = vpop.f32.mrf.mxu0  ;;  %v9282_v45 = vld [vmem:[%s14718_s4 + $0x3f8] sm:$0xf0]  ;;  %2819 = vmatpush.bf16.msrb.mxu2 %v9157_v24 }
 0x202   : > { %v2351_v33 = vadd.f32 %v2350_v62, %v12588_v21  ;;  %v2399_v22 = vpop.f32.mrf.mxu1  ;;  %2465 = vmatmul.bf16.gmra.mxu2 %v12338_v12 }
 0x203   : > { %vm2961_vm11 = vcmp.gt.f32.partialorder %v2317_v57, 0.0  ;;  %v3025_v17 = vmul.f32 0.2, %v2317_v57 }
 0x204   : > { %v12651_v10 = vadd.f32 %v2399_v22, %v2351_v33 }
 0x205   : > { %2514 = vmatmul.bf16.gmra.mxu3 %v12340_v16  ;;  %v3089_v48 = vsel %vm2961_vm11, %v2317_v57, %v3025_v17  ;;  %v2270_v42 = vpop.f32.mrf.mxu2  ;;  %v9285_v57 = vor.u32 %v10677_v50, %v9282_v45 }
 0x206   : > { %v12671_v55 = vpack.c.bf16 %v3089_v48, %v3085_v34  ;;  %v2271_v62 = vadd.f32 %v2270_v42, %v12536_v32  ;;  %v10613_v34 = vld [vmem:[%s14718_s4 + $0x1ec] sm:$0xf]  ;;  %v9026_v32 = vld [vmem:[%s14718_s4 + $0x1f8] sm:$0xf0] }
 0x207   : > { %2868 = vmatpush.bf16.msrb.mxu3 %v9285_v57  ;;  %v9029_v48 = vor.u32 %v10613_v34, %v9026_v32  ;;  %v9138_v34 = vld [vmem:[%s14718_s4 + $0x2d8] sm:$0xf0]  ;;  %v10577_v32 = vld [vmem:[%s14718_s4 + $0xcc] sm:$0xf] }
 0x208   : > { %14788 = vst [vmem:[#allocation16_spill] sm:$0xff] %v12671_v55  ;;  %v2319_v1 = vpop.f32.mrf.mxu3 }
 0x209   : > { %v2320_v17 = vadd.f32 %v2319_v1, %v2271_v62  ;;  %v2353_v33 = vpop.f32.mrf.mxu0  ;;  %2770 = vmatpush.bf16.msra.mxu1 %v9029_v48 }
 0x20a   : > { %v2354_v22 = vadd.f32 %v2353_v33, %v12588_v21  ;;  %v2402_v15 = vpop.f32.mrf.mxu1 }
 0x20b   : > { %v3029_v38 = vmul.f32 0.2, %v2320_v17  ;;  %vm2965_vm12 = vcmp.gt.f32.partialorder %v2320_v17, 0.0 }
 0x20c   : > { %v12675_v37 = vadd.f32 %v2402_v15, %v2354_v22  ;;  %2548 = vmatmul.bf16.gmra.mxu0 %v12038_v56  ;;  %v10641_v15 = vld [vmem:[%s14718_s4 + $0x2cc] sm:$0xf] }
 0x20d   : > { %2597 = vmatmul.bf16.gmra.mxu1 %v12049_v4  ;;  %v2272_v7 = vpop.f32.mrf.mxu2  ;;  %v3093_v33 = vsel %vm2965_vm12, %v2320_v17, %v3029_v38  ;;  %v9141_v17 = vor.u32 %v10641_v15, %v9138_v34  ;;  %v10673_v38 = vld [vmem:[%s14718_s4 + $0x3cc] sm:$0xf] }
 0x20e   : > { %v2273_v42 = vadd.f32 %v2272_v7, %v12544_v47 }
 0x20f   : > { %2820 = vmatpush.bf16.msrb.mxu2 %v9141_v17 }
 0x210   : > { %v2321_v24 = vpop.f32.mrf.mxu3 }
 0x211   : > { %v2322_v50 = vadd.f32 %v2321_v24, %v2273_v42  ;;  %v2355_v45 = vpop.f32.mrf.mxu0  ;;  %v8882_v24 = vld [vmem:[%s14718_s4 + $0xd8] sm:$0xf0] }
 0x212   : > { %v2356_v1 = vadd.f32 %v2355_v45, %v12588_v21  ;;  %v2404_v6 = vpop.f32.mrf.mxu1  ;;  %2470 = vmatmul.bf16.gmra.mxu2 %v12381_v39  ;;  %v8885_v45 = vor.u32 %v10577_v32, %v8882_v24 }
 0x213   : > { %vm2969_vm13 = vcmp.gt.f32.partialorder %v2322_v50, 0.0  ;;  %v3033_v62 = vmul.f32 0.2, %v2322_v50 }
 0x214   : > { %v12689_v57 = vadd.f32 %v2404_v6, %v2356_v1  ;;  %2722 = vmatpush.bf16.msra.mxu0 %v8885_v45 }
 0x215   : > { %2519 = vmatmul.bf16.gmra.mxu3 %v12383_v43  ;;  %v3097_v22 = vsel %vm2969_vm13, %v2322_v50, %v3033_v62  ;;  %v2275_v47 = vpop.f32.mrf.mxu2  ;;  %v9266_v50 = vld [vmem:[%s14718_s4 + $0x3d8] sm:$0xf0] }
 0x216   : > { %v12700_v7 = vpack.c.bf16 %v3097_v22, %v3093_v33  ;;  %v2276_v48 = vadd.f32 %v2275_v47, %v12562_v2  ;;  %v9269_v62 = vor.u32 %v10673_v38, %v9266_v50  ;;  %v10609_v22 = vld [vmem:[%s14718_s4 + $0x1cc] sm:$0xf]  ;;  %v9010_v47 = vld [vmem:[%s14718_s4 + $0x1d8] sm:$0xf0] }
 0x217   : > { %v9013_v34 = vor.u32 %v10609_v22, %v9010_v47  ;;  %v10637_v22 = vld [vmem:[%s14718_s4 + $0x2ac] sm:$0xf]  ;;  %v9122_v47 = vld [vmem:[%s14718_s4 + $0x2b8] sm:$0xf0] }
 0x218   : > { %14789 = vst [vmem:[#allocation17_spill] sm:$0xff] %v12700_v7  ;;  %v2324_v42 = vpop.f32.mrf.mxu3  ;;  %2869 = vmatpush.bf16.msrb.mxu3 %v9269_v62  ;;  %v9125_v7 = vor.u32 %v10637_v22, %v9122_v47 }
 0x219   : > { %v2325_v1 = vadd.f32 %v2324_v42, %v2276_v48  ;;  %v2358_v6 = vpop.f32.mrf.mxu0  ;;  %2771 = vmatpush.bf16.msra.mxu1 %v9013_v34 }
 0x21a   : > { %v2359_v2 = vadd.f32 %v2358_v6, %v12588_v21  ;;  %v2407_v33 = vpop.f32.mrf.mxu1  ;;  %v10573_v6 = vld [vmem:[%s14718_s4 + $0xac] sm:$0xf]  ;;  %2821 = vmatpush.bf16.msrb.mxu2 %v9125_v7  ;;  %v8978_v7 = vld [vmem:[%s14718_s4 + $0x198] sm:$0xf0] }
 0x21b   : > { %v3037_v17 = vmul.f32 0.2, %v2325_v1  ;;  %vm2973_vm14 = vcmp.gt.f32.partialorder %v2325_v1, 0.0 }
 0x21c   : > { %v12719_v15 = vadd.f32 %v2407_v33, %v2359_v2  ;;  %2553 = vmatmul.bf16.gmra.mxu0 %v11952_v61  ;;  %v10605_v2 = vld [vmem:[%s14718_s4 + $0x1ac] sm:$0xf] }
 0x21d   : > { %2602 = vmatmul.bf16.gmra.mxu1 %v11956_v0  ;;  %v2277_v32 = vpop.f32.mrf.mxu2 }
 0x21e   : > { %v2278_v48 = vadd.f32 %v2277_v32, %v12570_v14  ;;  %v8866_v14 = vld [vmem:[%s14718_s4 + $0xb8] sm:$0xf0]  ;;  %v10669_v32 = vld [vmem:[%s14718_s4 + $0x3ac] sm:$0xf] }
 0x21f   : > { %v8869_v34 = vor.u32 %v10573_v6, %v8866_v14 }
 0x220   : > { %v2326_v42 = vpop.f32.mrf.mxu3 }
 0x221   : > { %v2327_v24 = vadd.f32 %v2326_v42, %v2278_v48  ;;  %v2360_v38 = vpop.f32.mrf.mxu0  ;;  %v3101_v48 = vsel %vm2973_vm14, %v2325_v1, %v3037_v17  ;;  %2723 = vmatpush.bf16.msra.mxu0 %v8869_v34  ;;  %v10569_v1 = vld [vmem:[%s14718_s4 + $0x8c] sm:$0xf]  ;;  %v8850_v17 = vld [vmem:[%s14718_s4 + $0x98] sm:$0xf0] }
 0x222   : > { %v2361_v45 = vadd.f32 %v2360_v38, %v12588_v21  ;;  %v2409_v62 = vpop.f32.mrf.mxu1  ;;  %2631 = vmatmul.bf16.vlgmr.msra.gmra.mxu2 %v12098_v49 }
 0x223   : > { %vm2977_vm15 = vcmp.gt.f32.partialorder %v2327_v24, 0.0  ;;  %v3041_v50 = vmul.f32 0.2, %v2327_v24 }
 0x224   : > { %v12736_v33 = vadd.f32 %v2409_v62, %v2361_v45  ;;  %v9250_v45 = vld [vmem:[%s14718_s4 + $0x3b8] sm:$0xf0] }
 0x225   : > { %2680 = vmatmul.bf16.vlgmr.msra.gmra.mxu3 %v12100_v63  ;;  %v3105_v42 = vsel %vm2977_vm15, %v2327_v24, %v3041_v50  ;;  %v2436_v38 = vpop.f32.mrf.mxu2  ;;  %v8994_v62 = vld [vmem:[%s14718_s4 + $0x1b8] sm:$0xf0]  ;;  %v9253_v27 = vor.u32 %v10669_v32, %v9250_v45  ;;  %v10601_v24 = vld [vmem:[%s14718_s4 + $0x18c] sm:$0xf] }
 0x226   : > { %v12754_v55 = vpack.c.bf16 %v3105_v42, %v3101_v48  ;;  %v2437_v6 = vadd.f32 %v2436_v38, %v12591_v53  ;;  %v8997_v30 = vor.u32 %v10605_v2, %v8994_v62  ;;  %v8853_v53 = vor.u32 %v10569_v1, %v8850_v17  ;;  %v10565_v32 = vld [vmem:[%s14718_s4 + $0x6c] sm:$0xf]  ;;  %v8962_v38 = vld [vmem:[%s14718_s4 + $0x178] sm:$0xf0] }
 0x227   : > { %2870 = vmatpush.bf16.msrb.mxu3 %v9253_v27  ;;  %v8981_v22 = vor.u32 %v10601_v24, %v8978_v7  ;;  %v8834_v27 = vld [vmem:[%s14718_s4 + $0x78] sm:$0xf0]  ;;  %v10561_v1 = vld [vmem:[%s14718_s4 + $0x4c] sm:$0xf] }
 0x228   : > { %14790 = vst [vmem:[#allocation18_spill] sm:$0xff] %v12754_v55  ;;  %v2485_v14 = vpop.f32.mrf.mxu3  ;;  %2772 = vmatpush.bf16.msra.mxu1 %v8997_v30  ;;  %2724 = vmatpush.bf16.msra.mxu0 %v8853_v53  ;;  %v10597_v30 = vld [vmem:[%s14718_s4 + $0x16c] sm:$0xf]  ;;  %v8837_v42 = vor.u32 %v10565_v32, %v8834_v27  ;;  %v8818_v17 = vld [vmem:[%s14718_s4 + $0x58] sm:$0xf0] }
 0x229   : > { %v2486_v50 = vadd.f32 %v2485_v14, %v2437_v6  ;;  %v2363_v2 = vpop.f32.mrf.mxu0  ;;  %v8965_v62 = vor.u32 %v10597_v30, %v8962_v38  ;;  %v10593_v24 = vld [vmem:[%s14718_s4 + $0x14c] sm:$0xf] }
 0x22a   : > { %v2364_v47 = vadd.f32 %v2363_v2, %v12588_v21  ;;  %v2412_v34 = vpop.f32.mrf.mxu1  ;;  %v8821_v2 = vor.u32 %v10561_v1, %v8818_v17  ;;  %v10557_v30 = vld [vmem:[%s14718_s4 + $0x2c] sm:$0xf]  ;;  %v9106_v1 = vld [vmem:[%s14718_s4 + $0x298] sm:$0xf0] }
 0x22b   : > { %v2982_v53 = vmul.f32 0.2, %v2486_v50  ;;  %vm2918_vm0 = vcmp.gt.f32.partialorder %v2486_v50, 0.0  ;;  %v10589_v38 = vld [vmem:[%s14718_s4 + $0x12c] sm:$0xf] }
 0x22c   : > { %v12779_v48 = vadd.f32 %v2412_v34, %v2364_v47  ;;  %2558 = vmatmul.bf16.gmra.mxu0 %v11984_v41  ;;  %2773 = vmatpush.bf16.msra.mxu1 %v8981_v22  ;;  %v10665_v17 = vld [vmem:[%s14718_s4 + $0x38c] sm:$0xf] }
 0x22d   : > { %2607 = vmatmul.bf16.gmra.mxu1 %v11988_v44  ;;  %v2438_v45 = vpop.f32.mrf.mxu2  ;;  %2725 = vmatpush.bf16.msra.mxu0 %v8837_v42  ;;  %v8802_v42 = vld [vmem:[%s14718_s4 + $0x38] sm:$0xf0] }
 0x22e   : > { %v2439_v6 = vadd.f32 %v2438_v45, %v12599_v46  ;;  %v8946_v46 = vld [vmem:[%s14718_s4 + $0x158] sm:$0xf0]  ;;  %v3046_v45 = vsel %vm2918_vm0, %v2486_v50, %v2982_v53 }
 0x22f   : > { %v8949_v47 = vor.u32 %v10593_v24, %v8946_v46  ;;  %v8805_v24 = vor.u32 %v10557_v30, %v8802_v42  ;;  %v8930_v46 = vld [vmem:[%s14718_s4 + $0x138] sm:$0xf0]  ;;  %v10585_v42 = vld [vmem:[%s14718_s4 + $0x10c] sm:$0xf] }
 0x230   : > { %v2487_v14 = vpop.f32.mrf.mxu3  ;;  %2774 = vmatpush.bf16.msra.mxu1 %v8965_v62  ;;  %v8786_v30 = vld [vmem:[%s14718_s4 + $0x18] sm:$0xf0] }
 0x231   : > { %v2488_v7 = vadd.f32 %v2487_v14, %v2439_v6  ;;  %v2365_v22 = vpop.f32.mrf.mxu0  ;;  %2726 = vmatpush.bf16.msra.mxu0 %v8821_v2  ;;  %v10633_v14 = vld [vmem:[%s14718_s4 + $0x28c] sm:$0xf] }
 0x232   : > { %v2366_v32 = vadd.f32 %v2365_v22, %v12588_v21  ;;  %v2414_v27 = vpop.f32.mrf.mxu1  ;;  %2636 = vmatmul.bf16.gmra.mxu2 %v12168_v58  ;;  %v9109_v53 = vor.u32 %v10633_v14, %v9106_v1 }
 0x233   : > { %vm2922_vm1 = vcmp.gt.f32.partialorder %v2488_v7, 0.0  ;;  %v2986_v34 = vmul.f32 0.2, %v2488_v7 }
 0x234   : > { %v12811_v6 = vadd.f32 %v2414_v27, %v2366_v32  ;;  %2775 = vmatpush.bf16.msra.mxu1 %v8949_v47  ;;  %v8933_v32 = vor.u32 %v10589_v38, %v8930_v46  ;;  %2822 = vmatpush.bf16.msrb.mxu2 %v9109_v53  ;;  %v10553_v27 = vld [vmem:[%s14718_s4 + $0xc] sm:$0xf]  ;;  %v8914_v38 = vld [vmem:[%s14718_s4 + $0x118] sm:$0xf0] }
 0x235   : > { %2685 = vmatmul.bf16.gmra.mxu3 %v12173_v3  ;;  %v3050_v62 = vsel %vm2922_vm1, %v2488_v7, %v2986_v34  ;;  %v2441_v50 = vpop.f32.mrf.mxu2  ;;  %v9234_v7 = vld [vmem:[%s14718_s4 + $0x398] sm:$0xf0]  ;;  %2727 = vmatpush.bf16.msra.mxu0 %v8805_v24  ;;  %v8917_v14 = vor.u32 %v10585_v42, %v8914_v38 }
 0x236   : > { %v12822_v2 = vpack.c.bf16 %v3050_v62, %v3046_v45  ;;  %v2442_v22 = vadd.f32 %v2441_v50, %v12617_v9  ;;  %v9237_v34 = vor.u32 %v10665_v17, %v9234_v7  ;;  %v8789_v9 = vor.u32 %v10553_v27, %v8786_v30  ;;  %v9090_v42 = vld [vmem:[%s14718_s4 + $0x278] sm:$0xf0] }
 0x238   : > { %v2490_v47 = vpop.f32.mrf.mxu3  ;;  %2871 = vmatpush.bf16.msrb.mxu3 %v9237_v34  ;;  %2776 = vmatpush.bf16.msra.mxu1 %v8933_v32 }
 0x239   : > { %v2491_v45 = vadd.f32 %v2490_v47, %v2442_v22  ;;  %v2368_v62 = vpop.f32.mrf.mxu0  ;;  %2728 = vmatpush.bf16.msra.mxu0 %v8789_v9  ;;  %v10661_v9 = vld [vmem:[%s14718_s4 + $0x36c] sm:$0xf] }
 0x23a   : > { %v2369_v1 = vadd.f32 %v2368_v62, %v12588_v21  ;;  %v2417_v17 = vpop.f32.mrf.mxu1 }
 0x23b   : > { %v2990_v46 = vmul.f32 0.2, %v2491_v45  ;;  %vm2926_vm2 = vcmp.gt.f32.partialorder %v2491_v45, 0.0 }
 0x23c   : > { %v12844_v24 = vadd.f32 %v2417_v17, %v2369_v1  ;;  %2563 = vmatmul.bf16.gmra.mxu0 %v12016_v28  ;;  %2777 = vmatpush.bf16.msra.mxu1 %v8917_v14  ;;  %v9218_v17 = vld [vmem:[%s14718_s4 + $0x378] sm:$0xf0] }
 0x23d   : > { %2612 = vmatmul.bf16.gmra.mxu1 %v12020_v60  ;;  %v2443_v50 = vpop.f32.mrf.mxu2  ;;  %v3054_v38 = vsel %vm2926_vm2, %v2491_v45, %v2990_v46 }
 0x23e   : > { %v2444_v53 = vadd.f32 %v2443_v50, %v12625_v59  ;;  %v10629_v59 = vld [vmem:[%s14718_s4 + $0x26c] sm:$0xf] }
 0x23f   : > { %v9093_v1 = vor.u32 %v10629_v59, %v9090_v42 }
 0x240   : > { %v2492_v7 = vpop.f32.mrf.mxu3 }
 0x241   : > { %v2493_v22 = vadd.f32 %v2492_v7, %v2444_v53  ;;  %v2370_v47 = vpop.f32.mrf.mxu0  ;;  %2823 = vmatpush.bf16.msrb.mxu2 %v9093_v1  ;;  %v9074_v1 = vld [vmem:[%s14718_s4 + $0x258] sm:$0xf0] }
 0x242   : > { %v2371_v32 = vadd.f32 %v2370_v47, %v12588_v21  ;;  %v2419_v27 = vpop.f32.mrf.mxu1  ;;  %2641 = vmatmul.bf16.gmra.mxu2 %v12219_v51  ;;  %v9221_v47 = vor.u32 %v10661_v9, %v9218_v17  ;;  %v10657_v17 = vld [vmem:[%s14718_s4 + $0x34c] sm:$0xf] }
 0x243   : > { %vm2930_vm3 = vcmp.gt.f32.partialorder %v2493_v22, 0.0  ;;  %v2994_v34 = vmul.f32 0.2, %v2493_v22 }
 0x244   : > { %v12852_v30 = vadd.f32 %v2419_v27, %v2371_v32  ;;  %2872 = vmatpush.bf16.msrb.mxu3 %v9221_v47 }
 0x245   : > { %2690 = vmatmul.bf16.gmra.mxu3 %v12221_v52  ;;  %v3058_v62 = vsel %vm2930_vm3, %v2493_v22, %v2994_v34  ;;  %v2446_v14 = vpop.f32.mrf.mxu2 }
 0x246   : > { %v12866_v50 = vpack.c.bf16 %v3058_v62, %v3054_v38  ;;  %v2447_v53 = vadd.f32 %v2446_v14, %v12643_v25 }
 0x248   : > { %v2495_v7 = vpop.f32.mrf.mxu3 }
 0x249   : > { %v2496_v32 = vadd.f32 %v2495_v7, %v2447_v53  ;;  %v2373_v27 = vpop.f32.mrf.mxu0 }
 0x24a   : > { %v2374_v55 = vadd.f32 %v2373_v27, %v12588_v21  ;;  %v2422_v45 = vpop.f32.mrf.mxu1  ;;  %v9202_v27 = vld [vmem:[%s14718_s4 + $0x358] sm:$0xf0] }
 0x24b   : > { %v2998_v25 = vmul.f32 0.2, %v2496_v32  ;;  %vm2934_vm4 = vcmp.gt.f32.partialorder %v2496_v32, 0.0 }
 0x24c   : > { %v12870_v46 = vadd.f32 %v2422_v45, %v2374_v55  ;;  %2568 = vmatmul.bf16.gmra.mxu0 %v12058_v19 }
 0x24d   : > { %2617 = vmatmul.bf16.gmra.mxu1 %v12060_v20  ;;  %v2448_v22 = vpop.f32.mrf.mxu2 }
 0x24e   : > { %v2449_v34 = vadd.f32 %v2448_v22, %v12651_v10  ;;  %v10625_v10 = vld [vmem:[%s14718_s4 + $0x24c] sm:$0xf] }
 0x24f   : > { %v9077_v47 = vor.u32 %v10625_v10, %v9074_v1 }
 0x250   : > { %v2497_v59 = vpop.f32.mrf.mxu3 }
 0x251   : > { %v2498_v42 = vadd.f32 %v2497_v59, %v2449_v34  ;;  %v2375_v9 = vpop.f32.mrf.mxu0  ;;  %v12898_v59 = vld [vmem:[%s14719_s5] sm:$0xf]  ;;  %2824 = vmatpush.bf16.msrb.mxu2 %v9077_v47 }
 0x252   : > { %v2376_v62 = vadd.f32 %v2375_v9, %v12588_v21  ;;  %v2424_v14 = vpop.f32.mrf.mxu1  ;;  %2646 = vmatmul.bf16.gmra.mxu2 %v12243_v29  ;;  %v3062_v21 = vsel %vm2934_vm4, %v2496_v32, %v2998_v25  ;;  %14791 = vst [vmem:[#allocation19_spill] sm:$0xff] %v12898_v59  ;;  %v12901_v9 = vperm.slane %v12898_v59, 2  ;;  %v9205_v32 = vor.u32 %v10657_v17, %v9202_v27 }
 0x253   : > { %vm2938_vm5 = vcmp.gt.f32.partialorder %v2498_v42, 0.0  ;;  %v3002_v38 = vmul.f32 0.2, %v2498_v42 }
 0x254   : > { %v12878_v55 = vadd.f32 %v2424_v14, %v2376_v62  ;;  %2873 = vmatpush.bf16.msrb.mxu3 %v9205_v32 }
 0x255   : > { %2695 = vmatmul.bf16.gmra.mxu3 %v12245_v31  ;;  %v3066_v53 = vsel %vm2938_vm5, %v2498_v42, %v3002_v38  ;;  %v2451_v7 = vpop.f32.mrf.mxu2 }
 0x256   : > { %v12892_v45 = vpack.c.bf16 %v3066_v53, %v3062_v21  ;;  %v2452_v22 = vadd.f32 %v2451_v7, %v12675_v37 }
 0x258   : > { %v2500_v34 = vpop.f32.mrf.mxu3 }
 0x259   : > { %v2501_v25 = vadd.f32 %v2500_v34, %v2452_v22  ;;  %v2534_v42 = vpop.f32.mrf.mxu0  ;;  %v10653_v22 = vld [vmem:[%s14718_s4 + $0x32c] sm:$0xf] }
 0x25a   : > { %v2535_v38 = vadd.f32 %v2534_v42, %v12901_v9  ;;  %v2583_v62 = vpop.f32.mrf.mxu1 }
 0x25b   : > { %v3006_v21 = vmul.f32 0.2, %v2501_v25  ;;  %vm2942_vm6 = vcmp.gt.f32.partialorder %v2501_v25, 0.0 }
 0x25c   : > { %v12904_v14 = vadd.f32 %v2583_v62, %v2535_v38  ;;  %2729 = vmatmul.bf16.vlgmr.msra.gmra.mxu0 %v11936_v35  ;;  %v9186_v62 = vld [vmem:[%s14718_s4 + $0x338] sm:$0xf0] }
 0x25d   : > { %2778 = vmatmul.bf16.vlgmr.msra.gmra.mxu1 %v11938_v40  ;;  %v2453_v37 = vpop.f32.mrf.mxu2  ;;  %v10621_v40 = vld [vmem:[%s14718_s4 + $0x22c] sm:$0xf]  ;;  %v3070_v34 = vsel %vm2942_vm6, %v2501_v25, %v3006_v21 }
 0x25e   : > { %v2454_v10 = vadd.f32 %v2453_v37, %v12689_v57  ;;  %v9058_v57 = vld [vmem:[%s14718_s4 + $0x238] sm:$0xf0] }
 0x25f   : > { %v9061_v38 = vor.u32 %v10621_v40, %v9058_v57 }
 0x260   : > { %v2502_v1 = vpop.f32.mrf.mxu3 }
 0x261   : > { %v2503_v53 = vadd.f32 %v2502_v1, %v2454_v10  ;;  %v2536_v17 = vpop.f32.mrf.mxu0  ;;  %2825 = vmatpush.bf16.msrb.mxu2 %v9061_v38 }
 0x262   : > { %v2537_v47 = vadd.f32 %v2536_v17, %v12901_v9  ;;  %v2585_v27 = vpop.f32.mrf.mxu1  ;;  %2651 = vmatmul.bf16.gmra.mxu2 %v12278_v11  ;;  %v9189_v17 = vor.u32 %v10653_v22, %v9186_v62 }
 0x263   : > { %vm2946_vm7 = vcmp.gt.f32.partialorder %v2503_v53, 0.0  ;;  %v3010_v7 = vmul.f32 0.2, %v2503_v53 }
 0x264   : > { %v12912_v35 = vadd.f32 %v2585_v27, %v2537_v47  ;;  %2874 = vmatpush.bf16.msrb.mxu3 %v9189_v17  ;;  %v9170_v17 = vld [vmem:[%s14718_s4 + $0x318] sm:$0xf0] }
 0x265   : > { %2700 = vmatmul.bf16.gmra.mxu3 %v12280_v13  ;;  %v3074_v32 = vsel %vm2946_vm7, %v2503_v53, %v3010_v7  ;;  %v2456_v42 = vpop.f32.mrf.mxu2 }
 0x266   : > { %v12926_v37 = vpack.c.bf16 %v3074_v32, %v3070_v34  ;;  %v2457_v10 = vadd.f32 %v2456_v42, %v12719_v15 }
 0x268   : > { %v2505_v1 = vpop.f32.mrf.mxu3 }
 0x269   : > { %v2506_v47 = vadd.f32 %v2505_v1, %v2457_v10  ;;  %v2539_v27 = vpop.f32.mrf.mxu0 }
 0x26a   : > { %v2540_v59 = vadd.f32 %v2539_v27, %v12901_v9  ;;  %v2588_v25 = vpop.f32.mrf.mxu1 }
 0x26b   : > { %v3014_v15 = vmul.f32 0.2, %v2506_v47  ;;  %vm2950_vm8 = vcmp.gt.f32.partialorder %v2506_v47, 0.0 }
 0x26c   : > { %v12930_v21 = vadd.f32 %v2588_v25, %v2540_v59  ;;  %2734 = vmatmul.bf16.gmra.mxu0 %v11968_v18  ;;  %v10649_v59 = vld [vmem:[%s14718_s4 + $0x30c] sm:$0xf] }
 0x26d   : > { %2783 = vmatmul.bf16.gmra.mxu1 %v11970_v23  ;;  %v2458_v53 = vpop.f32.mrf.mxu2  ;;  %v10617_v23 = vld [vmem:[%s14718_s4 + $0x20c] sm:$0xf]  ;;  %v3078_v38 = vsel %vm2950_vm8, %v2506_v47, %v3014_v15 }
 0x26e   : > { %v2459_v7 = vadd.f32 %v2458_v53, %v12736_v33  ;;  %v9042_v33 = vld [vmem:[%s14718_s4 + $0x218] sm:$0xf0] }
 0x26f   : > { %v9045_v1 = vor.u32 %v10617_v23, %v9042_v33 }
 0x270   : > { %v2507_v40 = vpop.f32.mrf.mxu3 }
 0x271   : > { %v2508_v57 = vadd.f32 %v2507_v40, %v2459_v7  ;;  %v2541_v22 = vpop.f32.mrf.mxu0  ;;  %v9173_v7 = vor.u32 %v10649_v59, %v9170_v17  ;;  %2826 = vmatpush.bf16.msrb.mxu2 %v9045_v1 }
 0x272   : > { %v2542_v32 = vadd.f32 %v2541_v22, %v12901_v9  ;;  %v2590_v42 = vpop.f32.mrf.mxu1  ;;  %2656 = vmatmul.bf16.gmra.mxu2 %v12308_v8 }
 0x273   : > { %vm2954_vm9 = vcmp.gt.f32.partialorder %v2508_v57, 0.0  ;;  %v3018_v34 = vmul.f32 0.2, %v2508_v57  ;;  %2875 = vmatpush.bf16.msrb.mxu3 %v9173_v7 }
 0x274   : > { %v12938_v18 = vadd.f32 %v2590_v42, %v2542_v32 }
 0x275   : > { %2705 = vmatmul.bf16.gmra.mxu3 %v12310_v54  ;;  %v3082_v62 = vsel %vm2954_vm9, %v2508_v57, %v3018_v34  ;;  %v2461_v10 = vpop.f32.mrf.mxu2 }
 0x276   : > { %v12952_v27 = vpack.c.bf16 %v3082_v62, %v3078_v38  ;;  %v2462_v25 = vadd.f32 %v2461_v10, %v12779_v48 }
 0x278   : > { %v2510_v53 = vpop.f32.mrf.mxu3 }
 0x279   : > { %v2511_v40 = vadd.f32 %v2510_v53, %v2462_v25  ;;  %v2544_v22 = vpop.f32.mrf.mxu0 }
 0x27a   : > { %v2545_v32 = vadd.f32 %v2544_v22, %v12901_v9  ;;  %v2593_v47 = vpop.f32.mrf.mxu1 }
 0x27b   : > { %v3022_v48 = vmul.f32 0.2, %v2511_v40  ;;  %vm2958_vm10 = vcmp.gt.f32.partialorder %v2511_v40, 0.0 }
 0x27c   : > { %v12956_v15 = vadd.f32 %v2593_v47, %v2545_v32  ;;  %2739 = vmatmul.bf16.gmra.mxu0 %v12006_v5 }
 0x27d   : > { %2788 = vmatmul.bf16.gmra.mxu1 %v12008_v26  ;;  %v2463_v57 = vpop.f32.mrf.mxu2  ;;  %v3086_v26 = vsel %vm2958_vm10, %v2511_v40, %v3022_v48 }
 0x27e   : > { %v2464_v34 = vadd.f32 %v2463_v57, %v12811_v6 }
 0x280   : > { %v2512_v42 = vpop.f32.mrf.mxu3 }
 0x281   : > { %v2513_v23 = vadd.f32 %v2512_v42, %v2464_v34  ;;  %v2546_v33 = vpop.f32.mrf.mxu0 }
 0x282   : > { %v2547_v38 = vadd.f32 %v2546_v33, %v12901_v9  ;;  %v2595_v62 = vpop.f32.mrf.mxu1  ;;  %2661 = vmatmul.bf16.gmra.mxu2 %v12338_v12 }
 0x283   : > { %vm2962_vm11 = vcmp.gt.f32.partialorder %v2513_v23, 0.0  ;;  %v3026_v59 = vmul.f32 0.2, %v2513_v23 }
 0x284   : > { %v12964_v5 = vadd.f32 %v2595_v62, %v2547_v38 }
 0x285   : > { %2710 = vmatmul.bf16.gmra.mxu3 %v12340_v16  ;;  %v3090_v10 = vsel %vm2962_vm11, %v2513_v23, %v3026_v59  ;;  %v2466_v1 = vpop.f32.mrf.mxu2 }
 0x286   : > { %v12966_v6 = vpack.c.bf16 %v3090_v10, %v3086_v26  ;;  %v2467_v17 = vadd.f32 %v2466_v1, %v12844_v24 }
 0x288   : > { %v2515_v25 = vpop.f32.mrf.mxu3 }
 0x289   : > { %v2516_v53 = vadd.f32 %v2515_v25, %v2467_v17  ;;  %v2549_v7 = vpop.f32.mrf.mxu0 }
 0x28a   : > { %v2550_v22 = vadd.f32 %v2549_v7, %v12901_v9  ;;  %v2598_v32 = vpop.f32.mrf.mxu1 }
 0x28b   : > { %v3030_v42 = vmul.f32 0.2, %v2516_v53  ;;  %vm2966_vm12 = vcmp.gt.f32.partialorder %v2516_v53, 0.0 }
 0x28c   : > { %v12970_v47 = vadd.f32 %v2598_v32, %v2550_v22  ;;  %2744 = vmatmul.bf16.gmra.mxu0 %v12038_v56  ;;  %v9472_v22 = vld [vmem:[#allocation2 + $0x170] sm:$0xf]  ;;  %v10727_v32 = vld [vmem:[#allocation2 + $0x174] sm:$0xf0] }
 0x28d   : > { %2793 = vmatmul.bf16.gmra.mxu1 %v12049_v4  ;;  %v2468_v57 = vpop.f32.mrf.mxu2  ;;  %v3094_v4 = vsel %vm2966_vm12, %v2516_v53, %v3030_v42  ;;  %v9473_v53 = vor.u32 %v10727_v32, %v9472_v22  ;;  %v10709_v22 = vld [vmem:[#allocation2 + $0xe4] sm:$0xf0] }
 0x28e   : > { %v2469_v40 = vadd.f32 %v2468_v57, %v12852_v30  ;;  %v9344_v57 = vld [vmem:[#allocation2 + $0x70] sm:$0xf] }
 0x28f   : > { %3629 = vmatpush.bf16.msra.mxu2 %v9473_v53  ;;  %v9328_v53 = vld [vmem:[#allocation2 + $0x50] sm:$0xf] }
 0x290   : > { %v2517_v34 = vpop.f32.mrf.mxu3 }
 0x291   : > { %v2518_v48 = vadd.f32 %v2517_v34, %v2469_v40  ;;  %v2551_v24 = vpop.f32.mrf.mxu0  ;;  %v10695_v40 = vld [vmem:[#allocation2 + $0x74] sm:$0xf0] }
 0x292   : > { %v2552_v33 = vadd.f32 %v2551_v24, %v12901_v9  ;;  %v2600_v59 = vpop.f32.mrf.mxu1  ;;  %2666 = vmatmul.bf16.gmra.mxu2 %v12381_v39  ;;  %v9345_v42 = vor.u32 %v10695_v40, %v9344_v57  ;;  %v10743_v24 = vld [vmem:[#allocation2 + $0x1f4] sm:$0xf0] }
 0x293   : > { %vm2970_vm13 = vcmp.gt.f32.partialorder %v2518_v48, 0.0  ;;  %v3034_v23 = vmul.f32 0.2, %v2518_v48 }
 0x294   : > { %v12978_v56 = vadd.f32 %v2600_v59, %v2552_v33  ;;  %v10711_v59 = vld [vmem:[#allocation2 + $0xf4] sm:$0xf0]  ;;  %3531 = vmatpush.bf16.msrb.mxu0 %v9345_v42 }
 0x295   : > { %2715 = vmatmul.bf16.gmra.mxu3 %v12383_v43  ;;  %v3098_v38 = vsel %vm2970_vm13, %v2518_v48, %v3034_v23  ;;  %v2471_v62 = vpop.f32.mrf.mxu2  ;;  %v9536_v48 = vld [vmem:[#allocation2 + $0x1f0] sm:$0xf]  ;;  %v10691_v42 = vld [vmem:[#allocation2 + $0x54] sm:$0xf0] }
 0x296   : > { %v12980_v30 = vpack.c.bf16 %v3098_v38, %v3094_v4  ;;  %v2472_v26 = vadd.f32 %v2471_v62, %v12870_v46  ;;  %v9408_v23 = vld [vmem:[#allocation2 + $0xf0] sm:$0xf]  ;;  %v9537_v33 = vor.u32 %v10743_v24, %v9536_v48 }
 0x297   : > { %v9409_v62 = vor.u32 %v10711_v59, %v9408_v23  ;;  %v9392_v48 = vld [vmem:[#allocation2 + $0xd0] sm:$0xf]  ;;  %v9329_v23 = vor.u32 %v10691_v42, %v9328_v53 }
 0x298   : > { %v2520_v10 = vpop.f32.mrf.mxu3  ;;  %3678 = vmatpush.bf16.msra.mxu3 %v9537_v33 }
 0x299   : > { %v2521_v1 = vadd.f32 %v2520_v10, %v2472_v26  ;;  %v2554_v17 = vpop.f32.mrf.mxu0  ;;  %v9336_v26 = vld [vmem:[#allocation2 + $0x60] sm:$0xf]  ;;  %v10693_v10 = vld [vmem:[#allocation2 + $0x64] sm:$0xf0]  ;;  %3580 = vmatpush.bf16.msrb.mxu1 %v9409_v62 }
 0x29a   : > { %v2555_v25 = vadd.f32 %v2554_v17, %v12901_v9  ;;  %v2603_v7 = vpop.f32.mrf.mxu1 }
 0x29b   : > { %v3038_v17 = vmul.f32 0.2, %v2521_v1  ;;  %vm2974_vm14 = vcmp.gt.f32.partialorder %v2521_v1, 0.0 }
 0x29c   : > { %v12984_v34 = vadd.f32 %v2603_v7, %v2555_v25  ;;  %2749 = vmatmul.bf16.gmra.mxu0 %v11952_v61  ;;  %v9400_v61 = vld [vmem:[#allocation2 + $0xe0] sm:$0xf]  ;;  %v9337_v7 = vor.u32 %v10693_v10, %v9336_v26  ;;  %v10689_v10 = vld [vmem:[#allocation2 + $0x44] sm:$0xf0] }
 0x29d   : > { %2798 = vmatmul.bf16.gmra.mxu1 %v11956_v0  ;;  %v2473_v46 = vpop.f32.mrf.mxu2  ;;  %v9401_v32 = vor.u32 %v10709_v22, %v9400_v61  ;;  %v3102_v33 = vsel %vm2974_vm14, %v2521_v1, %v3038_v17  ;;  %v9384_v22 = vld [vmem:[#allocation2 + $0xc0] sm:$0xf] }
 0x29e   : > { %v2474_v4 = vadd.f32 %v2473_v46, %v12878_v55  ;;  %3532 = vmatpush.bf16.msrb.mxu0 %v9337_v7  ;;  %v10707_v46 = vld [vmem:[#allocation2 + $0xd4] sm:$0xf0]  ;;  %v9464_v17 = vld [vmem:[#allocation2 + $0x160] sm:$0xf] }
 0x29f   : > { %3581 = vmatpush.bf16.msrb.mxu1 %v9401_v32 }
 0x2a0   : > { %v2522_v38 = vpop.f32.mrf.mxu3 }
 0x2a1   : > { %v2523_v25 = vadd.f32 %v2522_v38, %v2474_v4  ;;  %v2556_v0 = vpop.f32.mrf.mxu0  ;;  %v9393_v38 = vor.u32 %v10707_v46, %v9392_v48  ;;  %v10687_v46 = vld [vmem:[#allocation2 + $0x34] sm:$0xf0] }
 0x2a2   : > { %v2557_v55 = vadd.f32 %v2556_v0, %v12901_v9  ;;  %v2605_v40 = vpop.f32.mrf.mxu1  ;;  %2827 = vmatmul.bf16.vlgmr.msrb.gmra.mxu2 %v12098_v49  ;;  %3533 = vmatpush.bf16.msrb.mxu0 %v9329_v23  ;;  %v10705_v0 = vld [vmem:[#allocation2 + $0xc4] sm:$0xf0]  ;;  %v9312_v23 = vld [vmem:[#allocation2 + $0x30] sm:$0xf] }
 0x2a3   : > { %vm2978_vm15 = vcmp.gt.f32.partialorder %v2523_v25, 0.0  ;;  %v3042_v57 = vmul.f32 0.2, %v2523_v25  ;;  %3582 = vmatpush.bf16.msrb.mxu1 %v9393_v38  ;;  %v9385_v53 = vor.u32 %v10705_v0, %v9384_v22  ;;  %v10703_v38 = vld [vmem:[#allocation2 + $0xb4] sm:$0xf0] }
 0x2a4   : > { %v12992_v24 = vadd.f32 %v2605_v40, %v2557_v55  ;;  %v10741_v40 = vld [vmem:[#allocation2 + $0x1e4] sm:$0xf0] }
 0x2a5   : > { %2876 = vmatmul.bf16.vlgmr.msrb.gmra.mxu3 %v12100_v63  ;;  %v3106_v59 = vsel %vm2978_vm15, %v2523_v25, %v3042_v57  ;;  %v2632_v4 = vpop.f32.mrf.mxu2  ;;  %v9320_v63 = vld [vmem:[#allocation2 + $0x40] sm:$0xf]  ;;  %v10725_v25 = vld [vmem:[#allocation2 + $0x164] sm:$0xf0] }
 0x2a6   : > { %v12995_v62 = vpack.c.bf16 %v3106_v59, %v3102_v33  ;;  %v2633_v49 = vadd.f32 %v2632_v4, %v12904_v14  ;;  %v9321_v7 = vor.u32 %v10689_v10, %v9320_v63  ;;  %v9528_v57 = vld [vmem:[#allocation2 + $0x1e0] sm:$0xf]  ;;  %v9465_v42 = vor.u32 %v10725_v25, %v9464_v17  ;;  %v9376_v33 = vld [vmem:[#allocation2 + $0xb0] sm:$0xf] }
 0x2a7   : > { %v9529_v48 = vor.u32 %v10741_v40, %v9528_v57  ;;  %v9313_v4 = vor.u32 %v10687_v46, %v9312_v23  ;;  %3583 = vmatpush.bf16.msrb.mxu1 %v9385_v53  ;;  %v9377_v63 = vor.u32 %v10703_v38, %v9376_v33  ;;  %v9304_v10 = vld [vmem:[#allocation2 + $0x20] sm:$0xf]  ;;  %v9296_v57 = vld [vmem:[#allocation2 + $0x10] sm:$0xf]  ;;  %v10683_v40 = vld [vmem:[#allocation2 + $0x14] sm:$0xf0] }
 0x2a8   : > { %v2681_v26 = vpop.f32.mrf.mxu3  ;;  %3534 = vmatpush.bf16.msrb.mxu0 %v9321_v7  ;;  %3630 = vmatpush.bf16.msra.mxu2 %v9465_v42  ;;  %v9297_v23 = vor.u32 %v10683_v40, %v9296_v57  ;;  %v9360_v46 = vld [vmem:[#allocation2 + $0x90] sm:$0xf]  ;;  %v10699_v33 = vld [vmem:[#allocation2 + $0x94] sm:$0xf0] }
 0x2a9   : > { %v2682_v61 = vadd.f32 %v2681_v26, %v2633_v49  ;;  %v2559_v32 = vpop.f32.mrf.mxu0  ;;  %3679 = vmatpush.bf16.msra.mxu3 %v9529_v48 }
 0x2aa   : > { %v2560_v55 = vadd.f32 %v2559_v32, %v12901_v9  ;;  %v2608_v1 = vpop.f32.mrf.mxu1  ;;  %v9368_v32 = vld [vmem:[#allocation2 + $0xa0] sm:$0xf] }
 0x2ab   : > { %v2983_v7 = vmul.f32 0.2, %v2682_v61  ;;  %vm2919_vm0 = vcmp.gt.f32.partialorder %v2682_v61, 0.0  ;;  %3584 = vmatpush.bf16.msrb.mxu1 %v9377_v63 }
 0x2ac   : > { %v12999_v14 = vadd.f32 %v2608_v1, %v2560_v55  ;;  %2754 = vmatmul.bf16.gmra.mxu0 %v11984_v41  ;;  %v10685_v41 = vld [vmem:[#allocation2 + $0x24] sm:$0xf0] }
 0x2ad   : > { %2803 = vmatmul.bf16.gmra.mxu1 %v11988_v44  ;;  %v2634_v59 = vpop.f32.mrf.mxu2  ;;  %3535 = vmatpush.bf16.msrb.mxu0 %v9313_v4  ;;  %v9305_v0 = vor.u32 %v10685_v41, %v9304_v10  ;;  %v10701_v55 = vld [vmem:[#allocation2 + $0xa4] sm:$0xf0]  ;;  %v3047_v53 = vsel %vm2919_vm0, %v2682_v61, %v2983_v7  ;;  %v9352_v61 = vld [vmem:[#allocation2 + $0x80] sm:$0xf] }
 0x2ae   : > { %v2635_v49 = vadd.f32 %v2634_v59, %v12912_v35  ;;  %v9369_v25 = vor.u32 %v10701_v55, %v9368_v32  ;;  %v10697_v10 = vld [vmem:[#allocation2 + $0x84] sm:$0xf0]  ;;  %v9456_v32 = vld [vmem:[#allocation2 + $0x150] sm:$0xf]  ;;  %v10723_v55 = vld [vmem:[#allocation2 + $0x154] sm:$0xf0] }
 0x2b0   : > { %v2683_v26 = vpop.f32.mrf.mxu3  ;;  %3585 = vmatpush.bf16.msrb.mxu1 %v9369_v25 }
 0x2b1   : > { %v2684_v22 = vadd.f32 %v2683_v26, %v2635_v49  ;;  %v2561_v44 = vpop.f32.mrf.mxu0  ;;  %3536 = vmatpush.bf16.msrb.mxu0 %v9305_v0  ;;  %v9288_v49 = vld [vmem:[#allocation2] sm:$0xf]  ;;  %v10681_v26 = vld [vmem:[#allocation2 + $0x4] sm:$0xf0] }
 0x2b2   : > { %v2562_v17 = vadd.f32 %v2561_v44, %v12901_v9  ;;  %v2610_v35 = vpop.f32.mrf.mxu1  ;;  %2832 = vmatmul.bf16.gmra.mxu2 %v12168_v58  ;;  %v9289_v7 = vor.u32 %v10681_v26, %v9288_v49  ;;  %v9520_v44 = vld [vmem:[#allocation2 + $0x1d0] sm:$0xf] }
 0x2b3   : > { %vm2923_vm1 = vcmp.gt.f32.partialorder %v2684_v22, 0.0  ;;  %v2987_v1 = vmul.f32 0.2, %v2684_v22 }
 0x2b4   : > { %v13007_v48 = vadd.f32 %v2610_v35, %v2562_v17  ;;  %v9457_v35 = vor.u32 %v10723_v55, %v9456_v32  ;;  %v10737_v32 = vld [vmem:[#allocation2 + $0x1c4] sm:$0xf0] }
 0x2b5   : > { %2881 = vmatmul.bf16.gmra.mxu3 %v12173_v3  ;;  %v3051_v42 = vsel %vm2923_vm1, %v2684_v22, %v2987_v1  ;;  %v2637_v4 = vpop.f32.mrf.mxu2  ;;  %v9361_v3 = vor.u32 %v10699_v33, %v9360_v46  ;;  %3537 = vmatpush.bf16.msrb.mxu0 %v9297_v23  ;;  %v10739_v1 = vld [vmem:[#allocation2 + $0x1d4] sm:$0xf0] }
 0x2b6   : > { %v13009_v59 = vpack.c.bf16 %v3051_v42, %v3047_v53  ;;  %v2638_v38 = vadd.f32 %v2637_v4, %v12930_v21  ;;  %v9353_v21 = vor.u32 %v10697_v10, %v9352_v61  ;;  %v9521_v25 = vor.u32 %v10739_v1, %v9520_v44  ;;  %3631 = vmatpush.bf16.msra.mxu2 %v9457_v35 }
 0x2b7   : > { %3586 = vmatpush.bf16.msrb.mxu1 %v9361_v3 }
 0x2b8   : > { %v2686_v58 = vpop.f32.mrf.mxu3  ;;  %3680 = vmatpush.bf16.msra.mxu3 %v9521_v25 }
 0x2b9   : > { %v2687_v63 = vadd.f32 %v2686_v58, %v2638_v38  ;;  %v2564_v41 = vpop.f32.mrf.mxu0  ;;  %3538 = vmatpush.bf16.msrb.mxu0 %v9289_v7 }
 0x2ba   : > { %v2565_v22 = vadd.f32 %v2564_v41, %v12901_v9  ;;  %v2613_v0 = vpop.f32.mrf.mxu1 }
 0x2bb   : > { %3587 = vmatpush.bf16.msrb.mxu1 %v9353_v21  ;;  %v2991_v42 = vmul.f32 0.2, %v2687_v63  ;;  %vm2927_vm2 = vcmp.gt.f32.partialorder %v2687_v63, 0.0 }
 0x2bc   : > { %v13013_v17 = vadd.f32 %v2613_v0, %v2565_v22  ;;  %2759 = vmatmul.bf16.gmra.mxu0 %v12016_v28  ;;  %v9448_v22 = vld [vmem:[#allocation2 + $0x140] sm:$0xf]  ;;  %v10721_v0 = vld [vmem:[#allocation2 + $0x144] sm:$0xf0] }
 0x2bd   : > { %2808 = vmatmul.bf16.gmra.mxu1 %v12020_v60  ;;  %v2639_v57 = vpop.f32.mrf.mxu2 }
 0x2be   : > { %v2640_v40 = vadd.f32 %v2639_v57, %v12938_v18  ;;  %v3055_v18 = vsel %vm2927_vm2, %v2687_v63, %v2991_v42  ;;  %v9449_v63 = vor.u32 %v10721_v0, %v9448_v22 }
 0x2c0   : > { %v2688_v53 = vpop.f32.mrf.mxu3  ;;  %3632 = vmatpush.bf16.msra.mxu2 %v9449_v63 }
 0x2c1   : > { %v2689_v23 = vadd.f32 %v2688_v53, %v2640_v40  ;;  %v2566_v46 = vpop.f32.mrf.mxu0 }
 0x2c2   : > { %v2567_v28 = vadd.f32 %v2566_v46, %v12901_v9  ;;  %v2615_v4 = vpop.f32.mrf.mxu1  ;;  %2837 = vmatmul.bf16.gmra.mxu2 %v12219_v51  ;;  %v9512_v51 = vld [vmem:[#allocation2 + $0x1c0] sm:$0xf] }
 0x2c3   : > { %vm2931_vm3 = vcmp.gt.f32.partialorder %v2689_v23, 0.0  ;;  %v2995_v33 = vmul.f32 0.2, %v2689_v23  ;;  %v9513_v55 = vor.u32 %v10737_v32, %v9512_v51 }
 0x2c4   : > { %v13021_v60 = vadd.f32 %v2615_v4, %v2567_v28 }
 0x2c5   : > { %2886 = vmatmul.bf16.gmra.mxu3 %v12221_v52  ;;  %v3059_v38 = vsel %vm2931_vm3, %v2689_v23, %v2995_v33  ;;  %v2642_v58 = vpop.f32.mrf.mxu2 }
 0x2c6   : > { %v13023_v3 = vpack.c.bf16 %v3059_v38, %v3055_v18  ;;  %v2643_v49 = vadd.f32 %v2642_v58, %v12956_v15  ;;  %3681 = vmatpush.bf16.msra.mxu3 %v9513_v55  ;;  %v10719_v38 = vld [vmem:[#allocation2 + $0x134] sm:$0xf0] }
 0x2c7   : > { %v10735_v58 = vld [vmem:[#allocation2 + $0x1b4] sm:$0xf0] }
 0x2c8   : > { %v2691_v26 = vpop.f32.mrf.mxu3 }
 0x2c9   : > { %v2692_v61 = vadd.f32 %v2691_v26, %v2643_v49  ;;  %v2569_v10 = vpop.f32.mrf.mxu0 }
 0x2ca   : > { %v2570_v41 = vadd.f32 %v2569_v10, %v12901_v9  ;;  %v2618_v7 = vpop.f32.mrf.mxu1 }
 0x2cb   : > { %v2999_v21 = vmul.f32 0.2, %v2692_v61  ;;  %vm2935_vm4 = vcmp.gt.f32.partialorder %v2692_v61, 0.0 }
 0x2cc   : > { %v13027_v52 = vadd.f32 %v2618_v7, %v2570_v41  ;;  %2764 = vmatmul.bf16.gmra.mxu0 %v12058_v19 }
 0x2cd   : > { %2813 = vmatmul.bf16.gmra.mxu1 %v12060_v20  ;;  %v2644_v44 = vpop.f32.mrf.mxu2  ;;  %v3063_v20 = vsel %vm2935_vm4, %v2692_v61, %v2999_v21  ;;  %v9432_v21 = vld [vmem:[#allocation2 + $0x120] sm:$0xf] }
 0x2ce   : > { %v2645_v15 = vadd.f32 %v2644_v44, %v12964_v5 }
 0x2d0   : > { %v2693_v1 = vpop.f32.mrf.mxu3 }
 0x2d1   : > { %v2694_v35 = vadd.f32 %v2693_v1, %v2645_v15  ;;  %v2571_v25 = vpop.f32.mrf.mxu0 }
 0x2d2   : > { %v2572_v40 = vadd.f32 %v2571_v25, %v12901_v9  ;;  %v2620_v53 = vpop.f32.mrf.mxu1  ;;  %2842 = vmatmul.bf16.gmra.mxu2 %v12243_v29  ;;  %v9440_v9 = vld [vmem:[#allocation2 + $0x130] sm:$0xf]  ;;  %v10717_v25 = vld [vmem:[#allocation2 + $0x124] sm:$0xf0] }
 0x2d3   : > { %vm2939_vm5 = vcmp.gt.f32.partialorder %v2694_v35, 0.0  ;;  %v3003_v57 = vmul.f32 0.2, %v2694_v35  ;;  %v9504_v29 = vld [vmem:[#allocation2 + $0x1b0] sm:$0xf] }
 0x2d4   : > { %v13035_v19 = vadd.f32 %v2620_v53, %v2572_v40  ;;  %v9505_v49 = vor.u32 %v10735_v58, %v9504_v29  ;;  %v10733_v40 = vld [vmem:[#allocation2 + $0x1a4] sm:$0xf0] }
 0x2d5   : > { %2891 = vmatmul.bf16.gmra.mxu3 %v12245_v31  ;;  %v3067_v5 = vsel %vm2939_vm5, %v2694_v35, %v3003_v57  ;;  %v2647_v42 = vpop.f32.mrf.mxu2  ;;  %v9441_v31 = vor.u32 %v10719_v38, %v9440_v9  ;;  %v9496_v57 = vld [vmem:[#allocation2 + $0x1a0] sm:$0xf] }
 0x2d6   : > { %v13037_v23 = vpack.c.bf16 %v3067_v5, %v3063_v20  ;;  %v2648_v46 = vadd.f32 %v2647_v42, %v12970_v47  ;;  %3682 = vmatpush.bf16.msra.mxu3 %v9505_v49  ;;  %v9497_v53 = vor.u32 %v10733_v40, %v9496_v57 }
 0x2d7   : > { %3633 = vmatpush.bf16.msra.mxu2 %v9441_v31 }
 0x2d8   : > { %v2696_v33 = vpop.f32.mrf.mxu3 }
 0x2d9   : > { %v2697_v28 = vadd.f32 %v2696_v33, %v2648_v46  ;;  %v13040_v4 = vpop.f32.mrf.mxu0 }
 0x2da   : > { %v13042_v18 = vpop.f32.mrf.mxu1  ;;  %3683 = vmatpush.bf16.msra.mxu3 %v9497_v53 }
 0x2db   : > { %v3007_v10 = vmul.f32 0.2, %v2697_v28  ;;  %vm2943_vm6 = vcmp.gt.f32.partialorder %v2697_v28, 0.0 }
 0x2dc   : > { %3539 = vmatmul.bf16.vlgmr.msrb.gmra.mxu0 %v12514_v36 }
 0x2dd   : > { %3588 = vmatmul.bf16.vlgmr.msrb.gmra.mxu1 %v12822_v2  ;;  %v2649_v26 = vpop.f32.mrf.mxu2  ;;  %v3071_v51 = vsel %vm2943_vm6, %v2697_v28, %v3007_v10  ;;  %v10715_v10 = vld [vmem:[#allocation2 + $0x114] sm:$0xf0] }
 0x2de   : > { %v2650_v61 = vadd.f32 %v2649_v26, %v12978_v56 }
 0x2e0   : > { %v2698_v47 = vpop.f32.mrf.mxu3 }
 0x2e1   : > { %v2699_v41 = vadd.f32 %v2698_v47, %v2650_v61  ;;  %v13047_v7 = vpop.f32.mrf.mxu0  ;;  %v9424_v47 = vld [vmem:[#allocation2 + $0x110] sm:$0xf] }
 0x2e2   : > { %v13049_v0 = vpop.f32.mrf.mxu1  ;;  %2847 = vmatmul.bf16.gmra.mxu2 %v12278_v11  ;;  %v14792_v11 = vld [vmem:[#allocation12_spill] sm:$0xff] }
 0x2e3   : > { %vm2947_vm7 = vcmp.gt.f32.partialorder %v2699_v41, 0.0  ;;  %v3011_v22 = vmul.f32 0.2, %v2699_v41 }
 0x2e5   : > { %2896 = vmatmul.bf16.gmra.mxu3 %v12280_v13  ;;  %v3075_v32 = vsel %vm2947_vm7, %v2699_v41, %v3011_v22  ;;  %v2652_v63 = vpop.f32.mrf.mxu2  ;;  %v9433_v13 = vor.u32 %v10717_v25, %v9432_v21  ;;  %v9425_v41 = vor.u32 %v10715_v10, %v9424_v47  ;;  %v9488_v22 = vld [vmem:[#allocation2 + $0x190] sm:$0xf] }
 0x2e6   : > { %v13053_v56 = vpack.c.bf16 %v3075_v32, %v3071_v51  ;;  %v2653_v55 = vadd.f32 %v2652_v63, %v12984_v34  ;;  %v14793_v51 = vld [vmem:[#allocation13_spill] sm:$0xff]  ;;  %v9416_v63 = vld [vmem:[#allocation2 + $0x100] sm:$0xf] }
 0x2e7   : > { %3634 = vmatpush.bf16.msra.mxu2 %v9433_v13 }
 0x2e8   : > { %v2701_v44 = vpop.f32.mrf.mxu3 }
 0x2e9   : > { %v2702_v15 = vadd.f32 %v2701_v44, %v2653_v55  ;;  %v13056_v1 = vpop.f32.mrf.mxu0  ;;  %v10713_v55 = vld [vmem:[#allocation2 + $0x104] sm:$0xf0] }
 0x2ea   : > { %v13058_v35 = vpop.f32.mrf.mxu1 }
 0x2eb   : > { %v3015_v42 = vmul.f32 0.2, %v2702_v15  ;;  %vm2951_vm8 = vcmp.gt.f32.partialorder %v2702_v15, 0.0  ;;  %3635 = vmatpush.bf16.msra.mxu2 %v9425_v41 }
 0x2ec   : > { %3544 = vmatmul.bf16.gmra.mxu0 %v14792_v11 }
 0x2ed   : > { %3593 = vmatmul.bf16.gmra.mxu1 %v12866_v50  ;;  %v2654_v20 = vpop.f32.mrf.mxu2  ;;  %v3079_v9 = vsel %vm2951_vm8, %v2702_v15, %v3015_v42  ;;  %v9417_v15 = vor.u32 %v10713_v55, %v9416_v63 }
 0x2ee   : > { %v2655_v5 = vadd.f32 %v2654_v20, %v12992_v24 }
 0x2ef   : > { %3636 = vmatpush.bf16.msra.mxu2 %v9417_v15  ;;  %v10726_v15 = vld [vmem:[#allocation2 + $0x174] sm:$0xf] }
 0x2f0   : > { %v2703_v34 = vpop.f32.mrf.mxu3 }
 0x2f1   : > { %v2704_v46 = vadd.f32 %v2703_v34, %v2655_v5  ;;  %v13063_v33 = vpop.f32.mrf.mxu0 }
 0x2f2   : > { %2852 = vmatmul.bf16.gmra.mxu2 %v12308_v8  ;;  %v13067_v29 = vpop.f32.mrf.mxu1  ;;  %v10731_v8 = vld [vmem:[#allocation2 + $0x194] sm:$0xf0] }
 0x2f3   : > { %vm2955_vm9 = vcmp.gt.f32.partialorder %v2704_v46, 0.0  ;;  %v3019_v28 = vmul.f32 0.2, %v2704_v46 }
 0x2f5   : > { %2901 = vmatmul.bf16.gmra.mxu3 %v12310_v54  ;;  %v3083_v38 = vsel %vm2955_vm9, %v2704_v46, %v3019_v28  ;;  %v2657_v58 = vpop.f32.mrf.mxu2  ;;  %v9489_v54 = vor.u32 %v10731_v8, %v9488_v22 }
 0x2f6   : > { %v13069_v24 = vpack.c.bf16 %v3083_v38, %v3079_v9  ;;  %v2658_v31 = vadd.f32 %v2657_v58, %v12999_v14  ;;  %v14794_v38 = vld [vmem:[#allocation14_spill] sm:$0xff]  ;;  %v9480_v58 = vld [vmem:[#allocation2 + $0x180] sm:$0xf] }
 0x2f7   : > { %3684 = vmatpush.bf16.msra.mxu3 %v9489_v54 }
 0x2f8   : > { %v2706_v49 = vpop.f32.mrf.mxu3 }
 0x2f9   : > { %v2707_v26 = vadd.f32 %v2706_v49, %v2658_v31  ;;  %v13072_v61 = vpop.f32.mrf.mxu0  ;;  %v10729_v31 = vld [vmem:[#allocation2 + $0x184] sm:$0xf0] }
 0x2fa   : > { %v13077_v21 = vpop.f32.mrf.mxu1 }
 0x2fb   : > { %v3023_v25 = vmul.f32 0.2, %v2707_v26  ;;  %vm2959_vm10 = vcmp.gt.f32.partialorder %v2707_v26, 0.0 }
 0x2fc   : > { %3549 = vmatmul.bf16.gmra.mxu0 %v14793_v51 }
 0x2fd   : > { %3598 = vmatmul.bf16.gmra.mxu1 %v12892_v45  ;;  %v2659_v32 = vpop.f32.mrf.mxu2  ;;  %v3087_v53 = vsel %vm2959_vm10, %v2707_v26, %v3023_v25  ;;  %v9474_v25 = vld [vmem:[#allocation2 + $0x178] sm:$0xf0] }
 0x2fe   : > { %v2660_v14 = vadd.f32 %v2659_v32, %v13007_v48 }
 0x300   : > { %v2708_v44 = vpop.f32.mrf.mxu3 }
 0x301   : > { %v2709_v57 = vadd.f32 %v2708_v44, %v2660_v14  ;;  %v13079_v40 = vpop.f32.mrf.mxu0 }
 0x302   : > { %2857 = vmatmul.bf16.gmra.mxu2 %v12338_v12  ;;  %v13086_v28 = vpop.f32.mrf.mxu1 }
 0x303   : > { %vm2963_vm11 = vcmp.gt.f32.partialorder %v2709_v57, 0.0  ;;  %v3027_v13 = vmul.f32 0.2, %v2709_v57 }
 0x305   : > { %2906 = vmatmul.bf16.gmra.mxu3 %v12340_v16  ;;  %v3091_v20 = vsel %vm2963_vm11, %v2709_v57, %v3027_v13  ;;  %v2662_v48 = vpop.f32.mrf.mxu2  ;;  %v9481_v16 = vor.u32 %v10729_v31, %v9480_v58  ;;  %v10694_v57 = vld [vmem:[#allocation2 + $0x74] sm:$0xf]  ;;  %v9346_v13 = vld [vmem:[#allocation2 + $0x78] sm:$0xf0] }
 0x306   : > { %v13083_v5 = vpack.c.bf16 %v3091_v20, %v3087_v53  ;;  %v2663_v34 = vadd.f32 %v2662_v48, %v13013_v17  ;;  %v9477_v53 = vor.u32 %v10726_v15, %v9474_v25  ;;  %v9349_v20 = vor.u32 %v10694_v57, %v9346_v13  ;;  %v9538_v48 = vld [vmem:[#allocation2 + $0x1f8] sm:$0xf0]  ;;  %v10690_v57 = vld [vmem:[#allocation2 + $0x54] sm:$0xf] }
 0x307   : > { %3685 = vmatpush.bf16.msra.mxu3 %v9481_v16  ;;  %v9410_v58 = vld [vmem:[#allocation2 + $0xf8] sm:$0xf0] }
 0x308   : > { %v2711_v42 = vpop.f32.mrf.mxu3  ;;  %v14796_v31 = vld [vmem:[#allocation19_spill] sm:$0xff]  ;;  %3825 = vmatpush.bf16.msrb.mxu2 %v9477_v53  ;;  %3727 = vmatpush.bf16.msra.mxu0 %v9349_v20  ;;  %v10706_v53 = vld [vmem:[#allocation2 + $0xd4] sm:$0xf] }
 0x309   : > { %v2712_v46 = vadd.f32 %v2711_v42, %v2663_v34  ;;  %v13088_v9 = vpop.f32.mrf.mxu0  ;;  %v10710_v34 = vld [vmem:[#allocation2 + $0xf4] sm:$0xf]  ;;  %v9330_v13 = vld [vmem:[#allocation2 + $0x58] sm:$0xf0] }
 0x30a   : > { %v13096_v22 = vpop.f32.mrf.mxu1  ;;  %v9333_v20 = vor.u32 %v10690_v57, %v9330_v13  ;;  %v14797_v13 = vld [vmem:[#allocation16_spill] sm:$0xff] }
 0x30b   : > { %v3031_v47 = vmul.f32 0.2, %v2712_v46  ;;  %vm2967_vm12 = vcmp.gt.f32.partialorder %v2712_v46, 0.0 }
 0x30c   : > { %3554 = vmatmul.bf16.gmra.mxu0 %v14794_v38 }
 0x30d   : > { %3603 = vmatmul.bf16.gmra.mxu1 %v12926_v37  ;;  %v2664_v12 = vpop.f32.mrf.mxu2  ;;  %v3095_v8 = vsel %vm2967_vm12, %v2712_v46, %v3031_v47  ;;  %v10692_v47 = vld [vmem:[#allocation2 + $0x64] sm:$0xf] }
 0x30e   : > { %v2665_v49 = vadd.f32 %v2664_v12, %v13021_v60  ;;  %v13109_v12 = vperm.slane %v14796_v31, 3 }
 0x310   : > { %v2713_v26 = vpop.f32.mrf.mxu3 }
 0x311   : > { %v2714_v17 = vadd.f32 %v2713_v26, %v2665_v49  ;;  %v13093_v10 = vpop.f32.mrf.mxu0  ;;  %v9413_v26 = vor.u32 %v10710_v34, %v9410_v58 }
 0x312   : > { %2862 = vmatmul.bf16.gmra.mxu2 %v12381_v39  ;;  %v14795_v39 = vld [vmem:[#allocation15_spill] sm:$0xff]  ;;  %v13105_v42 = vpop.f32.mrf.mxu1 }
 0x313   : > { %vm2971_vm13 = vcmp.gt.f32.partialorder %v2714_v17, 0.0  ;;  %v3035_v41 = vmul.f32 0.2, %v2714_v17  ;;  %3776 = vmatpush.bf16.msra.mxu1 %v9413_v26  ;;  %v9322_v26 = vld [vmem:[#allocation2 + $0x48] sm:$0xf0] }
 0x315   : > { %2911 = vmatmul.bf16.gmra.mxu3 %v12383_v43  ;;  %v3099_v54 = vsel %vm2971_vm13, %v2714_v17, %v3035_v41  ;;  %v2667_v32 = vpop.f32.mrf.mxu2  ;;  %v10742_v43 = vld [vmem:[#allocation2 + $0x1f4] sm:$0xf]  ;;  %v9338_v17 = vld [vmem:[#allocation2 + $0x68] sm:$0xf0]  ;;  %v10708_v41 = vld [vmem:[#allocation2 + $0xe4] sm:$0xf] }
 0x316   : > { %v13099_v63 = vpack.c.bf16 %v3099_v54, %v3095_v8  ;;  %v2668_v60 = vadd.f32 %v2667_v32, %v13027_v52  ;;  %v9541_v46 = vor.u32 %v10742_v43, %v9538_v48  ;;  %v9341_v32 = vor.u32 %v10692_v47, %v9338_v17  ;;  %v9394_v43 = vld [vmem:[#allocation2 + $0xd8] sm:$0xf0] }
 0x317   : > { %v2733_v47 = vadd.f32 %v13047_v7, %v13109_v12 }
 0x318   : > { %v2716_v55 = vpop.f32.mrf.mxu3  ;;  %3874 = vmatpush.bf16.msrb.mxu3 %v9541_v46  ;;  %3728 = vmatpush.bf16.msra.mxu0 %v9341_v32  ;;  %v9397_v46 = vor.u32 %v10706_v53, %v9394_v43  ;;  %v10724_v32 = vld [vmem:[#allocation2 + $0x164] sm:$0xf]  ;;  %v9314_v43 = vld [vmem:[#allocation2 + $0x38] sm:$0xf0] }
 0x319   : > { %v2717_v14 = vadd.f32 %v2716_v55, %v2668_v60  ;;  %v13102_v44 = vpop.f32.mrf.mxu0  ;;  %v9402_v60 = vld [vmem:[#allocation2 + $0xe8] sm:$0xf0] }
 0x31a   : > { %v9405_v15 = vor.u32 %v10708_v41, %v9402_v60  ;;  %v9466_v60 = vld [vmem:[#allocation2 + $0x168] sm:$0xf0] }
 0x31b   : > { %v3039_v8 = vmul.f32 0.2, %v2717_v14  ;;  %vm2975_vm14 = vcmp.gt.f32.partialorder %v2717_v14, 0.0  ;;  %v9469_v53 = vor.u32 %v10724_v32, %v9466_v60  ;;  %v2736_v60 = vadd.f32 %v13056_v1, %v13109_v12 }
 0x31c   : > { %3559 = vmatmul.bf16.gmra.mxu0 %v14795_v39  ;;  %3777 = vmatpush.bf16.msra.mxu1 %v9405_v15  ;;  %v9530_v15 = vld [vmem:[#allocation2 + $0x1e8] sm:$0xf0] }
 0x31d   : > { %3608 = vmatmul.bf16.gmra.mxu1 %v12952_v27  ;;  %v2669_v52 = vpop.f32.mrf.mxu2  ;;  %v3103_v48 = vsel %vm2975_vm14, %v2717_v14, %v3039_v8  ;;  %3729 = vmatpush.bf16.msra.mxu0 %v9333_v20  ;;  %v10704_v14 = vld [vmem:[#allocation2 + $0xc4] sm:$0xf]  ;;  %v9386_v8 = vld [vmem:[#allocation2 + $0xc8] sm:$0xf0]  ;;  %v10686_v20 = vld [vmem:[#allocation2 + $0x34] sm:$0xf]  ;;  %v2785_v1 = vadd.f32 %v13058_v35, %v2736_v60 }
 0x31e   : > { %v2670_v16 = vadd.f32 %v2669_v52, %v13035_v19  ;;  %v2731_v19 = vadd.f32 %v13040_v4, %v13109_v12  ;;  %3826 = vmatpush.bf16.msrb.mxu2 %v9469_v53  ;;  %v9298_v53 = vld [vmem:[#allocation2 + $0x18] sm:$0xf0]  ;;  %v10738_v60 = vld [vmem:[#allocation2 + $0x1d4] sm:$0xf] }
 0x31f   : > { %v9458_v35 = vld [vmem:[#allocation2 + $0x158] sm:$0xf0] }
 0x320   : > { %v2718_v49 = vpop.f32.mrf.mxu3  ;;  %v2780_v31 = vadd.f32 %v13042_v18, %v2731_v19  ;;  %3778 = vmatpush.bf16.msra.mxu1 %v9397_v46  ;;  %v10740_v18 = vld [vmem:[#allocation2 + $0x1e4] sm:$0xf]  ;;  %v9389_v19 = vor.u32 %v10704_v14, %v9386_v8  ;;  %v9378_v46 = vld [vmem:[#allocation2 + $0xb8] sm:$0xf0]  ;;  %v9370_v8 = vld [vmem:[#allocation2 + $0xa8] sm:$0xf0] }
 0x321   : > { %v2719_v54 = vadd.f32 %v2718_v49, %v2670_v16  ;;  %v13112_v55 = vpop.f32.mrf.mxu0  ;;  %v13120_v16 = vpop.f32.mrf.mxu1  ;;  %v10688_v49 = vld [vmem:[#allocation2 + $0x44] sm:$0xf]  ;;  %v9533_v7 = vor.u32 %v10740_v18, %v9530_v15 }
 0x322   : > { %3637 = vmatmul.bf16.vlgmr.msra.gmra.mxu2 %v13009_v59  ;;  %v9325_v41 = vor.u32 %v10688_v49, %v9322_v26  ;;  %v9306_v26 = vld [vmem:[#allocation2 + $0x28] sm:$0xf0]  ;;  %v10700_v14 = vld [vmem:[#allocation2 + $0xa4] sm:$0xf] }
 0x323   : > { %vm2979_vm15 = vcmp.gt.f32.partialorder %v2719_v54, 0.0  ;;  %v3043_v25 = vmul.f32 0.2, %v2719_v54  ;;  %3875 = vmatpush.bf16.msrb.mxu3 %v9533_v7 }
 0x324   : > { %3730 = vmatpush.bf16.msra.mxu0 %v9325_v41  ;;  %3779 = vmatpush.bf16.msra.mxu1 %v9389_v19  ;;  %v9373_v19 = vor.u32 %v10700_v14, %v9370_v8  ;;  %v10722_v14 = vld [vmem:[#allocation2 + $0x154] sm:$0xf] }
 0x325   : > { %v3107_v34 = vsel %vm2979_vm15, %v2719_v54, %v3043_v25  ;;  %v2828_v52 = vpop.f32.mrf.mxu2  ;;  %v2782_v25 = vadd.f32 %v13049_v0, %v2733_v47 }
 0x326   : > { %v13117_v58 = vpack.c.bf16 %v3107_v34, %v3103_v48  ;;  %v2829_v17 = vadd.f32 %v2828_v52, %v2780_v31  ;;  %v10702_v48 = vld [vmem:[#allocation2 + $0xb4] sm:$0xf]  ;;  %v9317_v52 = vor.u32 %v10686_v20, %v9314_v43 }
 0x327   : > { %v9381_v0 = vor.u32 %v10702_v48, %v9378_v46  ;;  %v10698_v48 = vld [vmem:[#allocation2 + $0x94] sm:$0xf] }
 0x328   : > { %v2877_v4 = vpop.f32.mrf.mxu3  ;;  %3731 = vmatpush.bf16.msra.mxu0 %v9317_v52 }
 0x329   : > { %v13124_v54 = vpop.f32.mrf.mxu0  ;;  %v2878_v57 = vadd.f32 %v2877_v4, %v2829_v17  ;;  %v10684_v4 = vld [vmem:[#allocation2 + $0x24] sm:$0xf]  ;;  %v13129_v32 = vpop.f32.mrf.mxu1  ;;  %3780 = vmatpush.bf16.msra.mxu1 %v9381_v0 }
 0x32a   : > { %v9309_v41 = vor.u32 %v10684_v4, %v9306_v26  ;;  %v10680_v0 = vld [vmem:[#allocation2 + $0x4] sm:$0xf]  ;;  %v9290_v4 = vld [vmem:[#allocation2 + $0x8] sm:$0xf0]  ;;  %v2738_v26 = vadd.f32 %v13063_v33, %v13109_v12 }
 0x32b   : > { %v2984_v47 = vmul.f32 0.2, %v2878_v57  ;;  %vm2920_vm0 = vcmp.gt.f32.partialorder %v2878_v57, 0.0 }
 0x32c   : > { %3564 = vmatmul.bf16.gmra.mxu0 %v14797_v13 }
 0x32d   : > { %3613 = vmatmul.bf16.gmra.mxu1 %v12966_v6  ;;  %v2830_v34 = vpop.f32.mrf.mxu2  ;;  %3732 = vmatpush.bf16.msra.mxu0 %v9309_v41  ;;  %v3048_v7 = vsel %vm2920_vm0, %v2878_v57, %v2984_v47  ;;  %v10696_v47 = vld [vmem:[#allocation2 + $0x84] sm:$0xf]  ;;  %v9293_v41 = vor.u32 %v10680_v0, %v9290_v4 }
 0x32e   : > { %v2831_v31 = vadd.f32 %v2830_v34, %v2782_v25  ;;  %v10682_v25 = vld [vmem:[#allocation2 + $0x14] sm:$0xf]  ;;  %v9362_v34 = vld [vmem:[#allocation2 + $0x98] sm:$0xf0]  ;;  %3781 = vmatpush.bf16.msra.mxu1 %v9373_v19  ;;  %v2787_v19 = vadd.f32 %v13067_v29, %v2738_v26  ;;  %v2741_v29 = vadd.f32 %v13072_v61, %v13109_v12  ;;  %v2743_v61 = vadd.f32 %v13079_v40, %v13109_v12 }
 0x32f   : > { %v9301_v43 = vor.u32 %v10682_v25, %v9298_v53 }
 0x330   : > { %v2879_v49 = vpop.f32.mrf.mxu3 }
 0x331   : > { %v2880_v17 = vadd.f32 %v2879_v49, %v2831_v31  ;;  %v13134_v15 = vpop.f32.mrf.mxu0  ;;  %v9365_v49 = vor.u32 %v10698_v48, %v9362_v34  ;;  %3733 = vmatpush.bf16.msra.mxu0 %v9301_v43  ;;  %v13142_v8 = vpop.f32.mrf.mxu1 }
 0x332   : > { %3642 = vmatmul.bf16.gmra.mxu2 %v13023_v3 }
 0x333   : > { %vm2924_vm1 = vcmp.gt.f32.partialorder %v2880_v17, 0.0  ;;  %v2988_v18 = vmul.f32 0.2, %v2880_v17  ;;  %3782 = vmatpush.bf16.msra.mxu1 %v9365_v49 }
 0x335   : > { %v3052_v20 = vsel %vm2924_vm1, %v2880_v17, %v2988_v18  ;;  %v2833_v46 = vpop.f32.mrf.mxu2  ;;  %v9354_v17 = vld [vmem:[#allocation2 + $0x88] sm:$0xf0]  ;;  %v9522_v18 = vld [vmem:[#allocation2 + $0x1d8] sm:$0xf0]  ;;  %3734 = vmatpush.bf16.msra.mxu0 %v9293_v41 }
 0x336   : > { %v13136_v52 = vpack.c.bf16 %v3052_v20, %v3048_v7  ;;  %v2834_v57 = vadd.f32 %v2833_v46, %v2785_v1  ;;  %v9357_v25 = vor.u32 %v10696_v47, %v9354_v17  ;;  %v14798_v7 = vld [vmem:[#allocation17_spill] sm:$0xff]  ;;  %v9461_v20 = vor.u32 %v10722_v14, %v9458_v35 }
 0x337   : > { %v9525_v33 = vor.u32 %v10738_v60, %v9522_v18  ;;  %v2790_v17 = vadd.f32 %v13077_v21, %v2741_v29  ;;  %v10720_v60 = vld [vmem:[#allocation2 + $0x144] sm:$0xf]  ;;  %v9450_v18 = vld [vmem:[#allocation2 + $0x148] sm:$0xf0] }
 0x338   : > { %v2882_v31 = vpop.f32.mrf.mxu3  ;;  %3686 = vmatmul.bf16.vlgmr.msra.gmra.mxu3 %v13136_v52  ;;  %3827 = vmatpush.bf16.msrb.mxu2 %v9461_v20 }
 0x339   : > { %v2883_v53 = vadd.f32 %v2882_v31, %v2834_v57  ;;  %v13146_v48 = vpop.f32.mrf.mxu0  ;;  %3876 = vmatpush.bf16.msrb.mxu3 %v9525_v33  ;;  %3783 = vmatpush.bf16.msra.mxu1 %v9357_v25  ;;  %v13152_v26 = vpop.f32.mrf.mxu1  ;;  %v10736_v25 = vld [vmem:[#allocation2 + $0x1c4] sm:$0xf]  ;;  %v14799_v33 = vld [vmem:[#allocation18_spill] sm:$0xff] }
 0x33b   : > { %v2992_v1 = vmul.f32 0.2, %v2883_v53  ;;  %vm2928_vm2 = vcmp.gt.f32.partialorder %v2883_v53, 0.0 }
 0x33c   : > { %3569 = vmatmul.bf16.gmra.mxu0 %v14798_v7 }
 0x33d   : > { %3618 = vmatmul.bf16.gmra.mxu1 %v12980_v30  ;;  %v2835_v43 = vpop.f32.mrf.mxu2  ;;  %v3056_v0 = vsel %vm2928_vm2, %v2883_v53, %v2992_v1  ;;  %v2792_v53 = vadd.f32 %v13086_v28, %v2743_v61  ;;  %v2746_v28 = vadd.f32 %v13088_v9, %v13109_v12  ;;  %v10718_v9 = vld [vmem:[#allocation2 + $0x134] sm:$0xf] }
 0x33e   : > { %v2836_v34 = vadd.f32 %v2835_v43, %v2787_v19  ;;  %v9514_v19 = vld [vmem:[#allocation2 + $0x1c8] sm:$0xf0]  ;;  %v9453_v43 = vor.u32 %v10720_v60, %v9450_v18  ;;  %v2748_v60 = vadd.f32 %v13093_v10, %v13109_v12 }
 0x33f   : > { %v9517_v21 = vor.u32 %v10736_v25, %v9514_v19  ;;  %v2795_v61 = vadd.f32 %v13096_v22, %v2746_v28 }
 0x340   : > { %v2884_v46 = vpop.f32.mrf.mxu3  ;;  %3828 = vmatpush.bf16.msrb.mxu2 %v9453_v43  ;;  %v9506_v43 = vld [vmem:[#allocation2 + $0x1b8] sm:$0xf0] }
 0x341   : > { %v2885_v49 = vadd.f32 %v2884_v46, %v2836_v34  ;;  %v13157_v14 = vpop.f32.mrf.mxu0  ;;  %3877 = vmatpush.bf16.msrb.mxu3 %v9517_v21  ;;  %v13165_v40 = vpop.f32.mrf.mxu1  ;;  %v2797_v21 = vadd.f32 %v13105_v42, %v2748_v60 }
 0x342   : > { %3647 = vmatmul.bf16.gmra.mxu2 %v13037_v23 }
 0x343   : > { %vm2932_vm3 = vcmp.gt.f32.partialorder %v2885_v49, 0.0  ;;  %v2996_v31 = vmul.f32 0.2, %v2885_v49 }
 0x345   : > { %v3060_v4 = vsel %vm2932_vm3, %v2885_v49, %v2996_v31  ;;  %v2838_v57 = vpop.f32.mrf.mxu2 }
 0x346   : > { %v13154_v47 = vpack.c.bf16 %v3060_v4, %v3056_v0  ;;  %v2839_v35 = vadd.f32 %v2838_v57, %v2790_v17 }
 0x348   : > { %v2887_v41 = vpop.f32.mrf.mxu3  ;;  %3691 = vmatmul.bf16.gmra.mxu3 %v13154_v47 }
 0x349   : > { %v2888_v20 = vadd.f32 %v2887_v41, %v2839_v35  ;;  %v13167_v31 = vpop.f32.mrf.mxu0  ;;  %v13178_v25 = vpop.f32.mrf.mxu1 }
 0x34b   : > { %v3000_v49 = vmul.f32 0.2, %v2888_v20  ;;  %vm2936_vm4 = vcmp.gt.f32.partialorder %v2888_v20, 0.0 }
 0x34c   : > { %3574 = vmatmul.bf16.gmra.mxu0 %v14799_v33 }
 0x34d   : > { %3623 = vmatmul.bf16.gmra.mxu1 %v12995_v62  ;;  %v2840_v34 = vpop.f32.mrf.mxu2  ;;  %v3064_v4 = vsel %vm2936_vm4, %v2888_v20, %v3000_v49  ;;  %v10734_v20 = vld [vmem:[#allocation2 + $0x1b4] sm:$0xf] }
 0x34e   : > { %v2841_v46 = vadd.f32 %v2840_v34, %v2792_v53  ;;  %v9442_v53 = vld [vmem:[#allocation2 + $0x138] sm:$0xf0] }
 0x34f   : > { %v9445_v22 = vor.u32 %v10718_v9, %v9442_v53  ;;  %v10716_v9 = vld [vmem:[#allocation2 + $0x124] sm:$0xf]  ;;  %v9434_v53 = vld [vmem:[#allocation2 + $0x128] sm:$0xf0] }
 0x350   : > { %v2889_v1 = vpop.f32.mrf.mxu3 }
 0x351   : > { %v2890_v29 = vadd.f32 %v2889_v1, %v2841_v46  ;;  %v13180_v19 = vpop.f32.mrf.mxu0  ;;  %v9509_v46 = vor.u32 %v10734_v20, %v9506_v43  ;;  %3829 = vmatpush.bf16.msrb.mxu2 %v9445_v22  ;;  %v10732_v20 = vld [vmem:[#allocation2 + $0x1a4] sm:$0xf]  ;;  %v9498_v43 = vld [vmem:[#allocation2 + $0x1a8] sm:$0xf0]  ;;  %v9437_v22 = vor.u32 %v10716_v9, %v9434_v53  ;;  %v9426_v9 = vld [vmem:[#allocation2 + $0x118] sm:$0xf0] }
 0x352   : > { %3652 = vmatmul.bf16.gmra.mxu2 %v13053_v56 }
 0x353   : > { %vm2940_vm5 = vcmp.gt.f32.partialorder %v2890_v29, 0.0  ;;  %v3004_v0 = vmul.f32 0.2, %v2890_v29  ;;  %3878 = vmatpush.bf16.msrb.mxu3 %v9509_v46  ;;  %v9501_v46 = vor.u32 %v10732_v20, %v9498_v43  ;;  %v10730_v20 = vld [vmem:[#allocation2 + $0x194] sm:$0xf] }
 0x354   : > { %v9490_v43 = vld [vmem:[#allocation2 + $0x198] sm:$0xf0] }
 0x355   : > { %v3068_v57 = vsel %vm2940_vm5, %v2890_v29, %v3004_v0  ;;  %v2843_v17 = vpop.f32.mrf.mxu2  ;;  %v2751_v0 = vadd.f32 %v13102_v44, %v13109_v12  ;;  %v2753_v44 = vadd.f32 %v13112_v55, %v13109_v12  ;;  %3830 = vmatpush.bf16.msrb.mxu2 %v9437_v22 }
 0x356   : > { %v13172_v41 = vpack.c.bf16 %v3068_v57, %v3064_v4  ;;  %v2844_v18 = vadd.f32 %v2843_v17, %v2795_v61 }
 0x357   : > { %3879 = vmatpush.bf16.msrb.mxu3 %v9501_v46  ;;  %v10712_v46 = vld [vmem:[#allocation2 + $0x104] sm:$0xf] }
 0x358   : > { %v2892_v35 = vpop.f32.mrf.mxu3  ;;  %3696 = vmatmul.bf16.gmra.mxu3 %v13172_v41 }
 0x359   : > { %v2893_v34 = vadd.f32 %v2892_v35, %v2844_v18  ;;  %v2800_v35 = vadd.f32 %v13120_v16, %v2751_v0 }
 0x35b   : > { %v3008_v29 = vmul.f32 0.2, %v2893_v34  ;;  %vm2944_vm6 = vcmp.gt.f32.partialorder %v2893_v34, 0.0 }
 0x35c   : > { %3735 = vmatmul.bf16.vlgmr.msra.gmra.mxu0 %v12514_v36  ;;  %v13188_v36 = vpop.f32.mrf.mxu1 }
 0x35d   : > { %3784 = vmatmul.bf16.vlgmr.msra.gmra.mxu1 %v12822_v2  ;;  %v2845_v1 = vpop.f32.mrf.mxu2  ;;  %v3072_v4 = vsel %vm2944_vm6, %v2893_v34, %v3008_v29  ;;  %v13190_v2 = vpop.f32.mrf.mxu0 }
 0x35e   : > { %v2846_v10 = vadd.f32 %v2845_v1, %v2797_v21  ;;  %v2802_v21 = vadd.f32 %v13129_v32, %v2753_v44  ;;  %v2756_v32 = vadd.f32 %v13124_v54, %v13109_v12 }
 0x360   : > { %v2894_v49 = vpop.f32.mrf.mxu3 }
 0x361   : > { %v2895_v28 = vadd.f32 %v2894_v49, %v2846_v10 }
 0x362   : > { %3657 = vmatmul.bf16.gmra.mxu2 %v13069_v24 }
 0x363   : > { %vm2948_vm7 = vcmp.gt.f32.partialorder %v2895_v28, 0.0  ;;  %v3012_v42 = vmul.f32 0.2, %v2895_v28 }
 0x364   : > { %v13200_v1 = vpop.f32.mrf.mxu1 }
 0x365   : > { %v3076_v57 = vsel %vm2948_vm7, %v2895_v28, %v3012_v42  ;;  %v2848_v17 = vpop.f32.mrf.mxu2  ;;  %v13203_v55 = vpop.f32.mrf.mxu0 }
 0x366   : > { %v13192_v61 = vpack.c.bf16 %v3076_v57, %v3072_v4  ;;  %v2849_v18 = vadd.f32 %v2848_v17, %v2800_v35  ;;  %v2805_v57 = vadd.f32 %v13142_v8, %v2756_v32  ;;  %v9493_v8 = vor.u32 %v10730_v20, %v9490_v43 }
 0x368   : > { %v2897_v60 = vpop.f32.mrf.mxu3  ;;  %3701 = vmatmul.bf16.gmra.mxu3 %v13192_v61 }
 0x369   : > { %v2898_v34 = vadd.f32 %v2897_v60, %v2849_v18  ;;  %v2758_v60 = vadd.f32 %v13134_v15, %v13109_v12  ;;  %v10714_v18 = vld [vmem:[#allocation2 + $0x114] sm:$0xf]  ;;  %v9418_v15 = vld [vmem:[#allocation2 + $0x108] sm:$0xf0]  ;;  %3880 = vmatpush.bf16.msrb.mxu3 %v9493_v8 }
 0x36a   : > { %v9429_v53 = vor.u32 %v10714_v18, %v9426_v9 }
 0x36b   : > { %v3016_v29 = vmul.f32 0.2, %v2898_v34  ;;  %vm2952_vm8 = vcmp.gt.f32.partialorder %v2898_v34, 0.0 }
 0x36c   : > { %3740 = vmatmul.bf16.gmra.mxu0 %v14792_v11  ;;  %v13211_v35 = vpop.f32.mrf.mxu1  ;;  %3831 = vmatpush.bf16.msrb.mxu2 %v9429_v53 }
 0x36d   : > { %3789 = vmatmul.bf16.gmra.mxu1 %v12866_v50  ;;  %v2850_v16 = vpop.f32.mrf.mxu2  ;;  %v3080_v0 = vsel %vm2952_vm8, %v2898_v34, %v3016_v29  ;;  %v13216_v44 = vpop.f32.mrf.mxu0 }
 0x36e   : > { %v2851_v10 = vadd.f32 %v2850_v16, %v2802_v21  ;;  %v2807_v21 = vadd.f32 %v13152_v26, %v2758_v60  ;;  %v10728_v60 = vld [vmem:[#allocation2 + $0x184] sm:$0xf] }
 0x370   : > { %v2899_v49 = vpop.f32.mrf.mxu3 }
 0x371   : > { %v2900_v28 = vadd.f32 %v2899_v49, %v2851_v10  ;;  %v9421_v49 = vor.u32 %v10712_v46, %v9418_v15 }
 0x372   : > { %3662 = vmatmul.bf16.gmra.mxu2 %v13083_v5 }
 0x373   : > { %vm2956_vm9 = vcmp.gt.f32.partialorder %v2900_v28, 0.0  ;;  %v3020_v11 = vmul.f32 0.2, %v2900_v28  ;;  %3832 = vmatpush.bf16.msrb.mxu2 %v9421_v49 }
 0x374   : > { %v13221_v32 = vpop.f32.mrf.mxu1 }
 0x375   : > { %v3084_v42 = vsel %vm2956_vm9, %v2900_v28, %v3020_v11  ;;  %v2853_v50 = vpop.f32.mrf.mxu2 }
 0x376   : > { %v13208_v4 = vpack.c.bf16 %v3084_v42, %v3080_v0  ;;  %v2854_v54 = vadd.f32 %v2853_v50, %v2805_v57 }
 0x378   : > { %v2902_v17 = vpop.f32.mrf.mxu3  ;;  %3706 = vmatmul.bf16.gmra.mxu3 %v13208_v4 }
 0x379   : > { %v2903_v34 = vadd.f32 %v2902_v17, %v2854_v54  ;;  %v9482_v54 = vld [vmem:[#allocation2 + $0x188] sm:$0xf0] }
 0x37a   : > { %v9485_v9 = vor.u32 %v10728_v60, %v9482_v54 }
 0x37b   : > { %v3024_v29 = vmul.f32 0.2, %v2903_v34  ;;  %vm2960_vm10 = vcmp.gt.f32.partialorder %v2903_v34, 0.0 }
 0x37c   : > { %3745 = vmatmul.bf16.gmra.mxu0 %v14793_v51  ;;  %v2761_v51 = vadd.f32 %v13146_v48, %v13109_v12  ;;  %v2763_v48 = vadd.f32 %v13157_v14, %v13109_v12  ;;  %3881 = vmatpush.bf16.msrb.mxu3 %v9485_v9  ;;  %v13234_v53 = vpop.f32.mrf.mxu1  ;;  %v2766_v14 = vadd.f32 %v13167_v31, %v13109_v12 }
 0x37d   : > { %3794 = vmatmul.bf16.gmra.mxu1 %v12892_v45  ;;  %v2855_v22 = vpop.f32.mrf.mxu2  ;;  %v13226_v45 = vpop.f32.mrf.mxu0  ;;  %v3088_v11 = vsel %vm2960_vm10, %v2903_v34, %v3024_v29  ;;  %v2768_v31 = vadd.f32 %v13180_v19, %v13109_v12  ;;  %v10750_v19 = vld [vmem:[%s14722_s8 + $0x30] sm:$0xff] }
 0x37e   : > { %v2856_v16 = vadd.f32 %v2855_v22, %v2807_v21  ;;  %v2810_v57 = vadd.f32 %v13165_v40, %v2761_v51  ;;  %v2812_v20 = vadd.f32 %v13178_v25, %v2763_v48  ;;  %v10749_v48 = vld [vmem:[%s14722_s8 + $0x28] sm:$0xff] }
 0x380   : > { %v2904_v10 = vpop.f32.mrf.mxu3 }
 0x381   : > { %v2905_v28 = vadd.f32 %v2904_v10, %v2856_v16 }
 0x382   : > { %3667 = vmatmul.bf16.gmra.mxu2 %v13099_v63 }
 0x383   : > { %vm2964_vm11 = vcmp.gt.f32.partialorder %v2905_v28, 0.0  ;;  %v3028_v26 = vmul.f32 0.2, %v2905_v28 }
 0x385   : > { %v3092_v0 = vsel %vm2964_vm11, %v2905_v28, %v3028_v26  ;;  %v2858_v42 = vpop.f32.mrf.mxu2  ;;  %v13238_v21 = vpop.f32.mrf.mxu0  ;;  %v2817_v26 = vadd.f32 %v13200_v1, %v2768_v31 }
 0x386   : > { %v13228_v50 = vpack.c.bf16 %v3092_v0, %v3088_v11  ;;  %v2859_v18 = vadd.f32 %v2858_v42, %v2810_v57  ;;  %v10751_v0 = vld [vmem:[%s14722_s8 + $0x38] sm:$0xff] }
 0x387   : > { %4167 = vmatpush.bf16.msrb.mxu0 %v10751_v0 }
 0x388   : > { %v2907_v17 = vpop.f32.mrf.mxu3  ;;  %3711 = vmatmul.bf16.gmra.mxu3 %v13228_v50 }
 0x389   : > { %v2908_v43 = vadd.f32 %v2907_v17, %v2859_v18 }
 0x38b   : > { %v3032_v22 = vmul.f32 0.2, %v2908_v43  ;;  %vm2968_vm12 = vcmp.gt.f32.partialorder %v2908_v43, 0.0  ;;  %4168 = vmatpush.bf16.msrb.mxu0 %v10750_v19 }
 0x38c   : > { %3750 = vmatmul.bf16.gmra.mxu0 %v14794_v38  ;;  %v13244_v38 = vpop.f32.mrf.mxu1 }
 0x38d   : > { %3799 = vmatmul.bf16.gmra.mxu1 %v12926_v37  ;;  %v2860_v40 = vpop.f32.mrf.mxu2  ;;  %v3096_v25 = vsel %vm2968_vm12, %v2908_v43, %v3032_v22  ;;  %v2815_v37 = vadd.f32 %v13188_v36, %v2766_v14  ;;  %v13249_v28 = vpop.f32.mrf.mxu0  ;;  %v10746_v22 = vld [vmem:[%s14722_s8 + $0x10] sm:$0xff] }
 0x38e   : > { %v2861_v34 = vadd.f32 %v2860_v40, %v2812_v20  ;;  %v10748_v20 = vld [vmem:[%s14722_s8 + $0x20] sm:$0xff]  ;;  %v10747_v40 = vld [vmem:[%s14722_s8 + $0x18] sm:$0xff] }
 0x38f   : > { %4169 = vmatpush.bf16.msrb.mxu0 %v10749_v48 }
 0x390   : > { %v2909_v8 = vpop.f32.mrf.mxu3 }
 0x391   : > { %v2910_v46 = vadd.f32 %v2909_v8, %v2861_v34  ;;  %v10759_v8 = vld [vmem:[%s14722_s8 + $0x78] sm:$0xff] }
 0x392   : > { %3672 = vmatmul.bf16.gmra.mxu2 %v13117_v58  ;;  %4216 = vmatpush.bf16.msrb.mxu1 %v10759_v8 }
 0x393   : > { %vm2972_vm13 = vcmp.gt.f32.partialorder %v2910_v46, 0.0  ;;  %v3036_v15 = vmul.f32 0.2, %v2910_v46  ;;  %4170 = vmatpush.bf16.msrb.mxu0 %v10748_v20 }
 0x394   : > { %v13260_v57 = vpop.f32.mrf.mxu1 }
 0x395   : > { %v3100_v16 = vsel %vm2972_vm13, %v2910_v46, %v3036_v15  ;;  %v2863_v10 = vpop.f32.mrf.mxu2  ;;  %v13265_v1 = vpop.f32.mrf.mxu0  ;;  %v10744_v15 = vld [vmem:[%s14722_s8] sm:$0xff] }
 0x396   : > { %v13246_v49 = vpack.c.bf16 %v3100_v16, %v3096_v25  ;;  %v2864_v51 = vadd.f32 %v2863_v10, %v2815_v37  ;;  %v10758_v10 = vld [vmem:[%s14722_s8 + $0x70] sm:$0xff] }
 0x397   : > { %4171 = vmatpush.bf16.msrb.mxu0 %v10747_v40  ;;  %4217 = vmatpush.bf16.msrb.mxu1 %v10758_v10 }
 0x398   : > { %v2912_v29 = vpop.f32.mrf.mxu3  ;;  %3716 = vmatmul.bf16.gmra.mxu3 %v13246_v49 }
 0x399   : > { %v2913_v11 = vadd.f32 %v2912_v29, %v2864_v51 }
 0x39b   : > { %v3040_v60 = vmul.f32 0.2, %v2913_v11  ;;  %vm2976_vm14 = vcmp.gt.f32.partialorder %v2913_v11, 0.0  ;;  %4172 = vmatpush.bf16.msrb.mxu0 %v10746_v22 }
 0x39c   : > { %3755 = vmatmul.bf16.gmra.mxu0 %v14795_v39  ;;  %v13277_v43 = vpop.f32.mrf.mxu1 }
 0x39d   : > { %3804 = vmatmul.bf16.gmra.mxu1 %v12952_v27  ;;  %v2865_v36 = vpop.f32.mrf.mxu2  ;;  %v3104_v27 = vsel %vm2976_vm14, %v2913_v11, %v3040_v60 }
 0x39e   : > { %v2866_v42 = vadd.f32 %v2865_v36, %v2817_v26 }
 0x3a0   : > { %v2914_v17 = vpop.f32.mrf.mxu3 }
 0x3a1   : > { %v2915_v12 = vadd.f32 %v2914_v17, %v2866_v42 }
 0x3a2   : > { %3833 = vmatmul.bf16.vlgmr.msrb.gmra.mxu2 %v13009_v59  ;;  %v13279_v59 = vpop.f32.mrf.mxu0 }
 0x3a3   : > { %vm2980_vm15 = vcmp.gt.f32.partialorder %v2915_v12, 0.0  ;;  %v3044_v39 = vmul.f32 0.2, %v2915_v12 }
 0x3a5   : > { %v3108_v54 = vsel %vm2980_vm15, %v2915_v12, %v3044_v39  ;;  %v3638_v18 = vpop.f32.mrf.mxu2 }
 0x3a6   : > { %v13271_v9 = vpack.c.bf16 %v3108_v54, %v3104_v27 }
 0x3a8   : > { %3721 = vmatmul.bf16.gmra.mxu3 %v13271_v9 }
 0x3aa   : > { %v13298_v46 = vpop.f32.mrf.mxu0 }
 0x3ac   : > { %3760 = vmatmul.bf16.gmra.mxu0 %v14797_v13  ;;  %v13293_v13 = vpop.f32.mrf.mxu1 }
 0x3ad   : > { %3809 = vmatmul.bf16.gmra.mxu1 %v12966_v6  ;;  %v3640_v34 = vpop.f32.mrf.mxu2  ;;  %v10745_v6 = vld [vmem:[%s14722_s8 + $0x8] sm:$0xff] }
 0x3ae   : > { %4173 = vmatpush.bf16.msrb.mxu0 %v10745_v6 }
 0x3b2   : > { %3838 = vmatmul.bf16.gmra.mxu2 %v13023_v3  ;;  %4174 = vmatpush.bf16.msrb.mxu0 %v10744_v15  ;;  %v13311_v37 = vpop.f32.mrf.mxu0 }
 0x3b4   : > { %v13305_v3 = vpop.f32.mrf.mxu1 }
 0x3b5   : > { %v3643_v14 = vpop.f32.mrf.mxu2 }
 0x3b8   : > { %3882 = vmatmul.bf16.vlgmr.msrb.gmra.mxu3 %v13136_v52  ;;  %v13316_v52 = vld [vmem:[%s14721_s7] sm:$0x3] }
 0x3ba   : > { %v13331_v11 = vpop.f32.mrf.mxu0 }
 0x3bb   : > { %v3687_v25 = vpop.f32.mrf.mxu3 }
 0x3bc   : > { %3765 = vmatmul.bf16.gmra.mxu0 %v14798_v7  ;;  %v13320_v7 = vperm.slane %v13316_v52, 0  ;;  %v13326_v51 = vpop.f32.mrf.mxu1 }
 0x3bd   : > { %3814 = vmatmul.bf16.gmra.mxu1 %v12980_v30  ;;  %v3645_v16 = vpop.f32.mrf.mxu2 }
 0x3be   : > { %v3543_v31 = vadd.f32 %v13203_v55, %v13320_v7  ;;  %v3541_v26 = vadd.f32 %v13190_v2, %v13320_v7  ;;  %v3548_v39 = vadd.f32 %v13226_v45, %v13320_v7  ;;  %v3546_v54 = vadd.f32 %v13216_v44, %v13320_v7 }
 0x3c0   : > { %v3590_v36 = vadd.f32 %v13211_v35, %v3541_v26  ;;  %v3597_v20 = vadd.f32 %v13244_v38, %v3548_v39  ;;  %v3551_v26 = vadd.f32 %v13238_v21, %v13320_v7  ;;  %v3556_v39 = vadd.f32 %v13265_v1, %v13320_v7 }
 0x3c2   : > { %3843 = vmatmul.bf16.gmra.mxu2 %v13037_v23  ;;  %v3592_v23 = vadd.f32 %v13221_v32, %v3543_v31  ;;  %v3639_v17 = vadd.f32 %v3638_v18, %v3590_v36  ;;  %v3646_v22 = vadd.f32 %v3645_v16, %v3597_v20  ;;  %v3553_v16 = vadd.f32 %v13249_v28, %v13320_v7  ;;  %v10755_v28 = vld [vmem:[%s14722_s8 + $0x58] sm:$0xff] }
 0x3c3   : > { %v3689_v29 = vpop.f32.mrf.mxu3  ;;  %v3605_v20 = vadd.f32 %v13293_v13, %v3556_v39 }
 0x3c4   : > { %v3641_v42 = vadd.f32 %v3640_v34, %v3592_v23  ;;  %v13340_v2 = vpop.f32.mrf.mxu1  ;;  %v3688_v12 = vadd.f32 %v3687_v25, %v3639_v17  ;;  %v3595_v34 = vadd.f32 %v13234_v53, %v3546_v54  ;;  %v3602_v36 = vadd.f32 %v13277_v43, %v3553_v16 }
 0x3c5   : > { %v13322_v30 = vpop.f32.mrf.mxu2 }
 0x3c6   : > { %v3690_v60 = vadd.f32 %v3689_v29, %v3641_v42  ;;  %v3955_v32 = vmul.f32 0.2, %v3688_v12  ;;  %vm3923_vm1 = vcmp.gt.f32.partialorder %v3688_v12, 0.0  ;;  %v3644_v6 = vadd.f32 %v3643_v14, %v3595_v34 }
 0x3c7   : > { %v3600_v42 = vadd.f32 %v13260_v57, %v3551_v26 }
 0x3c8   : > { %3887 = vmatmul.bf16.gmra.mxu3 %v13154_v47  ;;  %v10757_v47 = vld [vmem:[%s14722_s8 + $0x68] sm:$0xff]  ;;  %v3957_v35 = vmul.f32 0.2, %v3690_v60  ;;  %vm3925_vm0 = vcmp.gt.f32.partialorder %v3690_v60, 0.0  ;;  %v3987_v48 = vsel %vm3923_vm1, %v3688_v12, %v3955_v32  ;;  %v3558_v32 = vadd.f32 %v13279_v59, %v13320_v7 }
 0x3c9   : > { %4218 = vmatpush.bf16.msrb.mxu1 %v10757_v47 }
 0x3ca   : > { %v3989_v27 = vsel %vm3925_vm0, %v3690_v60, %v3957_v35 }
 0x3cb   : > { %v3692_v0 = vpop.f32.mrf.mxu3  ;;  %v4019_v18 = vpack.c.bf16 %v3989_v27, %v3987_v48 }
 0x3cc   : > { %3770 = vmatmul.bf16.gmra.mxu0 %v14799_v33  ;;  %v13343_v33 = vpop.f32.mrf.mxu0  ;;  %v13353_v40 = vpop.f32.mrf.mxu1  ;;  %v3693_v15 = vadd.f32 %v3692_v0, %v3644_v6 }
 0x3cd   : > { %3819 = vmatmul.bf16.gmra.mxu1 %v12995_v62  ;;  %v3650_v55 = vpop.f32.mrf.mxu2 }
 0x3ce   : > { %v3959_v53 = vmul.f32 0.2, %v3693_v15  ;;  %vm3927_vm3 = vcmp.gt.f32.partialorder %v3693_v15, 0.0  ;;  %v3651_v47 = vadd.f32 %v3650_v55, %v3602_v36 }
 0x3d2   : > { %3848 = vmatmul.bf16.gmra.mxu2 %v13053_v56 }
 0x3d3   : > { %v3694_v19 = vpop.f32.mrf.mxu3 }
 0x3d4   : > { %v13356_v8 = vpop.f32.mrf.mxu0  ;;  %v3695_v44 = vadd.f32 %v3694_v19, %v3646_v22  ;;  %v13362_v10 = vpop.f32.mrf.mxu1 }
 0x3d5   : > { %v13345_v62 = vpop.f32.mrf.mxu2 }
 0x3d6   : > { %v3961_v38 = vmul.f32 0.2, %v3695_v44  ;;  %vm3929_vm2 = vcmp.gt.f32.partialorder %v3695_v44, 0.0  ;;  %v3654_v1 = vadd.f32 %v13345_v62, %v3605_v20 }
 0x3d8   : > { %3892 = vmatmul.bf16.gmra.mxu3 %v13172_v41  ;;  %v10756_v41 = vld [vmem:[%s14722_s8 + $0x60] sm:$0xff]  ;;  %v3993_v14 = vsel %vm3929_vm2, %v3695_v44, %v3961_v38  ;;  %v3561_v38 = vadd.f32 %v13298_v46, %v13320_v7 }
 0x3d9   : > { %4219 = vmatpush.bf16.msrb.mxu1 %v10756_v41 }
 0x3da   : > { %v3610_v26 = vadd.f32 %v13326_v51, %v3561_v38 }
 0x3db   : > { %v3697_v56 = vpop.f32.mrf.mxu3 }
 0x3dc   : > { %4175 = vmatmul.bf16.vlgmr.msrb.gmra.mxu0 %v4019_v18  ;;  %v13368_v31 = vpop.f32.mrf.mxu0  ;;  %v13378_v60 = vpop.f32.mrf.mxu1  ;;  %v3607_v18 = vadd.f32 %v13305_v3, %v3558_v32 }
 0x3dd   : > { %v3655_v45 = vpop.f32.mrf.mxu2  ;;  %4220 = vmatpush.bf16.msrb.mxu1 %v10755_v28 }
 0x3de   : > { %v3656_v34 = vadd.f32 %v3655_v45, %v3607_v18 }
 0x3e2   : > { %3853 = vmatmul.bf16.gmra.mxu2 %v13069_v24  ;;  %v3991_v24 = vsel %vm3927_vm3, %v3693_v15, %v3959_v53 }
 0x3e3   : > { %v3699_v25 = vpop.f32.mrf.mxu3  ;;  %v4021_v23 = vpack.c.bf16 %v3993_v14, %v3991_v24 }
 0x3e4   : > { %v3700_v12 = vadd.f32 %v3699_v25, %v3651_v47  ;;  %v13381_v21 = vpop.f32.mrf.mxu0  ;;  %v13391_v27 = vpop.f32.mrf.mxu1  ;;  %v3563_v25 = vadd.f32 %v13311_v37, %v13320_v7 }
 0x3e5   : > { %v13364_v29 = vpop.f32.mrf.mxu2 }
 0x3e6   : > { %v3965_v43 = vmul.f32 0.2, %v3700_v12  ;;  %vm3933_vm4 = vcmp.gt.f32.partialorder %v3700_v12, 0.0  ;;  %v3612_v14 = vadd.f32 %v13340_v2, %v3563_v25  ;;  %v3659_v46 = vadd.f32 %v13364_v29, %v3610_v26 }
 0x3e7   : > { %v3566_v29 = vadd.f32 %v13331_v11, %v13320_v7 }
 0x3e8   : > { %3897 = vmatmul.bf16.gmra.mxu3 %v13192_v61  ;;  %v3649_v61 = vadd.f32 %v13322_v30, %v3600_v42  ;;  %v3997_v30 = vsel %vm3933_vm4, %v3700_v12, %v3965_v43 }
 0x3e9   : > { %v3615_v32 = vadd.f32 %v13353_v40, %v3566_v29  ;;  %v3573_v40 = vadd.f32 %v13368_v31, %v13320_v7 }
 0x3ea   : > { %v3698_v19 = vadd.f32 %v3697_v56, %v3649_v61 }
 0x3eb   : > { %v3702_v0 = vpop.f32.mrf.mxu3 }
 0x3ec   : > { %4180 = vmatmul.bf16.gmra.mxu0 %v4021_v23  ;;  %v3963_v57 = vmul.f32 0.2, %v3698_v19  ;;  %vm3931_vm5 = vcmp.gt.f32.partialorder %v3698_v19, 0.0  ;;  %v13394_v56 = vpop.f32.mrf.mxu0  ;;  %v3703_v41 = vadd.f32 %v3702_v0, %v3654_v1  ;;  %v13402_v3 = vpop.f32.mrf.mxu1 }
 0x3ed   : > { %v3660_v17 = vpop.f32.mrf.mxu2 }
 0x3ee   : > { %v3995_v54 = vsel %vm3931_vm5, %v3698_v19, %v3963_v57  ;;  %v3967_v13 = vmul.f32 0.2, %v3703_v41  ;;  %vm3935_vm7 = vcmp.gt.f32.partialorder %v3703_v41, 0.0  ;;  %v3661_v0 = vadd.f32 %v3660_v17, %v3612_v14 }
 0x3ef   : > { %v3568_v17 = vadd.f32 %v13343_v33, %v13320_v7 }
 0x3f1   : > { %v3617_v57 = vadd.f32 %v13362_v10, %v3568_v17 }
 0x3f2   : > { %3858 = vmatmul.bf16.gmra.mxu2 %v13083_v5  ;;  %v4023_v5 = vpack.c.bf16 %v3997_v30, %v3995_v54 }
 0x3f3   : > { %v3704_v35 = vpop.f32.mrf.mxu3 }
 0x3f4   : > { %v3705_v22 = vadd.f32 %v3704_v35, %v3656_v34  ;;  %v13404_v15 = vpop.f32.mrf.mxu0  ;;  %v13415_v24 = vpop.f32.mrf.mxu1 }
 0x3f5   : > { %v13384_v55 = vpop.f32.mrf.mxu2 }
 0x3f6   : > { %v3969_v44 = vmul.f32 0.2, %v3705_v22  ;;  %vm3937_vm6 = vcmp.gt.f32.partialorder %v3705_v22, 0.0  ;;  %v3664_v33 = vadd.f32 %v13384_v55, %v3615_v32 }
 0x3f8   : > { %3902 = vmatmul.bf16.gmra.mxu3 %v13208_v4  ;;  %v10754_v4 = vld [vmem:[%s14722_s8 + $0x50] sm:$0xff]  ;;  %v4001_v62 = vsel %vm3937_vm6, %v3705_v22, %v3969_v44 }
 0x3f9   : > { %4221 = vmatpush.bf16.msrb.mxu1 %v10754_v4 }
 0x3fb   : > { %v3707_v48 = vpop.f32.mrf.mxu3 }
 0x3fc   : > { %4185 = vmatmul.bf16.gmra.mxu0 %v4023_v5  ;;  %v13420_v37 = vpop.f32.mrf.mxu0  ;;  %v3708_v42 = vadd.f32 %v3707_v48, %v3659_v46  ;;  %v3785_v61 = vpop.f32.mrf.mxu1 }
 0x3fd   : > { %v3665_v59 = vpop.f32.mrf.mxu2 }
 0x3fe   : > { %v3971_v51 = vmul.f32 0.2, %v3708_v42  ;;  %vm3939_vm9 = vcmp.gt.f32.partialorder %v3708_v42, 0.0  ;;  %v3666_v30 = vadd.f32 %v3665_v59, %v3617_v57  ;;  %v3571_v59 = vadd.f32 %v13356_v8, %v13320_v7 }
 0x3ff   : > { %v13454_v8 = vperm.slane %v13316_v52, 1 }
 0x400   : > { %v4003_v35 = vsel %vm3939_vm9, %v3708_v42, %v3971_v51  ;;  %v3620_v44 = vadd.f32 %v13378_v60, %v3571_v59  ;;  %v3578_v60 = vadd.f32 %v13394_v56, %v13320_v7 }
 0x401   : > { %v3737_v26 = vadd.f32 %v13404_v15, %v13454_v8 }
 0x402   : > { %3863 = vmatmul.bf16.gmra.mxu2 %v13099_v63  ;;  %v3999_v63 = vsel %vm3935_vm7, %v3703_v41, %v3967_v13  ;;  %v3622_v41 = vadd.f32 %v13391_v27, %v3573_v40 }
 0x403   : > { %v3709_v6 = vpop.f32.mrf.mxu3  ;;  %v4025_v16 = vpack.c.bf16 %v4001_v62, %v3999_v63  ;;  %v3786_v42 = vadd.f32 %v3785_v61, %v3737_v26 }
 0x404   : > { %v3710_v36 = vadd.f32 %v3709_v6, %v3661_v0  ;;  %v13431_v19 = vpop.f32.mrf.mxu0  ;;  %v3787_v11 = vpop.f32.mrf.mxu1 }
 0x405   : > { %v13406_v45 = vpop.f32.mrf.mxu2 }
 0x406   : > { %v3973_v2 = vmul.f32 0.2, %v3710_v36  ;;  %vm3941_vm8 = vcmp.gt.f32.partialorder %v3710_v36, 0.0 }
 0x408   : > { %3907 = vmatmul.bf16.gmra.mxu3 %v13228_v50  ;;  %v10753_v50 = vld [vmem:[%s14722_s8 + $0x48] sm:$0xff]  ;;  %v4005_v12 = vsel %vm3941_vm8, %v3710_v36, %v3973_v2  ;;  %v3627_v36 = vadd.f32 %v13415_v24, %v3578_v60  ;;  %v4316_v60 = vld [vmem:[%s13473_s28 + $0x18] sm:$0xff] }
 0x409   : > { %4222 = vmatpush.bf16.msrb.mxu1 %v10753_v50  ;;  %v4027_v43 = vpack.c.bf16 %v4005_v12, %v4003_v35  ;;  %v4313_v35 = vld [vmem:[%s13473_s28] sm:$0xff] }
 0x40a   : > { %4345 = vrot.lane.b32.xlu0 %v4313_v35, %s11333_s21 }
 0x40b   : > { %v3712_v53 = vpop.f32.mrf.mxu3 }
 0x40c   : > { %4190 = vmatmul.bf16.gmra.mxu0 %v4025_v16  ;;  %v3713_v48 = vadd.f32 %v3712_v53, %v3664_v33  ;;  %v13439_v18 = vpop.f32.mrf.mxu0  ;;  %v13447_v6 = vpop.f32.mrf.mxu1 }
 0x40d   : > { %v3670_v23 = vpop.f32.mrf.mxu2 }
 0x40e   : > { %v3975_v10 = vmul.f32 0.2, %v3713_v48  ;;  %vm3943_vm11 = vcmp.gt.f32.partialorder %v3713_v48, 0.0  ;;  %v3671_v25 = vadd.f32 %v3670_v23, %v3622_v41  ;;  %v3576_v23 = vadd.f32 %v13381_v21, %v13320_v7 }
 0x410   : > { %v4007_v4 = vsel %vm3943_vm11, %v3713_v48, %v3975_v10  ;;  %v3625_v56 = vadd.f32 %v13402_v3, %v3576_v23 }
 0x412   : > { %3868 = vmatmul.bf16.gmra.mxu2 %v13117_v58 }
 0x413   : > { %v3714_v47 = vpop.f32.mrf.mxu3 }
 0x414   : > { %v3715_v54 = vadd.f32 %v3714_v47, %v3666_v30  ;;  %v13450_v13 = vpop.f32.mrf.mxu0  ;;  %v3792_v27 = vpop.f32.mrf.mxu1  ;;  %v3739_v47 = vadd.f32 %v13420_v37, %v13454_v8 }
 0x415   : > { %v13424_v28 = vpop.f32.mrf.mxu2 }
 0x416   : > { %v3977_v20 = vmul.f32 0.2, %v3715_v54  ;;  %vm3945_vm10 = vcmp.gt.f32.partialorder %v3715_v54, 0.0  ;;  %v3788_v17 = vadd.f32 %v3787_v11, %v3739_v47  ;;  %v3674_v7 = vadd.f32 %v13424_v28, %v3625_v56 }
 0x418   : > { %3912 = vmatmul.bf16.gmra.mxu3 %v13246_v49  ;;  %v10752_v49 = vld [vmem:[%s14722_s8 + $0x40] sm:$0xff]  ;;  %v4009_v55 = vsel %vm3945_vm10, %v3715_v54, %v3977_v20 }
 0x419   : > { %4223 = vmatpush.bf16.msrb.mxu1 %v10752_v49  ;;  %v4029_v22 = vpack.c.bf16 %v4009_v55, %v4007_v4  ;;  %v3744_v55 = vadd.f32 %v13439_v18, %v13454_v8 }
 0x41b   : > { %v3717_v58 = vpop.f32.mrf.mxu3 }
 0x41c   : > { %4195 = vmatmul.bf16.gmra.mxu0 %v4027_v43  ;;  %v13460_v0 = vpop.f32.mrf.mxu0  ;;  %v3795_v12 = vpop.f32.mrf.mxu1 }
 0x41d   : > { %v3675_v39 = vpop.f32.mrf.mxu2 }
 0x41e   : > { %v3676_v15 = vadd.f32 %v3675_v39, %v3627_v36  ;;  %v3742_v39 = vadd.f32 %v13431_v19, %v13454_v8 }
 0x420   : > { %v3791_v40 = vadd.f32 %v13447_v6, %v3742_v39 }
 0x423   : > { %v3719_v5 = vpop.f32.mrf.mxu3 }
 0x424   : > { %v3720_v62 = vadd.f32 %v3719_v5, %v3671_v25  ;;  %v13475_v24 = vpop.f32.mrf.mxu0  ;;  %v3797_v48 = vpop.f32.mrf.mxu1  ;;  %v4315_v25 = vld [vmem:[%s13473_s28 + $0x10] sm:$0xff] }
 0x425   : > { %v3834_v34 = vpop.f32.mrf.mxu2  ;;  %4349 = vrot.lane.b32.xlu1 %v4315_v25, %s11333_s21 }
 0x426   : > { %v3981_v53 = vmul.f32 0.2, %v3720_v62  ;;  %vm3949_vm12 = vcmp.gt.f32.partialorder %v3720_v62, 0.0  ;;  %v3835_v2 = vadd.f32 %v3834_v34, %v3786_v42  ;;  %v4314_v34 = vld [vmem:[%s13473_s28 + $0x8] sm:$0xff] }
 0x427   : > { %4347 = vrot.lane.b32.xlu0 %v4314_v34, %s11333_s21  ;;  %v4320_v34 = vld [vmem:[%s13473_s28 + $0x38] sm:$0xff] }
 0x428   : > { %3917 = vmatmul.bf16.gmra.mxu3 %v13271_v9  ;;  %v3669_v9 = vadd.f32 %v13406_v45, %v3620_v44  ;;  %v4013_v45 = vsel %vm3949_vm12, %v3720_v62, %v3981_v53 }
 0x42a   : > { %v3718_v38 = vadd.f32 %v3717_v58, %v3669_v9 }
 0x42b   : > { %v3722_v1 = vpop.f32.mrf.mxu3 }
 0x42c   : > { %4200 = vmatmul.bf16.gmra.mxu0 %v4029_v22  ;;  %v3979_v16 = vmul.f32 0.2, %v3718_v38  ;;  %vm3947_vm13 = vcmp.gt.f32.partialorder %v3718_v38, 0.0  ;;  %v3723_v37 = vadd.f32 %v3722_v1, %v3674_v7  ;;  %v3753_v59 = vpop.f32.mrf.mxu0  ;;  %v3793_v1 = vadd.f32 %v3792_v27, %v3744_v55 }
 0x42d   : > { %v3836_v31 = vpop.f32.mrf.mxu2  ;;  %4351 = vrot.lane.b32.xlu1 %v4316_v60, %s11333_s21 }
 0x42e   : > { %v4011_v52 = vsel %vm3947_vm13, %v3718_v38, %v3979_v16  ;;  %v3837_v61 = vadd.f32 %v3836_v31, %v3788_v17  ;;  %v3983_v28 = vmul.f32 0.2, %v3723_v37  ;;  %vm3951_vm1 = vcmp.gt.f32.partialorder %v3723_v37, 0.0  ;;  %v3800_v31 = vpop.f32.mrf.mxu1 }
 0x42f   : > { %v4031_v46 = vpack.c.bf16 %v4013_v45, %v4011_v52  ;;  %v3749_v45 = vadd.f32 %v13460_v0, %v13454_v8  ;;  %4359 = vrot.lane.b32.xlu0 %v4320_v34, %s11333_s21 }
 0x430   : > { %v4015_v5 = vsel %vm3951_vm1, %v3723_v37, %v3983_v28 }
 0x433   : > { %v3724_v63 = vpop.f32.mrf.mxu3 }
 0x434   : > { %v3725_v21 = vadd.f32 %v3724_v63, %v3676_v15  ;;  %v3756_v6 = vpop.f32.mrf.mxu0  ;;  %v3747_v63 = vadd.f32 %v13450_v13, %v13454_v8 }
 0x435   : > { %v3839_v14 = vpop.f32.mrf.mxu2 }
 0x436   : > { %v3985_v58 = vmul.f32 0.2, %v3725_v21  ;;  %vm3953_vm14 = vcmp.gt.f32.partialorder %v3725_v21, 0.0  ;;  %v3840_v19 = vadd.f32 %v3839_v14, %v3791_v40  ;;  %v3796_v26 = vadd.f32 %v3795_v12, %v3747_v63  ;;  %v3802_v23 = vpop.f32.mrf.mxu1 }
 0x438   : > { %v4017_v49 = vsel %vm3953_vm14, %v3725_v21, %v3985_v58 }
 0x439   : > { %v4033_v10 = vpack.c.bf16 %v4017_v49, %v4015_v5  ;;  %v3757_v49 = vadd.f32 %v3756_v6, %v13454_v8 }
 0x43b   : > { %v3883_v50 = vpop.f32.mrf.mxu3 }
 0x43c   : > { %4205 = vmatmul.bf16.gmra.mxu0 %v4031_v46  ;;  %v3884_v29 = vadd.f32 %v3883_v50, %v3835_v2  ;;  %v3798_v46 = vadd.f32 %v3797_v48, %v3749_v45  ;;  %v3758_v36 = vpop.f32.mrf.mxu0  ;;  %v4319_v45 = vld [vmem:[%s13473_s28 + $0x30] sm:$0xff] }
 0x43d   : > { %v3841_v51 = vpop.f32.mrf.mxu2  ;;  %v3759_v55 = vadd.f32 %v3758_v36, %v13454_v8 }
 0x43e   : > { %v3956_v43 = vmul.f32 0.2, %v3884_v29  ;;  %vm3924_vm15 = vcmp.gt.f32.partialorder %v3884_v29, 0.0  ;;  %v3842_v41 = vadd.f32 %v3841_v51, %v3793_v1  ;;  %v3752_v51 = vadd.f32 %v13475_v24, %v13454_v8  ;;  %v3805_v17 = vpop.f32.mrf.mxu1 }
 0x43f   : > { %v3806_v40 = vadd.f32 %v3805_v17, %v3757_v49 }
 0x440   : > { %v3988_v33 = vsel %vm3924_vm15, %v3884_v29, %v3956_v43 }
 0x443   : > { %v3885_v3 = vpop.f32.mrf.mxu3 }
 0x444   : > { %v3886_v57 = vadd.f32 %v3885_v3, %v3837_v61  ;;  %v3761_v29 = vpop.f32.mrf.mxu0  ;;  %v3801_v61 = vadd.f32 %v3800_v31, %v3752_v51  ;;  %v3754_v3 = vadd.f32 %v3753_v59, %v13454_v8  ;;  %v4318_v31 = vld [vmem:[%s13473_s28 + $0x28] sm:$0xff]  ;;  %v4323_v51 = vld [vmem:[%s13473_s28 + $0x50] sm:$0xff] }
 0x445   : > { %v3844_v30 = vpop.f32.mrf.mxu2 }
 0x446   : > { %vm3926_vm0 = vcmp.gt.f32.partialorder %v3886_v57, 0.0  ;;  %v3958_v32 = vmul.f32 0.2, %v3886_v57  ;;  %v3845_v52 = vadd.f32 %v3844_v30, %v3796_v26  ;;  %v3803_v58 = vadd.f32 %v3802_v23, %v3754_v3  ;;  %v4322_v23 = vld [vmem:[%s13473_s28 + $0x48] sm:$0xff] }
 0x447   : > { %4363 = vrot.lane.b32.xlu1 %v4322_v23, %s11333_s21 }
 0x448   : > { %v3990_v54 = vsel %vm3926_vm0, %v3886_v57, %v3958_v32  ;;  %v3807_v57 = vpop.f32.mrf.mxu1 }
 0x449   : > { %v4020_v11 = vpack.c.bf16 %v3990_v54, %v3988_v33 }
 0x44b   : > { %v3888_v20 = vpop.f32.mrf.mxu3  ;;  %4224 = vmatmul.bf16.vlgmr.msrb.gmra.mxu1 %v4020_v11 }
 0x44c   : > { %4210 = vmatmul.bf16.gmra.mxu0 %v4033_v10  ;;  %v3889_v22 = vadd.f32 %v3888_v20, %v3840_v19  ;;  %v3763_v30 = vpop.f32.mrf.mxu0  ;;  %v4317_v10 = vld [vmem:[%s13473_s28 + $0x20] sm:$0xff] }
 0x44d   : > { %v3846_v4 = vpop.f32.mrf.mxu2  ;;  %4353 = vrot.lane.b32.xlu2 %v4317_v10, %s11333_s21 }
 0x44e   : > { %v3960_v9 = vmul.f32 0.2, %v3889_v22  ;;  %vm3928_vm2 = vcmp.gt.f32.partialorder %v3889_v22, 0.0  ;;  %v3847_v47 = vadd.f32 %v3846_v4, %v3798_v46 }
 0x44f   : > { %4365 = vrot.lane.b32.xlu1 %v4323_v51, %s11333_s21 }
 0x450   : > { %v3992_v53 = vsel %vm3928_vm2, %v3889_v22, %v3960_v9  ;;  %v3810_v59 = vpop.f32.mrf.mxu1  ;;  %v3808_v22 = vadd.f32 %v3807_v57, %v3759_v55  ;;  %v4321_v9 = vld [vmem:[%s13473_s28 + $0x40] sm:$0xff] }
 0x451   : > { %4361 = vrot.lane.b32.xlu0 %v4321_v9, %s11333_s21 }
 0x453   : > { %v3890_v44 = vpop.f32.mrf.mxu3 }
 0x454   : > { %v3891_v62 = vadd.f32 %v3890_v44, %v3842_v41  ;;  %v3766_v4 = vpop.f32.mrf.mxu0 }
 0x455   : > { %v3849_v38 = vpop.f32.mrf.mxu2  ;;  %4355 = vrot.lane.b32.xlu2 %v4318_v31, %s11333_s21 }
 0x456   : > { %vm3930_vm3 = vcmp.gt.f32.partialorder %v3891_v62, 0.0  ;;  %v3962_v18 = vmul.f32 0.2, %v3891_v62  ;;  %v3850_v35 = vadd.f32 %v3849_v38, %v3801_v61 }
 0x458   : > { %v3994_v27 = vsel %vm3930_vm3, %v3891_v62, %v3962_v18  ;;  %v3812_v18 = vpop.f32.mrf.mxu1 }
 0x459   : > { %v4022_v16 = vpack.c.bf16 %v3994_v27, %v3992_v53  ;;  %v3762_v53 = vadd.f32 %v3761_v29, %v13454_v8 }
 0x45b   : > { %v3893_v14 = vpop.f32.mrf.mxu3  ;;  %4229 = vmatmul.bf16.gmra.mxu1 %v4022_v16 }
 0x45c   : > { %v3894_v42 = vadd.f32 %v3893_v14, %v3845_v52  ;;  %v3768_v27 = vpop.f32.mrf.mxu0  ;;  %v3811_v52 = vadd.f32 %v3810_v59, %v3762_v53 }
 0x45d   : > { %v3851_v50 = vpop.f32.mrf.mxu2  ;;  %4357 = vrot.lane.b32.xlu2 %v4319_v45, %s11333_s21 }
 0x45e   : > { %v3964_v56 = vmul.f32 0.2, %v3894_v42  ;;  %vm3932_vm4 = vcmp.gt.f32.partialorder %v3894_v42, 0.0  ;;  %v3852_v28 = vadd.f32 %v3851_v50, %v3803_v58  ;;  %v3764_v50 = vadd.f32 %v3763_v30, %v13454_v8 }
 0x460   : > { %v3996_v0 = vsel %vm3932_vm4, %v3894_v42, %v3964_v56  ;;  %v3813_v36 = vadd.f32 %v3812_v18, %v3764_v50  ;;  %v3815_v42 = vpop.f32.mrf.mxu1 }
 0x463   : > { %v3895_v13 = vpop.f32.mrf.mxu3 }
 0x464   : > { %v3896_v15 = vadd.f32 %v3895_v13, %v3847_v47  ;;  %v3771_v56 = vpop.f32.mrf.mxu0 }
 0x465   : > { %v3854_v7 = vpop.f32.mrf.mxu2 }
 0x466   : > { %vm3934_vm5 = vcmp.gt.f32.partialorder %v3896_v15, 0.0  ;;  %v3966_v2 = vmul.f32 0.2, %v3896_v15  ;;  %v3855_v1 = vadd.f32 %v3854_v7, %v3806_v40  ;;  %v3767_v7 = vadd.f32 %v3766_v4, %v13454_v8 }
 0x468   : > { %v3998_v12 = vsel %vm3934_vm5, %v3896_v15, %v3966_v2  ;;  %v3817_v61 = vpop.f32.mrf.mxu1  ;;  %v3816_v58 = vadd.f32 %v3815_v42, %v3767_v7 }
 0x469   : > { %v4024_v21 = vpack.c.bf16 %v3998_v12, %v3996_v0 }
 0x46b   : > { %v3898_v37 = vpop.f32.mrf.mxu3  ;;  %4234 = vmatmul.bf16.gmra.mxu1 %v4024_v21 }
 0x46c   : > { %v3899_v43 = vadd.f32 %v3898_v37, %v3850_v35  ;;  %v3773_v57 = vpop.f32.mrf.mxu0 }
 0x46d   : > { %v3856_v32 = vpop.f32.mrf.mxu2 }
 0x46e   : > { %v3968_v39 = vmul.f32 0.2, %v3899_v43  ;;  %vm3936_vm6 = vcmp.gt.f32.partialorder %v3899_v43, 0.0  ;;  %v3857_v44 = vadd.f32 %v3856_v32, %v3808_v22 }
 0x470   : > { %v4000_v11 = vsel %vm3936_vm6, %v3899_v43, %v3968_v39  ;;  %v3769_v43 = vadd.f32 %v3768_v27, %v13454_v8  ;;  %v3820_v49 = vpop.f32.mrf.mxu1 }
 0x472   : > { %v3818_v32 = vadd.f32 %v3817_v61, %v3769_v43 }
 0x473   : > { %v3900_v24 = vpop.f32.mrf.mxu3 }
 0x474   : > { %v3901_v33 = vadd.f32 %v3900_v24, %v3852_v28 }
 0x475   : > { %v3859_v19 = vpop.f32.mrf.mxu2 }
 0x476   : > { %vm3938_vm7 = vcmp.gt.f32.partialorder %v3901_v33, 0.0  ;;  %v3970_v54 = vmul.f32 0.2, %v3901_v33  ;;  %v3860_v46 = vadd.f32 %v3859_v19, %v3811_v52  ;;  %v3774_v19 = vadd.f32 %v3773_v57, %v13454_v8 }
 0x478   : > { %v4002_v48 = vsel %vm3938_vm7, %v3901_v33, %v3970_v54 }
 0x479   : > { %v4026_v5 = vpack.c.bf16 %v4002_v48, %v4000_v11  ;;  %v4176_v48 = vpop.f32.mrf.mxu0 }
 0x47b   : > { %v3903_v20 = vpop.f32.mrf.mxu3  ;;  %4239 = vmatmul.bf16.gmra.mxu1 %v4026_v5 }
 0x47c   : > { %v3904_v41 = vadd.f32 %v3903_v20, %v3855_v1  ;;  %v3772_v20 = vadd.f32 %v3771_v56, %v13454_v8  ;;  %v3822_v1 = vpop.f32.mrf.mxu1 }
 0x47d   : > { %v3861_v63 = vpop.f32.mrf.mxu2 }
 0x47e   : > { %v3972_v62 = vmul.f32 0.2, %v3904_v41  ;;  %vm3940_vm8 = vcmp.gt.f32.partialorder %v3904_v41, 0.0  ;;  %v3862_v15 = vadd.f32 %v3861_v63, %v3813_v36  ;;  %v3821_v59 = vadd.f32 %v3820_v49, %v3772_v20 }
 0x480   : > { %v4004_v16 = vsel %vm3940_vm8, %v3904_v41, %v3972_v62  ;;  %v3823_v41 = vadd.f32 %v3822_v1, %v3774_v19  ;;  %v4324_v62 = vld [vmem:[%s13473_s28 + $0x58] sm:$0xff] }
 0x481   : > { %4367 = vrot.lane.b32.xlu2 %v4324_v62, %s11333_s21 }
 0x483   : > { %v3905_v25 = vpop.f32.mrf.mxu3 }
 0x484   : > { %v3906_v6 = vadd.f32 %v3905_v25, %v3857_v44  ;;  %v4178_v44 = vpop.f32.mrf.mxu0 }
 0x485   : > { %v3864_v13 = vpop.f32.mrf.mxu2 }
 0x486   : > { %vm3942_vm9 = vcmp.gt.f32.partialorder %v3906_v6, 0.0  ;;  %v3974_v38 = vmul.f32 0.2, %v3906_v6  ;;  %v3865_v28 = vadd.f32 %v3864_v13, %v3816_v58  ;;  %v4346_v13 = vpop.permute.xlu0 %4345 }
 0x488   : > { %v4006_v14 = vsel %vm3942_vm9, %v3906_v6, %v3974_v38 }
 0x489   : > { %v4028_v60 = vpack.c.bf16 %v4006_v14, %v4004_v16  ;;  %v13524_v16 = vld [vmem:[%s14723_s9] ss:$0 sm:$0xff]  ;;  %v4326_v14 = vld [vmem:[%s13473_s28 + $0x68] sm:$0xff] }
 0x48a   : > { %4371 = vrot.lane.b32.xlu2 %v4326_v14, %s11333_s21  ;;  %v4179_v36 = vadd.f32 %v13524_v16, %v4178_v44 }
 0x48b   : > { %v3908_v26 = vpop.f32.mrf.mxu3  ;;  %4244 = vmatmul.bf16.gmra.mxu1 %v4028_v60 }
 0x48c   : > { %v3909_v47 = vadd.f32 %v3908_v26, %v3860_v46  ;;  %v4181_v27 = vpop.f32.mrf.mxu0  ;;  %v4177_v26 = vadd.f32 %v13524_v16, %v4176_v48 }
 0x48d   : > { %v3866_v3 = vpop.f32.mrf.mxu2 }
 0x48e   : > { %v3976_v17 = vmul.f32 0.2, %v3909_v47  ;;  %vm3944_vm10 = vcmp.gt.f32.partialorder %v3909_v47, 0.0  ;;  %v3867_v30 = vadd.f32 %v3866_v3, %v3818_v32 }
 0x490   : > { %v4008_v21 = vsel %vm3944_vm10, %v3909_v47, %v3976_v17  ;;  %v4182_v17 = vadd.f32 %v13524_v16, %v4181_v27 }
 0x493   : > { %v3910_v2 = vpop.f32.mrf.mxu3 }
 0x494   : > { %v3911_v0 = vadd.f32 %v3910_v2, %v3862_v15  ;;  %v4183_v60 = vpop.f32.mrf.mxu0 }
 0x495   : > { %v3869_v11 = vpop.f32.mrf.mxu2  ;;  %v4184_v3 = vadd.f32 %v13524_v16, %v4183_v60 }
 0x496   : > { %vm3946_vm11 = vcmp.gt.f32.partialorder %v3911_v0, 0.0  ;;  %v3978_v12 = vmul.f32 0.2, %v3911_v0  ;;  %v3870_v4 = vadd.f32 %v3869_v11, %v3821_v59 }
 0x497   : > { %v4350_v57 = vpop.permute.xlu1 %4349 }
 0x498   : > { %v4010_v29 = vsel %vm3946_vm11, %v3911_v0, %v3978_v12 }
 0x499   : > { %v4030_v37 = vpack.c.bf16 %v4010_v29, %v4008_v21  ;;  %v4348_v21 = vpop.permute.xlu0 %4347 }
 0x49b   : > { %v3913_v35 = vpop.f32.mrf.mxu3  ;;  %4249 = vmatmul.bf16.gmra.mxu1 %v4030_v37 }
 0x49c   : > { %v3914_v24 = vadd.f32 %v3913_v35, %v3865_v28  ;;  %v4186_v46 = vpop.f32.mrf.mxu0 }
 0x49d   : > { %v3871_v22 = vpop.f32.mrf.mxu2 }
 0x49e   : > { %v3980_v33 = vmul.f32 0.2, %v3914_v24  ;;  %vm3948_vm12 = vcmp.gt.f32.partialorder %v3914_v24, 0.0  ;;  %v3872_v31 = vadd.f32 %v3871_v22, %v3823_v41 }
 0x49f   : > { %v4352_v48 = vpop.permute.xlu1 %4351 }
 0x4a0   : > { %v4012_v10 = vsel %vm3948_vm12, %v3914_v24, %v3980_v33 }
 0x4a3   : > { %v3915_v39 = vpop.f32.mrf.mxu3 }
 0x4a4   : > { %v3916_v54 = vadd.f32 %v3915_v39, %v3867_v30  ;;  %v4188_v0 = vpop.f32.mrf.mxu0  ;;  %v4325_v30 = vld [vmem:[%s13473_s28 + $0x60] sm:$0xff]  ;;  %v4187_v39 = vadd.f32 %v13524_v16, %v4186_v46 }
 0x4a6   : > { %vm3950_vm13 = vcmp.gt.f32.partialorder %v3916_v54, 0.0  ;;  %v3982_v5 = vmul.f32 0.2, %v3916_v54 }
 0x4a7   : > { %v4354_v59 = vpop.permute.xlu2 %4353 }
 0x4a8   : > { %v4014_v34 = vsel %vm3950_vm13, %v3916_v54, %v3982_v5 }
 0x4a9   : > { %v4032_v40 = vpack.c.bf16 %v4014_v34, %v4012_v10 }
 0x4ab   : > { %v3918_v55 = vpop.f32.mrf.mxu3  ;;  %4254 = vmatmul.bf16.gmra.mxu1 %v4032_v40 }
 0x4ac   : > { %v3919_v25 = vadd.f32 %v3918_v55, %v3870_v4  ;;  %v4191_v28 = vpop.f32.mrf.mxu0  ;;  %v4189_v55 = vadd.f32 %v13524_v16, %v4188_v0 }
 0x4ae   : > { %v3984_v6 = vmul.f32 0.2, %v3919_v25  ;;  %vm3952_vm14 = vcmp.gt.f32.partialorder %v3919_v25, 0.0 }
 0x4b0   : > { %v4016_v63 = vsel %vm3952_vm14, %v3919_v25, %v3984_v6  ;;  %v4356_v6 = vpop.permute.xlu2 %4355 }
 0x4b3   : > { %v3920_v9 = vpop.f32.mrf.mxu3 }
 0x4b4   : > { %v3921_v18 = vadd.f32 %v3920_v9, %v3872_v31  ;;  %v4193_v5 = vpop.f32.mrf.mxu0  ;;  %v4192_v31 = vadd.f32 %v13524_v16, %v4191_v28 }
 0x4b6   : > { %vm3954_vm15 = vcmp.gt.f32.partialorder %v3921_v18, 0.0  ;;  %v3986_v38 = vmul.f32 0.2, %v3921_v18 }
 0x4b8   : > { %v4018_v8 = vsel %vm3954_vm15, %v3921_v18, %v3986_v38 }
 0x4b9   : > { %v4034_v53 = vpack.c.bf16 %v4018_v8, %v4016_v63 }
 0x4bb   : > { %4259 = vmatmul.bf16.gmra.mxu1 %v4034_v53  ;;  %v4194_v53 = vadd.f32 %v13524_v16, %v4193_v5 }
 0x4bc   : > { %v4196_v44 = vpop.f32.mrf.mxu0 }
 0x4c4   : > { %v4198_v27 = vpop.f32.mrf.mxu0 }
 0x4c8   : > { %v4225_v45 = vpop.f32.mrf.mxu1 }
 0x4c9   : > { %v13535_v23 = vadd.f32 %v4225_v45, %v4177_v26  ;;  %v4358_v45 = vpop.permute.xlu2 %4357 }
 0x4cb   : > { %v4265_v52 = vmul.f32 0.5, %v13535_v23  ;;  %8466 = vst [vmem:[%s13533_s17] sm:$0xff] %v13535_v23 }
 0x4cd   : > { %v4281_v50 = vmul.f32 1.442695, %v4265_v52 }
 0x4cf   : > { %11084 = vpow2.f32 %v4281_v50 }
 0x4d0   : > { %v4227_v42 = vpop.f32.mrf.mxu1 }
 0x4d1   : > { %v13541_v47 = vadd.f32 %v4227_v42, %v4179_v36  ;;  %v4197_v36 = vadd.f32 %v13524_v16, %v4196_v44 }
 0x4d3   : > { %v4266_v56 = vmul.f32 0.5, %v13541_v47  ;;  %8467 = vst [vmem:[%s13533_s17 + $0x8] sm:$0xff] %v13541_v47 }
 0x4d5   : > { %v11085_v15 = vpop.eup %11084  ;;  %v4283_v2 = vmul.f32 1.442695, %v4266_v56  ;;  %v4360_v56 = vpop.permute.xlu0 %4359 }
 0x4d6   : > { %v4393_v51 = vmul.f32 %v11085_v15, %v4346_v13  ;;  %v4201_v15 = vpop.f32.mrf.mxu0 }
 0x4d7   : > { %11086 = vpow2.f32 %v4283_v2  ;;  %v4202_v28 = vadd.f32 %v13524_v16, %v4201_v15 }
 0x4d8   : > { %v4230_v12 = vpop.f32.mrf.mxu1  ;;  %4425 = vrot.lane.b32.xlu0 %v4393_v51, %s11334_s18 }
 0x4d9   : > { %v13548_v7 = vadd.f32 %v4230_v12, %v4182_v17  ;;  %v4199_v12 = vadd.f32 %v13524_v16, %v4198_v27 }
 0x4db   : > { %8468 = vst [vmem:[%s13533_s17 + $0x10] sm:$0xff] %v13548_v7  ;;  %v4267_v37 = vmul.f32 0.5, %v13548_v7 }
 0x4dd   : > { %v11087_v29 = vpop.eup %11086  ;;  %v4285_v58 = vmul.f32 1.442695, %v4267_v37 }
 0x4de   : > { %v4394_v61 = vmul.f32 %v11087_v29, %v4348_v21 }
 0x4df   : > { %11088 = vpow2.f32 %v4285_v58 }
 0x4e0   : > { %v4232_v35 = vpop.f32.mrf.mxu1  ;;  %4427 = vrot.lane.b32.xlu1 %v4394_v61, %s11334_s18  ;;  %v4362_v61 = vpop.permute.xlu0 %4361 }
 0x4e1   : > { %v13555_v43 = vadd.f32 %v4232_v35, %v4184_v3  ;;  %v4203_v3 = vpop.f32.mrf.mxu0 }
 0x4e3   : > { %v4268_v32 = vmul.f32 0.5, %v13555_v43  ;;  %8469 = vst [vmem:[%s13533_s17 + $0x18] sm:$0xff] %v13555_v43 }
 0x4e5   : > { %v4287_v24 = vmul.f32 1.442695, %v4268_v32  ;;  %v11089_v49 = vpop.eup %11088 }
 0x4e6   : > { %v4395_v34 = vmul.f32 %v11089_v49, %v4350_v57 }
 0x4e7   : > { %11090 = vpow2.f32 %v4287_v24 }
 0x4e8   : > { %v4235_v33 = vpop.f32.mrf.mxu1  ;;  %4369 = vrot.lane.b32.xlu1 %v4325_v30, %s11333_s21  ;;  %v4364_v30 = vpop.permute.xlu1 %4363 }
 0x4e9   : > { %v13563_v54 = vadd.f32 %v4235_v33, %v4187_v39  ;;  %v4206_v33 = vpop.f32.mrf.mxu0 }
 0x4eb   : > { %v4269_v11 = vmul.f32 0.5, %v13563_v54  ;;  %8470 = vst [vmem:[%s13533_s17 + $0x20] sm:$0xff] %v13563_v54 }
 0x4ed   : > { %v11091_v20 = vpop.eup %11090  ;;  %v4289_v10 = vmul.f32 1.442695, %v4269_v11  ;;  %v4204_v11 = vadd.f32 %v13524_v16, %v4203_v3 }
 0x4ee   : > { %v4396_v40 = vmul.f32 %v11091_v20, %v4352_v48  ;;  %v4207_v20 = vadd.f32 %v13524_v16, %v4206_v33 }
 0x4ef   : > { %11092 = vpow2.f32 %v4289_v10 }
 0x4f0   : > { %v4237_v19 = vpop.f32.mrf.mxu1  ;;  %4431 = vrot.lane.b32.xlu2 %v4396_v40, %s11334_s18  ;;  %4429 = vrot.lane.b32.xlu1 %v4395_v34, %s11334_s18 }
 0x4f1   : > { %v13571_v4 = vadd.f32 %v4237_v19, %v4189_v55  ;;  %v4208_v10 = vpop.f32.mrf.mxu0  ;;  %v11335_v55 = vmov 1  }
 0x4f2   : > { %11060 = vset.pattern.permute.xlu2 %v11335_v55  ;;  %v4209_v19 = vadd.f32 %v13524_v16, %v4208_v10  ;;  %v10822_v10 = vld [vmem:[#allocation4 + $0x1ec] sm:$0xf0] }
 0x4f3   : > { %v4270_v1 = vmul.f32 0.5, %v13571_v4  ;;  %8471 = vst [vmem:[%s13533_s17 + $0x28] sm:$0xff] %v13571_v4 }
 0x4f5   : > { %v11093_v22 = vpop.eup %11092  ;;  %v4291_v41 = vmul.f32 1.442695, %v4270_v1 }
 0x4f6   : > { %v4397_v25 = vmul.f32 %v11093_v22, %v4354_v59  ;;  %v11336_v59 = vmov 0  }
 0x4f7   : > { %11094 = vpow2.f32 %v4291_v41  ;;  %11059 = vset.pattern.permute.xlu0 %v11336_v59  ;;  %11061 = vset.pattern.permute.xlu1 %v11336_v59 }
 0x4f8   : > { %v4240_v9 = vpop.f32.mrf.mxu1  ;;  %4433 = vrot.lane.b32.xlu2 %v4397_v25, %s11334_s18 }
 0x4f9   : > { %v13578_v62 = vadd.f32 %v4240_v9, %v4192_v31  ;;  %v4211_v41 = vpop.f32.mrf.mxu0 }
 0x4fa   : > { %v4212_v44 = vadd.f32 %v13524_v16, %v4211_v41 }
 0x4fb   : > { %v4271_v18 = vmul.f32 0.5, %v13578_v62  ;;  %8472 = vst [vmem:[%s13533_s17 + $0x30] sm:$0xff] %v13578_v62 }
 0x4fd   : > { %v11095_v38 = vpop.eup %11094  ;;  %v4293_v63 = vmul.f32 1.442695, %v4271_v18 }
 0x4fe   : > { %v4398_v8 = vmul.f32 %v11095_v38, %v4356_v6 }
 0x4ff   : > { %11096 = vpow2.f32 %v4293_v63  ;;  %v4366_v63 = vpop.permute.xlu1 %4365 }
 0x500   : > { %v4242_v14 = vpop.f32.mrf.mxu1  ;;  %4435 = vrot.lane.b32.xlu0 %v4398_v8, %s11334_s18 }
 0x501   : > { %v13585_v60 = vadd.f32 %v4242_v14, %v4194_v53  ;;  %v4213_v9 = vpop.f32.mrf.mxu0  ;;  %v4328_v14 = vld [vmem:[%s13473_s28 + $0x78] sm:$0xff] }
 0x502   : > { %v4214_v6 = vadd.f32 %v13524_v16, %v4213_v9  ;;  %v4368_v16 = vpop.permute.xlu2 %4367 }
 0x503   : > { %v4272_v26 = vmul.f32 0.5, %v13585_v60  ;;  %8473 = vst [vmem:[%s13533_s17 + $0x38] sm:$0xff] %v13585_v60 }
 0x505   : > { %v11097_v52 = vpop.eup %11096  ;;  %v4295_v50 = vmul.f32 1.442695, %v4272_v26 }
 0x506   : > { %v4399_v46 = vmul.f32 %v11097_v52, %v4358_v45 }
 0x507   : > { %11098 = vpow2.f32 %v4295_v50 }
 0x508   : > { %v4245_v42 = vpop.f32.mrf.mxu1  ;;  %4437 = vrot.lane.b32.xlu2 %v4399_v46, %s11334_s18 }
 0x509   : > { %v13592_v13 = vadd.f32 %v4245_v42, %v4197_v36 }
 0x50a   : > { %v13646_v36 = vpop.permute.xlu2 %4371 }
 0x50b   : > { %v4273_v2 = vmul.f32 0.5, %v13592_v13  ;;  %8474 = vst [vmem:[%s13533_s17 + $0x40] sm:$0xff] %v13592_v13 }
 0x50d   : > { %v11099_v51 = vpop.eup %11098  ;;  %v4297_v17 = vmul.f32 1.442695, %v4273_v2 }
 0x50e   : > { %v4400_v0 = vmul.f32 %v11099_v51, %v4360_v56  ;;  %v4327_v56 = vld [vmem:[%s13473_s28 + $0x70] sm:$0xff] }
 0x50f   : > { %11100 = vpow2.f32 %v4297_v17 }
 0x510   : > { %v4247_v21 = vpop.f32.mrf.mxu1  ;;  %4439 = vrot.lane.b32.xlu0 %v4400_v0, %s11334_s18 }
 0x511   : > { %v13599_v29 = vadd.f32 %v4247_v21, %v4199_v12 }
 0x513   : > { %v4274_v37 = vmul.f32 0.5, %v13599_v29  ;;  %8475 = vst [vmem:[%s13533_s17 + $0x48] sm:$0xff] %v13599_v29 }
 0x515   : > { %v11101_v35 = vpop.eup %11100  ;;  %v4299_v58 = vmul.f32 1.442695, %v4274_v37 }
 0x516   : > { %v4401_v57 = vmul.f32 %v11101_v35, %v4362_v61 }
 0x517   : > { %11102 = vpow2.f32 %v4299_v58 }
 0x518   : > { %v4250_v32 = vpop.f32.mrf.mxu1  ;;  %4441 = vrot.lane.b32.xlu1 %v4401_v57, %s11334_s18 }
 0x519   : > { %v13606_v24 = vadd.f32 %v4250_v32, %v4202_v28 }
 0x51b   : > { %8476 = vst [vmem:[%s13533_s17 + $0x50] sm:$0xff] %v13606_v24  ;;  %v4275_v45 = vmul.f32 0.5, %v13606_v24 }
 0x51d   : > { %v11103_v39 = vpop.eup %11102  ;;  %v4301_v46 = vmul.f32 1.442695, %v4275_v45 }
 0x51e   : > { %v4402_v49 = vmul.f32 %v11103_v39, %v4364_v30 }
 0x51f   : > { %11104 = vpow2.f32 %v4301_v46 }
 0x520   : > { %v4252_v48 = vpop.f32.mrf.mxu1  ;;  %4443 = vrot.lane.b32.xlu2 %v4402_v49, %s11334_s18 }
 0x521   : > { %v13612_v5 = vadd.f32 %v4252_v48, %v4204_v11  ;;  %v10790_v11 = vld [vmem:[#allocation4 + $0xec] sm:$0xf0]  ;;  %v9848_v48 = vld [vmem:[#allocation4 + $0x1e0] sm:$0xf] }
 0x522   : > { %v9849_v41 = vor.u32 %v10822_v10, %v9848_v48  ;;  %v10772_v48 = vld [vmem:[#allocation4 + $0x64] sm:$0xf] }
 0x523   : > { %8477 = vst [vmem:[%s13533_s17 + $0x58] sm:$0xff] %v13612_v5  ;;  %v4276_v52 = vmul.f32 0.5, %v13612_v5 }
 0x524   : > { %5337 = vmatpush.bf16.msra.mxu3 %v9849_v41 }
 0x525   : > { %v11105_v2 = vpop.eup %11104 }
 0x526   : > { %v4403_v17 = vmul.f32 %v11105_v2, %v4366_v63  ;;  %v9690_v2 = vld [vmem:[#allocation4 + $0xb0] sm:$0xf0] }
 0x528   : > { %v4255_v34 = vpop.f32.mrf.mxu1 }
 0x529   : > { %v13617_v40 = vadd.f32 %v4255_v34, %v4207_v20  ;;  %v10788_v34 = vld [vmem:[#allocation4 + $0xe4] sm:$0xf] }
 0x52b   : > { %8478 = vst [vmem:[%s13533_s17 + $0x60] sm:$0xff] %v13617_v40  ;;  %v4277_v12 = vmul.f32 0.5, %v13617_v40 }
 0x530   : > { %v4257_v1 = vpop.f32.mrf.mxu1 }
 0x531   : > { %v13625_v22 = vadd.f32 %v4257_v1, %v4209_v19  ;;  %v9722_v19 = vld [vmem:[#allocation4 + $0xf0] sm:$0xf0] }
 0x533   : > { %8479 = vst [vmem:[%s13533_s17 + $0x68] sm:$0xff] %v13625_v22  ;;  %v4278_v32 = vmul.f32 0.5, %v13625_v22 }
 0x535   : > { %v4307_v30 = vmul.f32 1.442695, %v4278_v32  ;;  %v10808_v32 = vld [vmem:[#allocation4 + $0x184] sm:$0xf] }
 0x538   : > { %v4260_v25 = vpop.f32.mrf.mxu1 }
 0x539   : > { %v13630_v31 = vadd.f32 %v4260_v25, %v4212_v44  ;;  %v10820_v44 = vld [vmem:[#allocation4 + $0x1e4] sm:$0xf]  ;;  %v9850_v25 = vld [vmem:[#allocation4 + $0x1f0] sm:$0xf0] }
 0x53b   : > { %8480 = vst [vmem:[%s13533_s17 + $0x70] sm:$0xff] %v13630_v31 }
 0x540   : > { %v4262_v18 = vpop.f32.mrf.mxu1 }
 0x541   : > { %v13635_v38 = vadd.f32 %v4262_v18, %v4214_v6  ;;  %v9704_v6 = vld [vmem:[#allocation4 + $0xc0] sm:$0xf]  ;;  %v10786_v18 = vld [vmem:[#allocation4 + $0xcc] sm:$0xf0] }
 0x542   : > { %v9705_v63 = vor.u32 %v10786_v18, %v9704_v6 }
 0x543   : > { %8481 = vst [vmem:[%s13533_s17 + $0x78] sm:$0xff] %v13635_v38  ;;  %s14863_s17 = sld [smem:[#allocation37_spill]] }
 0x54a   : > { %v4426_v8 = vpop.permute.xlu0 %4425  ;;  %v4432_v15 = vpop.permute.xlu2 %4431 }
 0x54b   : > { %v4473_v53 = vadd.f32 %v4426_v8, %v13535_v23  ;;  %v4303_v23 = vmul.f32 1.442695, %v4276_v52  ;;  %v4476_v21 = vadd.f32 %v4432_v15, %v13555_v43  ;;  %v9832_v8 = vld [vmem:[#allocation4 + $0x1c0] sm:$0xf]  ;;  %v10816_v52 = vld [vmem:[#allocation4 + $0x1c4] sm:$0xf] }
 0x54c   : > { %v10780_v15 = vld [vmem:[#allocation4 + $0xa4] sm:$0xf] }
 0x54d   : > { %4611 = vperm.xlu2 %11060, %v4473_v53   ;;  %4493 = vperm.xlu0 %11059, %v4473_v53   ;;  %11106 = vpow2.f32 %v4303_v23  ;;  %v10818_v53 = vld [vmem:[#allocation4 + $0x1cc] sm:$0xf0]  ;;  %v9688_v23 = vld [vmem:[#allocation4 + $0xa0] sm:$0xf] }
 0x552   : > { %v4428_v27 = vpop.permute.xlu1 %4427  ;;  %v4434_v37 = vpop.permute.xlu2 %4433 }
 0x553   : > { %v4474_v26 = vadd.f32 %v4428_v27, %v13541_v47  ;;  %v11107_v51 = vpop.eup %11106  ;;  %v4477_v3 = vadd.f32 %v4434_v37, %v13563_v54  ;;  %v4280_v27 = vmul.f32 0.5, %v13635_v38 }
 0x554   : > { %v4404_v0 = vmul.f32 %v11107_v51, %v4368_v16  ;;  %v9706_v16 = vld [vmem:[#allocation4 + $0xd0] sm:$0xf0] }
 0x555   : > { %4498 = vperm.xlu1 %11061, %v4474_v26   ;;  %4375 = vrot.lane.b32.xlu2 %v4328_v14, %s11333_s21  ;;  %v9833_v14 = vor.u32 %v10818_v53, %v9832_v8  ;;  %v4311_v51 = vmul.f32 1.442695, %v4280_v27  ;;  %v10768_v8 = vld [vmem:[#allocation4 + $0x44] sm:$0xf]  ;;  %v9642_v53 = vld [vmem:[#allocation4 + $0x50] sm:$0xf0] }
 0x557   : > { %5338 = vmatpush.bf16.msra.mxu3 %v9833_v14  ;;  %v9645_v14 = vor.u32 %v10768_v8, %v9642_v53 }
 0x55a   : > { %v4370_v50 = vpop.permute.xlu1 %4369 }
 0x55d   : > { %11062 = vset.pattern.permute.xlu1 %v11335_v55 }
 0x55e   : > { %4615 = vperm.xlu1 %11062, %v4474_v26   ;;  %v10784_v26 = vld [vmem:[#allocation4 + $0xc4] sm:$0xf] }
 0x55f   : > { %v9709_v45 = vor.u32 %v10784_v26, %v9706_v16  ;;  %v10800_v26 = vld [vmem:[#allocation4 + $0x144] sm:$0xf]  ;;  %v9770_v16 = vld [vmem:[#allocation4 + $0x150] sm:$0xf0] }
 0x562   : > { %v4430_v47 = vpop.permute.xlu1 %4429  ;;  %v4438_v57 = vpop.permute.xlu2 %4437 }
 0x563   : > { %v4475_v42 = vadd.f32 %v4430_v47, %v13548_v7  ;;  %v4305_v7 = vmul.f32 1.442695, %v4277_v12  ;;  %v4479_v28 = vadd.f32 %v4438_v57, %v13578_v62  ;;  %v9720_v62 = vld [vmem:[#allocation4 + $0xe0] sm:$0xf]  ;;  %v10812_v12 = vld [vmem:[#allocation4 + $0x1a4] sm:$0xf] }
 0x564   : > { %v9721_v20 = vor.u32 %v10790_v11, %v9720_v62  ;;  %v9816_v47 = vld [vmem:[#allocation4 + $0x1a0] sm:$0xf]  ;;  %v10776_v57 = vld [vmem:[#allocation4 + $0x84] sm:$0xf]  ;;  %v10806_v11 = vld [vmem:[#allocation4 + $0x16c] sm:$0xf0] }
 0x565   : > { %4619 = vperm.xlu2 %11060, %v4475_v42   ;;  %4503 = vperm.xlu0 %11059, %v4475_v42   ;;  %11108 = vpow2.f32 %v4305_v7 }
 0x566   : > { %4373 = vrot.lane.b32.xlu1 %v4327_v56, %s11333_s21  ;;  %11110 = vpow2.f32 %v4307_v30  ;;  %5288 = vmatpush.bf16.msra.mxu2 %v9721_v20  ;;  %v10814_v56 = vld [vmem:[#allocation4 + $0x1ac] sm:$0xf0]  ;;  %v9802_v30 = vld [vmem:[#allocation4 + $0x190] sm:$0xf0]  ;;  %s14811_s21 = sld [smem:[#allocation36_spill]] }
 0x567   : > { %11063 = vset.pattern.permute.xlu1 %v11336_v59  ;;  %11112 = vpow2.f32 %v4311_v51  ;;  %v9658_v20 = vld [vmem:[#allocation4 + $0x70] sm:$0xf0] }
 0x568   : > { %v9754_v51 = vld [vmem:[#allocation4 + $0x130] sm:$0xf0] }
 0x56a   : > { %5289 = vmatpush.bf16.msra.mxu2 %v9705_v63  ;;  %v10802_v63 = vld [vmem:[#allocation4 + $0x14c] sm:$0xf0] }
 0x56b   : > { %v11109_v58 = vpop.eup %11108 }
 0x56c   : > { %v4405_v43 = vmul.f32 %v11109_v58, %v4370_v50  ;;  %v11111_v1 = vpop.eup %11110  ;;  %v9834_v50 = vld [vmem:[#allocation4 + $0x1d0] sm:$0xf0] }
 0x56d   : > { %4445 = vrot.lane.b32.xlu2 %v4403_v17, %s11334_s18  ;;  %4447 = vrot.lane.b32.xlu0 %v4404_v0, %s11334_s18  ;;  %v4406_v9 = vmul.f32 %v11111_v1, %v13646_v36  ;;  %v9837_v46 = vor.u32 %v10816_v52, %v9834_v50  ;;  %v10782_v36 = vld [vmem:[#allocation4 + $0xac] sm:$0xf0]  ;;  %v9817_v17 = vor.u32 %v10814_v56, %v9816_v47  ;;  %v9786_v1 = vld [vmem:[#allocation4 + $0x170] sm:$0xf0]  ;;  %v9624_v52 = vld [vmem:[#allocation4 + $0x20] sm:$0xf] }
 0x56e   : > { %4508 = vperm.xlu1 %11063, %v4476_v21   ;;  %11064 = vset.pattern.permute.xlu0 %v11335_v55  ;;  %v9689_v42 = vor.u32 %v10782_v36, %v9688_v23  ;;  %v9693_v0 = vor.u32 %v10780_v15, %v9690_v2  ;;  %v10766_v50 = vld [vmem:[#allocation4 + $0x2c] sm:$0xf0]  ;;  %v10764_v47 = vld [vmem:[#allocation4 + $0x24] sm:$0xf] }
 0x56f   : > { %5339 = vmatpush.bf16.msra.mxu3 %v9817_v17  ;;  %v9625_v23 = vor.u32 %v10766_v50, %v9624_v52  ;;  %v10798_v36 = vld [vmem:[#allocation4 + $0x12c] sm:$0xf0]  ;;  %v10796_v2 = vld [vmem:[#allocation4 + $0x124] sm:$0xf] }
 0x570   : > { %5290 = vmatpush.bf16.msra.mxu2 %v9689_v42  ;;  %v9626_v42 = vld [vmem:[#allocation4 + $0x30] sm:$0xf0]  ;;  %v9757_v17 = vor.u32 %v10796_v2, %v9754_v51 }
 0x571   : > { %v9629_v15 = vor.u32 %v10764_v47, %v9626_v42 }
 0x572   : > { %v4436_v61 = vpop.permute.xlu0 %4435 }
 0x573   : > { %v4478_v35 = vadd.f32 %v4436_v61, %v13571_v4  ;;  %v9672_v61 = vld [vmem:[#allocation4 + $0x80] sm:$0xf] }
 0x575   : > { %4627 = vperm.xlu2 %11060, %v4477_v3   ;;  %4623 = vperm.xlu0 %11064, %v4476_v21   ;;  %v9818_v21 = vld [vmem:[#allocation4 + $0x1b0] sm:$0xf0] }
 0x576   : > { %4518 = vperm.xlu1 %11063, %v4478_v35   ;;  %v9821_v7 = vor.u32 %v10812_v12, %v9818_v21  ;;  %v10762_v12 = vld [vmem:[#allocation4 + $0xc] sm:$0xf0]  ;;  %v9736_v21 = vld [vmem:[#allocation4 + $0x100] sm:$0xf] }
 0x57a   : > { %v4444_v33 = vpop.permute.xlu2 %4443 }
 0x57d   : > { %4449 = vrot.lane.b32.xlu2 %v4405_v43, %s11334_s18  ;;  %11065 = vset.pattern.permute.xlu0 %v11336_v59  ;;  %v10810_v43 = vld [vmem:[#allocation4 + $0x18c] sm:$0xf0] }
 0x57e   : > { %4513 = vperm.xlu0 %11065, %v4477_v3   ;;  %11066 = vset.pattern.permute.xlu1 %v11335_v55  ;;  %v10778_v3 = vld [vmem:[#allocation4 + $0x8c] sm:$0xf0] }
 0x57f   : > { %4631 = vperm.xlu1 %11066, %v4478_v35   ;;  %11069 = vset.pattern.permute.xlu2 %v11336_v59  ;;  %v9800_v35 = vld [vmem:[#allocation4 + $0x180] sm:$0xf]  ;;  %v9673_v58 = vor.u32 %v10778_v3, %v9672_v61  ;;  %v10794_v61 = vld [vmem:[#allocation4 + $0x10c] sm:$0xf0]  ;;  %v10760_v3 = vld [vmem:[#allocation4 + $0x4] sm:$0xf] }
 0x581   : > { %5291 = vmatpush.bf16.msra.mxu2 %v9673_v58  ;;  %v9737_v58 = vor.u32 %v10794_v61, %v9736_v21 }
 0x582   : > { %v4440_v54 = vpop.permute.xlu0 %4439 }
 0x583   : > { %v4480_v4 = vadd.f32 %v4440_v54, %v13585_v60  ;;  %v4482_v60 = vadd.f32 %v4444_v33, %v13599_v29  ;;  %v9853_v29 = vor.u32 %v10820_v44, %v9850_v25  ;;  %v9674_v54 = vld [vmem:[#allocation4 + $0x90] sm:$0xf0]  ;;  %v9656_v33 = vld [vmem:[#allocation4 + $0x60] sm:$0xf] }
 0x584   : > { %v9640_v25 = vld [vmem:[#allocation4 + $0x40] sm:$0xf] }
 0x585   : > { %4528 = vperm.xlu2 %11069, %v4480_v4   ;;  %5435 = vmatpush.bf16.msra.mxu1 %v9853_v29  ;;  %v10770_v29 = vld [vmem:[#allocation4 + $0x4c] sm:$0xf0] }
 0x586   : > { %11068 = vset.pattern.permute.xlu0 %v11335_v55  ;;  %v9641_v18 = vor.u32 %v10770_v29, %v9640_v25  ;;  %v4279_v25 = vmul.f32 0.5, %v13630_v31 }
 0x587   : > { %4635 = vperm.xlu0 %11068, %v4479_v28   ;;  %11067 = vset.pattern.permute.xlu1 %v11336_v59 }
 0x588   : > { %4523 = vperm.xlu1 %11067, %v4479_v28   ;;  %v9677_v28 = vor.u32 %v10776_v57, %v9674_v54  ;;  %v10792_v57 = vld [vmem:[#allocation4 + $0x104] sm:$0xf]  ;;  %v9738_v54 = vld [vmem:[#allocation4 + $0x110] sm:$0xf0]  ;;  %v4309_v53 = vmul.f32 1.442695, %v4279_v25 }
 0x589   : > { %5436 = vmatpush.bf16.msra.mxu1 %v9837_v46  ;;  %v9752_v46 = vld [vmem:[#allocation4 + $0x120] sm:$0xf] }
 0x58a   : > { %v4442_v39 = vpop.permute.xlu1 %4441  ;;  %v9753_v56 = vor.u32 %v10798_v36, %v9752_v46  ;;  %11114 = vpow2.f32 %v4309_v53 }
 0x58b   : > { %v4481_v49 = vadd.f32 %v4442_v39, %v13592_v13  ;;  %v9725_v13 = vor.u32 %v10788_v34, %v9722_v19  ;;  %v9805_v39 = vor.u32 %v10808_v32, %v9802_v30  ;;  %v9661_v34 = vor.u32 %v10772_v48, %v9658_v20  ;;  %v10804_v19 = vld [vmem:[#allocation4 + $0x164] sm:$0xf] }
 0x58c   : > { %v9789_v41 = vor.u32 %v10804_v19, %v9786_v1 }
 0x58d   : > { %4533 = vperm.xlu2 %11069, %v4481_v49   ;;  %5386 = vmatpush.bf16.msra.mxu0 %v9725_v13  ;;  %v11113_v13 = vpop.eup %11112 }
 0x58e   : > { %5437 = vmatpush.bf16.msra.mxu1 %v9821_v7 }
 0x58f   : > { %11071 = vset.pattern.permute.xlu0 %v11336_v59 }
 0x590   : > { %4538 = vperm.xlu0 %11071, %v4482_v60   ;;  %11070 = vset.pattern.permute.xlu1 %v11335_v55  ;;  %v11115_v2 = vpop.eup %11114 }
 0x591   : > { %4639 = vperm.xlu1 %11070, %v4480_v4   ;;  %5387 = vmatpush.bf16.msra.mxu0 %v9709_v45  ;;  %v9801_v4 = vor.u32 %v10810_v43, %v9800_v35  ;;  %v9773_v45 = vor.u32 %v10800_v26, %v9770_v16  ;;  %v9610_v35 = vld [vmem:[#allocation4 + $0x10] sm:$0xf0] }
 0x592   : > { %5438 = vmatpush.bf16.msra.mxu1 %v9805_v39  ;;  %v9613_v43 = vor.u32 %v10760_v3, %v9610_v35 }
 0x593   : > { %5340 = vmatpush.bf16.msra.mxu3 %v9801_v4  ;;  %v9741_v4 = vor.u32 %v10792_v57, %v9738_v54 }
 0x595   : > { %11072 = vset.pattern.permute.xlu2 %v11335_v55  ;;  %5388 = vmatpush.bf16.msra.mxu0 %v9693_v0  ;;  %v9608_v0 = vld [vmem:[#allocation4] sm:$0xf] }
 0x596   : > { %4647 = vperm.xlu2 %11072, %v4482_v60   ;;  %v9784_v60 = vld [vmem:[#allocation4 + $0x160] sm:$0xf]  ;;  %5439 = vmatpush.bf16.msra.mxu1 %v9789_v41  ;;  %v9609_v7 = vor.u32 %v10762_v12, %v9608_v0 }
 0x597   : > { %v9785_v10 = vor.u32 %v10806_v11, %v9784_v60 }
 0x599   : > { %4451 = vrot.lane.b32.xlu1 %v4406_v9, %s11334_s18  ;;  %5389 = vmatpush.bf16.msra.mxu0 %v9677_v28  ;;  %v9768_v9 = vld [vmem:[#allocation4 + $0x140] sm:$0xf] }
 0x59a   : > { %5341 = vmatpush.bf16.msra.mxu3 %v9785_v10  ;;  %v9769_v27 = vor.u32 %v10802_v63, %v9768_v9  ;;  %5440 = vmatpush.bf16.msra.mxu1 %v9773_v45  ;;  %v4489_v28 = vld [vmem:[%s14724_s10] sm:$0x3] }
 0x59b   : > { %v4490_v32 = vunpack.c.l.bf16 %v4489_v28 }
 0x59d   : > { %5390 = vmatpush.bf16.msra.mxu0 %v9661_v34  ;;  %v4572_v39 = vperm.slane %v4490_v32, 0  ;;  %v4675_v60 = vperm.slane %v4490_v32, 3 }
 0x59e   : > { %5342 = vmatpush.bf16.msra.mxu3 %v9769_v27  ;;  %5441 = vmatpush.bf16.msra.mxu1 %v9757_v17 }
 0x59f   : > { %v13691_v10 = vperm.slane %v4675_v60, 1 }
 0x5a1   : > { %4643 = vperm.xlu1 %11070, %v4481_v49   ;;  %v10774_v49 = vld [vmem:[#allocation4 + $0x6c] sm:$0xf0]  ;;  %5391 = vmatpush.bf16.msra.mxu0 %v9645_v14 }
 0x5a2   : > { %v9657_v62 = vor.u32 %v10774_v49, %v9656_v33  ;;  %5343 = vmatpush.bf16.msra.mxu3 %v9753_v56  ;;  %5442 = vmatpush.bf16.msra.mxu1 %v9741_v4  ;;  %v4573_v33 = vperm.slane %v4490_v32, 2  ;;  %v4674_v49 = vperm.slane %v4490_v32, 1 }
 0x5a4   : > { %5292 = vmatpush.bf16.msra.mxu2 %v9657_v62  ;;  %v13685_v62 = vperm.slane %v4572_v39, 0  ;;  %v13687_v11 = vperm.slane %v4573_v33, 0  ;;  %v13689_v20 = vperm.slane %v4674_v49, 1 }
 0x5a5   : > { %5392 = vmatpush.bf16.msra.mxu0 %v9629_v15 }
 0x5a6   : > { %5344 = vmatpush.bf16.msra.mxu3 %v9737_v58 }
 0x5a7   : > { %v13676_v37 = vpop.permute.xlu2 %4611 }
 0x5a8   : > { %5293 = vmatpush.bf16.msra.mxu2 %v9641_v18  ;;  %v4680_v29 = vmul.f32 %v13689_v20, %v13676_v37  ;;  %v4681_v9 = vmul.f32 %v13691_v10, %v13676_v37 }
 0x5a9   : > { %11073 = vset.pattern.permute.xlu1 %v11336_v59  ;;  %5393 = vmatpush.bf16.msra.mxu0 %v9613_v43 }
 0x5ac   : > { %5294 = vmatpush.bf16.msra.mxu2 %v9625_v23 }
 0x5af   : > { %v4376_v44 = vpop.permute.xlu2 %4375 }
 0x5b0   : > { %v4408_v6 = vmul.f32 %v11113_v13, %v4376_v44  ;;  %5295 = vmatpush.bf16.msra.mxu2 %v9609_v7  ;;  %v4744_v13 = vld [vmem:[%s14725_s11] sm:$0x3] }
 0x5b1   : > { %v13706_v18 = vperm.slane %v4744_v13, 1 }
 0x5b2   : > { %4455 = vrot.lane.b32.xlu2 %v4408_v6, %s11334_s18  ;;  %v13704_v6 = vperm.slane %v4744_v13, 0 }
 0x5bf   : > { %v13683_v30 = vpop.permute.xlu2 %4619  ;;  %v4494_v48 = vpop.permute.xlu0 %4493 }
 0x5c0   : > { %v4578_v1 = vmul.f32 %v13685_v62, %v4494_v48  ;;  %v4579_v41 = vmul.f32 %v13687_v11, %v4494_v48  ;;  %v4684_v28 = vmul.f32 %v13689_v20, %v13683_v30  ;;  %v4685_v32 = vmul.f32 %v13691_v10, %v13683_v30 }
 0x5c2   : > { %v4712_v63 = vadd.f32 %v4680_v29, %v4578_v1  ;;  %v4713_v8 = vadd.f32 %v4681_v9, %v4579_v41 }
 0x5c4   : > { %v4750_v27 = vadd.f32 %v13704_v6, %v4712_v63 }
 0x5c6   : > { %v4814_v46 = vmul.f32 0.2, %v4750_v27  ;;  %vm4782_vm0 = vcmp.gt.f32.partialorder %v4750_v27, 0.0 }
 0x5c7   : > { %v4499_v34 = vpop.permute.xlu1 %4498  ;;  %v4446_v19 = vpop.permute.xlu2 %4445 }
 0x5c8   : > { %v4483_v44 = vadd.f32 %v4446_v19, %v13606_v24  ;;  %v4751_v24 = vadd.f32 %v13706_v18, %v4713_v8  ;;  %v4580_v26 = vmul.f32 %v13685_v62, %v4499_v34  ;;  %v4581_v16 = vmul.f32 %v13687_v11, %v4499_v34 }
 0x5c9   : > { %v4846_v51 = vsel %vm4782_vm0, %v4750_v27, %v4814_v46 }
 0x5ca   : > { %4543 = vperm.xlu0 %11071, %v4483_v44   ;;  %4651 = vperm.xlu2 %11072, %v4483_v44   ;;  %v4815_v23 = vmul.f32 0.2, %v4751_v24  ;;  %vm4783_vm1 = vcmp.gt.f32.partialorder %v4751_v24, 0.0 }
 0x5cc   : > { %v4847_v0 = vsel %vm4783_vm1, %v4751_v24, %v4815_v23 }
 0x5cf   : > { %v4628_v35 = vpop.permute.xlu2 %4627 }
 0x5d0   : > { %v4616_v14 = vpop.permute.xlu1 %4615  ;;  %v4688_v24 = vmul.f32 %v13689_v20, %v4628_v35 }
 0x5d1   : > { %v4682_v37 = vmul.f32 %v13689_v20, %v4616_v14  ;;  %v4683_v45 = vmul.f32 %v13691_v10, %v4616_v14 }
 0x5d2   : > { %11074 = vset.pattern.permute.xlu0 %v11335_v55  ;;  %11076 = vset.pattern.permute.xlu2 %v11336_v59 }
 0x5d3   : > { %v4714_v52 = vadd.f32 %v4682_v37, %v4580_v26  ;;  %v4715_v50 = vadd.f32 %v4683_v45, %v4581_v16 }
 0x5d5   : > { %v4752_v36 = vadd.f32 %v13704_v6, %v4714_v52  ;;  %v4753_v47 = vadd.f32 %v13706_v18, %v4715_v50 }
 0x5d7   : > { %vm4784_vm2 = vcmp.gt.f32.partialorder %v4752_v36, 0.0  ;;  %vm4785_vm3 = vcmp.gt.f32.partialorder %v4753_v47, 0.0  ;;  %v4816_v42 = vmul.f32 0.2, %v4752_v36  ;;  %v4817_v56 = vmul.f32 0.2, %v4753_v47  ;;  %v4504_v15 = vpop.permute.xlu0 %4503  ;;  %v4450_v49 = vpop.permute.xlu2 %4449 }
 0x5d8   : > { %v4374_v17 = vpop.permute.xlu1 %4373  ;;  %v4582_v58 = vmul.f32 %v13685_v62, %v4504_v15  ;;  %v4583_v43 = vmul.f32 %v13687_v11, %v4504_v15  ;;  %v4485_v30 = vadd.f32 %v4450_v49, %v13617_v40  ;;  %v4689_v40 = vmul.f32 %v13691_v10, %v4628_v35 }
 0x5d9   : > { %v4848_v12 = vsel %vm4784_vm2, %v4752_v36, %v4816_v42  ;;  %v4849_v21 = vsel %vm4785_vm3, %v4753_v47, %v4817_v56  ;;  %v4407_v7 = vmul.f32 %v11115_v2, %v4374_v17 }
 0x5da   : > { %v13718_v61 = vpack.c.bf16 %v4848_v12, %v4846_v51  ;;  %v13720_v3 = vpack.c.bf16 %v4849_v21, %v4847_v0  ;;  %v4716_v39 = vadd.f32 %v4684_v28, %v4582_v58  ;;  %v4717_v33 = vadd.f32 %v4685_v32, %v4583_v43 }
 0x5db   : > { %4453 = vrot.lane.b32.xlu1 %v4407_v7, %s11334_s18 }
 0x5dc   : > { %5296 = vmatmul.bf16.vlgmr.msra.gmra.mxu2 %v13718_v61  ;;  %5345 = vmatmul.bf16.vlgmr.msra.gmra.mxu3 %v13720_v3  ;;  %v4754_v60 = vadd.f32 %v13704_v6, %v4716_v39  ;;  %v4755_v48 = vadd.f32 %v13706_v18, %v4717_v33 }
 0x5dd   : > { %5394 = vmatmul.bf16.vlgmr.msra.gmra.mxu0 %v13718_v61  ;;  %5443 = vmatmul.bf16.vlgmr.msra.gmra.mxu1 %v13720_v3 }
 0x5de   : > { %v4818_v29 = vmul.f32 0.2, %v4754_v60  ;;  %v4819_v9 = vmul.f32 0.2, %v4755_v48  ;;  %vm4786_vm4 = vcmp.gt.f32.partialorder %v4754_v60, 0.0  ;;  %vm4787_vm5 = vcmp.gt.f32.partialorder %v4755_v48, 0.0 }
 0x5df   : > { %v4448_v57 = vpop.permute.xlu0 %4447  ;;  %v4529_v14 = vpop.permute.xlu2 %4528 }
 0x5e0   : > { %v4484_v54 = vadd.f32 %v4448_v57, %v13612_v5  ;;  %v4509_v4 = vpop.permute.xlu1 %4508  ;;  %v4850_v16 = vsel %vm4786_vm4, %v4754_v60, %v4818_v29  ;;  %v4851_v45 = vsel %vm4787_vm5, %v4755_v48, %v4819_v9 }
 0x5e1   : > { %v4584_v19 = vmul.f32 %v13685_v62, %v4509_v4  ;;  %v4585_v5 = vmul.f32 %v13687_v11, %v4509_v4 }
 0x5e2   : > { %4655 = vperm.xlu0 %11074, %v4484_v54  }
 0x5e3   : > { %4548 = vperm.xlu1 %11073, %v4484_v54  }
 0x5e7   : > { %v4624_v34 = vpop.permute.xlu0 %4623  ;;  %v13765_v43 = vpop.permute.xlu2 %4533 }
 0x5e8   : > { %v4686_v1 = vmul.f32 %v13689_v20, %v4624_v34  ;;  %v4687_v41 = vmul.f32 %v13691_v10, %v4624_v34  ;;  %v4519_v13 = vpop.permute.xlu1 %4518 }
 0x5e9   : > { %v4588_v50 = vmul.f32 %v13685_v62, %v4519_v13  ;;  %v4589_v46 = vmul.f32 %v13687_v11, %v4519_v13 }
 0x5ea   : > { %v4718_v44 = vadd.f32 %v4686_v1, %v4584_v19  ;;  %v4719_v25 = vadd.f32 %v4687_v41, %v4585_v5  ;;  %11078 = vset.pattern.permute.xlu0 %v11336_v59 }
 0x5eb   : > { %4553 = vperm.xlu1 %11073, %v4485_v30  }
 0x5ec   : > { %v4756_v63 = vadd.f32 %v13704_v6, %v4718_v44  ;;  %v4757_v8 = vadd.f32 %v13706_v18, %v4719_v25 }
 0x5ee   : > { %vm4788_vm6 = vcmp.gt.f32.partialorder %v4756_v63, 0.0  ;;  %vm4789_vm7 = vcmp.gt.f32.partialorder %v4757_v8, 0.0  ;;  %v4820_v53 = vmul.f32 0.2, %v4756_v63  ;;  %v4821_v27 = vmul.f32 0.2, %v4757_v8 }
 0x5f0   : > { %v4514_v26 = vpop.permute.xlu0 %4513  ;;  %v4852_v37 = vsel %vm4788_vm6, %v4756_v63, %v4820_v53  ;;  %v4853_v52 = vsel %vm4789_vm7, %v4757_v8, %v4821_v27  ;;  %v4648_v25 = vpop.permute.xlu2 %4647 }
 0x5f1   : > { %v4586_v23 = vmul.f32 %v13685_v62, %v4514_v26  ;;  %v4587_v36 = vmul.f32 %v13687_v11, %v4514_v26  ;;  %v4632_v47 = vpop.permute.xlu1 %4631  ;;  %v13752_v15 = vpack.c.bf16 %v4852_v37, %v4850_v16  ;;  %v13754_v2 = vpack.c.bf16 %v4853_v52, %v4851_v45 }
 0x5f2   : > { %v4690_v42 = vmul.f32 %v13689_v20, %v4632_v47  ;;  %v4691_v56 = vmul.f32 %v13691_v10, %v4632_v47 }
 0x5f3   : > { %v4720_v51 = vadd.f32 %v4688_v24, %v4586_v23  ;;  %v4721_v17 = vadd.f32 %v4689_v40, %v4587_v36  ;;  %11075 = vset.pattern.permute.xlu1 %v11335_v55  ;;  %5301 = vmatmul.bf16.gmra.mxu2 %v13752_v15 }
 0x5f4   : > { %v4722_v0 = vadd.f32 %v4690_v42, %v4588_v50  ;;  %v4723_v12 = vadd.f32 %v4691_v56, %v4589_v46  ;;  %5350 = vmatmul.bf16.gmra.mxu3 %v13754_v2  ;;  %5399 = vmatmul.bf16.gmra.mxu0 %v13752_v15 }
 0x5f5   : > { %5448 = vmatmul.bf16.gmra.mxu1 %v13754_v2  ;;  %v4758_v21 = vadd.f32 %v13704_v6, %v4720_v51  ;;  %4659 = vperm.xlu1 %11075, %v4485_v30   ;;  %v4759_v7 = vadd.f32 %v13706_v18, %v4721_v17  ;;  %v4592_v30 = vmul.f32 %v13685_v62, %v4529_v14 }
 0x5f6   : > { %v4760_v35 = vadd.f32 %v13704_v6, %v4722_v0  ;;  %v4761_v58 = vadd.f32 %v13706_v18, %v4723_v12 }
 0x5f7   : > { %v4822_v57 = vmul.f32 0.2, %v4758_v21  ;;  %v4823_v4 = vmul.f32 0.2, %v4759_v7  ;;  %vm4790_vm8 = vcmp.gt.f32.partialorder %v4758_v21, 0.0  ;;  %vm4791_vm9 = vcmp.gt.f32.partialorder %v4759_v7, 0.0 }
 0x5f8   : > { %v4824_v28 = vmul.f32 0.2, %v4760_v35  ;;  %v4825_v32 = vmul.f32 0.2, %v4761_v58  ;;  %vm4792_vm10 = vcmp.gt.f32.partialorder %v4760_v35, 0.0  ;;  %vm4793_vm11 = vcmp.gt.f32.partialorder %v4761_v58, 0.0 }
 0x5f9   : > { %v4636_v39 = vpop.permute.xlu0 %4635  ;;  %v4854_v33 = vsel %vm4790_vm8, %v4758_v21, %v4822_v57  ;;  %v4855_v60 = vsel %vm4791_vm9, %v4759_v7, %v4823_v4  ;;  %v4698_v7 = vmul.f32 %v13689_v20, %v4648_v25  ;;  %v4595_v57 = vmul.f32 %v13687_v11, %v13765_v43 }
 0x5fa   : > { %v4524_v54 = vpop.permute.xlu1 %4523  ;;  %v4856_v49 = vsel %vm4792_vm10, %v4760_v35, %v4824_v28  ;;  %v4857_v48 = vsel %vm4793_vm11, %v4761_v58, %v4825_v32  ;;  %v4692_v34 = vmul.f32 %v13689_v20, %v4636_v39  ;;  %v4693_v19 = vmul.f32 %v13691_v10, %v4636_v39 }
 0x5fb   : > { %v4590_v5 = vmul.f32 %v13685_v62, %v4524_v54  ;;  %v4591_v1 = vmul.f32 %v13687_v11, %v4524_v54  ;;  %v13772_v41 = vpack.c.bf16 %v4856_v49, %v4854_v33  ;;  %v13774_v13 = vpack.c.bf16 %v4857_v48, %v4855_v60 }
 0x5fc   : > { %v4699_v35 = vmul.f32 %v13691_v10, %v4648_v25 }
 0x5fd   : > { %11079 = vset.pattern.permute.xlu1 %v11336_v59  ;;  %v4593_v59 = vmul.f32 %v13687_v11, %v4529_v14  ;;  %v4724_v63 = vadd.f32 %v4692_v34, %v4590_v5  ;;  %v4725_v8 = vadd.f32 %v4693_v19, %v4591_v1 }
 0x5ff   : > { %v4762_v14 = vadd.f32 %v13704_v6, %v4724_v63  ;;  %v4763_v26 = vadd.f32 %v13706_v18, %v4725_v8  ;;  %v9728_v63 = vld [vmem:[#allocation4 + $0xe8] sm:$0xf]  ;;  %v10791_v8 = vld [vmem:[#allocation4 + $0xf4] sm:$0xf0] }
 0x601   : > { %v4826_v46 = vmul.f32 0.2, %v4762_v14  ;;  %v4827_v23 = vmul.f32 0.2, %v4763_v26  ;;  %vm4794_vm14 = vcmp.gt.f32.partialorder %v4762_v14, 0.0  ;;  %vm4795_vm15 = vcmp.gt.f32.partialorder %v4763_v26, 0.0 }
 0x602   : > { %v4539_v47 = vpop.permute.xlu0 %4538 }
 0x603   : > { %v4640_v44 = vpop.permute.xlu1 %4639  ;;  %5306 = vmatmul.bf16.gmra.mxu2 %v13772_v41  ;;  %v4596_v51 = vmul.f32 %v13685_v62, %v4539_v47  ;;  %v4597_v17 = vmul.f32 %v13687_v11, %v4539_v47  ;;  %v4858_v0 = vsel %vm4794_vm14, %v4762_v14, %v4826_v46  ;;  %v4859_v12 = vsel %vm4795_vm15, %v4763_v26, %v4827_v23  ;;  %v10789_v26 = vld [vmem:[#allocation4 + $0xec] sm:$0xf] }
 0x604   : > { %v4694_v29 = vmul.f32 %v13689_v20, %v4640_v44  ;;  %v4695_v9 = vmul.f32 %v13691_v10, %v4640_v44  ;;  %5355 = vmatmul.bf16.gmra.mxu3 %v13774_v13  ;;  %5404 = vmatmul.bf16.gmra.mxu0 %v13772_v41 }
 0x605   : > { %5453 = vmatmul.bf16.gmra.mxu1 %v13774_v13  ;;  %v4730_v28 = vadd.f32 %v4698_v7, %v4596_v51  ;;  %v4731_v32 = vadd.f32 %v4699_v35, %v4597_v17  ;;  %v9712_v51 = vld [vmem:[#allocation4 + $0xc8] sm:$0xf] }
 0x606   : > { %v4726_v53 = vadd.f32 %v4694_v29, %v4592_v30  ;;  %v4727_v27 = vadd.f32 %v4695_v9, %v4593_v59 }
 0x607   : > { %v4768_v60 = vadd.f32 %v13704_v6, %v4730_v28  ;;  %v4769_v48 = vadd.f32 %v13706_v18, %v4731_v32 }
 0x608   : > { %v4764_v24 = vadd.f32 %v13704_v6, %v4726_v53  ;;  %v4765_v40 = vadd.f32 %v13706_v18, %v4727_v27  ;;  %v9729_v53 = vor.u32 %v10791_v8, %v9728_v63  ;;  %v9856_v27 = vld [vmem:[#allocation4 + $0x1e8] sm:$0xf] }
 0x609   : > { %v4832_v5 = vmul.f32 0.2, %v4768_v60  ;;  %v4833_v1 = vmul.f32 0.2, %v4769_v48  ;;  %vm4800_vm2 = vcmp.gt.f32.partialorder %v4768_v60, 0.0  ;;  %vm4801_vm3 = vcmp.gt.f32.partialorder %v4769_v48, 0.0 }
 0x60a   : > { %v4828_v16 = vmul.f32 0.2, %v4764_v24  ;;  %v4829_v37 = vmul.f32 0.2, %v4765_v40  ;;  %vm4796_vm12 = vcmp.gt.f32.partialorder %v4764_v24, 0.0  ;;  %vm4797_vm13 = vcmp.gt.f32.partialorder %v4765_v40, 0.0  ;;  %5484 = vmatpush.bf16.msrb.mxu2 %v9729_v53 }
 0x60b   : > { %v4452_v45 = vpop.permute.xlu1 %4451  ;;  %v4864_v59 = vsel %vm4800_vm2, %v4768_v60, %v4832_v5  ;;  %v4865_v25 = vsel %vm4801_vm3, %v4769_v48, %v4833_v1  ;;  %v9840_v48 = vld [vmem:[#allocation4 + $0x1c8] sm:$0xf] }
 0x60c   : > { %v4486_v52 = vadd.f32 %v4452_v45, %v13625_v22  ;;  %v4456_v50 = vpop.permute.xlu2 %4455  ;;  %v4860_v42 = vsel %vm4796_vm12, %v4764_v24, %v4828_v16  ;;  %v4861_v56 = vsel %vm4797_vm13, %v4765_v40, %v4829_v37  ;;  %v10823_v24 = vld [vmem:[#allocation4 + $0x1f4] sm:$0xf0]  ;;  %v9730_v16 = vld [vmem:[#allocation4 + $0xf8] sm:$0xf0] }
 0x60d   : > { %v4488_v36 = vadd.f32 %v4456_v50, %v13635_v38  ;;  %v13792_v21 = vpack.c.bf16 %v4860_v42, %v4858_v0  ;;  %v13794_v22 = vpack.c.bf16 %v4861_v56, %v4859_v12  ;;  %v4594_v38 = vmul.f32 %v13685_v62, %v13765_v43  ;;  %v10821_v42 = vld [vmem:[#allocation4 + $0x1ec] sm:$0xf]  ;;  %v9858_v56 = vld [vmem:[#allocation4 + $0x1f8] sm:$0xf0]  ;;  %v10787_v12 = vld [vmem:[#allocation4 + $0xd4] sm:$0xf0] }
 0x60e   : > { %4558 = vperm.xlu2 %11076, %v4486_v52   ;;  %v9857_v40 = vor.u32 %v10823_v24, %v9856_v27  ;;  %v9733_v37 = vor.u32 %v10789_v26, %v9730_v16  ;;  %v9861_v0 = vor.u32 %v10821_v42, %v9858_v56  ;;  %v9713_v7 = vor.u32 %v10787_v12, %v9712_v51  ;;  %v10817_v42 = vld [vmem:[#allocation4 + $0x1cc] sm:$0xf]  ;;  %v9842_v56 = vld [vmem:[#allocation4 + $0x1d8] sm:$0xf0] }
 0x60f   : > { %4568 = vperm.xlu1 %11079, %v4488_v36   ;;  %v9845_v51 = vor.u32 %v10817_v42, %v9842_v56 }
 0x610   : > { %5533 = vmatpush.bf16.msrb.mxu3 %v9857_v40  ;;  %5582 = vmatpush.bf16.msrb.mxu0 %v9733_v37 }
 0x611   : > { %5631 = vmatpush.bf16.msrb.mxu1 %v9861_v0  ;;  %5485 = vmatpush.bf16.msrb.mxu2 %v9713_v7 }
 0x613   : > { %v4644_v58 = vpop.permute.xlu1 %4643  ;;  %5311 = vmatmul.bf16.gmra.mxu2 %v13792_v21 }
 0x614   : > { %v4696_v54 = vmul.f32 %v13689_v20, %v4644_v58  ;;  %v4697_v4 = vmul.f32 %v13691_v10, %v4644_v58  ;;  %5360 = vmatmul.bf16.gmra.mxu3 %v13794_v22  ;;  %5409 = vmatmul.bf16.gmra.mxu0 %v13792_v21 }
 0x615   : > { %5458 = vmatmul.bf16.gmra.mxu1 %v13794_v22 }
 0x616   : > { %v4728_v39 = vadd.f32 %v4696_v54, %v4594_v38  ;;  %v4729_v33 = vadd.f32 %v4697_v4, %v4595_v57  ;;  %11077 = vset.pattern.permute.xlu2 %v11335_v55  ;;  %5632 = vmatpush.bf16.msrb.mxu1 %v9845_v51 }
 0x617   : > { %4663 = vperm.xlu2 %11077, %v4486_v52   ;;  %11080 = vset.pattern.permute.xlu1 %v11335_v55 }
 0x618   : > { %v4766_v43 = vadd.f32 %v13704_v6, %v4728_v39  ;;  %v4767_v49 = vadd.f32 %v13706_v18, %v4729_v33  ;;  %4671 = vperm.xlu1 %11080, %v4488_v36  }
 0x61a   : > { %v4830_v34 = vmul.f32 0.2, %v4766_v43  ;;  %v4831_v19 = vmul.f32 0.2, %v4767_v49  ;;  %vm4798_vm0 = vcmp.gt.f32.partialorder %v4766_v43, 0.0  ;;  %vm4799_vm1 = vcmp.gt.f32.partialorder %v4767_v49, 0.0 }
 0x61c   : > { %v4862_v30 = vsel %vm4798_vm0, %v4766_v43, %v4830_v34  ;;  %v4863_v44 = vsel %vm4799_vm1, %v4767_v49, %v4831_v19  ;;  %v10819_v34 = vld [vmem:[#allocation4 + $0x1d4] sm:$0xf0] }
 0x61d   : > { %v13814_v29 = vpack.c.bf16 %v4864_v59, %v4862_v30  ;;  %v13816_v9 = vpack.c.bf16 %v4865_v25, %v4863_v44  ;;  %v9841_v44 = vor.u32 %v10819_v34, %v9840_v48  ;;  %v10781_v48 = vld [vmem:[#allocation4 + $0xac] sm:$0xf]  ;;  %v9698_v34 = vld [vmem:[#allocation4 + $0xb8] sm:$0xf0] }
 0x61f   : > { %5534 = vmatpush.bf16.msrb.mxu3 %v9841_v44 }
 0x623   : > { %5316 = vmatmul.bf16.gmra.mxu2 %v13814_v29 }
 0x624   : > { %5365 = vmatmul.bf16.gmra.mxu3 %v13816_v9  ;;  %5414 = vmatmul.bf16.gmra.mxu0 %v13814_v29  ;;  %v4652_v45 = vpop.permute.xlu2 %4651 }
 0x625   : > { %5463 = vmatmul.bf16.gmra.mxu1 %v13816_v9  ;;  %v4700_v36 = vmul.f32 %v13689_v20, %v4652_v45  ;;  %v4701_v47 = vmul.f32 %v13691_v10, %v4652_v45 }
 0x63c   : > { %v4544_v14 = vpop.permute.xlu0 %4543 }
 0x63d   : > { %v4598_v52 = vmul.f32 %v13685_v62, %v4544_v14  ;;  %v4599_v46 = vmul.f32 %v13687_v11, %v4544_v14 }
 0x63f   : > { %v4732_v17 = vadd.f32 %v4700_v36, %v4598_v52  ;;  %v4733_v38 = vadd.f32 %v4701_v47, %v4599_v46  ;;  %v10785_v52 = vld [vmem:[#allocation4 + $0xcc] sm:$0xf]  ;;  %v9714_v46 = vld [vmem:[#allocation4 + $0xd8] sm:$0xf0] }
 0x640   : > { %v9717_v36 = vor.u32 %v10785_v52, %v9714_v46 }
 0x641   : > { %v4770_v58 = vadd.f32 %v13704_v6, %v4732_v17  ;;  %v4771_v28 = vadd.f32 %v13706_v18, %v4733_v38  ;;  %v9696_v17 = vld [vmem:[#allocation4 + $0xa8] sm:$0xf]  ;;  %v10783_v38 = vld [vmem:[#allocation4 + $0xb4] sm:$0xf0] }
 0x642   : > { %5583 = vmatpush.bf16.msrb.mxu0 %v9717_v36 }
 0x643   : > { %v4834_v60 = vmul.f32 0.2, %v4770_v58  ;;  %v4835_v19 = vmul.f32 0.2, %v4771_v28  ;;  %vm4802_vm4 = vcmp.gt.f32.partialorder %v4770_v58, 0.0  ;;  %vm4803_vm5 = vcmp.gt.f32.partialorder %v4771_v28, 0.0 }
 0x645   : > { %v4866_v24 = vsel %vm4802_vm4, %v4770_v58, %v4834_v60  ;;  %v4867_v14 = vsel %vm4803_vm5, %v4771_v28, %v4835_v19  ;;  %v10815_v58 = vld [vmem:[#allocation4 + $0x1b4] sm:$0xf0]  ;;  %v9697_v28 = vor.u32 %v10783_v38, %v9696_v17 }
 0x647   : > { %5486 = vmatpush.bf16.msrb.mxu2 %v9697_v28  ;;  %v9808_v28 = vld [vmem:[#allocation4 + $0x188] sm:$0xf] }
 0x64d   : > { %v4454_v50 = vpop.permute.xlu1 %4453 }
 0x64e   : > { %v4487_v23 = vadd.f32 %v4454_v50, %v13630_v31  ;;  %v13830_v31 = vld [vmem:[%s14727_s13] sm:$0xf] }
 0x64f   : > { %v13839_v33 = vperm.slane %v13830_v31, 1  ;;  %v13846_v25 = vperm.slane %v13830_v31, 0 }
 0x650   : > { %4667 = vperm.xlu2 %11077, %v4487_v23   ;;  %4563 = vperm.xlu0 %11078, %v4487_v23  }
 0x654   : > { %v4656_v35 = vpop.permute.xlu0 %4655 }
 0x655   : > { %v4702_v57 = vmul.f32 %v13689_v20, %v4656_v35  ;;  %v4703_v54 = vmul.f32 %v13691_v10, %v4656_v35  ;;  %v4549_v4 = vpop.permute.xlu1 %4548  ;;  %v9824_v35 = vld [vmem:[#allocation4 + $0x1a8] sm:$0xf] }
 0x656   : > { %v4600_v32 = vmul.f32 %v13685_v62, %v4549_v4  ;;  %v4601_v39 = vmul.f32 %v13687_v11, %v4549_v4 }
 0x658   : > { %v4734_v43 = vadd.f32 %v4702_v57, %v4600_v32  ;;  %v4735_v49 = vadd.f32 %v4703_v54, %v4601_v39  ;;  %11081 = vset.pattern.permute.xlu0 %v11335_v55  ;;  %v9825_v39 = vor.u32 %v10815_v58, %v9824_v35  ;;  %v9680_v58 = vld [vmem:[#allocation4 + $0x88] sm:$0xf] }
 0x65a   : > { %v4772_v5 = vadd.f32 %v13704_v6, %v4734_v43  ;;  %v4773_v1 = vadd.f32 %v13706_v18, %v4735_v49  ;;  %v5395_v30 = vpop.f32.mrf.mxu0  ;;  %v5444_v8 = vpop.f32.mrf.mxu1  ;;  %5535 = vmatpush.bf16.msrb.mxu3 %v9825_v39 }
 0x65b   : > { %v5396_v59 = vadd.f32 %v5395_v30, %v13839_v33 }
 0x65c   : > { %vm4804_vm6 = vcmp.gt.f32.partialorder %v4772_v5, 0.0  ;;  %vm4805_vm7 = vcmp.gt.f32.partialorder %v4773_v1, 0.0  ;;  %v4836_v55 = vmul.f32 0.2, %v4772_v5  ;;  %v4837_v63 = vmul.f32 0.2, %v4773_v1 }
 0x65d   : > { %v13848_v53 = vadd.f32 %v5444_v8, %v5396_v59  ;;  %v4554_v27 = vpop.permute.xlu1 %4553 }
 0x65e   : > { %v4868_v40 = vsel %vm4804_vm6, %v4772_v5, %v4836_v55  ;;  %v4869_v26 = vsel %vm4805_vm7, %v4773_v1, %v4837_v63  ;;  %v4602_v32 = vmul.f32 %v13685_v62, %v4554_v27  ;;  %v4603_v43 = vmul.f32 %v13687_v11, %v4554_v27 }
 0x65f   : > { %v5297_v16 = vpop.f32.mrf.mxu2  ;;  %v13850_v37 = vpack.c.bf16 %v4868_v40, %v4866_v24  ;;  %v13852_v45 = vpack.c.bf16 %v4869_v26, %v4867_v14  ;;  %v5346_v23 = vpop.f32.mrf.mxu3  ;;  %v9701_v1 = vor.u32 %v10781_v48, %v9698_v34  ;;  %v10813_v14 = vld [vmem:[#allocation4 + $0x1ac] sm:$0xf]  ;;  %v9826_v26 = vld [vmem:[#allocation4 + $0x1b8] sm:$0xf0]  ;;  %v10811_v34 = vld [vmem:[#allocation4 + $0x194] sm:$0xf0] }
 0x660   : > { %v5298_v50 = vadd.f32 %v5297_v16, %v13846_v25  ;;  %v9829_v52 = vor.u32 %v10813_v14, %v9826_v26  ;;  %v10809_v26 = vld [vmem:[#allocation4 + $0x18c] sm:$0xf]  ;;  %vm5681_vm2 = vcmp.gt.f32.partialorder %v13848_v53, 0.0 }
 0x661   : > { %5321 = vmatmul.bf16.gmra.mxu2 %v13850_v37  ;;  %5370 = vmatmul.bf16.gmra.mxu3 %v13852_v45 }
 0x662   : > { %v13857_v47 = vadd.f32 %v5346_v23, %v5298_v50  ;;  %5419 = vmatmul.bf16.gmra.mxu0 %v13850_v37  ;;  %5468 = vmatmul.bf16.gmra.mxu1 %v13852_v45  ;;  %v13862_v57 = vpop.f32.mrf.mxu0  ;;  %v13864_v54 = vpop.f32.mrf.mxu1 }
 0x663   : > { %5584 = vmatpush.bf16.msrb.mxu0 %v9701_v1  ;;  %5633 = vmatpush.bf16.msrb.mxu1 %v9829_v52 }
 0x664   : > { %vm5680_vm3 = vcmp.gt.f32.partialorder %v13857_v47, 0.0 }
 0x667   : > { %v4660_v0 = vpop.permute.xlu1 %4659  ;;  %v13869_v19 = vpop.f32.mrf.mxu2 }
 0x668   : > { %v4559_v12 = vpop.permute.xlu2 %4558  ;;  %v4704_v7 = vmul.f32 %v13689_v20, %v4660_v0  ;;  %v4705_v4 = vmul.f32 %v13691_v10, %v4660_v0  ;;  %v13871_v5 = vpop.f32.mrf.mxu3 }
 0x669   : > { %v4604_v44 = vmul.f32 %v13685_v62, %v4559_v12  ;;  %v4605_v63 = vmul.f32 %v13687_v11, %v4559_v12 }
 0x66a   : > { %v4736_v49 = vadd.f32 %v4704_v7, %v4602_v32  ;;  %v4737_v60 = vadd.f32 %v4705_v4, %v4603_v43  ;;  %v10779_v4 = vld [vmem:[#allocation4 + $0x94] sm:$0xf0] }
 0x66b   : > { %v9681_v48 = vor.u32 %v10779_v4, %v9680_v58 }
 0x66c   : > { %v4774_v30 = vadd.f32 %v13704_v6, %v4736_v49  ;;  %v4775_v55 = vadd.f32 %v13706_v18, %v4737_v60 }
 0x66d   : > { %5487 = vmatpush.bf16.msrb.mxu2 %v9681_v48 }
 0x66e   : > { %v4838_v23 = vmul.f32 0.2, %v4774_v30  ;;  %vm4806_vm8 = vcmp.gt.f32.partialorder %v4774_v30, 0.0  ;;  %v4839_v42 = vmul.f32 0.2, %v4775_v55  ;;  %vm4807_vm9 = vcmp.gt.f32.partialorder %v4775_v55, 0.0 }
 0x670   : > { %v4870_v35 = vsel %vm4806_vm8, %v4774_v30, %v4838_v23  ;;  %v4871_v49 = vsel %vm4807_vm9, %v4775_v55, %v4839_v42  ;;  %v9809_v30 = vor.u32 %v10811_v34, %v9808_v28  ;;  %v10777_v55 = vld [vmem:[#allocation4 + $0x8c] sm:$0xf] }
 0x671   : > { %v4664_v59 = vpop.permute.xlu2 %4663  ;;  %v5400_v8 = vpop.f32.mrf.mxu0  ;;  %v10773_v28 = vld [vmem:[#allocation4 + $0x6c] sm:$0xf] }
 0x672   : > { %v5449_v27 = vpop.f32.mrf.mxu1  ;;  %v4706_v24 = vmul.f32 %v13689_v20, %v4664_v59  ;;  %v4707_v40 = vmul.f32 %v13691_v10, %v4664_v59  ;;  %v5401_v16 = vadd.f32 %v5400_v8, %v13839_v33  ;;  %5536 = vmatpush.bf16.msrb.mxu3 %v9809_v30 }
 0x674   : > { %v4738_v50 = vadd.f32 %v4706_v24, %v4604_v44  ;;  %v4739_v46 = vadd.f32 %v4707_v40, %v4605_v63  ;;  %v13880_v36 = vadd.f32 %v5449_v27, %v5401_v16  ;;  %v9682_v63 = vld [vmem:[#allocation4 + $0x98] sm:$0xf0] }
 0x675   : > { %v9685_v24 = vor.u32 %v10777_v55, %v9682_v63  ;;  %v9810_v16 = vld [vmem:[#allocation4 + $0x198] sm:$0xf0]  ;;  %v10805_v55 = vld [vmem:[#allocation4 + $0x16c] sm:$0xf] }
 0x676   : > { %v4776_v56 = vadd.f32 %v13704_v6, %v4738_v50  ;;  %v4777_v51 = vadd.f32 %v13706_v18, %v4739_v46  ;;  %v5302_v17 = vpop.f32.mrf.mxu2  ;;  %v9813_v50 = vor.u32 %v10809_v26, %v9810_v16 }
 0x677   : > { %v5351_v0 = vpop.f32.mrf.mxu3  ;;  %v5303_v7 = vadd.f32 %v5302_v17, %v13846_v25  ;;  %5585 = vmatpush.bf16.msrb.mxu0 %v9685_v24  ;;  %v10775_v17 = vld [vmem:[#allocation4 + $0x74] sm:$0xf0]  ;;  %v9794_v24 = vld [vmem:[#allocation4 + $0x178] sm:$0xf0] }
 0x678   : > { %vm4808_vm10 = vcmp.gt.f32.partialorder %v4776_v56, 0.0  ;;  %vm4809_vm11 = vcmp.gt.f32.partialorder %v4777_v51, 0.0  ;;  %v4840_v12 = vmul.f32 0.2, %v4776_v56  ;;  %v4841_v38 = vmul.f32 0.2, %v4777_v51  ;;  %5634 = vmatpush.bf16.msrb.mxu1 %v9813_v50 }
 0x679   : > { %v13885_v32 = vpop.f32.mrf.mxu0  ;;  %v13889_v1 = vadd.f32 %v5351_v0, %v5303_v7 }
 0x67a   : > { %v13887_v39 = vpop.f32.mrf.mxu1  ;;  %v4872_v43 = vsel %vm4808_vm10, %v4776_v56, %v4840_v12  ;;  %v4873_v60 = vsel %vm4809_vm11, %v4777_v51, %v4841_v38  ;;  %v9664_v56 = vld [vmem:[#allocation4 + $0x68] sm:$0xf]  ;;  %v10807_v38 = vld [vmem:[#allocation4 + $0x174] sm:$0xf0]  ;;  %vm5689_vm10 = vcmp.gt.f32.partialorder %v13880_v36, 0.0 }
 0x67b   : > { %v13891_v44 = vpack.c.bf16 %v4872_v43, %v4870_v35  ;;  %v13893_v59 = vpack.c.bf16 %v4873_v60, %v4871_v49  ;;  %v9665_v0 = vor.u32 %v10775_v17, %v9664_v56  ;;  %v9792_v12 = vld [vmem:[#allocation4 + $0x168] sm:$0xf]  ;;  %v9666_v43 = vld [vmem:[#allocation4 + $0x78] sm:$0xf0]  ;;  %v10803_v56 = vld [vmem:[#allocation4 + $0x154] sm:$0xf0] }
 0x67c   : > { %v9793_v4 = vor.u32 %v10807_v38, %v9792_v12  ;;  %v9669_v48 = vor.u32 %v10773_v28, %v9666_v43  ;;  %v9650_v12 = vld [vmem:[#allocation4 + $0x58] sm:$0xf0]  ;;  %v10801_v38 = vld [vmem:[#allocation4 + $0x14c] sm:$0xf]  ;;  %vm5688_vm8 = vcmp.gt.f32.partialorder %v13889_v1, 0.0 }
 0x67d   : > { %5326 = vmatmul.bf16.gmra.mxu2 %v13891_v44  ;;  %5375 = vmatmul.bf16.gmra.mxu3 %v13893_v59 }
 0x67e   : > { %5424 = vmatmul.bf16.gmra.mxu0 %v13891_v44  ;;  %5473 = vmatmul.bf16.gmra.mxu1 %v13893_v59  ;;  %v13899_v8 = vpop.f32.mrf.mxu2 }
 0x67f   : > { %v13901_v27 = vpop.f32.mrf.mxu3  ;;  %5488 = vmatpush.bf16.msrb.mxu2 %v9665_v0  ;;  %5537 = vmatpush.bf16.msrb.mxu3 %v9793_v4  ;;  %v10769_v0 = vld [vmem:[#allocation4 + $0x4c] sm:$0xf] }
 0x680   : > { %5586 = vmatpush.bf16.msrb.mxu0 %v9669_v48  ;;  %v9653_v48 = vor.u32 %v10769_v0, %v9650_v12 }
 0x681   : > { %v5405_v40 = vpop.f32.mrf.mxu0 }
 0x682   : > { %v5454_v14 = vpop.f32.mrf.mxu1  ;;  %v5406_v52 = vadd.f32 %v5405_v40, %v13839_v33  ;;  %v9797_v40 = vor.u32 %v10805_v55, %v9794_v24  ;;  %v10767_v55 = vld [vmem:[#allocation4 + $0x34] sm:$0xf0] }
 0x684   : > { %v13904_v46 = vadd.f32 %v5454_v14, %v5406_v52  ;;  %5635 = vmatpush.bf16.msrb.mxu1 %v9797_v40  ;;  %v9648_v52 = vld [vmem:[#allocation4 + $0x48] sm:$0xf]  ;;  %5587 = vmatpush.bf16.msrb.mxu0 %v9653_v48  ;;  %v9634_v48 = vld [vmem:[#allocation4 + $0x38] sm:$0xf0] }
 0x685   : > { %v9760_v40 = vld [vmem:[#allocation4 + $0x128] sm:$0xf] }
 0x686   : > { %v5307_v23 = vpop.f32.mrf.mxu2 }
 0x687   : > { %v5356_v42 = vpop.f32.mrf.mxu3  ;;  %v5308_v51 = vadd.f32 %v5307_v23, %v13846_v25  ;;  %v10771_v23 = vld [vmem:[#allocation4 + $0x54] sm:$0xf0] }
 0x689   : > { %v13907_v7 = vadd.f32 %v5356_v42, %v5308_v51  ;;  %v13909_v35 = vpop.f32.mrf.mxu0  ;;  %v9776_v42 = vld [vmem:[#allocation4 + $0x148] sm:$0xf]  ;;  %v9649_v51 = vor.u32 %v10771_v23, %v9648_v52 }
 0x68a   : > { %v13911_v58 = vpop.f32.mrf.mxu1  ;;  %v9777_v17 = vor.u32 %v10803_v56, %v9776_v42 }
 0x68b   : > { %5489 = vmatpush.bf16.msrb.mxu2 %v9649_v51 }
 0x68c   : > { %5538 = vmatpush.bf16.msrb.mxu3 %v9777_v17 }
 0x68e   : > { %v13913_v49 = vpop.f32.mrf.mxu2 }
 0x68f   : > { %v13915_v60 = vpop.f32.mrf.mxu3 }
 0x691   : > { %v5410_v34 = vpop.f32.mrf.mxu0 }
 0x692   : > { %v5459_v30 = vpop.f32.mrf.mxu1  ;;  %v5411_v63 = vadd.f32 %v5410_v34, %v13839_v33  ;;  %v9778_v34 = vld [vmem:[#allocation4 + $0x158] sm:$0xf0] }
 0x694   : > { %v13918_v14 = vadd.f32 %v5459_v30, %v5411_v63  ;;  %v9632_v30 = vld [vmem:[#allocation4 + $0x28] sm:$0xf]  ;;  %v9781_v63 = vor.u32 %v10801_v38, %v9778_v34  ;;  %v10765_v38 = vld [vmem:[#allocation4 + $0x2c] sm:$0xf] }
 0x695   : > { %v9633_v24 = vor.u32 %v10767_v55, %v9632_v30  ;;  %v10797_v34 = vld [vmem:[#allocation4 + $0x12c] sm:$0xf]  ;;  %v9637_v55 = vor.u32 %v10765_v38, %v9634_v48 }
 0x696   : > { %14801 = vst [vmem:[#allocation12_spill] sm:$0xff] %v13918_v14  ;;  %v5312_v26 = vpop.f32.mrf.mxu2  ;;  %5636 = vmatpush.bf16.msrb.mxu1 %v9781_v63  ;;  %v9762_v63 = vld [vmem:[#allocation4 + $0x138] sm:$0xf0]  ;;  %v10761_v14 = vld [vmem:[#allocation4 + $0xc] sm:$0xf] }
 0x697   : > { %v5361_v16 = vpop.f32.mrf.mxu3  ;;  %v5313_v50 = vadd.f32 %v5312_v26, %v13846_v25  ;;  %v10799_v26 = vld [vmem:[#allocation4 + $0x134] sm:$0xf0]  ;;  %5490 = vmatpush.bf16.msrb.mxu2 %v9633_v24  ;;  %5588 = vmatpush.bf16.msrb.mxu0 %v9637_v55  ;;  %v4569_v24 = vpop.permute.xlu1 %4568 }
 0x698   : > { %v9761_v52 = vor.u32 %v10799_v26, %v9760_v40  ;;  %v9765_v40 = vor.u32 %v10797_v34, %v9762_v63  ;;  %v9616_v26 = vld [vmem:[#allocation4 + $0x8] sm:$0xf]  ;;  %v4608_v34 = vmul.f32 %v13685_v62, %v4569_v24  ;;  %v4609_v55 = vmul.f32 %v13687_v11, %v4569_v24 }
 0x699   : > { %v13921_v4 = vadd.f32 %v5361_v16, %v5313_v50  ;;  %v13923_v28 = vpop.f32.mrf.mxu0 }
 0x69a   : > { %v13925_v43 = vpop.f32.mrf.mxu1  ;;  %5539 = vmatpush.bf16.msrb.mxu3 %v9761_v52  ;;  %5637 = vmatpush.bf16.msrb.mxu1 %v9765_v40  ;;  %v10763_v52 = vld [vmem:[#allocation4 + $0x14] sm:$0xf0] }
 0x69b   : > { %14802 = vst [vmem:[#allocation13_spill] sm:$0xff] %v13921_v4  ;;  %v10793_v4 = vld [vmem:[#allocation4 + $0x10c] sm:$0xf] }
 0x69c   : > { %14803 = vst [vmem:[#allocation14_spill] sm:$0xff] %v13925_v43 }
 0x69e   : > { %v13927_v23 = vpop.f32.mrf.mxu2 }
 0x69f   : > { %v13929_v16 = vpop.f32.mrf.mxu3 }
 0x6a0   : > { %14804 = vst [vmem:[#allocation15_spill] sm:$0xff] %v13929_v16  ;;  %v9746_v16 = vld [vmem:[#allocation4 + $0x118] sm:$0xf0] }
 0x6a1   : > { %v5415_v50 = vpop.f32.mrf.mxu0 }
 0x6a2   : > { %v5416_v42 = vadd.f32 %v5415_v50, %v13839_v33  ;;  %v5464_v56 = vpop.f32.mrf.mxu1  ;;  %v9744_v50 = vld [vmem:[#allocation4 + $0x108] sm:$0xf] }
 0x6a4   : > { %v13932_v0 = vadd.f32 %v5464_v56, %v5416_v42  ;;  %v10795_v42 = vld [vmem:[#allocation4 + $0x114] sm:$0xf0]  ;;  %v9617_v56 = vor.u32 %v10763_v52, %v9616_v26 }
 0x6a6   : > { %14805 = vst [vmem:[#allocation19_spill] sm:$0xff] %v13932_v0  ;;  %v5317_v51 = vpop.f32.mrf.mxu2  ;;  %v9745_v0 = vor.u32 %v10795_v42, %v9744_v50  ;;  %5491 = vmatpush.bf16.msrb.mxu2 %v9617_v56 }
 0x6a7   : > { %v5318_v17 = vadd.f32 %v5317_v51, %v13846_v25  ;;  %v5366_v12 = vpop.f32.mrf.mxu3  ;;  %v9618_v51 = vld [vmem:[#allocation4 + $0x18] sm:$0xf0] }
 0x6a8   : > { %v9621_v43 = vor.u32 %v10761_v14, %v9618_v51  ;;  %5540 = vmatpush.bf16.msrb.mxu3 %v9745_v0 }
 0x6a9   : > { %v13935_v30 = vadd.f32 %v5366_v12, %v5318_v17  ;;  %v9749_v17 = vor.u32 %v10793_v4, %v9746_v16  ;;  %v4672_v12 = vpop.permute.xlu1 %4671 }
 0x6aa   : > { %5589 = vmatpush.bf16.msrb.mxu0 %v9621_v43  ;;  %v4710_v38 = vmul.f32 %v13689_v20, %v4672_v12  ;;  %v4711_v48 = vmul.f32 %v13691_v10, %v4672_v12  ;;  %v4668_v26 = vpop.permute.xlu2 %4667 }
 0x6ab   : > { %5638 = vmatpush.bf16.msrb.mxu1 %v9749_v17  ;;  %v4708_v4 = vmul.f32 %v13689_v20, %v4668_v26  ;;  %v4709_v43 = vmul.f32 %v13691_v10, %v4668_v26  ;;  %v10886_v26 = vld [vmem:[#allocation6 + $0x1ec] sm:$0xf0] }
 0x6ac   : > { %v4742_v63 = vadd.f32 %v4710_v38, %v4608_v34  ;;  %v4743_v40 = vadd.f32 %v4711_v48, %v4609_v55 }
 0x6ae   : > { %v4780_v14 = vadd.f32 %v13704_v6, %v4742_v63  ;;  %v4781_v52 = vadd.f32 %v13706_v18, %v4743_v40  ;;  %v10104_v63 = vld [vmem:[#allocation6 + $0x1e0] sm:$0xf] }
 0x6b0   : > { %v4844_v51 = vmul.f32 0.2, %v4780_v14  ;;  %v4845_v24 = vmul.f32 0.2, %v4781_v52  ;;  %vm4812_vm12 = vcmp.gt.f32.partialorder %v4780_v14, 0.0  ;;  %vm4813_vm13 = vcmp.gt.f32.partialorder %v4781_v52, 0.0 }
 0x6b2   : > { %v4876_v10 = vsel %vm4812_vm12, %v4780_v14, %v4844_v51  ;;  %v10105_v14 = vor.u32 %v10886_v26, %v10104_v63 }
 0x6b4   : > { %6731 = vmatpush.bf16.msra.mxu3 %v10105_v14 }
 0x6c2   : > { %v4564_v0 = vpop.permute.xlu0 %4563 }
 0x6c3   : > { %v4606_v16 = vmul.f32 %v13685_v62, %v4564_v0  ;;  %v4607_v50 = vmul.f32 %v13687_v11, %v4564_v0  ;;  %v4877_v62 = vsel %vm4813_vm13, %v4781_v52, %v4845_v24  ;;  %v10232_v52 = vld [vmem:[#allocation6 + $0x2e0] sm:$0xf]  ;;  %v10918_v0 = vld [vmem:[#allocation6 + $0x2ec] sm:$0xf0]  ;;  %v13957_v24 = vpop.f32.mrf.mxu0 }
 0x6c5   : > { %v4740_v42 = vadd.f32 %v4708_v4, %v4606_v16  ;;  %v4741_v56 = vadd.f32 %v4709_v43, %v4607_v50  ;;  %v10360_v4 = vld [vmem:[#allocation6 + $0x3e0] sm:$0xf]  ;;  %v10233_v43 = vor.u32 %v10918_v0, %v10232_v52  ;;  %v10950_v16 = vld [vmem:[#allocation6 + $0x3ec] sm:$0xf0] }
 0x6c6   : > { %v9960_v50 = vld [vmem:[#allocation6 + $0xc0] sm:$0xf]  ;;  %v10914_v0 = vld [vmem:[#allocation6 + $0x2cc] sm:$0xf0] }
 0x6c7   : > { %v4778_v17 = vadd.f32 %v13704_v6, %v4740_v42  ;;  %v4779_v12 = vadd.f32 %v13706_v18, %v4741_v56  ;;  %v9976_v6 = vld [vmem:[#allocation6 + $0xe0] sm:$0xf]  ;;  %v10854_v18 = vld [vmem:[#allocation6 + $0xec] sm:$0xf0]  ;;  %v10361_v56 = vor.u32 %v10950_v16, %v10360_v4  ;;  %6780 = vmatpush.bf16.msra.mxu0 %v10233_v43 }
 0x6c8   : > { %v9977_v40 = vor.u32 %v10854_v18, %v9976_v6  ;;  %v10850_v42 = vld [vmem:[#allocation6 + $0xcc] sm:$0xf0]  ;;  %v10216_v52 = vld [vmem:[#allocation6 + $0x2c0] sm:$0xf] }
 0x6c9   : > { %vm4810_vm14 = vcmp.gt.f32.partialorder %v4778_v17, 0.0  ;;  %vm4811_vm15 = vcmp.gt.f32.partialorder %v4779_v12, 0.0  ;;  %v4842_v38 = vmul.f32 0.2, %v4778_v17  ;;  %v4843_v20 = vmul.f32 0.2, %v4779_v12  ;;  %6829 = vmatpush.bf16.msra.mxu1 %v10361_v56 }
 0x6ca   : > { %6682 = vmatpush.bf16.msra.mxu2 %v9977_v40  ;;  %v9961_v51 = vor.u32 %v10850_v42, %v9960_v50  ;;  %v10882_v6 = vld [vmem:[#allocation6 + $0x1cc] sm:$0xf0]  ;;  %v10217_v4 = vor.u32 %v10914_v0, %v10216_v52  ;;  %v9944_v16 = vld [vmem:[#allocation6 + $0xa0] sm:$0xf] }
 0x6cb   : > { %v4874_v48 = vsel %vm4810_vm14, %v4778_v17, %v4842_v38  ;;  %v4875_v34 = vsel %vm4811_vm15, %v4779_v12, %v4843_v20  ;;  %v13959_v17 = vpop.f32.mrf.mxu1  ;;  %v13961_v12 = vpop.f32.mrf.mxu2  ;;  %v10846_v50 = vld [vmem:[#allocation6 + $0xac] sm:$0xf0]  ;;  %v10072_v42 = vld [vmem:[#allocation6 + $0x1a0] sm:$0xf] }
 0x6cc   : > { %v13949_v55 = vpack.c.bf16 %v4876_v10, %v4874_v48  ;;  %v13951_v11 = vpack.c.bf16 %v4877_v62, %v4875_v34  ;;  %v13963_v38 = vpop.f32.mrf.mxu3  ;;  %v10088_v62 = vld [vmem:[#allocation6 + $0x1c0] sm:$0xf]  ;;  %6781 = vmatpush.bf16.msra.mxu0 %v10217_v4  ;;  %v9945_v56 = vor.u32 %v10846_v50, %v9944_v16  ;;  %v10874_v0 = vld [vmem:[#allocation6 + $0x18c] sm:$0xf0] }
 0x6cd   : > { %v10089_v18 = vor.u32 %v10882_v6, %v10088_v62  ;;  %v10328_v62 = vld [vmem:[#allocation6 + $0x3a0] sm:$0xf] }
 0x6ce   : > { %5331 = vmatmul.bf16.gmra.mxu2 %v13949_v55  ;;  %5380 = vmatmul.bf16.gmra.mxu3 %v13951_v11  ;;  %v10056_v52 = vld [vmem:[#allocation6 + $0x180] sm:$0xf] }
 0x6cf   : > { %5429 = vmatmul.bf16.gmra.mxu0 %v13949_v55  ;;  %5478 = vmatmul.bf16.gmra.mxu1 %v13951_v11  ;;  %v10057_v4 = vor.u32 %v10874_v0, %v10056_v52 }
 0x6d0   : > { %6683 = vmatpush.bf16.msra.mxu2 %v9961_v51  ;;  %6732 = vmatpush.bf16.msra.mxu3 %v10089_v18  ;;  %v10878_v51 = vld [vmem:[#allocation6 + $0x1ac] sm:$0xf0] }
 0x6d4   : > { %6684 = vmatpush.bf16.msra.mxu2 %v9945_v56 }
 0x6de   : > { %5492 = vmatmul.bf16.vlgmr.msrb.gmra.mxu2 %v13718_v61  ;;  %5541 = vmatmul.bf16.vlgmr.msrb.gmra.mxu3 %v13720_v3 }
 0x6df   : > { %v5420_v20 = vpop.f32.mrf.mxu0  ;;  %5590 = vmatmul.bf16.vlgmr.msrb.gmra.mxu0 %v13718_v61  ;;  %5639 = vmatmul.bf16.vlgmr.msrb.gmra.mxu1 %v13720_v3  ;;  %v5469_v10 = vpop.f32.mrf.mxu1  ;;  %v10344_v61 = vld [vmem:[#allocation6 + $0x3c0] sm:$0xf]  ;;  %v10946_v3 = vld [vmem:[#allocation6 + $0x3cc] sm:$0xf0] }
 0x6e0   : > { %v5421_v48 = vadd.f32 %v5420_v20, %v13839_v33  ;;  %v10345_v43 = vor.u32 %v10946_v3, %v10344_v61  ;;  %v10073_v20 = vor.u32 %v10878_v51, %v10072_v42  ;;  %v10184_v51 = vld [vmem:[#allocation6 + $0x280] sm:$0xf] }
 0x6e2   : > { %v13970_v34 = vadd.f32 %v5469_v10, %v5421_v48  ;;  %6830 = vmatpush.bf16.msra.mxu1 %v10345_v43  ;;  %v10200_v48 = vld [vmem:[#allocation6 + $0x2a0] sm:$0xf]  ;;  %v10910_v10 = vld [vmem:[#allocation6 + $0x2ac] sm:$0xf0]  ;;  %6733 = vmatpush.bf16.msra.mxu3 %v10073_v20 }
 0x6e3   : > { %v10201_v18 = vor.u32 %v10910_v10, %v10200_v48  ;;  %v10906_v20 = vld [vmem:[#allocation6 + $0x28c] sm:$0xf0]  ;;  %v10312_v48 = vld [vmem:[#allocation6 + $0x380] sm:$0xf] }
 0x6e4   : > { %v5322_v63 = vpop.f32.mrf.mxu2  ;;  %v5371_v26 = vpop.f32.mrf.mxu3 }
 0x6e5   : > { %v5323_v40 = vadd.f32 %v5322_v63, %v13846_v25  ;;  %v10942_v63 = vld [vmem:[#allocation6 + $0x3ac] sm:$0xf0]  ;;  %6782 = vmatpush.bf16.msra.mxu0 %v10201_v18 }
 0x6e6   : > { %6734 = vmatpush.bf16.msra.mxu3 %v10057_v4  ;;  %v10938_v18 = vld [vmem:[#allocation6 + $0x38c] sm:$0xf0] }
 0x6e7   : > { %v13973_v14 = vadd.f32 %v5371_v26, %v5323_v40  ;;  %v13979_v6 = vpop.f32.mrf.mxu0  ;;  %v9928_v40 = vld [vmem:[#allocation6 + $0x80] sm:$0xf]  ;;  %v13981_v61 = vpop.f32.mrf.mxu1  ;;  %v10870_v4 = vld [vmem:[#allocation6 + $0x16c] sm:$0xf0] }
 0x6ec   : > { %v13983_v3 = vpop.f32.mrf.mxu2  ;;  %v13985_v43 = vpop.f32.mrf.mxu3 }
 0x6ee   : > { %5497 = vmatmul.bf16.gmra.mxu2 %v13752_v15  ;;  %5546 = vmatmul.bf16.gmra.mxu3 %v13754_v2 }
 0x6ef   : > { %5595 = vmatmul.bf16.gmra.mxu0 %v13752_v15  ;;  %5644 = vmatmul.bf16.gmra.mxu1 %v13754_v2  ;;  %v10842_v15 = vld [vmem:[#allocation6 + $0x8c] sm:$0xf0]  ;;  %v10329_v2 = vor.u32 %v10942_v63, %v10328_v62  ;;  %v10185_v62 = vor.u32 %v10906_v20, %v10184_v51 }
 0x6f0   : > { %v9929_v26 = vor.u32 %v10842_v15, %v9928_v40  ;;  %v10313_v40 = vor.u32 %v10938_v18, %v10312_v48  ;;  %v9912_v15 = vld [vmem:[#allocation6 + $0x60] sm:$0xf]  ;;  %v10934_v20 = vld [vmem:[#allocation6 + $0x36c] sm:$0xf0] }
 0x6f1   : > { %6831 = vmatpush.bf16.msra.mxu1 %v10329_v2  ;;  %v10838_v2 = vld [vmem:[#allocation6 + $0x6c] sm:$0xf0]  ;;  %6783 = vmatpush.bf16.msra.mxu0 %v10185_v62  ;;  %v9896_v48 = vld [vmem:[#allocation6 + $0x40] sm:$0xf] }
 0x6f2   : > { %6685 = vmatpush.bf16.msra.mxu2 %v9929_v26  ;;  %v10040_v26 = vld [vmem:[#allocation6 + $0x160] sm:$0xf]  ;;  %v9913_v0 = vor.u32 %v10838_v2, %v9912_v15 }
 0x6f3   : > { %v10280_v2 = vld [vmem:[#allocation6 + $0x340] sm:$0xf] }
 0x6f5   : > { %6832 = vmatpush.bf16.msra.mxu1 %v10313_v40  ;;  %v10866_v40 = vld [vmem:[#allocation6 + $0x14c] sm:$0xf0] }
 0x6f6   : > { %6686 = vmatpush.bf16.msra.mxu2 %v9913_v0  ;;  %v9880_v0 = vld [vmem:[#allocation6 + $0x20] sm:$0xf] }
 0x6fb   : > { %v5425_v16 = vpop.f32.mrf.mxu0  ;;  %v5474_v42 = vpop.f32.mrf.mxu1 }
 0x6fc   : > { %v5426_v50 = vadd.f32 %v5425_v16, %v13839_v33 }
 0x6fe   : > { %v13988_v56 = vadd.f32 %v5474_v42, %v5426_v50  ;;  %5502 = vmatmul.bf16.gmra.mxu2 %v13772_v41  ;;  %5551 = vmatmul.bf16.gmra.mxu3 %v13774_v13  ;;  %v10902_v50 = vld [vmem:[#allocation6 + $0x26c] sm:$0xf0]  ;;  %v10296_v42 = vld [vmem:[#allocation6 + $0x360] sm:$0xf] }
 0x6ff   : > { %5600 = vmatmul.bf16.gmra.mxu0 %v13772_v41  ;;  %5649 = vmatmul.bf16.gmra.mxu1 %v13774_v13  ;;  %v10041_v41 = vor.u32 %v10870_v4, %v10040_v26  ;;  %v10168_v13 = vld [vmem:[#allocation6 + $0x260] sm:$0xf]  ;;  %v10297_v62 = vor.u32 %v10934_v20, %v10296_v42  ;;  %v10830_v4 = vld [vmem:[#allocation6 + $0x2c] sm:$0xf0] }
 0x700   : > { %v5327_v10 = vpop.f32.mrf.mxu2  ;;  %v5376_v52 = vpop.f32.mrf.mxu3  ;;  %v10169_v51 = vor.u32 %v10902_v50, %v10168_v13  ;;  %v9881_v13 = vor.u32 %v10830_v4, %v9880_v0  ;;  %v9864_v42 = vld [vmem:[#allocation6] sm:$0xf]  ;;  %v10922_v0 = vld [vmem:[#allocation6 + $0x30c] sm:$0xf0] }
 0x701   : > { %v5328_v63 = vadd.f32 %v5327_v10, %v13846_v25  ;;  %6735 = vmatpush.bf16.msra.mxu3 %v10041_v41  ;;  %v10834_v10 = vld [vmem:[#allocation6 + $0x4c] sm:$0xf0]  ;;  %6833 = vmatpush.bf16.msra.mxu1 %v10297_v62  ;;  %v9992_v20 = vld [vmem:[#allocation6 + $0x100] sm:$0xf] }
 0x702   : > { %v9897_v18 = vor.u32 %v10834_v10, %v9896_v48  ;;  %6784 = vmatpush.bf16.msra.mxu0 %v10169_v51  ;;  %v10826_v51 = vld [vmem:[#allocation6 + $0xc] sm:$0xf0]  ;;  %v10136_v62 = vld [vmem:[#allocation6 + $0x220] sm:$0xf] }
 0x703   : > { %v13995_v16 = vadd.f32 %v5376_v52, %v5328_v63  ;;  %v10024_v63 = vld [vmem:[#allocation6 + $0x140] sm:$0xf]  ;;  %v10930_v52 = vld [vmem:[#allocation6 + $0x34c] sm:$0xf0]  ;;  %v9865_v48 = vor.u32 %v10826_v51, %v9864_v42 }
 0x704   : > { %v10025_v15 = vor.u32 %v10866_v40, %v10024_v63  ;;  %6687 = vmatpush.bf16.msra.mxu2 %v9897_v18  ;;  %v10281_v41 = vor.u32 %v10930_v52, %v10280_v2  ;;  %v10858_v10 = vld [vmem:[#allocation6 + $0x10c] sm:$0xf0]  ;;  %v10264_v63 = vld [vmem:[#allocation6 + $0x320] sm:$0xf] }
 0x705   : > { %v10894_v18 = vld [vmem:[#allocation6 + $0x22c] sm:$0xf0]  ;;  %v10248_v52 = vld [vmem:[#allocation6 + $0x300] sm:$0xf] }
 0x706   : > { %6736 = vmatpush.bf16.msra.mxu3 %v10025_v15  ;;  %6834 = vmatpush.bf16.msra.mxu1 %v10281_v41  ;;  %v10137_v40 = vor.u32 %v10894_v18, %v10136_v62  ;;  %v10926_v15 = vld [vmem:[#allocation6 + $0x32c] sm:$0xf0]  ;;  %v10249_v4 = vor.u32 %v10922_v0, %v10248_v52  ;;  %v9978_v18 = vld [vmem:[#allocation6 + $0xf0] sm:$0xf0] }
 0x708   : > { %6688 = vmatpush.bf16.msra.mxu2 %v9881_v13  ;;  %v14017_v2 = vpop.f32.mrf.mxu2 }
 0x70c   : > { %6689 = vmatpush.bf16.msra.mxu2 %v9865_v48 }
 0x70e   : > { %5507 = vmatmul.bf16.gmra.mxu2 %v13792_v21  ;;  %5556 = vmatmul.bf16.gmra.mxu3 %v13794_v22 }
 0x70f   : > { %5605 = vmatmul.bf16.gmra.mxu0 %v13792_v21  ;;  %5654 = vmatmul.bf16.gmra.mxu1 %v13794_v22  ;;  %v10152_v21 = vld [vmem:[#allocation6 + $0x240] sm:$0xf]  ;;  %v10898_v22 = vld [vmem:[#allocation6 + $0x24c] sm:$0xf0] }
 0x710   : > { %v10153_v26 = vor.u32 %v10898_v22, %v10152_v21  ;;  %v9993_v21 = vor.u32 %v10858_v10, %v9992_v20  ;;  %v14015_v22 = vpop.f32.mrf.mxu1  ;;  %v10852_v10 = vld [vmem:[#allocation6 + $0xe4] sm:$0xf] }
 0x712   : > { %6785 = vmatpush.bf16.msra.mxu0 %v10153_v26  ;;  %v14019_v26 = vpop.f32.mrf.mxu3 }
 0x716   : > { %6786 = vmatpush.bf16.msra.mxu0 %v10137_v40  ;;  %v10884_v40 = vld [vmem:[#allocation6 + $0x1e4] sm:$0xf] }
 0x71e   : > { %5512 = vmatmul.bf16.gmra.mxu2 %v13814_v29  ;;  %5561 = vmatmul.bf16.gmra.mxu3 %v13816_v9 }
 0x71f   : > { %5610 = vmatmul.bf16.gmra.mxu0 %v13814_v29  ;;  %5659 = vmatmul.bf16.gmra.mxu1 %v13816_v9  ;;  %v10008_v29 = vld [vmem:[#allocation6 + $0x120] sm:$0xf]  ;;  %v10862_v9 = vld [vmem:[#allocation6 + $0x12c] sm:$0xf0] }
 0x720   : > { %v10009_v50 = vor.u32 %v10862_v9, %v10008_v29  ;;  %v10120_v29 = vld [vmem:[#allocation6 + $0x200] sm:$0xf]  ;;  %v5300_v9 = vadd.f32 %v13869_v19, %v13846_v25 }
 0x722   : > { %6737 = vmatpush.bf16.msra.mxu3 %v10009_v50 }
 0x726   : > { %6738 = vmatpush.bf16.msra.mxu3 %v9993_v21 }
 0x72e   : > { %5517 = vmatmul.bf16.gmra.mxu2 %v13850_v37  ;;  %5566 = vmatmul.bf16.gmra.mxu3 %v13852_v45 }
 0x72f   : > { %5615 = vmatmul.bf16.gmra.mxu0 %v13850_v37  ;;  %5664 = vmatmul.bf16.gmra.mxu1 %v13852_v45  ;;  %v10265_v37 = vor.u32 %v10926_v15, %v10264_v63  ;;  %v14013_v45 = vpop.f32.mrf.mxu0  ;;  %v9981_v63 = vor.u32 %v10852_v10, %v9978_v18  ;;  %v10106_v15 = vld [vmem:[#allocation6 + $0x1f0] sm:$0xf0] }
 0x730   : > { %v10234_v18 = vld [vmem:[#allocation6 + $0x2f0] sm:$0xf0] }
 0x731   : > { %6835 = vmatpush.bf16.msra.mxu1 %v10265_v37  ;;  %6878 = vmatpush.bf16.msrb.mxu2 %v9981_v63  ;;  %v10948_v63 = vld [vmem:[#allocation6 + $0x3e4] sm:$0xf] }
 0x735   : > { %6836 = vmatpush.bf16.msra.mxu1 %v10249_v4 }
 0x73e   : > { %5522 = vmatmul.bf16.gmra.mxu2 %v13891_v44  ;;  %5571 = vmatmul.bf16.gmra.mxu3 %v13893_v59 }
 0x73f   : > { %5620 = vmatmul.bf16.gmra.mxu0 %v13891_v44  ;;  %5669 = vmatmul.bf16.gmra.mxu1 %v13893_v59  ;;  %v10890_v44 = vld [vmem:[#allocation6 + $0x20c] sm:$0xf0]  ;;  %v5398_v59 = vadd.f32 %v13862_v57, %v13839_v33  ;;  %v5349_v57 = vadd.f32 %v13871_v5, %v5300_v9  ;;  %v5744_v5 = vmul.f32 0.2, %v13857_v47 }
 0x740   : > { %v10121_v42 = vor.u32 %v10890_v44, %v10120_v29 }
 0x741   : > { %v5447_v20 = vadd.f32 %v13864_v54, %v5398_v59  ;;  %v5748_v0 = vmul.f32 0.2, %v5349_v57  ;;  %vm5684_vm1 = vcmp.gt.f32.partialorder %v5349_v57, 0.0  ;;  %v5745_v54 = vmul.f32 0.2, %v13848_v53 }
 0x742   : > { %6787 = vmatpush.bf16.msra.mxu0 %v10121_v42  ;;  %v5808_v9 = vsel %vm5680_vm3, %v13857_v47, %v5744_v5  ;;  %v14047_v42 = vperm.slane %v13830_v31, 3  ;;  %v10362_v47 = vld [vmem:[#allocation6 + $0x3f0] sm:$0xf0]  ;;  %v5403_v31 = vadd.f32 %v13885_v32, %v13839_v33 }
 0x743   : > { %v5749_v52 = vmul.f32 0.2, %v5447_v20  ;;  %vm5685_vm0 = vcmp.gt.f32.partialorder %v5447_v20, 0.0  ;;  %v5809_v59 = vsel %vm5681_vm2, %v13848_v53, %v5745_v54  ;;  %vm5697_vm2 = vcmp.gt.f32.partialorder %v13904_v46, 0.0 }
 0x745   : > { %v5813_v4 = vsel %vm5685_vm0, %v5447_v20, %v5749_v52  ;;  %vm5696_vm0 = vcmp.gt.f32.partialorder %v13907_v7, 0.0 }
 0x74c   : > { %v5430_v41 = vpop.f32.mrf.mxu0  ;;  %v5479_v13 = vpop.f32.mrf.mxu1 }
 0x74d   : > { %v5431_v50 = vadd.f32 %v5430_v41, %v13839_v33  ;;  %v5812_v41 = vsel %vm5684_vm1, %v5349_v57, %v5748_v0  ;;  %v10916_v57 = vld [vmem:[#allocation6 + $0x2e4] sm:$0xf]  ;;  %v11181_v0 = vld [vmem:[%s14727_s13] sm:$0xf] }
 0x74e   : > { %5527 = vmatmul.bf16.gmra.mxu2 %v13949_v55  ;;  %5576 = vmatmul.bf16.gmra.mxu3 %v13951_v11  ;;  %v10237_v53 = vor.u32 %v10916_v57, %v10234_v18  ;;  %v10880_v18 = vld [vmem:[#allocation6 + $0x1c4] sm:$0xf] }
 0x74f   : > { %v14028_v51 = vadd.f32 %v5479_v13, %v5431_v50  ;;  %5625 = vmatmul.bf16.gmra.mxu0 %v13949_v55  ;;  %5674 = vmatmul.bf16.gmra.mxu1 %v13951_v11  ;;  %v10109_v11 = vor.u32 %v10884_v40, %v10106_v15  ;;  %v5305_v40 = vadd.f32 %v13899_v8, %v13846_v25  ;;  %v14063_v8 = vperm.slane %v11181_v0, 2 }
 0x750   : > { %6976 = vmatpush.bf16.msrb.mxu0 %v10237_v53 }
 0x751   : > { %v5332_v48 = vpop.f32.mrf.mxu2  ;;  %v5381_v19 = vpop.f32.mrf.mxu3  ;;  %6927 = vmatpush.bf16.msrb.mxu3 %v10109_v11  ;;  %v10365_v11 = vor.u32 %v10948_v63, %v10362_v47  ;;  %v5354_v32 = vadd.f32 %v13901_v27, %v5305_v40  ;;  %v10090_v63 = vld [vmem:[#allocation6 + $0x1d0] sm:$0xf0]  ;;  %v5752_v40 = vmul.f32 0.2, %v13889_v1 }
 0x752   : > { %v5333_v62 = vadd.f32 %v5332_v48, %v13846_v25  ;;  %v14049_v48 = vpack.c.bf16 %v5813_v4, %v5809_v59  ;;  %v9962_v59 = vld [vmem:[#allocation6 + $0xd0] sm:$0xf0] }
 0x753   : > { %7025 = vmatpush.bf16.msrb.mxu1 %v10365_v11  ;;  %vm5692_vm6 = vcmp.gt.f32.partialorder %v5354_v32, 0.0 }
 0x754   : > { %v5382_v21 = vadd.f32 %v5381_v19, %v5333_v62  ;;  %v14035_v37 = vpop.f32.mrf.mxu0  ;;  %v14037_v55 = vpop.f32.mrf.mxu1  ;;  %v14051_v19 = vpack.c.bf16 %v5812_v41, %v5808_v9 }
 0x756   : > { %v5800_v50 = vmul.f32 0.2, %v5382_v21  ;;  %vm5736_vm4 = vcmp.gt.f32.partialorder %v5382_v21, 0.0 }
 0x758   : > { %v5864_v54 = vsel %vm5736_vm4, %v5382_v21, %v5800_v50  ;;  %v10093_v50 = vor.u32 %v10880_v18, %v10090_v63 }
 0x759   : > { %v5334_v13 = vpop.f32.mrf.mxu2  ;;  %v5383_v29 = vpop.f32.mrf.mxu3 }
 0x75a   : > { %v5335_v44 = vadd.f32 %v5334_v13, %v13846_v25  ;;  %6928 = vmatpush.bf16.msrb.mxu3 %v10093_v50  ;;  %v10912_v50 = vld [vmem:[#allocation6 + $0x2c4] sm:$0xf] }
 0x75c   : > { %v5384_v10 = vadd.f32 %v5383_v29, %v5335_v44  ;;  %v5591_v62 = vpop.f32.mrf.mxu0  ;;  %v5640_v20 = vpop.f32.mrf.mxu1  ;;  %v10848_v29 = vld [vmem:[#allocation6 + $0xc4] sm:$0xf]  ;;  %v5452_v44 = vadd.f32 %v13887_v39, %v5403_v31 }
 0x75d   : > { %v5592_v52 = vadd.f32 %v5591_v62, %v14047_v42  ;;  %v9965_v57 = vor.u32 %v10848_v29, %v9962_v59  ;;  %v5816_v29 = vsel %vm5688_vm8, %v13889_v1, %v5752_v40  ;;  %v5310_v1 = vadd.f32 %v13913_v49, %v13846_v25  ;;  %v10346_v40 = vld [vmem:[#allocation6 + $0x3d0] sm:$0xf0] }
 0x75e   : > { %vm5740_vm5 = vcmp.gt.f32.partialorder %v5384_v10, 0.0  ;;  %v5804_v15 = vmul.f32 0.2, %v5384_v10  ;;  %6690 = vmatmul.bf16.vlgmr.msra.gmra.mxu2 %v14051_v19  ;;  %6739 = vmatmul.bf16.vlgmr.msra.gmra.mxu3 %v14049_v48  ;;  %v5757_v47 = vmul.f32 0.2, %v5452_v44  ;;  %vm5693_vm7 = vcmp.gt.f32.partialorder %v5452_v44, 0.0 }
 0x75f   : > { %v5641_v9 = vadd.f32 %v5640_v20, %v5592_v52  ;;  %6879 = vmatpush.bf16.msrb.mxu2 %v9965_v57 }
 0x760   : > { %v5868_v5 = vsel %vm5740_vm5, %v5384_v10, %v5804_v15  ;;  %v5756_v10 = vmul.f32 0.2, %v5354_v32  ;;  %v5753_v15 = vmul.f32 0.2, %v13880_v36 }
 0x761   : > { %v14066_v4 = vpack.c.bf16 %v5868_v5, %v5864_v54  ;;  %v5493_v41 = vpop.f32.mrf.mxu2  ;;  %v5542_v13 = vpop.f32.mrf.mxu3  ;;  %v5747_v39 = vmul.f32 0.2, %v5641_v9  ;;  %vm5683_vm9 = vcmp.gt.f32.partialorder %v5641_v9, 0.0  ;;  %v5821_v5 = vsel %vm5693_vm7, %v5452_v44, %v5757_v47 }
 0x762   : > { %v5494_v62 = vadd.f32 %v5493_v41, %v14063_v8  ;;  %v5820_v11 = vsel %vm5692_vm6, %v5354_v32, %v5756_v10  ;;  %v5817_v57 = vsel %vm5689_vm10, %v13880_v36, %v5753_v15  ;;  %v10218_v10 = vld [vmem:[#allocation6 + $0x2d0] sm:$0xf0]  ;;  %v5408_v36 = vadd.f32 %v13909_v35, %v13839_v33 }
 0x763   : > { %v5811_v59 = vsel %vm5683_vm9, %v5641_v9, %v5747_v39  ;;  %v14078_v18 = vpack.c.bf16 %v5820_v11, %v5816_v29  ;;  %v14082_v44 = vpack.c.bf16 %v5821_v5, %v5817_v57  ;;  %v10221_v9 = vor.u32 %v10912_v50, %v10218_v10  ;;  %v10876_v57 = vld [vmem:[#allocation6 + $0x1a4] sm:$0xf] }
 0x764   : > { %v5593_v53 = vpop.f32.mrf.mxu0  ;;  %v5642_v21 = vpop.f32.mrf.mxu1  ;;  %v5543_v20 = vadd.f32 %v5542_v13, %v5494_v62  ;;  %v5359_v11 = vadd.f32 %v13915_v60, %v5310_v1  ;;  %v5457_v5 = vadd.f32 %v13911_v58, %v5408_v36  ;;  %v5760_v10 = vmul.f32 0.2, %v13907_v7 }
 0x765   : > { %v5594_v27 = vadd.f32 %v5593_v53, %v14047_v42  ;;  %6977 = vmatpush.bf16.msrb.mxu0 %v10221_v9  ;;  %v5761_v9 = vmul.f32 0.2, %v13904_v46 }
 0x766   : > { %v5746_v13 = vmul.f32 0.2, %v5543_v20  ;;  %vm5682_vm12 = vcmp.gt.f32.partialorder %v5543_v20, 0.0  ;;  %v5764_v60 = vmul.f32 0.2, %v5359_v11  ;;  %vm5700_vm14 = vcmp.gt.f32.partialorder %v5359_v11, 0.0 }
 0x767   : > { %v5643_v31 = vadd.f32 %v5642_v21, %v5594_v27  ;;  %v10944_v27 = vld [vmem:[#allocation6 + $0x3c4] sm:$0xf]  ;;  %vm5701_vm15 = vcmp.gt.f32.partialorder %v5457_v5, 0.0 }
 0x768   : > { %v10349_v39 = vor.u32 %v10944_v27, %v10346_v40  ;;  %v5810_v15 = vsel %vm5682_vm12, %v5543_v20, %v5746_v13  ;;  %v10074_v20 = vld [vmem:[#allocation6 + $0x1b0] sm:$0xf0]  ;;  %v5765_v27 = vmul.f32 0.2, %v5457_v5  ;;  %v5828_v40 = vsel %vm5700_vm14, %v5359_v11, %v5764_v60 }
 0x769   : > { %vm5687_vm11 = vcmp.gt.f32.partialorder %v5643_v31, 0.0  ;;  %v5751_v52 = vmul.f32 0.2, %v5643_v31  ;;  %v5495_v0 = vpop.f32.mrf.mxu2  ;;  %v5544_v54 = vpop.f32.mrf.mxu3  ;;  %v10330_v60 = vld [vmem:[#allocation6 + $0x3b0] sm:$0xf0] }
 0x76a   : > { %v5496_v41 = vadd.f32 %v5495_v0, %v14063_v8  ;;  %7026 = vmatpush.bf16.msrb.mxu1 %v10349_v39 }
 0x76b   : > { %v5815_v62 = vsel %vm5687_vm11, %v5643_v31, %v5751_v52 }
 0x76c   : > { %v14080_v63 = vpack.c.bf16 %v5815_v62, %v5811_v59  ;;  %v5545_v53 = vadd.f32 %v5544_v54, %v5496_v41  ;;  %v5596_v32 = vpop.f32.mrf.mxu0  ;;  %v5645_v21 = vpop.f32.mrf.mxu1  ;;  %v10844_v54 = vld [vmem:[#allocation6 + $0xa4] sm:$0xf]  ;;  %v9946_v41 = vld [vmem:[#allocation6 + $0xb0] sm:$0xf0] }
 0x76d   : > { %v5597_v31 = vadd.f32 %v5596_v32, %v14047_v42  ;;  %v9949_v62 = vor.u32 %v10844_v54, %v9946_v41  ;;  %v10077_v32 = vor.u32 %v10876_v57, %v10074_v20  ;;  %v5825_v41 = vsel %vm5697_vm2, %v13904_v46, %v5761_v9 }
 0x76e   : > { %vm5686_vm13 = vcmp.gt.f32.partialorder %v5545_v53, 0.0  ;;  %v5750_v47 = vmul.f32 0.2, %v5545_v53  ;;  %6837 = vmatmul.bf16.vlgmr.msra.gmra.mxu1 %v14080_v63  ;;  %6695 = vmatmul.bf16.gmra.mxu2 %v14078_v18  ;;  %v5413_v46 = vadd.f32 %v13923_v28, %v13839_v33 }
 0x76f   : > { %6744 = vmatmul.bf16.gmra.mxu3 %v14082_v44  ;;  %v5646_v29 = vadd.f32 %v5645_v21, %v5597_v31  ;;  %6880 = vmatpush.bf16.msrb.mxu2 %v9949_v62  ;;  %v5829_v31 = vsel %vm5701_vm15, %v5457_v5, %v5765_v27 }
 0x770   : > { %v5814_v49 = vsel %vm5686_vm13, %v5545_v53, %v5750_v47  ;;  %6929 = vmatpush.bf16.msrb.mxu3 %v10077_v32  ;;  %v10940_v32 = vld [vmem:[#allocation6 + $0x3a4] sm:$0xf]  ;;  %v14110_v5 = vpack.c.bf16 %v5829_v31, %v5825_v41 }
 0x771   : > { %v14093_v52 = vpack.c.bf16 %v5814_v49, %v5810_v15  ;;  %v5498_v35 = vpop.f32.mrf.mxu2  ;;  %v5547_v0 = vpop.f32.mrf.mxu3  ;;  %v5755_v58 = vmul.f32 0.2, %v5646_v29  ;;  %vm5691_vm1 = vcmp.gt.f32.partialorder %v5646_v29, 0.0  ;;  %v5824_v49 = vsel %vm5696_vm0, %v13907_v7, %v5760_v10  ;;  %v10872_v41 = vld [vmem:[#allocation6 + $0x184] sm:$0xf] }
 0x772   : > { %v5499_v59 = vadd.f32 %v5498_v35, %v14063_v8  ;;  %v5315_v7 = vadd.f32 %v13927_v23, %v13846_v25  ;;  %v10333_v10 = vor.u32 %v10940_v32, %v10330_v60  ;;  %v14808_v32 = vld [vmem:[#allocation13_spill] sm:$0xff]  ;;  %vm5712_vm0 = vcmp.gt.f32.partialorder %v13935_v30, 0.0 }
 0x773   : > { %6788 = vmatmul.bf16.vlgmr.msra.gmra.mxu0 %v14093_v52  ;;  %v5819_v35 = vsel %vm5691_vm1, %v5646_v29, %v5755_v58  ;;  %vm5704_vm8 = vcmp.gt.f32.partialorder %v14808_v32, 0.0 }
 0x774   : > { %v5598_v13 = vpop.f32.mrf.mxu0  ;;  %v5647_v53 = vpop.f32.mrf.mxu1  ;;  %v5548_v21 = vadd.f32 %v5547_v0, %v5499_v59  ;;  %v14106_v59 = vpack.c.bf16 %v5828_v40, %v5824_v49  ;;  %7027 = vmatpush.bf16.msrb.mxu1 %v10333_v10 }
 0x775   : > { %v5599_v50 = vadd.f32 %v5598_v13, %v14047_v42  ;;  %v10908_v13 = vld [vmem:[#allocation6 + $0x2a4] sm:$0xf] }
 0x776   : > { %v5754_v0 = vmul.f32 0.2, %v5548_v21  ;;  %vm5690_vm4 = vcmp.gt.f32.partialorder %v5548_v21, 0.0 }
 0x777   : > { %v5648_v1 = vadd.f32 %v5647_v53, %v5599_v50  ;;  %v10202_v53 = vld [vmem:[#allocation6 + $0x2b0] sm:$0xf0] }
 0x778   : > { %v10205_v29 = vor.u32 %v10908_v13, %v10202_v53  ;;  %v5818_v58 = vsel %vm5690_vm4, %v5548_v21, %v5754_v0  ;;  %v10058_v21 = vld [vmem:[#allocation6 + $0x190] sm:$0xf0] }
 0x779   : > { %vm5695_vm3 = vcmp.gt.f32.partialorder %v5648_v1, 0.0  ;;  %v5759_v36 = vmul.f32 0.2, %v5648_v1  ;;  %v5500_v47 = vpop.f32.mrf.mxu2  ;;  %v5549_v39 = vpop.f32.mrf.mxu3 }
 0x77a   : > { %v5501_v15 = vadd.f32 %v5500_v47, %v14063_v8  ;;  %6978 = vmatpush.bf16.msrb.mxu0 %v10205_v29  ;;  %v10840_v47 = vld [vmem:[#allocation6 + $0x84] sm:$0xf] }
 0x77b   : > { %v5823_v54 = vsel %vm5695_vm3, %v5648_v1, %v5759_v36  ;;  %v14806_v1 = vld [vmem:[#allocation15_spill] sm:$0xff] }
 0x77c   : > { %v14108_v62 = vpack.c.bf16 %v5823_v54, %v5819_v35  ;;  %v5550_v57 = vadd.f32 %v5549_v39, %v5501_v15  ;;  %v5601_v11 = vpop.f32.mrf.mxu0  ;;  %v5650_v20 = vpop.f32.mrf.mxu1  ;;  %v5364_v9 = vadd.f32 %v14806_v1, %v5315_v7  ;;  %v14807_v39 = vld [vmem:[#allocation14_spill] sm:$0xff]  ;;  %v5768_v7 = vmul.f32 0.2, %v14808_v32 }
 0x77d   : > { %v5602_v27 = vadd.f32 %v5601_v11, %v14047_v42  ;;  %v5462_v31 = vadd.f32 %v14807_v39, %v5413_v46  ;;  %v9930_v15 = vld [vmem:[#allocation6 + $0x90] sm:$0xf0]  ;;  %v10061_v11 = vor.u32 %v10872_v41, %v10058_v21 }
 0x77e   : > { %vm5694_vm5 = vcmp.gt.f32.partialorder %v5550_v57, 0.0  ;;  %v5758_v50 = vmul.f32 0.2, %v5550_v57  ;;  %6842 = vmatmul.bf16.gmra.mxu1 %v14108_v62  ;;  %6700 = vmatmul.bf16.gmra.mxu2 %v14106_v59  ;;  %v9933_v54 = vor.u32 %v10840_v47, %v9930_v15  ;;  %v5772_v13 = vmul.f32 0.2, %v5364_v9 }
 0x77f   : > { %6749 = vmatmul.bf16.gmra.mxu3 %v14110_v5  ;;  %v5651_v49 = vadd.f32 %v5650_v20, %v5602_v27  ;;  %v5773_v29 = vmul.f32 0.2, %v5462_v31  ;;  %vm5708_vm6 = vcmp.gt.f32.partialorder %v5364_v9, 0.0  ;;  %vm5709_vm7 = vcmp.gt.f32.partialorder %v5462_v31, 0.0 }
 0x780   : > { %v5822_v23 = vsel %vm5694_vm5, %v5550_v57, %v5758_v50  ;;  %6881 = vmatpush.bf16.msrb.mxu2 %v9933_v54  ;;  %6930 = vmatpush.bf16.msrb.mxu3 %v10061_v11  ;;  %v14809_v50 = vld [vmem:[#allocation12_spill] sm:$0xff]  ;;  %v5836_v27 = vsel %vm5708_vm6, %v5364_v9, %v5772_v13  ;;  %v5832_v39 = vsel %vm5704_vm8, %v14808_v32, %v5768_v7  ;;  %v10186_v13 = vld [vmem:[#allocation6 + $0x290] sm:$0xf0]  ;;  %vm5720_vm8 = vcmp.gt.f32.partialorder %v13973_v14, 0.0 }
 0x781   : > { %v14121_v40 = vpack.c.bf16 %v5822_v23, %v5818_v58  ;;  %v5503_v28 = vpop.f32.mrf.mxu2  ;;  %v5552_v36 = vpop.f32.mrf.mxu3  ;;  %v5763_v20 = vmul.f32 0.2, %v5651_v49  ;;  %v5769_v10 = vmul.f32 0.2, %v14809_v50  ;;  %vm5699_vm9 = vcmp.gt.f32.partialorder %v5651_v49, 0.0 }
 0x782   : > { %v5504_v35 = vadd.f32 %v5503_v28, %v14063_v8  ;;  %vm5705_vm10 = vcmp.gt.f32.partialorder %v14809_v50, 0.0  ;;  %v5837_v28 = vsel %vm5709_vm7, %v5462_v31, %v5773_v29  ;;  %v14134_v41 = vpack.c.bf16 %v5836_v27, %v5832_v39  ;;  %v10904_v11 = vld [vmem:[#allocation6 + $0x284] sm:$0xf]  ;;  %v10314_v7 = vld [vmem:[#allocation6 + $0x390] sm:$0xf0] }
 0x783   : > { %6793 = vmatmul.bf16.gmra.mxu0 %v14121_v40  ;;  %v5827_v15 = vsel %vm5699_vm9, %v5651_v49, %v5763_v20  ;;  %v5833_v54 = vsel %vm5705_vm10, %v14809_v50, %v5769_v10  ;;  %v5320_v32 = vadd.f32 %v13961_v12, %v13846_v25  ;;  %v10189_v49 = vor.u32 %v10904_v11, %v10186_v13 }
 0x784   : > { %v5603_v0 = vpop.f32.mrf.mxu0  ;;  %v5652_v57 = vpop.f32.mrf.mxu1  ;;  %v5553_v60 = vadd.f32 %v5552_v36, %v5504_v35  ;;  %v14138_v31 = vpack.c.bf16 %v5837_v28, %v5833_v54  ;;  %v5418_v29 = vadd.f32 %v13957_v24, %v13839_v33  ;;  %v10868_v54 = vld [vmem:[#allocation6 + $0x164] sm:$0xf]  ;;  %v5776_v13 = vmul.f32 0.2, %v13935_v30 }
 0x785   : > { %v5604_v53 = vadd.f32 %v5603_v0, %v14047_v42  ;;  %6979 = vmatpush.bf16.msrb.mxu0 %v10189_v49  ;;  %v5369_v27 = vadd.f32 %v13963_v38, %v5320_v32  ;;  %v14810_v49 = vld [vmem:[#allocation19_spill] sm:$0xff]  ;;  %vm5721_vm10 = vcmp.gt.f32.partialorder %v13970_v34, 0.0 }
 0x786   : > { %v5762_v36 = vmul.f32 0.2, %v5553_v60  ;;  %vm5698_vm12 = vcmp.gt.f32.partialorder %v5553_v60, 0.0  ;;  %v5467_v28 = vadd.f32 %v13959_v17, %v5418_v29  ;;  %vm5713_vm2 = vcmp.gt.f32.partialorder %v14810_v49, 0.0 }
 0x787   : > { %v5653_v46 = vadd.f32 %v5652_v57, %v5604_v53  ;;  %v10936_v53 = vld [vmem:[#allocation6 + $0x384] sm:$0xf]  ;;  %v5780_v38 = vmul.f32 0.2, %v5369_v27  ;;  %vm5716_vm14 = vcmp.gt.f32.partialorder %v5369_v27, 0.0 }
 0x788   : > { %v5826_v10 = vsel %vm5698_vm12, %v5553_v60, %v5762_v36  ;;  %v10042_v60 = vld [vmem:[#allocation6 + $0x170] sm:$0xf0]  ;;  %vm5717_vm15 = vcmp.gt.f32.partialorder %v5467_v28, 0.0 }
 0x789   : > { %vm5703_vm11 = vcmp.gt.f32.partialorder %v5653_v46, 0.0  ;;  %v5767_v58 = vmul.f32 0.2, %v5653_v46  ;;  %v5505_v23 = vpop.f32.mrf.mxu2  ;;  %v5554_v1 = vpop.f32.mrf.mxu3  ;;  %v5844_v29 = vsel %vm5716_vm14, %v5369_v27, %v5780_v38  ;;  %v10932_v38 = vld [vmem:[#allocation6 + $0x364] sm:$0xf]  ;;  %vm5729_vm14 = vcmp.gt.f32.partialorder %v13988_v56, 0.0 }
 0x78a   : > { %v5506_v47 = vadd.f32 %v5505_v23, %v14063_v8 }
 0x78b   : > { %v5831_v35 = vsel %vm5703_vm11, %v5653_v46, %v5767_v58  ;;  %v10317_v46 = vor.u32 %v10936_v53, %v10314_v7  ;;  %v5781_v53 = vmul.f32 0.2, %v5467_v28  ;;  %v5777_v7 = vmul.f32 0.2, %v14810_v49 }
 0x78c   : > { %v14136_v21 = vpack.c.bf16 %v5831_v35, %v5827_v15  ;;  %v5555_v0 = vadd.f32 %v5554_v1, %v5506_v47  ;;  %v5606_v9 = vpop.f32.mrf.mxu0  ;;  %v5655_v57 = vpop.f32.mrf.mxu1  ;;  %v10836_v1 = vld [vmem:[#allocation6 + $0x64] sm:$0xf]  ;;  %v9914_v47 = vld [vmem:[#allocation6 + $0x70] sm:$0xf0] }
 0x78d   : > { %v5607_v50 = vadd.f32 %v5606_v9, %v14047_v42  ;;  %7028 = vmatpush.bf16.msrb.mxu1 %v10317_v46  ;;  %v9917_v35 = vor.u32 %v10836_v1, %v9914_v47  ;;  %v10045_v9 = vor.u32 %v10868_v54, %v10042_v60 }
 0x78e   : > { %vm5702_vm13 = vcmp.gt.f32.partialorder %v5555_v0, 0.0  ;;  %v5766_v20 = vmul.f32 0.2, %v5555_v0  ;;  %6847 = vmatmul.bf16.gmra.mxu1 %v14136_v21  ;;  %6705 = vmatmul.bf16.gmra.mxu2 %v14134_v41 }
 0x78f   : > { %6754 = vmatmul.bf16.gmra.mxu3 %v14138_v31  ;;  %v5656_v39 = vadd.f32 %v5655_v57, %v5607_v50  ;;  %6882 = vmatpush.bf16.msrb.mxu2 %v9917_v35 }
 0x790   : > { %v5830_v12 = vsel %vm5702_vm13, %v5555_v0, %v5766_v20  ;;  %6931 = vmatpush.bf16.msrb.mxu3 %v10045_v9  ;;  %v10170_v9 = vld [vmem:[#allocation6 + $0x270] sm:$0xf0] }
 0x791   : > { %v14149_v58 = vpack.c.bf16 %v5830_v12, %v5826_v10  ;;  %v5508_v24 = vpop.f32.mrf.mxu2  ;;  %v5557_v23 = vpop.f32.mrf.mxu3  ;;  %v5771_v17 = vmul.f32 0.2, %v5656_v39  ;;  %vm5707_vm1 = vcmp.gt.f32.partialorder %v5656_v39, 0.0  ;;  %v5845_v10 = vsel %vm5717_vm15, %v5467_v28, %v5781_v53 }
 0x792   : > { %v5509_v15 = vadd.f32 %v5508_v24, %v14063_v8  ;;  %v5840_v24 = vsel %vm5712_vm0, %v13935_v30, %v5776_v13  ;;  %v5325_v30 = vadd.f32 %v13983_v3, %v13846_v25  ;;  %v5423_v13 = vadd.f32 %v13979_v6, %v13839_v33 }
 0x793   : > { %6798 = vmatmul.bf16.gmra.mxu0 %v14149_v58  ;;  %v5835_v1 = vsel %vm5707_vm1, %v5656_v39, %v5771_v17  ;;  %v14162_v35 = vpack.c.bf16 %v5844_v29, %v5840_v24  ;;  %vm5728_vm15 = vcmp.gt.f32.partialorder %v13995_v16, 0.0 }
 0x794   : > { %v5608_v36 = vpop.f32.mrf.mxu0  ;;  %v5657_v0 = vpop.f32.mrf.mxu1  ;;  %v5558_v57 = vadd.f32 %v5557_v23, %v5509_v15  ;;  %v5841_v15 = vsel %vm5713_vm2, %v14810_v49, %v5777_v7  ;;  %v5374_v7 = vadd.f32 %v13985_v43, %v5325_v30  ;;  %v5785_v30 = vmul.f32 0.2, %v13970_v34 }
 0x795   : > { %v5609_v11 = vadd.f32 %v5608_v36, %v14047_v42  ;;  %v14166_v28 = vpack.c.bf16 %v5845_v10, %v5841_v15  ;;  %v9898_v10 = vld [vmem:[#allocation6 + $0x50] sm:$0xf0] }
 0x796   : > { %v5770_v23 = vmul.f32 0.2, %v5558_v57  ;;  %vm5706_vm4 = vcmp.gt.f32.partialorder %v5558_v57, 0.0  ;;  %v5788_v43 = vmul.f32 0.2, %v5374_v7  ;;  %vm5724_vm6 = vcmp.gt.f32.partialorder %v5374_v7, 0.0 }
 0x797   : > { %v5658_v32 = vadd.f32 %v5657_v0, %v5609_v11  ;;  %v10900_v0 = vld [vmem:[#allocation6 + $0x264] sm:$0xf]  ;;  %v10298_v11 = vld [vmem:[#allocation6 + $0x370] sm:$0xf0] }
 0x798   : > { %v10173_v39 = vor.u32 %v10900_v0, %v10170_v9  ;;  %v10301_v17 = vor.u32 %v10932_v38, %v10298_v11  ;;  %v5834_v49 = vsel %vm5706_vm4, %v5558_v57, %v5770_v23  ;;  %v10026_v57 = vld [vmem:[#allocation6 + $0x150] sm:$0xf0]  ;;  %v5784_v0 = vmul.f32 0.2, %v13973_v14 }
 0x799   : > { %vm5711_vm3 = vcmp.gt.f32.partialorder %v5658_v32, 0.0  ;;  %v5775_v20 = vmul.f32 0.2, %v5658_v32  ;;  %v5510_v46 = vpop.f32.mrf.mxu2  ;;  %v5559_v50 = vpop.f32.mrf.mxu3 }
 0x79a   : > { %v5511_v12 = vadd.f32 %v5510_v46, %v14063_v8  ;;  %6980 = vmatpush.bf16.msrb.mxu0 %v10173_v39  ;;  %7029 = vmatpush.bf16.msrb.mxu1 %v10301_v17  ;;  %v10832_v46 = vld [vmem:[#allocation6 + $0x44] sm:$0xf]  ;;  %v5852_v39 = vsel %vm5724_vm6, %v5374_v7, %v5788_v43 }
 0x79b   : > { %v5839_v47 = vsel %vm5711_vm3, %v5658_v32, %v5775_v20 }
 0x79c   : > { %v14164_v54 = vpack.c.bf16 %v5839_v47, %v5835_v1  ;;  %v5560_v60 = vadd.f32 %v5559_v50, %v5511_v12  ;;  %v5611_v27 = vpop.f32.mrf.mxu0  ;;  %v5660_v36 = vpop.f32.mrf.mxu1  ;;  %v5472_v50 = vadd.f32 %v13981_v61, %v5423_v13  ;;  %v9901_v1 = vor.u32 %v10832_v46, %v9898_v10  ;;  %v10864_v47 = vld [vmem:[#allocation6 + $0x144] sm:$0xf] }
 0x79d   : > { %v5612_v32 = vadd.f32 %v5611_v27, %v14047_v42  ;;  %v5849_v46 = vsel %vm5721_vm10, %v13970_v34, %v5785_v30  ;;  %v5428_v34 = vadd.f32 %v14013_v45, %v13839_v33  ;;  %v10828_v30 = vld [vmem:[#allocation6 + $0x24] sm:$0xf] }
 0x79e   : > { %vm5710_vm5 = vcmp.gt.f32.partialorder %v5560_v60, 0.0  ;;  %v5774_v53 = vmul.f32 0.2, %v5560_v60  ;;  %6852 = vmatmul.bf16.gmra.mxu1 %v14164_v54  ;;  %6710 = vmatmul.bf16.gmra.mxu2 %v14162_v35  ;;  %v5789_v9 = vmul.f32 0.2, %v5472_v50  ;;  %vm5725_vm7 = vcmp.gt.f32.partialorder %v5472_v50, 0.0 }
 0x79f   : > { %6759 = vmatmul.bf16.gmra.mxu3 %v14166_v28  ;;  %v5661_v12 = vadd.f32 %v5660_v36, %v5612_v32  ;;  %6883 = vmatpush.bf16.msrb.mxu2 %v9901_v1 }
 0x7a0   : > { %v5838_v3 = vsel %vm5710_vm5, %v5560_v60, %v5774_v53  ;;  %v10029_v60 = vor.u32 %v10864_v47, %v10026_v57  ;;  %v5853_v17 = vsel %vm5725_vm7, %v5472_v50, %v5789_v9  ;;  %v10896_v57 = vld [vmem:[#allocation6 + $0x244] sm:$0xf] }
 0x7a1   : > { %v14177_v29 = vpack.c.bf16 %v5838_v3, %v5834_v49  ;;  %v5513_v6 = vpop.f32.mrf.mxu2  ;;  %v5562_v20 = vpop.f32.mrf.mxu3  ;;  %v5779_v61 = vmul.f32 0.2, %v5661_v12  ;;  %vm5715_vm9 = vcmp.gt.f32.partialorder %v5661_v12, 0.0  ;;  %v5848_v49 = vsel %vm5720_vm8, %v13973_v14, %v5784_v0 }
 0x7a2   : > { %v5514_v24 = vadd.f32 %v5513_v6, %v14063_v8  ;;  %6932 = vmatpush.bf16.msrb.mxu3 %v10029_v60  ;;  %v14190_v10 = vpack.c.bf16 %v5852_v39, %v5848_v49  ;;  %v14194_v50 = vpack.c.bf16 %v5853_v17, %v5849_v46  ;;  %v5330_v14 = vadd.f32 %v14017_v2, %v13846_v25  ;;  %v10282_v60 = vld [vmem:[#allocation6 + $0x350] sm:$0xf0] }
 0x7a3   : > { %6803 = vmatmul.bf16.gmra.mxu0 %v14177_v29  ;;  %v5843_v3 = vsel %vm5715_vm9, %v5661_v12, %v5779_v61  ;;  %v5477_v39 = vadd.f32 %v14015_v22, %v5428_v34  ;;  %v5792_v22 = vmul.f32 0.2, %v13995_v16  ;;  %vm5737_vm8 = vcmp.gt.f32.partialorder %v14028_v51, 0.0 }
 0x7a4   : > { %v5613_v23 = vpop.f32.mrf.mxu0  ;;  %v5662_v15 = vpop.f32.mrf.mxu1  ;;  %v5563_v36 = vadd.f32 %v5562_v20, %v5514_v24  ;;  %v5379_v2 = vadd.f32 %v14019_v26, %v5330_v14  ;;  %v5793_v26 = vmul.f32 0.2, %v13988_v56 }
 0x7a5   : > { %v5614_v27 = vadd.f32 %v5613_v23, %v14047_v42  ;;  %v10154_v23 = vld [vmem:[#allocation6 + $0x250] sm:$0xf0]  ;;  %vm5733_vm1 = vcmp.gt.f32.partialorder %v5477_v39, 0.0  ;;  %v5856_v34 = vsel %vm5728_vm15, %v13995_v16, %v5792_v22 }
 0x7a6   : > { %v5778_v6 = vmul.f32 0.2, %v5563_v36  ;;  %vm5714_vm12 = vcmp.gt.f32.partialorder %v5563_v36, 0.0  ;;  %v10157_v12 = vor.u32 %v10896_v57, %v10154_v23  ;;  %vm5732_vm0 = vcmp.gt.f32.partialorder %v5379_v2, 0.0  ;;  %v10138_v16 = vld [vmem:[#allocation6 + $0x230] sm:$0xf0] }
 0x7a7   : > { %v5663_v38 = vadd.f32 %v5662_v15, %v5614_v27  ;;  %v10928_v15 = vld [vmem:[#allocation6 + $0x344] sm:$0xf] }
 0x7a8   : > { %v10285_v27 = vor.u32 %v10928_v15, %v10282_v60  ;;  %6981 = vmatpush.bf16.msrb.mxu0 %v10157_v12  ;;  %v5842_v9 = vsel %vm5714_vm12, %v5563_v36, %v5778_v6  ;;  %v10010_v36 = vld [vmem:[#allocation6 + $0x130] sm:$0xf0]  ;;  %v5857_v60 = vsel %vm5729_vm14, %v13988_v56, %v5793_v26 }
 0x7a9   : > { %vm5719_vm11 = vcmp.gt.f32.partialorder %v5663_v38, 0.0  ;;  %v5783_v11 = vmul.f32 0.2, %v5663_v38  ;;  %v5515_v13 = vpop.f32.mrf.mxu2  ;;  %v5564_v53 = vpop.f32.mrf.mxu3 }
 0x7aa   : > { %v5516_v32 = vadd.f32 %v5515_v13, %v14063_v8  ;;  %7030 = vmatpush.bf16.msrb.mxu1 %v10285_v27 }
 0x7ab   : > { %v5847_v20 = vsel %vm5719_vm11, %v5663_v38, %v5783_v11  ;;  %v9882_v11 = vld [vmem:[#allocation6 + $0x30] sm:$0xf0] }
 0x7ac   : > { %v14192_v24 = vpack.c.bf16 %v5847_v20, %v5843_v3  ;;  %v5565_v1 = vadd.f32 %v5564_v53, %v5516_v32  ;;  %v5616_v7 = vpop.f32.mrf.mxu0  ;;  %v5665_v47 = vpop.f32.mrf.mxu1  ;;  %v9885_v17 = vor.u32 %v10828_v30, %v9882_v11  ;;  %v10860_v32 = vld [vmem:[#allocation6 + $0x124] sm:$0xf]  ;;  %v5796_v20 = vmul.f32 0.2, %v5379_v2  ;;  %v9994_v11 = vld [vmem:[#allocation6 + $0x110] sm:$0xf0] }
 0x7ad   : > { %v5617_v0 = vadd.f32 %v5616_v7, %v14047_v42  ;;  %v10013_v6 = vor.u32 %v10860_v32, %v10010_v36 }
 0x7ae   : > { %vm5718_vm13 = vcmp.gt.f32.partialorder %v5565_v1, 0.0  ;;  %v5782_v43 = vmul.f32 0.2, %v5565_v1  ;;  %6857 = vmatmul.bf16.gmra.mxu1 %v14192_v24  ;;  %6715 = vmatmul.bf16.gmra.mxu2 %v14190_v10  ;;  %v5860_v23 = vsel %vm5732_vm0, %v5379_v2, %v5796_v20  ;;  %v5433_v20 = vadd.f32 %v14035_v37, %v13839_v33 }
 0x7af   : > { %6764 = vmatmul.bf16.gmra.mxu3 %v14194_v50  ;;  %v5666_v13 = vadd.f32 %v5665_v47, %v5617_v0  ;;  %6884 = vmatpush.bf16.msrb.mxu2 %v9885_v17  ;;  %v10824_v0 = vld [vmem:[#allocation6 + $0x4] sm:$0xf] }
 0x7b0   : > { %v5846_v25 = vsel %vm5718_vm13, %v5565_v1, %v5782_v43  ;;  %v5797_v1 = vmul.f32 0.2, %v5477_v39  ;;  %6933 = vmatpush.bf16.msrb.mxu3 %v10013_v6  ;;  %v5482_v37 = vadd.f32 %v14037_v55, %v5433_v20 }
 0x7b1   : > { %v14205_v61 = vpack.c.bf16 %v5846_v25, %v5842_v9  ;;  %v5518_v45 = vpop.f32.mrf.mxu2  ;;  %v5567_v38 = vpop.f32.mrf.mxu3  ;;  %v5787_v7 = vmul.f32 0.2, %v5666_v13  ;;  %vm5723_vm2 = vcmp.gt.f32.partialorder %v5666_v13, 0.0  ;;  %v9866_v9 = vld [vmem:[#allocation6 + $0x10] sm:$0xf0] }
 0x7b2   : > { %v5519_v53 = vadd.f32 %v5518_v45, %v14063_v8  ;;  %v5861_v43 = vsel %vm5733_vm1, %v5477_v39, %v5797_v1  ;;  %v10856_v25 = vld [vmem:[#allocation6 + $0x104] sm:$0xf]  ;;  %v9869_v30 = vor.u32 %v10824_v0, %v9866_v9  ;;  %vm5741_vm6 = vcmp.gt.f32.partialorder %v5482_v37, 0.0 }
 0x7b3   : > { %6808 = vmatmul.bf16.gmra.mxu0 %v14205_v61  ;;  %v5851_v45 = vsel %vm5723_vm2, %v5666_v13, %v5787_v7  ;;  %v10924_v39 = vld [vmem:[#allocation6 + $0x324] sm:$0xf]  ;;  %v14226_v6 = vpack.c.bf16 %v5861_v43, %v5857_v60  ;;  %v10266_v13 = vld [vmem:[#allocation6 + $0x330] sm:$0xf0] }
 0x7b4   : > { %v5618_v49 = vpop.f32.mrf.mxu0  ;;  %v5667_v3 = vpop.f32.mrf.mxu1  ;;  %v5568_v47 = vadd.f32 %v5567_v38, %v5519_v53  ;;  %v14222_v53 = vpack.c.bf16 %v5860_v23, %v5856_v34  ;;  %6885 = vmatpush.bf16.msrb.mxu2 %v9869_v30  ;;  %v10269_v22 = vor.u32 %v10924_v39, %v10266_v13  ;;  %v10888_v43 = vld [vmem:[#allocation6 + $0x204] sm:$0xf] }
 0x7b5   : > { %v5619_v46 = vadd.f32 %v5618_v49, %v14047_v42  ;;  %v10892_v49 = vld [vmem:[#allocation6 + $0x224] sm:$0xf] }
 0x7b6   : > { %v5786_v2 = vmul.f32 0.2, %v5568_v47  ;;  %vm5722_vm4 = vcmp.gt.f32.partialorder %v5568_v47, 0.0  ;;  %v10141_v26 = vor.u32 %v10892_v49, %v10138_v16  ;;  %7031 = vmatpush.bf16.msrb.mxu1 %v10269_v22  ;;  %v10920_v0 = vld [vmem:[#allocation6 + $0x304] sm:$0xf] }
 0x7b7   : > { %v5668_v57 = vadd.f32 %v5667_v3, %v5619_v46  ;;  %v9997_v3 = vor.u32 %v10856_v25, %v9994_v11  ;;  %v10250_v25 = vld [vmem:[#allocation6 + $0x310] sm:$0xf0]  ;;  %v5801_v11 = vmul.f32 0.2, %v14028_v51 }
 0x7b8   : > { %6982 = vmatpush.bf16.msrb.mxu0 %v10141_v26  ;;  %v5850_v7 = vsel %vm5722_vm4, %v5568_v47, %v5786_v2  ;;  %v10253_v2 = vor.u32 %v10920_v0, %v10250_v25 }
 0x7b9   : > { %vm5727_vm3 = vcmp.gt.f32.partialorder %v5668_v57, 0.0  ;;  %v5791_v15 = vmul.f32 0.2, %v5668_v57  ;;  %v5520_v14 = vpop.f32.mrf.mxu2  ;;  %v5569_v12 = vpop.f32.mrf.mxu3  ;;  %6934 = vmatpush.bf16.msrb.mxu3 %v9997_v3  ;;  %v5865_v13 = vsel %vm5737_vm8, %v14028_v51, %v5801_v11 }
 0x7ba   : > { %v5521_v27 = vadd.f32 %v5520_v14, %v14063_v8  ;;  %7032 = vmatpush.bf16.msrb.mxu1 %v10253_v2 }
 0x7bb   : > { %v5855_v38 = vsel %vm5727_vm3, %v5668_v57, %v5791_v15 }
 0x7bc   : > { %v14224_v17 = vpack.c.bf16 %v5855_v38, %v5851_v45  ;;  %v5570_v56 = vadd.f32 %v5569_v12, %v5521_v27  ;;  %v5621_v32 = vpop.f32.mrf.mxu0  ;;  %v5670_v36 = vpop.f32.mrf.mxu1  ;;  %v10122_v27 = vld [vmem:[#allocation6 + $0x210] sm:$0xf0]  ;;  %v5805_v45 = vmul.f32 0.2, %v5482_v37 }
 0x7bd   : > { %v5622_v1 = vadd.f32 %v5621_v32, %v14047_v42  ;;  %v10125_v9 = vor.u32 %v10888_v43, %v10122_v27 }
 0x7be   : > { %vm5726_vm5 = vcmp.gt.f32.partialorder %v5570_v56, 0.0  ;;  %v5790_v46 = vmul.f32 0.2, %v5570_v56  ;;  %6862 = vmatmul.bf16.gmra.mxu1 %v14224_v17  ;;  %6720 = vmatmul.bf16.gmra.mxu2 %v14222_v53  ;;  %v5869_v49 = vsel %vm5741_vm6, %v5482_v37, %v5805_v45  ;;  %v10887_v37 = vld [vmem:[#allocation6 + $0x1f4] sm:$0xf0] }
 0x7bf   : > { %6769 = vmatmul.bf16.gmra.mxu3 %v14226_v6  ;;  %v5671_v14 = vadd.f32 %v5670_v36, %v5622_v1  ;;  %6983 = vmatpush.bf16.msrb.mxu0 %v10125_v9 }
 0x7c0   : > { %v5854_v57 = vsel %vm5726_vm5, %v5570_v56, %v5790_v46 }
 0x7c1   : > { %v14234_v23 = vpack.c.bf16 %v5854_v57, %v5850_v7  ;;  %v5523_v15 = vpop.f32.mrf.mxu2  ;;  %v5572_v33 = vpop.f32.mrf.mxu3  ;;  %v5795_v38 = vmul.f32 0.2, %v5671_v14  ;;  %vm5731_vm7 = vcmp.gt.f32.partialorder %v5671_v14, 0.0  ;;  %v9984_v7 = vld [vmem:[#allocation6 + $0xe8] sm:$0xf] }
 0x7c2   : > { %v5524_v12 = vadd.f32 %v5523_v15, %v14063_v8  ;;  %v10855_v57 = vld [vmem:[#allocation6 + $0xf4] sm:$0xf0]  ;;  %v10112_v15 = vld [vmem:[#allocation6 + $0x1e8] sm:$0xf] }
 0x7c3   : > { %6813 = vmatmul.bf16.gmra.mxu0 %v14234_v23  ;;  %v5859_v39 = vsel %vm5731_vm7, %v5671_v14, %v5795_v38  ;;  %v10113_v51 = vor.u32 %v10887_v37, %v10112_v15 }
 0x7c4   : > { %v5623_v60 = vpop.f32.mrf.mxu0  ;;  %v5672_v34 = vpop.f32.mrf.mxu1  ;;  %v5573_v30 = vadd.f32 %v5572_v33, %v5524_v12  ;;  %v14246_v33 = vpack.c.bf16 %v5869_v49, %v5865_v13  ;;  %v9985_v12 = vor.u32 %v10855_v57, %v9984_v7 }
 0x7c5   : > { %v5624_v47 = vadd.f32 %v5623_v60, %v14047_v42  ;;  %7123 = vmatpush.bf16.msra.mxu3 %v10113_v51  ;;  %v10851_v51 = vld [vmem:[#allocation6 + $0xd4] sm:$0xf0] }
 0x7c6   : > { %v5794_v3 = vmul.f32 0.2, %v5573_v30  ;;  %vm5730_vm10 = vcmp.gt.f32.partialorder %v5573_v30, 0.0  ;;  %7074 = vmatpush.bf16.msra.mxu2 %v9985_v12 }
 0x7c7   : > { %v5673_v55 = vadd.f32 %v5672_v34, %v5624_v47 }
 0x7c8   : > { %v5858_v34 = vsel %vm5730_vm10, %v5573_v30, %v5794_v3  ;;  %v10368_v30 = vld [vmem:[#allocation6 + $0x3e8] sm:$0xf] }
 0x7c9   : > { %vm5735_vm9 = vcmp.gt.f32.partialorder %v5673_v55, 0.0  ;;  %v5799_v56 = vmul.f32 0.2, %v5673_v55  ;;  %v5525_v32 = vpop.f32.mrf.mxu2  ;;  %v5574_v36 = vpop.f32.mrf.mxu3 }
 0x7ca   : > { %v5526_v16 = vadd.f32 %v5525_v32, %v14063_v8  ;;  %v10919_v32 = vld [vmem:[#allocation6 + $0x2f4] sm:$0xf0] }
 0x7cb   : > { %v5863_v26 = vsel %vm5735_vm9, %v5673_v55, %v5799_v56  ;;  %v10240_v56 = vld [vmem:[#allocation6 + $0x2e8] sm:$0xf] }
 0x7cc   : > { %v14244_v20 = vpack.c.bf16 %v5863_v26, %v5859_v39  ;;  %v5575_v46 = vadd.f32 %v5574_v36, %v5526_v16  ;;  %v5626_v22 = vpop.f32.mrf.mxu0  ;;  %v5675_v1 = vpop.f32.mrf.mxu1  ;;  %v10241_v49 = vor.u32 %v10919_v32, %v10240_v56  ;;  %v10951_v16 = vld [vmem:[#allocation6 + $0x3f4] sm:$0xf0]  ;;  %v10352_v56 = vld [vmem:[#allocation6 + $0x3c8] sm:$0xf] }
 0x7cd   : > { %v5627_v14 = vadd.f32 %v5626_v22, %v14047_v42  ;;  %v10369_v13 = vor.u32 %v10951_v16, %v10368_v30  ;;  %v10947_v30 = vld [vmem:[#allocation6 + $0x3d4] sm:$0xf0] }
 0x7ce   : > { %vm5734_vm11 = vcmp.gt.f32.partialorder %v5575_v46, 0.0  ;;  %v5798_v60 = vmul.f32 0.2, %v5575_v46  ;;  %6867 = vmatmul.bf16.gmra.mxu1 %v14244_v20  ;;  %6725 = vmatmul.bf16.gmra.mxu2 %v14066_v4 }
 0x7cf   : > { %6774 = vmatmul.bf16.gmra.mxu3 %v14246_v33  ;;  %v5676_v9 = vadd.f32 %v5675_v1, %v5627_v14  ;;  %7172 = vmatpush.bf16.msra.mxu0 %v10241_v49  ;;  %v14261_v1 = vld [vmem:[%s14811_s21] sm:$0xf]  ;;  %v9968_v14 = vld [vmem:[#allocation6 + $0xc8] sm:$0xf] }
 0x7d0   : > { %v5862_v43 = vsel %vm5734_vm11, %v5575_v46, %v5798_v60  ;;  %7221 = vmatpush.bf16.msra.mxu1 %v10369_v13  ;;  %v9952_v13 = vld [vmem:[#allocation6 + $0xa8] sm:$0xf] }
 0x7d1   : > { %v14252_v27 = vpack.c.bf16 %v5862_v43, %v5858_v34  ;;  %v5528_v0 = vpop.f32.mrf.mxu2  ;;  %v5577_v47 = vpop.f32.mrf.mxu3  ;;  %v5803_v38 = vmul.f32 0.2, %v5676_v9  ;;  %vm5739_vm12 = vcmp.gt.f32.partialorder %v5676_v9, 0.0  ;;  %v10096_v34 = vld [vmem:[#allocation6 + $0x1c8] sm:$0xf] }
 0x7d2   : > { %v5529_v25 = vadd.f32 %v5528_v0, %v14063_v8 }
 0x7d3   : > { %6818 = vmatmul.bf16.gmra.mxu0 %v14252_v27  ;;  %v5867_v22 = vsel %vm5739_vm12, %v5676_v9, %v5803_v38  ;;  %v9969_v9 = vor.u32 %v10851_v51, %v9968_v14 }
 0x7d4   : > { %v5628_v45 = vpop.f32.mrf.mxu0  ;;  %v5677_v55 = vpop.f32.mrf.mxu1  ;;  %v5578_v36 = vadd.f32 %v5577_v47, %v5529_v25  ;;  %v10883_v25 = vld [vmem:[#allocation6 + $0x1d4] sm:$0xf0] }
 0x7d5   : > { %v5629_v2 = vadd.f32 %v5628_v45, %v14047_v42  ;;  %7075 = vmatpush.bf16.msra.mxu2 %v9969_v9  ;;  %v10208_v9 = vld [vmem:[#allocation6 + $0x2a8] sm:$0xf] }
 0x7d6   : > { %v5802_v7 = vmul.f32 0.2, %v5578_v36  ;;  %vm5738_vm14 = vcmp.gt.f32.partialorder %v5578_v36, 0.0 }
 0x7d7   : > { %v5678_v11 = vadd.f32 %v5677_v55, %v5629_v2  ;;  %v10097_v2 = vor.u32 %v10883_v25, %v10096_v34  ;;  %v10224_v55 = vld [vmem:[#allocation6 + $0x2c8] sm:$0xf]  ;;  %v10911_v25 = vld [vmem:[#allocation6 + $0x2b4] sm:$0xf0] }
 0x7d8   : > { %v5866_v37 = vsel %vm5738_vm14, %v5578_v36, %v5802_v7  ;;  %v10353_v36 = vor.u32 %v10947_v30, %v10352_v56  ;;  %v10879_v7 = vld [vmem:[#allocation6 + $0x1b4] sm:$0xf0] }
 0x7d9   : > { %vm5743_vm13 = vcmp.gt.f32.partialorder %v5678_v11, 0.0  ;;  %v5807_v39 = vmul.f32 0.2, %v5678_v11  ;;  %v5530_v3 = vpop.f32.mrf.mxu2  ;;  %v5579_v26 = vpop.f32.mrf.mxu3  ;;  %7124 = vmatpush.bf16.msra.mxu3 %v10097_v2  ;;  %v10943_v2 = vld [vmem:[#allocation6 + $0x3b4] sm:$0xf0] }
 0x7da   : > { %v5531_v46 = vadd.f32 %v5530_v3, %v14063_v8  ;;  %v14268_v8 = vperm.slane %v14261_v1, 0  ;;  %7222 = vmatpush.bf16.msra.mxu1 %v10353_v36 }
 0x7db   : > { %v5871_v42 = vsel %vm5743_vm13, %v5678_v11, %v5807_v39  ;;  %v10915_v11 = vld [vmem:[#allocation6 + $0x2d4] sm:$0xf0] }
 0x7dc   : > { %v14263_v57 = vpack.c.bf16 %v5871_v42, %v5867_v22  ;;  %v5580_v15 = vadd.f32 %v5579_v26, %v5531_v46  ;;  %v10225_v32 = vor.u32 %v10915_v11, %v10224_v55  ;;  %v10847_v46 = vld [vmem:[#allocation6 + $0xb4] sm:$0xf0]  ;;  %v10080_v22 = vld [vmem:[#allocation6 + $0x1a8] sm:$0xf]  ;;  %v10209_v55 = vor.u32 %v10911_v25, %v10208_v9 }
 0x7dd   : > { %v9953_v42 = vor.u32 %v10847_v46, %v9952_v13  ;;  %v9936_v46 = vld [vmem:[#allocation6 + $0x88] sm:$0xf] }
 0x7de   : > { %vm5742_vm15 = vcmp.gt.f32.partialorder %v5580_v15, 0.0  ;;  %v5806_v12 = vmul.f32 0.2, %v5580_v15  ;;  %6872 = vmatmul.bf16.gmra.mxu1 %v14263_v57  ;;  %6886 = vmatmul.bf16.vlgmr.msrb.gmra.mxu2 %v14051_v19 }
 0x7df   : > { %6935 = vmatmul.bf16.vlgmr.msrb.gmra.mxu3 %v14049_v48  ;;  %7173 = vmatpush.bf16.msra.mxu0 %v10225_v32 }
 0x7e0   : > { %v5870_v60 = vsel %vm5742_vm15, %v5580_v15, %v5806_v12  ;;  %v10081_v15 = vor.u32 %v10879_v7, %v10080_v22  ;;  %7076 = vmatpush.bf16.msra.mxu2 %v9953_v42  ;;  %v10843_v22 = vld [vmem:[#allocation6 + $0x94] sm:$0xf0] }
 0x7e1   : > { %v14271_v43 = vpack.c.bf16 %v5870_v60, %v5866_v37  ;;  %v6691_v0 = vpop.f32.mrf.mxu2  ;;  %v6740_v47 = vpop.f32.mrf.mxu3  ;;  %v10875_v42 = vld [vmem:[#allocation6 + $0x194] sm:$0xf0] }
 0x7e2   : > { %v6692_v45 = vadd.f32 %v6691_v0, %v14268_v8  ;;  %7125 = vmatpush.bf16.msra.mxu3 %v10081_v15 }
 0x7e3   : > { %6823 = vmatmul.bf16.gmra.mxu0 %v14271_v43 }
 0x7e4   : > { %v6741_v38 = vadd.f32 %v6740_v47, %v6692_v45  ;;  %v10336_v45 = vld [vmem:[#allocation6 + $0x3a8] sm:$0xf]  ;;  %7174 = vmatpush.bf16.msra.mxu0 %v10209_v55 }
 0x7e5   : > { %v10337_v11 = vor.u32 %v10943_v2, %v10336_v45  ;;  %v10192_v55 = vld [vmem:[#allocation6 + $0x288] sm:$0xf] }
 0x7e7   : > { %7223 = vmatpush.bf16.msra.mxu1 %v10337_v11  ;;  %v10907_v11 = vld [vmem:[#allocation6 + $0x294] sm:$0xf0] }
 0x7e9   : > { %v6693_v49 = vpop.f32.mrf.mxu2  ;;  %v6742_v16 = vpop.f32.mrf.mxu3 }
 0x7ea   : > { %v6694_v39 = vadd.f32 %v6693_v49, %v14268_v8 }
 0x7eb   : > { %v6838_v3 = vpop.f32.mrf.mxu1 }
 0x7ec   : > { %v6743_v26 = vadd.f32 %v6742_v16, %v6694_v39 }
 0x7ee   : > { %7033 = vmatmul.bf16.vlgmr.msrb.gmra.mxu1 %v14080_v63  ;;  %6891 = vmatmul.bf16.gmra.mxu2 %v14078_v18 }
 0x7ef   : > { %6940 = vmatmul.bf16.gmra.mxu3 %v14082_v44 }
 0x7f0   : > { %v6789_v12 = vpop.f32.mrf.mxu0 }
 0x7f1   : > { %v6790_v37 = vadd.f32 %v6789_v12, %v6741_v38  ;;  %v6696_v60 = vpop.f32.mrf.mxu2  ;;  %v9937_v12 = vor.u32 %v10843_v22, %v9936_v46 }
 0x7f2   : > { %v6697_v14 = vadd.f32 %v6696_v60, %v14268_v8  ;;  %v6745_v51 = vpop.f32.mrf.mxu3 }
 0x7f3   : > { %v6839_v34 = vadd.f32 %v6838_v3, %v6790_v37  ;;  %v6840_v0 = vpop.f32.mrf.mxu1  ;;  %6984 = vmatmul.bf16.vlgmr.msrb.gmra.mxu0 %v14093_v52  ;;  %7077 = vmatpush.bf16.msra.mxu2 %v9937_v12  ;;  %v9920_v12 = vld [vmem:[#allocation6 + $0x68] sm:$0xf] }
 0x7f4   : > { %v6746_v47 = vadd.f32 %v6745_v51, %v6697_v14 }
 0x7f5   : > { %v7530_v49 = vmul.f32 0.2, %v6839_v34  ;;  %vm7466_vm0 = vcmp.gt.f32.partialorder %v6839_v34, 0.0 }
 0x7f7   : > { %v14284_v7 = vsel %vm7466_vm0, %v6839_v34, %v7530_v49 }
 0x7f8   : > { %v6791_v56 = vpop.f32.mrf.mxu0 }
 0x7f9   : > { %v6792_v32 = vadd.f32 %v6791_v56, %v6743_v26  ;;  %v6698_v30 = vpop.f32.mrf.mxu2  ;;  %v10064_v26 = vld [vmem:[#allocation6 + $0x188] sm:$0xf] }
 0x7fa   : > { %v6699_v38 = vadd.f32 %v6698_v30, %v14268_v8  ;;  %v6747_v36 = vpop.f32.mrf.mxu3  ;;  %v10065_v37 = vor.u32 %v10875_v42, %v10064_v26  ;;  %v10320_v56 = vld [vmem:[#allocation6 + $0x388] sm:$0xf]  ;;  %v10193_v30 = vor.u32 %v10907_v11, %v10192_v55 }
 0x7fb   : > { %v6841_v16 = vadd.f32 %v6840_v0, %v6792_v32  ;;  %v6843_v39 = vpop.f32.mrf.mxu1  ;;  %v10939_v32 = vld [vmem:[#allocation6 + $0x394] sm:$0xf0] }
 0x7fc   : > { %v6748_v3 = vadd.f32 %v6747_v36, %v6699_v38  ;;  %7126 = vmatpush.bf16.msra.mxu3 %v10065_v37  ;;  %v10321_v38 = vor.u32 %v10939_v32, %v10320_v56  ;;  %7175 = vmatpush.bf16.msra.mxu0 %v10193_v30  ;;  %v10839_v37 = vld [vmem:[#allocation6 + $0x74] sm:$0xf0] }
 0x7fd   : > { %vm7470_vm1 = vcmp.gt.f32.partialorder %v6841_v16, 0.0  ;;  %v7534_v13 = vmul.f32 0.2, %v6841_v16 }
 0x7fe   : > { %7038 = vmatmul.bf16.gmra.mxu1 %v14108_v62  ;;  %6896 = vmatmul.bf16.gmra.mxu2 %v14106_v59 }
 0x7ff   : > { %v14286_v15 = vsel %vm7470_vm1, %v6841_v16, %v7534_v13  ;;  %6945 = vmatmul.bf16.gmra.mxu3 %v14110_v5  ;;  %7224 = vmatpush.bf16.msra.mxu1 %v10321_v38 }
 0x800   : > { %v6794_v14 = vpop.f32.mrf.mxu0 }
 0x801   : > { %v6795_v51 = vadd.f32 %v6794_v14, %v6746_v47  ;;  %v6701_v0 = vpop.f32.mrf.mxu2  ;;  %v9921_v14 = vor.u32 %v10839_v37, %v9920_v12 }
 0x802   : > { %v6702_v9 = vadd.f32 %v6701_v0, %v14268_v8  ;;  %v6750_v25 = vpop.f32.mrf.mxu3 }
 0x803   : > { %v6844_v45 = vadd.f32 %v6843_v39, %v6795_v51  ;;  %v6845_v34 = vpop.f32.mrf.mxu1  ;;  %6989 = vmatmul.bf16.gmra.mxu0 %v14121_v40  ;;  %v10871_v51 = vld [vmem:[#allocation6 + $0x174] sm:$0xf0]  ;;  %7078 = vmatpush.bf16.msra.mxu2 %v9921_v14 }
 0x804   : > { %v6751_v2 = vadd.f32 %v6750_v25, %v6702_v9 }
 0x805   : > { %v7538_v46 = vmul.f32 0.2, %v6844_v45  ;;  %vm7474_vm2 = vcmp.gt.f32.partialorder %v6844_v45, 0.0 }
 0x807   : > { %v14297_v9 = vsel %vm7474_vm2, %v6844_v45, %v7538_v46  ;;  %v10176_v45 = vld [vmem:[#allocation6 + $0x268] sm:$0xf] }
 0x808   : > { %v6796_v36 = vpop.f32.mrf.mxu0 }
 0x809   : > { %v6797_v49 = vadd.f32 %v6796_v36, %v6748_v3  ;;  %v6703_v47 = vpop.f32.mrf.mxu2  ;;  %v10048_v3 = vld [vmem:[#allocation6 + $0x168] sm:$0xf] }
 0x80a   : > { %v6704_v16 = vadd.f32 %v6703_v47, %v14268_v8  ;;  %v6752_v13 = vpop.f32.mrf.mxu3  ;;  %v10049_v0 = vor.u32 %v10871_v51, %v10048_v3  ;;  %v10903_v47 = vld [vmem:[#allocation6 + $0x274] sm:$0xf0] }
 0x80b   : > { %v6846_v39 = vadd.f32 %v6845_v34, %v6797_v49  ;;  %v6848_v22 = vpop.f32.mrf.mxu1  ;;  %v10177_v46 = vor.u32 %v10903_v47, %v10176_v45 }
 0x80c   : > { %v6753_v26 = vadd.f32 %v6752_v13, %v6704_v16  ;;  %7127 = vmatpush.bf16.msra.mxu3 %v10049_v0  ;;  %v10304_v16 = vld [vmem:[#allocation6 + $0x368] sm:$0xf]  ;;  %v10935_v13 = vld [vmem:[#allocation6 + $0x374] sm:$0xf0] }
 0x80d   : > { %v7542_v42 = vmul.f32 0.2, %v6846_v39  ;;  %vm7478_vm3 = vcmp.gt.f32.partialorder %v6846_v39, 0.0  ;;  %7176 = vmatpush.bf16.msra.mxu0 %v10177_v46 }
 0x80e   : > { %7043 = vmatmul.bf16.gmra.mxu1 %v14136_v21  ;;  %6901 = vmatmul.bf16.gmra.mxu2 %v14134_v41 }
 0x80f   : > { %6950 = vmatmul.bf16.gmra.mxu3 %v14138_v31  ;;  %v14299_v25 = vsel %vm7478_vm3, %v6846_v39, %v7542_v42  ;;  %v10305_v39 = vor.u32 %v10935_v13, %v10304_v16  ;;  %v10831_v13 = vld [vmem:[#allocation6 + $0x34] sm:$0xf0] }
 0x810   : > { %v6799_v34 = vpop.f32.mrf.mxu0 }
 0x811   : > { %v6800_v11 = vadd.f32 %v6799_v34, %v6751_v2  ;;  %v6706_v56 = vpop.f32.mrf.mxu2  ;;  %7225 = vmatpush.bf16.msra.mxu1 %v10305_v39 }
 0x812   : > { %v6707_v32 = vadd.f32 %v6706_v56, %v14268_v8  ;;  %v6755_v30 = vpop.f32.mrf.mxu3  ;;  %v10835_v56 = vld [vmem:[#allocation6 + $0x54] sm:$0xf0] }
 0x813   : > { %v6849_v38 = vadd.f32 %v6848_v22, %v6800_v11  ;;  %v6850_v36 = vpop.f32.mrf.mxu1  ;;  %6994 = vmatmul.bf16.gmra.mxu0 %v14149_v58  ;;  %v9904_v11 = vld [vmem:[#allocation6 + $0x48] sm:$0xf] }
 0x814   : > { %v6756_v49 = vadd.f32 %v6755_v30, %v6707_v32  ;;  %v9905_v32 = vor.u32 %v10835_v56, %v9904_v11  ;;  %v10867_v30 = vld [vmem:[#allocation6 + $0x154] sm:$0xf0] }
 0x815   : > { %v7546_v3 = vmul.f32 0.2, %v6849_v38  ;;  %vm7482_vm4 = vcmp.gt.f32.partialorder %v6849_v38, 0.0 }
 0x816   : > { %7079 = vmatpush.bf16.msra.mxu2 %v9905_v32 }
 0x817   : > { %v14309_v47 = vsel %vm7482_vm4, %v6849_v38, %v7546_v3  ;;  %v10160_v38 = vld [vmem:[#allocation6 + $0x248] sm:$0xf]  ;;  %v10899_v3 = vld [vmem:[#allocation6 + $0x254] sm:$0xf0] }
 0x818   : > { %v6801_v42 = vpop.f32.mrf.mxu0  ;;  %14812 = vst [vmem:[#allocation16_spill] sm:$0xff] %v14309_v47  ;;  %v10161_v11 = vor.u32 %v10899_v3, %v10160_v38  ;;  %v10863_v3 = vld [vmem:[#allocation6 + $0x134] sm:$0xf0]  ;;  %v9906_v47 = vld [vmem:[#allocation6 + $0x58] sm:$0xf0] }
 0x819   : > { %v6802_v12 = vadd.f32 %v6801_v42, %v6753_v26  ;;  %v6708_v37 = vpop.f32.mrf.mxu2  ;;  %v10032_v26 = vld [vmem:[#allocation6 + $0x148] sm:$0xf] }
 0x81a   : > { %v6709_v2 = vadd.f32 %v6708_v37, %v14268_v8  ;;  %v6757_v14 = vpop.f32.mrf.mxu3  ;;  %v10033_v45 = vor.u32 %v10867_v30, %v10032_v26  ;;  %7177 = vmatpush.bf16.msra.mxu0 %v10161_v11 }
 0x81b   : > { %v6851_v22 = vadd.f32 %v6850_v36, %v6802_v12  ;;  %v6853_v51 = vpop.f32.mrf.mxu1 }
 0x81c   : > { %v6758_v0 = vadd.f32 %v6757_v14, %v6709_v2  ;;  %7128 = vmatpush.bf16.msra.mxu3 %v10033_v45 }
 0x81d   : > { %v7550_v34 = vmul.f32 0.2, %v6851_v22  ;;  %vm7486_vm5 = vcmp.gt.f32.partialorder %v6851_v22, 0.0 }
 0x81e   : > { %7048 = vmatmul.bf16.gmra.mxu1 %v14164_v54  ;;  %6906 = vmatmul.bf16.gmra.mxu2 %v14162_v35 }
 0x81f   : > { %6955 = vmatmul.bf16.gmra.mxu3 %v14166_v28  ;;  %v14311_v36 = vsel %vm7486_vm5, %v6851_v22, %v7550_v34  ;;  %v10288_v22 = vld [vmem:[#allocation6 + $0x348] sm:$0xf]  ;;  %v10931_v34 = vld [vmem:[#allocation6 + $0x354] sm:$0xf0] }
 0x820   : > { %14813 = vst [vmem:[#allocation17_spill] sm:$0xff] %v14311_v36  ;;  %v6804_v16 = vpop.f32.mrf.mxu0  ;;  %v10289_v56 = vor.u32 %v10931_v34, %v10288_v22 }
 0x821   : > { %v6805_v46 = vadd.f32 %v6804_v16, %v6756_v49  ;;  %v6711_v39 = vpop.f32.mrf.mxu2 }
 0x822   : > { %v6712_v42 = vadd.f32 %v6711_v39, %v14268_v8  ;;  %v6760_v12 = vpop.f32.mrf.mxu3  ;;  %7226 = vmatpush.bf16.msra.mxu1 %v10289_v56 }
 0x823   : > { %v6854_v37 = vadd.f32 %v6853_v51, %v6805_v46  ;;  %v6855_v2 = vpop.f32.mrf.mxu1  ;;  %6999 = vmatmul.bf16.gmra.mxu0 %v14177_v29 }
 0x824   : > { %v6761_v14 = vadd.f32 %v6760_v12, %v6712_v42  ;;  %v9888_v12 = vld [vmem:[#allocation6 + $0x28] sm:$0xf] }
 0x825   : > { %v7554_v16 = vmul.f32 0.2, %v6854_v37  ;;  %vm7490_vm6 = vcmp.gt.f32.partialorder %v6854_v37, 0.0  ;;  %v9889_v38 = vor.u32 %v10831_v13, %v9888_v12 }
 0x827   : > { %v14321_v34 = vsel %vm7490_vm6, %v6854_v37, %v7554_v16  ;;  %7080 = vmatpush.bf16.msra.mxu2 %v9889_v38  ;;  %v10144_v37 = vld [vmem:[#allocation6 + $0x228] sm:$0xf]  ;;  %v10895_v16 = vld [vmem:[#allocation6 + $0x234] sm:$0xf0] }
 0x828   : > { %v6806_v32 = vpop.f32.mrf.mxu0  ;;  %14814 = vst [vmem:[#allocation18_spill] sm:$0xff] %v14321_v34  ;;  %v10859_v34 = vld [vmem:[#allocation6 + $0x114] sm:$0xf0] }
 0x829   : > { %v6807_v26 = vadd.f32 %v6806_v32, %v6758_v0  ;;  %v6713_v30 = vpop.f32.mrf.mxu2  ;;  %v10016_v0 = vld [vmem:[#allocation6 + $0x128] sm:$0xf] }
 0x82a   : > { %v6714_v49 = vadd.f32 %v6713_v30, %v14268_v8  ;;  %v6762_v45 = vpop.f32.mrf.mxu3  ;;  %v10017_v22 = vor.u32 %v10863_v3, %v10016_v0  ;;  %v10145_v0 = vor.u32 %v10895_v16, %v10144_v37 }
 0x82b   : > { %v6856_v51 = vadd.f32 %v6855_v2, %v6807_v26  ;;  %v6858_v46 = vpop.f32.mrf.mxu1 }
 0x82c   : > { %v6763_v39 = vadd.f32 %v6762_v45, %v6714_v49  ;;  %7129 = vmatpush.bf16.msra.mxu3 %v10017_v22  ;;  %7178 = vmatpush.bf16.msra.mxu0 %v10145_v0 }
 0x82d   : > { %v7558_v42 = vmul.f32 0.2, %v6856_v51  ;;  %vm7494_vm7 = vcmp.gt.f32.partialorder %v6856_v51, 0.0 }
 0x82e   : > { %7053 = vmatmul.bf16.gmra.mxu1 %v14192_v24  ;;  %6911 = vmatmul.bf16.gmra.mxu2 %v14190_v10 }
 0x82f   : > { %6960 = vmatmul.bf16.gmra.mxu3 %v14194_v50  ;;  %v14323_v2 = vsel %vm7494_vm7, %v6856_v51, %v7558_v42  ;;  %v10272_v51 = vld [vmem:[#allocation6 + $0x328] sm:$0xf]  ;;  %v10927_v42 = vld [vmem:[#allocation6 + $0x334] sm:$0xf0] }
 0x830   : > { %14815 = vst [vmem:[#allocation15_spill] sm:$0xff] %v14323_v2  ;;  %v6809_v11 = vpop.f32.mrf.mxu0  ;;  %v10273_v38 = vor.u32 %v10927_v42, %v10272_v51 }
 0x831   : > { %v6810_v32 = vadd.f32 %v6809_v11, %v6761_v14  ;;  %v6716_v26 = vpop.f32.mrf.mxu2  ;;  %v9872_v11 = vld [vmem:[#allocation6 + $0x8] sm:$0xf] }
 0x832   : > { %v6717_v13 = vadd.f32 %v6716_v26, %v14268_v8  ;;  %v6765_v30 = vpop.f32.mrf.mxu3  ;;  %7227 = vmatpush.bf16.msra.mxu1 %v10273_v38 }
 0x833   : > { %v6859_v49 = vadd.f32 %v6858_v46, %v6810_v32  ;;  %v6860_v45 = vpop.f32.mrf.mxu1  ;;  %7004 = vmatmul.bf16.gmra.mxu0 %v14205_v61  ;;  %v10827_v46 = vld [vmem:[#allocation6 + $0x14] sm:$0xf0]  ;;  %v10000_v32 = vld [vmem:[#allocation6 + $0x108] sm:$0xf] }
 0x834   : > { %v6766_v12 = vadd.f32 %v6765_v30, %v6717_v13  ;;  %v9873_v30 = vor.u32 %v10827_v46, %v9872_v11  ;;  %v10001_v37 = vor.u32 %v10859_v34, %v10000_v32  ;;  %v10256_v11 = vld [vmem:[#allocation6 + $0x308] sm:$0xf] }
 0x835   : > { %v7562_v26 = vmul.f32 0.2, %v6859_v49  ;;  %vm7498_vm8 = vcmp.gt.f32.partialorder %v6859_v49, 0.0 }
 0x836   : > { %7081 = vmatpush.bf16.msra.mxu2 %v9873_v30  ;;  %7130 = vmatpush.bf16.msra.mxu3 %v10001_v37 }
 0x838   : > { %v6811_v3 = vpop.f32.mrf.mxu0 }
 0x839   : > { %v6812_v55 = vadd.f32 %v6811_v3, %v6763_v39  ;;  %v6718_v56 = vpop.f32.mrf.mxu2  ;;  %v14333_v39 = vsel %vm7498_vm8, %v6859_v49, %v7562_v26  ;;  %v10891_v49 = vld [vmem:[#allocation6 + $0x214] sm:$0xf0] }
 0x83a   : > { %v6719_v14 = vadd.f32 %v6718_v56, %v14268_v8  ;;  %v6767_v22 = vpop.f32.mrf.mxu3  ;;  %14816 = vst [vmem:[#allocation14_spill] sm:$0xff] %v14333_v39 }
 0x83b   : > { %v6861_v60 = vadd.f32 %v6860_v45, %v6812_v55  ;;  %v6863_v13 = vpop.f32.mrf.mxu1  ;;  %v9986_v45 = vld [vmem:[#allocation6 + $0xf8] sm:$0xf0] }
 0x83c   : > { %v6768_v2 = vadd.f32 %v6767_v22, %v6719_v14  ;;  %v10128_v22 = vld [vmem:[#allocation6 + $0x208] sm:$0xf] }
 0x83d   : > { %v7566_v16 = vmul.f32 0.2, %v6861_v60  ;;  %vm7502_vm9 = vcmp.gt.f32.partialorder %v6861_v60, 0.0  ;;  %v10129_v46 = vor.u32 %v10891_v49, %v10128_v22  ;;  %v10114_v49 = vld [vmem:[#allocation6 + $0x1f8] sm:$0xf0] }
 0x83e   : > { %7058 = vmatmul.bf16.gmra.mxu1 %v14224_v17  ;;  %6916 = vmatmul.bf16.gmra.mxu2 %v14222_v53 }
 0x83f   : > { %6965 = vmatmul.bf16.gmra.mxu3 %v14226_v6  ;;  %v14335_v56 = vsel %vm7502_vm9, %v6861_v60, %v7566_v16  ;;  %v10923_v60 = vld [vmem:[#allocation6 + $0x314] sm:$0xf0]  ;;  %7179 = vmatpush.bf16.msra.mxu0 %v10129_v46 }
 0x840   : > { %14817 = vst [vmem:[#allocation13_spill] sm:$0xff] %v14335_v56  ;;  %v6814_v55 = vpop.f32.mrf.mxu0  ;;  %v10257_v32 = vor.u32 %v10923_v60, %v10256_v11 }
 0x841   : > { %v6815_v51 = vadd.f32 %v6814_v55, %v6766_v12  ;;  %v6721_v34 = vpop.f32.mrf.mxu2 }
 0x842   : > { %v6722_v42 = vadd.f32 %v6721_v34, %v14268_v8  ;;  %v6770_v0 = vpop.f32.mrf.mxu3  ;;  %7228 = vmatpush.bf16.msra.mxu1 %v10257_v32 }
 0x843   : > { %v6864_v38 = vadd.f32 %v6863_v13, %v6815_v51  ;;  %v6865_v3 = vpop.f32.mrf.mxu1  ;;  %7009 = vmatmul.bf16.gmra.mxu0 %v14234_v23 }
 0x844   : > { %v6771_v14 = vadd.f32 %v6770_v0, %v6722_v42  ;;  %v10853_v0 = vld [vmem:[#allocation6 + $0xec] sm:$0xf] }
 0x845   : > { %v7570_v55 = vmul.f32 0.2, %v6864_v38  ;;  %vm7506_vm10 = vcmp.gt.f32.partialorder %v6864_v38, 0.0  ;;  %v9989_v22 = vor.u32 %v10853_v0, %v9986_v45 }
 0x847   : > { %v14345_v60 = vsel %vm7506_vm10, %v6864_v38, %v7570_v55  ;;  %7270 = vmatpush.bf16.msrb.mxu2 %v9989_v22  ;;  %v10917_v38 = vld [vmem:[#allocation6 + $0x2ec] sm:$0xf]  ;;  %v10242_v55 = vld [vmem:[#allocation6 + $0x2f8] sm:$0xf0] }
 0x848   : > { %v6816_v26 = vpop.f32.mrf.mxu0  ;;  %14818 = vst [vmem:[#allocation12_spill] sm:$0xff] %v14345_v60  ;;  %v10370_v22 = vld [vmem:[#allocation6 + $0x3f8] sm:$0xf0]  ;;  %v10945_v60 = vld [vmem:[#allocation6 + $0x3cc] sm:$0xf] }
 0x849   : > { %v6817_v30 = vadd.f32 %v6816_v26, %v6768_v2  ;;  %v6723_v37 = vpop.f32.mrf.mxu2  ;;  %v10885_v2 = vld [vmem:[#allocation6 + $0x1ec] sm:$0xf] }
 0x84a   : > { %v6724_v12 = vadd.f32 %v6723_v37, %v14268_v8  ;;  %v6772_v16 = vpop.f32.mrf.mxu3  ;;  %v10117_v11 = vor.u32 %v10885_v2, %v10114_v49  ;;  %v10245_v2 = vor.u32 %v10917_v38, %v10242_v55  ;;  %v10881_v38 = vld [vmem:[#allocation6 + $0x1cc] sm:$0xf] }
 0x84b   : > { %v6866_v13 = vadd.f32 %v6865_v3, %v6817_v30  ;;  %v6868_v51 = vpop.f32.mrf.mxu1 }
 0x84c   : > { %v6773_v34 = vadd.f32 %v6772_v16, %v6724_v12  ;;  %7319 = vmatpush.bf16.msrb.mxu3 %v10117_v11  ;;  %7368 = vmatpush.bf16.msrb.mxu0 %v10245_v2 }
 0x84d   : > { %v7574_v42 = vmul.f32 0.2, %v6866_v13  ;;  %vm7510_vm11 = vcmp.gt.f32.partialorder %v6866_v13, 0.0 }
 0x84e   : > { %7063 = vmatmul.bf16.gmra.mxu1 %v14244_v20  ;;  %6921 = vmatmul.bf16.gmra.mxu2 %v14066_v4 }
 0x84f   : > { %6970 = vmatmul.bf16.gmra.mxu3 %v14246_v33  ;;  %v14347_v3 = vsel %vm7510_vm11, %v6866_v13, %v7574_v42  ;;  %v10949_v13 = vld [vmem:[#allocation6 + $0x3ec] sm:$0xf] }
 0x850   : > { %14819 = vst [vmem:[#allocation19_spill] sm:$0xff] %v14347_v3  ;;  %v6819_v46 = vpop.f32.mrf.mxu0  ;;  %v10373_v32 = vor.u32 %v10949_v13, %v10370_v22  ;;  %v10098_v22 = vld [vmem:[#allocation6 + $0x1d8] sm:$0xf0] }
 0x851   : > { %v6820_v26 = vadd.f32 %v6819_v46, %v6771_v14  ;;  %v6726_v30 = vpop.f32.mrf.mxu2  ;;  %v10354_v3 = vld [vmem:[#allocation6 + $0x3d8] sm:$0xf0] }
 0x852   : > { %v6727_v45 = vadd.f32 %v6726_v30, %v14268_v8  ;;  %v6775_v37 = vpop.f32.mrf.mxu3  ;;  %7417 = vmatpush.bf16.msrb.mxu1 %v10373_v32  ;;  %v9970_v32 = vld [vmem:[#allocation6 + $0xd8] sm:$0xf0] }
 0x853   : > { %v6869_v12 = vadd.f32 %v6868_v51, %v6820_v26  ;;  %v6870_v16 = vpop.f32.mrf.mxu1  ;;  %7014 = vmatmul.bf16.gmra.mxu0 %v14252_v27 }
 0x854   : > { %v6776_v0 = vadd.f32 %v6775_v37, %v6727_v45 }
 0x855   : > { %v7578_v46 = vmul.f32 0.2, %v6869_v12  ;;  %vm7514_vm12 = vcmp.gt.f32.partialorder %v6869_v12, 0.0 }
 0x858   : > { %v6821_v42 = vpop.f32.mrf.mxu0 }
 0x859   : > { %v6822_v49 = vadd.f32 %v6821_v42, %v6773_v34  ;;  %v6728_v39 = vpop.f32.mrf.mxu2  ;;  %v14357_v34 = vperm.slane %v14261_v1, 1 }
 0x85a   : > { %v6729_v14 = vadd.f32 %v6728_v39, %v14268_v8  ;;  %v6777_v11 = vpop.f32.mrf.mxu3  ;;  %v14360_v8 = vsel %vm7514_vm12, %v6869_v12, %v7578_v46 }
 0x85b   : > { %v6871_v30 = vadd.f32 %v6870_v16, %v6822_v49  ;;  %v6873_v51 = vpop.f32.mrf.mxu1  ;;  %14820 = vst [vmem:[#allocation20_spill] sm:$0xff] %v14360_v8  ;;  %v10849_v16 = vld [vmem:[#allocation6 + $0xcc] sm:$0xf] }
 0x85c   : > { %v6778_v26 = vadd.f32 %v6777_v11, %v6729_v14  ;;  %v9973_v2 = vor.u32 %v10849_v16, %v9970_v32  ;;  %v10101_v14 = vor.u32 %v10881_v38, %v10098_v22 }
 0x85d   : > { %v7582_v45 = vmul.f32 0.2, %v6871_v30  ;;  %vm7518_vm13 = vcmp.gt.f32.partialorder %v6871_v30, 0.0 }
 0x85e   : > { %7068 = vmatmul.bf16.gmra.mxu1 %v14263_v57  ;;  %7082 = vmatmul.bf16.vlgmr.msra.gmra.mxu2 %v14051_v19 }
 0x85f   : > { %7131 = vmatmul.bf16.vlgmr.msra.gmra.mxu3 %v14049_v48  ;;  %v14362_v39 = vsel %vm7518_vm13, %v6871_v30, %v7582_v45  ;;  %7271 = vmatpush.bf16.msrb.mxu2 %v9973_v2  ;;  %v10913_v30 = vld [vmem:[#allocation6 + $0x2cc] sm:$0xf]  ;;  %v10226_v45 = vld [vmem:[#allocation6 + $0x2d8] sm:$0xf0] }
 0x860   : > { %14821 = vst [vmem:[#allocation21_spill] sm:$0xff] %v14362_v39  ;;  %v6824_v37 = vpop.f32.mrf.mxu0  ;;  %7320 = vmatpush.bf16.msrb.mxu3 %v10101_v14  ;;  %v10229_v55 = vor.u32 %v10913_v30, %v10226_v45  ;;  %v9954_v14 = vld [vmem:[#allocation6 + $0xb8] sm:$0xf0] }
 0x861   : > { %v6825_v13 = vadd.f32 %v6824_v37, %v6776_v0  ;;  %v6887_v42 = vpop.f32.mrf.mxu2  ;;  %v10357_v0 = vor.u32 %v10945_v60, %v10354_v3  ;;  %v10877_v3 = vld [vmem:[#allocation6 + $0x1ac] sm:$0xf]  ;;  %v9922_v39 = vld [vmem:[#allocation6 + $0x78] sm:$0xf0] }
 0x862   : > { %v6888_v1 = vadd.f32 %v6887_v42, %v14357_v34  ;;  %v6936_v49 = vpop.f32.mrf.mxu3  ;;  %7369 = vmatpush.bf16.msrb.mxu0 %v10229_v55 }
 0x863   : > { %v6874_v11 = vadd.f32 %v6873_v51, %v6825_v13  ;;  %v6875_v12 = vpop.f32.mrf.mxu1  ;;  %7019 = vmatmul.bf16.gmra.mxu0 %v14271_v43  ;;  %7418 = vmatpush.bf16.msrb.mxu1 %v10357_v0 }
 0x864   : > { %v6937_v46 = vadd.f32 %v6936_v49, %v6888_v1  ;;  %v10845_v49 = vld [vmem:[#allocation6 + $0xac] sm:$0xf] }
 0x865   : > { %v7586_v13 = vmul.f32 0.2, %v6874_v11  ;;  %vm7522_vm14 = vcmp.gt.f32.partialorder %v6874_v11, 0.0  ;;  %v9957_v60 = vor.u32 %v10845_v49, %v9954_v14 }
 0x867   : > { %v14372_v30 = vsel %vm7522_vm14, %v6874_v11, %v7586_v13  ;;  %7272 = vmatpush.bf16.msrb.mxu2 %v9957_v60  ;;  %v10909_v11 = vld [vmem:[#allocation6 + $0x2ac] sm:$0xf]  ;;  %v10210_v13 = vld [vmem:[#allocation6 + $0x2b8] sm:$0xf0] }
 0x868   : > { %v6826_v37 = vpop.f32.mrf.mxu0  ;;  %14822 = vst [vmem:[#allocation22_spill] sm:$0xff] %v14372_v30 }
 0x869   : > { %v6827_v16 = vadd.f32 %v6826_v37, %v6778_v26  ;;  %v6889_v32 = vpop.f32.mrf.mxu2  ;;  %v10082_v26 = vld [vmem:[#allocation6 + $0x1b8] sm:$0xf0] }
 0x86a   : > { %v6890_v38 = vadd.f32 %v6889_v32, %v14357_v34  ;;  %v6938_v51 = vpop.f32.mrf.mxu3  ;;  %v10085_v55 = vor.u32 %v10877_v3, %v10082_v26  ;;  %v10213_v3 = vor.u32 %v10909_v11, %v10210_v13  ;;  %v9938_v11 = vld [vmem:[#allocation6 + $0x98] sm:$0xf0] }
 0x86b   : > { %v6876_v42 = vadd.f32 %v6875_v12, %v6827_v16  ;;  %v7034_v22 = vpop.f32.mrf.mxu1  ;;  %v10066_v13 = vld [vmem:[#allocation6 + $0x198] sm:$0xf0] }
 0x86c   : > { %v6939_v2 = vadd.f32 %v6938_v51, %v6890_v38  ;;  %7321 = vmatpush.bf16.msrb.mxu3 %v10085_v55  ;;  %7370 = vmatpush.bf16.msrb.mxu0 %v10213_v3 }
 0x86d   : > { %v7590_v1 = vmul.f32 0.2, %v6876_v42  ;;  %vm7526_vm15 = vcmp.gt.f32.partialorder %v6876_v42, 0.0 }
 0x86e   : > { %7229 = vmatmul.bf16.vlgmr.msra.gmra.mxu1 %v14080_v63  ;;  %7087 = vmatmul.bf16.gmra.mxu2 %v14078_v18 }
 0x86f   : > { %7136 = vmatmul.bf16.gmra.mxu3 %v14082_v44  ;;  %v14374_v12 = vsel %vm7526_vm15, %v6876_v42, %v7590_v1  ;;  %v10941_v42 = vld [vmem:[#allocation6 + $0x3ac] sm:$0xf]  ;;  %v10338_v1 = vld [vmem:[#allocation6 + $0x3b8] sm:$0xf0] }
 0x870   : > { %14823 = vst [vmem:[#allocation23_spill] sm:$0xff] %v14374_v12  ;;  %v6985_v45 = vpop.f32.mrf.mxu0  ;;  %v10341_v60 = vor.u32 %v10941_v42, %v10338_v1 }
 0x871   : > { %v6986_v37 = vadd.f32 %v6985_v45, %v6937_v46  ;;  %v6892_v16 = vpop.f32.mrf.mxu2 }
 0x872   : > { %v6893_v32 = vadd.f32 %v6892_v16, %v14357_v34  ;;  %v6941_v38 = vpop.f32.mrf.mxu3  ;;  %7419 = vmatpush.bf16.msrb.mxu1 %v10341_v60 }
 0x873   : > { %v7035_v51 = vadd.f32 %v7034_v22, %v6986_v37  ;;  %v7036_v49 = vpop.f32.mrf.mxu1  ;;  %7180 = vmatmul.bf16.vlgmr.msra.gmra.mxu0 %v14093_v52 }
 0x874   : > { %v6942_v14 = vadd.f32 %v6941_v38, %v6893_v32  ;;  %v10841_v38 = vld [vmem:[#allocation6 + $0x8c] sm:$0xf] }
 0x875   : > { %v7531_v45 = vmul.f32 0.2, %v7035_v51  ;;  %vm7467_vm0 = vcmp.gt.f32.partialorder %v7035_v51, 0.0 }
 0x877   : > { %v14383_v42 = vsel %vm7467_vm0, %v7035_v51, %v7531_v45 }
 0x878   : > { %v6987_v26 = vpop.f32.mrf.mxu0 }
 0x879   : > { %v6988_v8 = vadd.f32 %v6987_v26, %v6939_v2  ;;  %v6894_v0 = vpop.f32.mrf.mxu2  ;;  %v10873_v2 = vld [vmem:[#allocation6 + $0x18c] sm:$0xf] }
 0x87a   : > { %v6895_v46 = vadd.f32 %v6894_v0, %v14357_v34  ;;  %v6943_v55 = vpop.f32.mrf.mxu3  ;;  %v10069_v0 = vor.u32 %v10873_v2, %v10066_v13 }
 0x87b   : > { %v7037_v22 = vadd.f32 %v7036_v49, %v6988_v8  ;;  %v7039_v37 = vpop.f32.mrf.mxu1  ;;  %v9941_v8 = vor.u32 %v10841_v38, %v9938_v11  ;;  %v10937_v38 = vld [vmem:[#allocation6 + $0x38c] sm:$0xf]  ;;  %v10322_v11 = vld [vmem:[#allocation6 + $0x398] sm:$0xf0] }
 0x87c   : > { %v6944_v16 = vadd.f32 %v6943_v55, %v6895_v46  ;;  %7322 = vmatpush.bf16.msrb.mxu3 %v10069_v0  ;;  %v10325_v13 = vor.u32 %v10937_v38, %v10322_v11 }
 0x87d   : > { %vm7471_vm1 = vcmp.gt.f32.partialorder %v7037_v22, 0.0  ;;  %v7535_v32 = vmul.f32 0.2, %v7037_v22  ;;  %7273 = vmatpush.bf16.msrb.mxu2 %v9941_v8 }
 0x87e   : > { %7234 = vmatmul.bf16.gmra.mxu1 %v14108_v62  ;;  %7092 = vmatmul.bf16.gmra.mxu2 %v14106_v59 }
 0x87f   : > { %v14385_v1 = vsel %vm7471_vm1, %v7037_v22, %v7535_v32  ;;  %7141 = vmatmul.bf16.gmra.mxu3 %v14110_v5  ;;  %v10905_v22 = vld [vmem:[#allocation6 + $0x28c] sm:$0xf]  ;;  %v10194_v32 = vld [vmem:[#allocation6 + $0x298] sm:$0xf0]  ;;  %7420 = vmatpush.bf16.msrb.mxu1 %v10325_v13 }
 0x880   : > { %v6990_v3 = vpop.f32.mrf.mxu0  ;;  %v10197_v2 = vor.u32 %v10905_v22, %v10194_v32 }
 0x881   : > { %v6991_v60 = vadd.f32 %v6990_v3, %v6942_v14  ;;  %v6897_v26 = vpop.f32.mrf.mxu2 }
 0x882   : > { %v6898_v46 = vadd.f32 %v6897_v26, %v14357_v34  ;;  %v6946_v55 = vpop.f32.mrf.mxu3  ;;  %7371 = vmatpush.bf16.msrb.mxu0 %v10197_v2 }
 0x883   : > { %v7040_v30 = vadd.f32 %v7039_v37, %v6991_v60  ;;  %v7041_v51 = vpop.f32.mrf.mxu1  ;;  %7185 = vmatmul.bf16.gmra.mxu0 %v14121_v40 }
 0x884   : > { %v6947_v45 = vadd.f32 %v6946_v55, %v6898_v46  ;;  %v10837_v55 = vld [vmem:[#allocation6 + $0x6c] sm:$0xf] }
 0x885   : > { %v7539_v3 = vmul.f32 0.2, %v7040_v30  ;;  %vm7475_vm2 = vcmp.gt.f32.partialorder %v7040_v30, 0.0  ;;  %v9925_v22 = vor.u32 %v10837_v55, %v9922_v39 }
 0x887   : > { %v14396_v38 = vsel %vm7475_vm2, %v7040_v30, %v7539_v3  ;;  %7274 = vmatpush.bf16.msrb.mxu2 %v9925_v22  ;;  %v10901_v30 = vld [vmem:[#allocation6 + $0x26c] sm:$0xf]  ;;  %v10178_v3 = vld [vmem:[#allocation6 + $0x278] sm:$0xf0] }
 0x888   : > { %v6992_v49 = vpop.f32.mrf.mxu0  ;;  %14824 = vst [vmem:[#allocation24_spill] sm:$0xff] %v14396_v38 }
 0x889   : > { %v6993_v12 = vadd.f32 %v6992_v49, %v6944_v16  ;;  %v6899_v14 = vpop.f32.mrf.mxu2  ;;  %v10869_v16 = vld [vmem:[#allocation6 + $0x16c] sm:$0xf]  ;;  %v10050_v49 = vld [vmem:[#allocation6 + $0x178] sm:$0xf0] }
 0x88a   : > { %v6900_v8 = vadd.f32 %v6899_v14, %v14357_v34  ;;  %v6948_v0 = vpop.f32.mrf.mxu3  ;;  %v10053_v32 = vor.u32 %v10869_v16, %v10050_v49  ;;  %v10181_v16 = vor.u32 %v10901_v30, %v10178_v3  ;;  %v10034_v3 = vld [vmem:[#allocation6 + $0x158] sm:$0xf0] }
 0x88b   : > { %v7042_v37 = vadd.f32 %v7041_v51, %v6993_v12  ;;  %v7044_v60 = vpop.f32.mrf.mxu1 }
 0x88c   : > { %v6949_v26 = vadd.f32 %v6948_v0, %v6900_v8  ;;  %7323 = vmatpush.bf16.msrb.mxu3 %v10053_v32  ;;  %7372 = vmatpush.bf16.msrb.mxu0 %v10181_v16 }
 0x88d   : > { %v7543_v46 = vmul.f32 0.2, %v7042_v37  ;;  %vm7479_vm3 = vcmp.gt.f32.partialorder %v7042_v37, 0.0 }
 0x88e   : > { %7239 = vmatmul.bf16.gmra.mxu1 %v14136_v21  ;;  %7097 = vmatmul.bf16.gmra.mxu2 %v14134_v41 }
 0x88f   : > { %7146 = vmatmul.bf16.gmra.mxu3 %v14138_v31  ;;  %v14398_v12 = vsel %vm7479_vm3, %v7042_v37, %v7543_v46  ;;  %v10933_v37 = vld [vmem:[#allocation6 + $0x36c] sm:$0xf]  ;;  %v10306_v46 = vld [vmem:[#allocation6 + $0x378] sm:$0xf0] }
 0x890   : > { %v6995_v51 = vpop.f32.mrf.mxu0  ;;  %v10309_v22 = vor.u32 %v10933_v37, %v10306_v46 }
 0x891   : > { %v6996_v2 = vadd.f32 %v6995_v51, %v6947_v45  ;;  %v6902_v13 = vpop.f32.mrf.mxu2 }
 0x892   : > { %v6903_v39 = vadd.f32 %v6902_v13, %v14357_v34  ;;  %v6951_v14 = vpop.f32.mrf.mxu3  ;;  %7421 = vmatpush.bf16.msrb.mxu1 %v10309_v22 }
 0x893   : > { %v7045_v8 = vadd.f32 %v7044_v60, %v6996_v2  ;;  %v7046_v0 = vpop.f32.mrf.mxu1  ;;  %7190 = vmatmul.bf16.gmra.mxu0 %v14149_v58 }
 0x894   : > { %v6952_v55 = vadd.f32 %v6951_v14, %v6903_v39  ;;  %v10833_v14 = vld [vmem:[#allocation6 + $0x4c] sm:$0xf] }
 0x895   : > { %v7547_v51 = vmul.f32 0.2, %v7045_v8  ;;  %vm7483_vm4 = vcmp.gt.f32.partialorder %v7045_v8, 0.0  ;;  %v9909_v30 = vor.u32 %v10833_v14, %v9906_v47 }
 0x897   : > { %v14408_v37 = vsel %vm7483_vm4, %v7045_v8, %v7547_v51  ;;  %7275 = vmatpush.bf16.msrb.mxu2 %v9909_v30  ;;  %v10897_v8 = vld [vmem:[#allocation6 + $0x24c] sm:$0xf]  ;;  %v10162_v51 = vld [vmem:[#allocation6 + $0x258] sm:$0xf0] }
 0x898   : > { %v6997_v49 = vpop.f32.mrf.mxu0  ;;  %14825 = vst [vmem:[#allocation25_spill] sm:$0xff] %v14408_v37  ;;  %v9890_v37 = vld [vmem:[#allocation6 + $0x38] sm:$0xf0] }
 0x899   : > { %v6998_v56 = vadd.f32 %v6997_v49, %v6949_v26  ;;  %v6904_v11 = vpop.f32.mrf.mxu2  ;;  %v10865_v26 = vld [vmem:[#allocation6 + $0x14c] sm:$0xf] }
 0x89a   : > { %v6905_v45 = vadd.f32 %v6904_v11, %v14357_v34  ;;  %v6953_v32 = vpop.f32.mrf.mxu3  ;;  %v10037_v11 = vor.u32 %v10865_v26, %v10034_v3  ;;  %v10165_v26 = vor.u32 %v10897_v8, %v10162_v51  ;;  %v10018_v51 = vld [vmem:[#allocation6 + $0x138] sm:$0xf0] }
 0x89b   : > { %v7047_v60 = vadd.f32 %v7046_v0, %v6998_v56  ;;  %v7049_v2 = vpop.f32.mrf.mxu1 }
 0x89c   : > { %v6954_v13 = vadd.f32 %v6953_v32, %v6905_v45  ;;  %7324 = vmatpush.bf16.msrb.mxu3 %v10037_v11  ;;  %7373 = vmatpush.bf16.msrb.mxu0 %v10165_v26 }
 0x89d   : > { %v7551_v39 = vmul.f32 0.2, %v7047_v60  ;;  %vm7487_vm5 = vcmp.gt.f32.partialorder %v7047_v60, 0.0 }
 0x89e   : > { %7244 = vmatmul.bf16.gmra.mxu1 %v14164_v54  ;;  %7102 = vmatmul.bf16.gmra.mxu2 %v14162_v35 }
 0x89f   : > { %7151 = vmatmul.bf16.gmra.mxu3 %v14166_v28  ;;  %v14410_v56 = vsel %vm7487_vm5, %v7047_v60, %v7551_v39  ;;  %v10929_v60 = vld [vmem:[#allocation6 + $0x34c] sm:$0xf]  ;;  %v10290_v39 = vld [vmem:[#allocation6 + $0x358] sm:$0xf0] }
 0x8a0   : > { %14826 = vst [vmem:[#allocation26_spill] sm:$0xff] %v14410_v56  ;;  %v7000_v0 = vpop.f32.mrf.mxu0  ;;  %v10293_v30 = vor.u32 %v10929_v60, %v10290_v39 }
 0x8a1   : > { %v7001_v16 = vadd.f32 %v7000_v0, %v6952_v55  ;;  %v6907_v22 = vpop.f32.mrf.mxu2 }
 0x8a2   : > { %v6908_v47 = vadd.f32 %v6907_v22, %v14357_v34  ;;  %v6956_v49 = vpop.f32.mrf.mxu3  ;;  %7422 = vmatpush.bf16.msrb.mxu1 %v10293_v30 }
 0x8a3   : > { %v7050_v45 = vadd.f32 %v7049_v2, %v7001_v16  ;;  %v7051_v32 = vpop.f32.mrf.mxu1  ;;  %7195 = vmatmul.bf16.gmra.mxu0 %v14177_v29 }
 0x8a4   : > { %v6957_v14 = vadd.f32 %v6956_v49, %v6908_v47  ;;  %v10829_v49 = vld [vmem:[#allocation6 + $0x2c] sm:$0xf] }
 0x8a5   : > { %v7555_v0 = vmul.f32 0.2, %v7050_v45  ;;  %vm7491_vm6 = vcmp.gt.f32.partialorder %v7050_v45, 0.0  ;;  %v9893_v8 = vor.u32 %v10829_v49, %v9890_v37 }
 0x8a7   : > { %v14420_v60 = vsel %vm7491_vm6, %v7050_v45, %v7555_v0  ;;  %7276 = vmatpush.bf16.msrb.mxu2 %v9893_v8  ;;  %v10893_v45 = vld [vmem:[#allocation6 + $0x22c] sm:$0xf]  ;;  %v10146_v0 = vld [vmem:[#allocation6 + $0x238] sm:$0xf0] }
 0x8a8   : > { %v7002_v3 = vpop.f32.mrf.mxu0  ;;  %14827 = vst [vmem:[#allocation27_spill] sm:$0xff] %v14420_v60 }
 0x8a9   : > { %v7003_v36 = vadd.f32 %v7002_v3, %v6954_v13  ;;  %v6909_v46 = vpop.f32.mrf.mxu2  ;;  %v10861_v13 = vld [vmem:[#allocation6 + $0x12c] sm:$0xf] }
 0x8aa   : > { %v6910_v55 = vadd.f32 %v6909_v46, %v14357_v34  ;;  %v6958_v11 = vpop.f32.mrf.mxu3  ;;  %v10021_v46 = vor.u32 %v10861_v13, %v10018_v51  ;;  %v10149_v13 = vor.u32 %v10893_v45, %v10146_v0 }
 0x8ab   : > { %v7052_v2 = vadd.f32 %v7051_v32, %v7003_v36  ;;  %v7054_v16 = vpop.f32.mrf.mxu1 }
 0x8ac   : > { %v6959_v22 = vadd.f32 %v6958_v11, %v6910_v55  ;;  %7325 = vmatpush.bf16.msrb.mxu3 %v10021_v46  ;;  %7374 = vmatpush.bf16.msrb.mxu0 %v10149_v13 }
 0x8ad   : > { %v7559_v47 = vmul.f32 0.2, %v7052_v2  ;;  %vm7495_vm7 = vcmp.gt.f32.partialorder %v7052_v2, 0.0 }
 0x8ae   : > { %7249 = vmatmul.bf16.gmra.mxu1 %v14192_v24  ;;  %7107 = vmatmul.bf16.gmra.mxu2 %v14190_v10 }
 0x8af   : > { %7156 = vmatmul.bf16.gmra.mxu3 %v14194_v50  ;;  %v14422_v36 = vsel %vm7495_vm7, %v7052_v2, %v7559_v47  ;;  %v10925_v2 = vld [vmem:[#allocation6 + $0x32c] sm:$0xf]  ;;  %v10274_v47 = vld [vmem:[#allocation6 + $0x338] sm:$0xf0] }
 0x8b0   : > { %14828 = vst [vmem:[#allocation28_spill] sm:$0xff] %v14422_v36  ;;  %v7005_v32 = vpop.f32.mrf.mxu0  ;;  %v10277_v8 = vor.u32 %v10925_v2, %v10274_v47  ;;  %v10002_v36 = vld [vmem:[#allocation6 + $0x118] sm:$0xf0] }
 0x8b1   : > { %v7006_v26 = vadd.f32 %v7005_v32, %v6957_v14  ;;  %v6912_v30 = vpop.f32.mrf.mxu2  ;;  %v10825_v32 = vld [vmem:[#allocation6 + $0xc] sm:$0xf] }
 0x8b2   : > { %v6913_v37 = vadd.f32 %v6912_v30, %v14357_v34  ;;  %v6961_v3 = vpop.f32.mrf.mxu3  ;;  %7423 = vmatpush.bf16.msrb.mxu1 %v10277_v8 }
 0x8b3   : > { %v7055_v55 = vadd.f32 %v7054_v16, %v7006_v26  ;;  %v7056_v11 = vpop.f32.mrf.mxu1  ;;  %7200 = vmatmul.bf16.gmra.mxu0 %v14205_v61  ;;  %v9874_v16 = vld [vmem:[#allocation6 + $0x18] sm:$0xf0]  ;;  %v10857_v26 = vld [vmem:[#allocation6 + $0x10c] sm:$0xf] }
 0x8b4   : > { %v6962_v49 = vadd.f32 %v6961_v3, %v6913_v37  ;;  %v9877_v3 = vor.u32 %v10825_v32, %v9874_v16  ;;  %v10005_v45 = vor.u32 %v10857_v26, %v10002_v36  ;;  %v10921_v32 = vld [vmem:[#allocation6 + $0x30c] sm:$0xf] }
 0x8b5   : > { %v7563_v30 = vmul.f32 0.2, %v7055_v55  ;;  %vm7499_vm8 = vcmp.gt.f32.partialorder %v7055_v55, 0.0 }
 0x8b6   : > { %7277 = vmatpush.bf16.msrb.mxu2 %v9877_v3  ;;  %7326 = vmatpush.bf16.msrb.mxu3 %v10005_v45 }
 0x8b8   : > { %v7007_v51 = vpop.f32.mrf.mxu0 }
 0x8b9   : > { %v7008_v56 = vadd.f32 %v7007_v51, %v6959_v22  ;;  %v6914_v39 = vpop.f32.mrf.mxu2  ;;  %v14432_v22 = vsel %vm7499_vm8, %v7055_v55, %v7563_v30  ;;  %v10130_v55 = vld [vmem:[#allocation6 + $0x218] sm:$0xf0] }
 0x8ba   : > { %v6915_v14 = vadd.f32 %v6914_v39, %v14357_v34  ;;  %v6963_v46 = vpop.f32.mrf.mxu3 }
 0x8bb   : > { %v7057_v60 = vadd.f32 %v7056_v11, %v7008_v56  ;;  %v7059_v37 = vpop.f32.mrf.mxu1 }
 0x8bc   : > { %v6964_v38 = vadd.f32 %v6963_v46, %v6915_v14  ;;  %v10889_v46 = vld [vmem:[#allocation6 + $0x20c] sm:$0xf] }
 0x8bd   : > { %v7567_v0 = vmul.f32 0.2, %v7057_v60  ;;  %vm7503_vm9 = vcmp.gt.f32.partialorder %v7057_v60, 0.0  ;;  %v10133_v16 = vor.u32 %v10889_v46, %v10130_v55 }
 0x8be   : > { %7254 = vmatmul.bf16.gmra.mxu1 %v14224_v17  ;;  %7112 = vmatmul.bf16.gmra.mxu2 %v14222_v53 }
 0x8bf   : > { %7161 = vmatmul.bf16.gmra.mxu3 %v14226_v6  ;;  %v14434_v39 = vsel %vm7503_vm9, %v7057_v60, %v7567_v0  ;;  %v10258_v60 = vld [vmem:[#allocation6 + $0x318] sm:$0xf0]  ;;  %7375 = vmatpush.bf16.msrb.mxu0 %v10133_v16 }
 0x8c0   : > { %v7010_v56 = vpop.f32.mrf.mxu0  ;;  %v10261_v26 = vor.u32 %v10921_v32, %v10258_v60 }
 0x8c1   : > { %v7011_v2 = vadd.f32 %v7010_v56, %v6962_v49  ;;  %v6917_v36 = vpop.f32.mrf.mxu2 }
 0x8c2   : > { %v6918_v47 = vadd.f32 %v6917_v36, %v14357_v34  ;;  %v6966_v13 = vpop.f32.mrf.mxu3  ;;  %7424 = vmatpush.bf16.msrb.mxu1 %v10261_v26 }
 0x8c3   : > { %v7060_v8 = vadd.f32 %v7059_v37, %v7011_v2  ;;  %v7061_v51 = vpop.f32.mrf.mxu1  ;;  %7205 = vmatmul.bf16.gmra.mxu0 %v14234_v23 }
 0x8c4   : > { %v6967_v14 = vadd.f32 %v6966_v13, %v6918_v47 }
 0x8c5   : > { %v7571_v56 = vmul.f32 0.2, %v7060_v8  ;;  %vm7507_vm10 = vcmp.gt.f32.partialorder %v7060_v8, 0.0 }
 0x8c8   : > { %v7012_v30 = vpop.f32.mrf.mxu0 }
 0x8c9   : > { %v7013_v3 = vadd.f32 %v7012_v30, %v6964_v38  ;;  %v6919_v45 = vpop.f32.mrf.mxu2  ;;  %v14444_v38 = vsel %vm7507_vm10, %v7060_v8, %v7571_v56 }
 0x8ca   : > { %v6920_v49 = vadd.f32 %v6919_v45, %v14357_v34  ;;  %v6968_v0 = vpop.f32.mrf.mxu3  ;;  %v10959_v45 = vld [vmem:[#allocation7 + $0x38] sm:$0xff] }
 0x8cb   : > { %v7062_v37 = vadd.f32 %v7061_v51, %v7013_v3  ;;  %v7064_v2 = vpop.f32.mrf.mxu1  ;;  %7950 = vmatpush.bf16.msra.mxu2 %v10959_v45 }
 0x8cc   : > { %v6969_v36 = vadd.f32 %v6968_v0, %v6920_v49 }
 0x8cd   : > { %v7575_v47 = vmul.f32 0.2, %v7062_v37  ;;  %vm7511_vm11 = vcmp.gt.f32.partialorder %v7062_v37, 0.0 }
 0x8ce   : > { %7259 = vmatmul.bf16.gmra.mxu1 %v14244_v20  ;;  %7117 = vmatmul.bf16.gmra.mxu2 %v14066_v4 }
 0x8cf   : > { %7166 = vmatmul.bf16.gmra.mxu3 %v14246_v33  ;;  %v14446_v13 = vsel %vm7511_vm11, %v7062_v37, %v7575_v47 }
 0x8d0   : > { %v7015_v46 = vpop.f32.mrf.mxu0 }
 0x8d1   : > { %v7016_v51 = vadd.f32 %v7015_v46, %v6967_v14  ;;  %v6922_v32 = vpop.f32.mrf.mxu2 }
 0x8d2   : > { %v6923_v60 = vadd.f32 %v6922_v32, %v14357_v34  ;;  %v6971_v16 = vpop.f32.mrf.mxu3 }
 0x8d3   : > { %v7065_v26 = vadd.f32 %v7064_v2, %v7016_v51  ;;  %v7066_v30 = vpop.f32.mrf.mxu1  ;;  %7210 = vmatmul.bf16.gmra.mxu0 %v14252_v27  ;;  %v14458_v2 = vld [vmem:[%s14811_s21] sm:$0xf] }
 0x8d4   : > { %v6972_v3 = vadd.f32 %v6971_v16, %v6923_v60  ;;  %v10967_v16 = vld [vmem:[#allocation7 + $0x78] sm:$0xff] }
 0x8d5   : > { %v7579_v47 = vmul.f32 0.2, %v7065_v26  ;;  %vm7515_vm12 = vcmp.gt.f32.partialorder %v7065_v26, 0.0  ;;  %7999 = vmatpush.bf16.msra.mxu3 %v10967_v16 }
 0x8d8   : > { %v7017_v49 = vpop.f32.mrf.mxu0 }
 0x8d9   : > { %v7018_v8 = vadd.f32 %v7017_v49, %v6969_v36  ;;  %v6924_v0 = vpop.f32.mrf.mxu2  ;;  %v14461_v36 = vperm.slane %v14458_v2, 2 }
 0x8da   : > { %v6925_v56 = vadd.f32 %v6924_v0, %v14357_v34  ;;  %v6973_v37 = vpop.f32.mrf.mxu3  ;;  %v14464_v34 = vsel %vm7515_vm12, %v7065_v26, %v7579_v47  ;;  %v10975_v26 = vld [vmem:[#allocation7 + $0xb8] sm:$0xff] }
 0x8db   : > { %v7067_v55 = vadd.f32 %v7066_v30, %v7018_v8  ;;  %v7069_v14 = vpop.f32.mrf.mxu1  ;;  %14829 = vst [vmem:[#allocation29_spill] sm:$0xff] %v14464_v34  ;;  %8048 = vmatpush.bf16.msra.mxu0 %v10975_v26  ;;  %v10966_v34 = vld [vmem:[#allocation7 + $0x70] sm:$0xff] }
 0x8dc   : > { %v6974_v46 = vadd.f32 %v6973_v37, %v6925_v56  ;;  %v10983_v37 = vld [vmem:[#allocation7 + $0xf8] sm:$0xff]  ;;  %8000 = vmatpush.bf16.msra.mxu3 %v10966_v34 }
 0x8dd   : > { %v7583_v32 = vmul.f32 0.2, %v7067_v55  ;;  %vm7519_vm13 = vcmp.gt.f32.partialorder %v7067_v55, 0.0  ;;  %8097 = vmatpush.bf16.msra.mxu1 %v10983_v37 }
 0x8de   : > { %7264 = vmatmul.bf16.gmra.mxu1 %v14263_v57  ;;  %7278 = vmatmul.bf16.vlgmr.msrb.gmra.mxu2 %v14051_v19 }
 0x8df   : > { %7327 = vmatmul.bf16.vlgmr.msrb.gmra.mxu3 %v14049_v48  ;;  %v14466_v51 = vsel %vm7519_vm13, %v7067_v55, %v7583_v32  ;;  %v10958_v55 = vld [vmem:[#allocation7 + $0x30] sm:$0xff] }
 0x8e0   : > { %v7020_v60 = vpop.f32.mrf.mxu0  ;;  %7951 = vmatpush.bf16.msra.mxu2 %v10958_v55 }
 0x8e1   : > { %v7021_v19 = vadd.f32 %v7020_v60, %v6972_v3  ;;  %v7083_v45 = vpop.f32.mrf.mxu2 }
 0x8e2   : > { %v7084_v49 = vadd.f32 %v7083_v45, %v14461_v36  ;;  %v7132_v8 = vpop.f32.mrf.mxu3 }
 0x8e3   : > { %v7070_v0 = vadd.f32 %v7069_v14, %v7021_v19  ;;  %v7071_v56 = vpop.f32.mrf.mxu1  ;;  %7215 = vmatmul.bf16.gmra.mxu0 %v14271_v43 }
 0x8e4   : > { %v7133_v48 = vadd.f32 %v7132_v8, %v7084_v49 }
 0x8e5   : > { %v7587_v45 = vmul.f32 0.2, %v7070_v0  ;;  %vm7523_vm14 = vcmp.gt.f32.partialorder %v7070_v0, 0.0 }
 0x8e7   : > { %v14476_v49 = vsel %vm7523_vm14, %v7070_v0, %v7587_v45  ;;  %v10982_v0 = vld [vmem:[#allocation7 + $0xf0] sm:$0xff] }
 0x8e8   : > { %v7022_v47 = vpop.f32.mrf.mxu0  ;;  %8098 = vmatpush.bf16.msra.mxu1 %v10982_v0 }
 0x8e9   : > { %v7023_v32 = vadd.f32 %v7022_v47, %v6974_v46  ;;  %v7085_v30 = vpop.f32.mrf.mxu2 }
 0x8ea   : > { %v7086_v3 = vadd.f32 %v7085_v30, %v14461_v36  ;;  %v7134_v60 = vpop.f32.mrf.mxu3 }
 0x8eb   : > { %v7072_v11 = vadd.f32 %v7071_v56, %v7023_v32  ;;  %v7230_v16 = vpop.f32.mrf.mxu1  ;;  %v10957_v32 = vld [vmem:[#allocation7 + $0x28] sm:$0xff] }
 0x8ec   : > { %v7135_v14 = vadd.f32 %v7134_v60, %v7086_v3  ;;  %7952 = vmatpush.bf16.msra.mxu2 %v10957_v32 }
 0x8ed   : > { %v7591_v19 = vmul.f32 0.2, %v7072_v11  ;;  %vm7527_vm15 = vcmp.gt.f32.partialorder %v7072_v11, 0.0 }
 0x8ee   : > { %7425 = vmatmul.bf16.vlgmr.msrb.gmra.mxu1 %v14080_v63  ;;  %7283 = vmatmul.bf16.gmra.mxu2 %v14078_v18 }
 0x8ef   : > { %7332 = vmatmul.bf16.gmra.mxu3 %v14082_v44  ;;  %v14478_v46 = vsel %vm7527_vm15, %v7072_v11, %v7591_v19  ;;  %v10974_v44 = vld [vmem:[#allocation7 + $0xb0] sm:$0xff] }
 0x8f0   : > { %v7181_v30 = vpop.f32.mrf.mxu0  ;;  %v7687_v8 = vpack.c.bf16 %v14478_v46, %v14476_v49  ;;  %8049 = vmatpush.bf16.msra.mxu0 %v10974_v44 }
 0x8f1   : > { %v7182_v56 = vadd.f32 %v7181_v30, %v7133_v48  ;;  %v7088_v26 = vpop.f32.mrf.mxu2 }
 0x8f2   : > { %v7089_v37 = vadd.f32 %v7088_v26, %v14461_v36  ;;  %v7137_v55 = vpop.f32.mrf.mxu3 }
 0x8f3   : > { %v7231_v47 = vadd.f32 %v7230_v16, %v7182_v56  ;;  %v7232_v63 = vpop.f32.mrf.mxu1  ;;  %7376 = vmatmul.bf16.vlgmr.msrb.gmra.mxu0 %v14093_v52  ;;  %v10965_v56 = vld [vmem:[#allocation7 + $0x68] sm:$0xff] }
 0x8f4   : > { %v7138_v18 = vadd.f32 %v7137_v55, %v7089_v37  ;;  %8001 = vmatpush.bf16.msra.mxu3 %v10965_v56 }
 0x8f5   : > { %v7532_v45 = vmul.f32 0.2, %v7231_v47  ;;  %vm7468_vm0 = vcmp.gt.f32.partialorder %v7231_v47, 0.0 }
 0x8f7   : > { %v14487_v26 = vsel %vm7468_vm0, %v7231_v47, %v7532_v45  ;;  %v10973_v47 = vld [vmem:[#allocation7 + $0xa8] sm:$0xff] }
 0x8f8   : > { %v7183_v11 = vpop.f32.mrf.mxu0  ;;  %8050 = vmatpush.bf16.msra.mxu0 %v10973_v47 }
 0x8f9   : > { %v7184_v34 = vadd.f32 %v7183_v11, %v7135_v14  ;;  %v7090_v3 = vpop.f32.mrf.mxu2 }
 0x8fa   : > { %v7091_v48 = vadd.f32 %v7090_v3, %v14461_v36  ;;  %v7139_v60 = vpop.f32.mrf.mxu3  ;;  %v10956_v3 = vld [vmem:[#allocation7 + $0x20] sm:$0xff] }
 0x8fb   : > { %v7233_v19 = vadd.f32 %v7232_v63, %v7184_v34  ;;  %v7235_v30 = vpop.f32.mrf.mxu1  ;;  %v10981_v34 = vld [vmem:[#allocation7 + $0xe8] sm:$0xff]  ;;  %7953 = vmatpush.bf16.msra.mxu2 %v10956_v3 }
 0x8fc   : > { %v7140_v16 = vadd.f32 %v7139_v60, %v7091_v48  ;;  %8099 = vmatpush.bf16.msra.mxu1 %v10981_v34 }
 0x8fd   : > { %vm7472_vm1 = vcmp.gt.f32.partialorder %v7233_v19, 0.0  ;;  %v7536_v52 = vmul.f32 0.2, %v7233_v19 }
 0x8fe   : > { %7430 = vmatmul.bf16.gmra.mxu1 %v14108_v62  ;;  %7288 = vmatmul.bf16.gmra.mxu2 %v14106_v59 }
 0x8ff   : > { %v14489_v37 = vsel %vm7472_vm1, %v7233_v19, %v7536_v52  ;;  %7337 = vmatmul.bf16.gmra.mxu3 %v14110_v5 }
 0x900   : > { %v7660_v14 = vpack.c.bf16 %v14489_v37, %v14487_v26  ;;  %v7186_v55 = vpop.f32.mrf.mxu0 }
 0x901   : > { %v7187_v63 = vadd.f32 %v7186_v55, %v7138_v18  ;;  %v7093_v44 = vpop.f32.mrf.mxu2 }
 0x902   : > { %v7094_v0 = vadd.f32 %v7093_v44, %v14461_v36  ;;  %v7142_v32 = vpop.f32.mrf.mxu3 }
 0x903   : > { %v7236_v11 = vadd.f32 %v7235_v30, %v7187_v63  ;;  %v7237_v62 = vpop.f32.mrf.mxu1  ;;  %7381 = vmatmul.bf16.gmra.mxu0 %v14121_v40  ;;  %v10964_v40 = vld [vmem:[#allocation7 + $0x60] sm:$0xff] }
 0x904   : > { %v7143_v59 = vadd.f32 %v7142_v32, %v7094_v0  ;;  %8002 = vmatpush.bf16.msra.mxu3 %v10964_v40 }
 0x905   : > { %v7540_v19 = vmul.f32 0.2, %v7236_v11  ;;  %vm7476_vm2 = vcmp.gt.f32.partialorder %v7236_v11, 0.0 }
 0x907   : > { %v14500_v63 = vsel %vm7476_vm2, %v7236_v11, %v7540_v19  ;;  %v10980_v11 = vld [vmem:[#allocation7 + $0xe0] sm:$0xff] }
 0x908   : > { %v7188_v5 = vpop.f32.mrf.mxu0  ;;  %8100 = vmatpush.bf16.msra.mxu1 %v10980_v11 }
 0x909   : > { %v7189_v48 = vadd.f32 %v7188_v5, %v7140_v16  ;;  %v7095_v60 = vpop.f32.mrf.mxu2  ;;  %v10955_v5 = vld [vmem:[#allocation7 + $0x18] sm:$0xff] }
 0x90a   : > { %v7096_v18 = vadd.f32 %v7095_v60, %v14461_v36  ;;  %v7144_v45 = vpop.f32.mrf.mxu3  ;;  %7954 = vmatpush.bf16.msra.mxu2 %v10955_v5  ;;  %v10954_v5 = vld [vmem:[#allocation7 + $0x10] sm:$0xff] }
 0x90b   : > { %v7238_v52 = vadd.f32 %v7237_v62, %v7189_v48  ;;  %v7240_v56 = vpop.f32.mrf.mxu1 }
 0x90c   : > { %v7145_v30 = vadd.f32 %v7144_v45, %v7096_v18 }
 0x90d   : > { %v7544_v55 = vmul.f32 0.2, %v7238_v52  ;;  %vm7480_vm3 = vcmp.gt.f32.partialorder %v7238_v52, 0.0 }
 0x90e   : > { %7435 = vmatmul.bf16.gmra.mxu1 %v14136_v21  ;;  %7293 = vmatmul.bf16.gmra.mxu2 %v14134_v41 }
 0x90f   : > { %7342 = vmatmul.bf16.gmra.mxu3 %v14138_v31  ;;  %v14502_v16 = vsel %vm7480_vm3, %v7238_v52, %v7544_v55  ;;  %v10972_v31 = vld [vmem:[#allocation7 + $0xa0] sm:$0xff]  ;;  %7955 = vmatpush.bf16.msra.mxu2 %v10954_v5  ;;  %v10961_v5 = vld [vmem:[#allocation7 + $0x48] sm:$0xff] }
 0x910   : > { %v7191_v44 = vpop.f32.mrf.mxu0  ;;  %v7664_v0 = vpack.c.bf16 %v14502_v16, %v14500_v63  ;;  %8051 = vmatpush.bf16.msra.mxu0 %v10972_v31  ;;  %v14844_v63 = vld [vmem:[#allocation28_spill] sm:$0xff]  ;;  %v14845_v16 = vld [vmem:[#allocation27_spill] sm:$0xff] }
 0x911   : > { %v7192_v32 = vadd.f32 %v7191_v44, %v7143_v59  ;;  %v7098_v62 = vpop.f32.mrf.mxu2 }
 0x912   : > { %v7099_v47 = vadd.f32 %v7098_v62, %v14461_v36  ;;  %v7147_v34 = vpop.f32.mrf.mxu3 }
 0x913   : > { %v7241_v3 = vadd.f32 %v7240_v56, %v7192_v32  ;;  %v7242_v21 = vpop.f32.mrf.mxu1  ;;  %7386 = vmatmul.bf16.gmra.mxu0 %v14149_v58  ;;  %v10963_v58 = vld [vmem:[#allocation7 + $0x58] sm:$0xff] }
 0x914   : > { %v7148_v41 = vadd.f32 %v7147_v34, %v7099_v47  ;;  %8003 = vmatpush.bf16.msra.mxu3 %v10963_v58 }
 0x915   : > { %v7548_v19 = vmul.f32 0.2, %v7241_v3  ;;  %vm7484_vm4 = vcmp.gt.f32.partialorder %v7241_v3, 0.0 }
 0x917   : > { %v14512_v44 = vsel %vm7484_vm4, %v7241_v3, %v7548_v19  ;;  %v10979_v3 = vld [vmem:[#allocation7 + $0xd8] sm:$0xff] }
 0x918   : > { %v7193_v48 = vpop.f32.mrf.mxu0  ;;  %8101 = vmatpush.bf16.msra.mxu1 %v10979_v3  ;;  %v10953_v3 = vld [vmem:[#allocation7 + $0x8] sm:$0xff] }
 0x919   : > { %v7194_v60 = vadd.f32 %v7193_v48, %v7145_v30  ;;  %v7100_v18 = vpop.f32.mrf.mxu2  ;;  %7956 = vmatpush.bf16.msra.mxu2 %v10953_v3 }
 0x91a   : > { %v7101_v59 = vadd.f32 %v7100_v18, %v14461_v36  ;;  %v7149_v45 = vpop.f32.mrf.mxu3 }
 0x91b   : > { %v7243_v52 = vadd.f32 %v7242_v21, %v7194_v60  ;;  %v7245_v55 = vpop.f32.mrf.mxu1 }
 0x91c   : > { %v7150_v56 = vadd.f32 %v7149_v45, %v7101_v59 }
 0x91d   : > { %v7552_v40 = vmul.f32 0.2, %v7243_v52  ;;  %vm7488_vm5 = vcmp.gt.f32.partialorder %v7243_v52, 0.0 }
 0x91e   : > { %7440 = vmatmul.bf16.gmra.mxu1 %v14164_v54  ;;  %7298 = vmatmul.bf16.gmra.mxu2 %v14162_v35 }
 0x91f   : > { %7347 = vmatmul.bf16.gmra.mxu3 %v14166_v28  ;;  %v14514_v30 = vsel %vm7488_vm5, %v7243_v52, %v7552_v40  ;;  %v10971_v28 = vld [vmem:[#allocation7 + $0x98] sm:$0xff] }
 0x920   : > { %v7196_v32 = vpop.f32.mrf.mxu0  ;;  %v7668_v62 = vpack.c.bf16 %v14514_v30, %v14512_v44  ;;  %8052 = vmatpush.bf16.msra.mxu0 %v10971_v28  ;;  %v14850_v44 = vpack.c.bf16 %v14434_v39, %v14432_v22 }
 0x921   : > { %v7197_v47 = vadd.f32 %v7196_v32, %v7148_v41  ;;  %v7103_v34 = vpop.f32.mrf.mxu2 }
 0x922   : > { %v7104_v21 = vadd.f32 %v7103_v34, %v14461_v36  ;;  %v7152_v31 = vpop.f32.mrf.mxu3 }
 0x923   : > { %v7246_v11 = vadd.f32 %v7245_v55, %v7197_v47  ;;  %v7247_v54 = vpop.f32.mrf.mxu1  ;;  %7391 = vmatmul.bf16.gmra.mxu0 %v14177_v29  ;;  %v10962_v29 = vld [vmem:[#allocation7 + $0x50] sm:$0xff] }
 0x924   : > { %v7153_v35 = vadd.f32 %v7152_v31, %v7104_v21  ;;  %8004 = vmatpush.bf16.msra.mxu3 %v10962_v29 }
 0x925   : > { %v7556_v45 = vmul.f32 0.2, %v7246_v11  ;;  %vm7492_vm6 = vcmp.gt.f32.partialorder %v7246_v11, 0.0 }
 0x927   : > { %v14524_v58 = vsel %vm7492_vm6, %v7246_v11, %v7556_v45  ;;  %v10978_v11 = vld [vmem:[#allocation7 + $0xd0] sm:$0xff] }
 0x928   : > { %v7198_v48 = vpop.f32.mrf.mxu0  ;;  %8102 = vmatpush.bf16.msra.mxu1 %v10978_v11  ;;  %8005 = vmatpush.bf16.msra.mxu3 %v10961_v5 }
 0x929   : > { %v7199_v60 = vadd.f32 %v7198_v48, %v7150_v56  ;;  %v7105_v18 = vpop.f32.mrf.mxu2 }
 0x92a   : > { %v7106_v41 = vadd.f32 %v7105_v18, %v14461_v36  ;;  %v7154_v59 = vpop.f32.mrf.mxu3 }
 0x92b   : > { %v7248_v19 = vadd.f32 %v7247_v54, %v7199_v60  ;;  %v7250_v52 = vpop.f32.mrf.mxu1 }
 0x92c   : > { %v7155_v55 = vadd.f32 %v7154_v59, %v7106_v41 }
 0x92d   : > { %v7560_v40 = vmul.f32 0.2, %v7248_v19  ;;  %vm7496_vm7 = vcmp.gt.f32.partialorder %v7248_v19, 0.0 }
 0x92e   : > { %7445 = vmatmul.bf16.gmra.mxu1 %v14192_v24  ;;  %7303 = vmatmul.bf16.gmra.mxu2 %v14190_v10 }
 0x92f   : > { %7352 = vmatmul.bf16.gmra.mxu3 %v14194_v50  ;;  %v14526_v56 = vsel %vm7496_vm7, %v7248_v19, %v7560_v40  ;;  %v10970_v50 = vld [vmem:[#allocation7 + $0x90] sm:$0xff] }
 0x930   : > { %v7201_v32 = vpop.f32.mrf.mxu0  ;;  %v7672_v47 = vpack.c.bf16 %v14526_v56, %v14524_v58  ;;  %8053 = vmatpush.bf16.msra.mxu0 %v10970_v50  ;;  %v14854_v58 = vpack.c.bf16 %v14446_v13, %v14444_v38 }
 0x931   : > { %v7202_v34 = vadd.f32 %v7201_v32, %v7153_v35  ;;  %v7108_v21 = vpop.f32.mrf.mxu2 }
 0x932   : > { %v7109_v31 = vadd.f32 %v7108_v21, %v14461_v36  ;;  %v7157_v54 = vpop.f32.mrf.mxu3 }
 0x933   : > { %v7251_v28 = vadd.f32 %v7250_v52, %v7202_v34  ;;  %v7252_v24 = vpop.f32.mrf.mxu1  ;;  %7396 = vmatmul.bf16.gmra.mxu0 %v14205_v61  ;;  %v10952_v52 = vld [vmem:[#allocation7] sm:$0xff] }
 0x934   : > { %v7158_v10 = vadd.f32 %v7157_v54, %v7109_v31  ;;  %v10960_v61 = vld [vmem:[#allocation7 + $0x40] sm:$0xff]  ;;  %7957 = vmatpush.bf16.msra.mxu2 %v10952_v52 }
 0x935   : > { %v7564_v59 = vmul.f32 0.2, %v7251_v28  ;;  %vm7500_vm8 = vcmp.gt.f32.partialorder %v7251_v28, 0.0  ;;  %8006 = vmatpush.bf16.msra.mxu3 %v10960_v61  ;;  %v10968_v61 = vld [vmem:[#allocation7 + $0x80] sm:$0xff] }
 0x938   : > { %v7203_v48 = vpop.f32.mrf.mxu0 }
 0x939   : > { %v7204_v60 = vadd.f32 %v7203_v48, %v7155_v55  ;;  %v7110_v35 = vpop.f32.mrf.mxu2  ;;  %v14536_v55 = vsel %vm7500_vm8, %v7251_v28, %v7564_v59 }
 0x93a   : > { %v7111_v18 = vadd.f32 %v7110_v35, %v14461_v36  ;;  %v7159_v41 = vpop.f32.mrf.mxu3 }
 0x93b   : > { %v7253_v45 = vadd.f32 %v7252_v24, %v7204_v60  ;;  %v7255_v19 = vpop.f32.mrf.mxu1 }
 0x93c   : > { %v7160_v40 = vadd.f32 %v7159_v41, %v7111_v18 }
 0x93d   : > { %v7568_v29 = vmul.f32 0.2, %v7253_v45  ;;  %vm7504_vm9 = vcmp.gt.f32.partialorder %v7253_v45, 0.0 }
 0x93e   : > { %7450 = vmatmul.bf16.gmra.mxu1 %v14224_v17  ;;  %7308 = vmatmul.bf16.gmra.mxu2 %v14222_v53  ;;  %v10969_v17 = vld [vmem:[#allocation7 + $0x88] sm:$0xff] }
 0x93f   : > { %7357 = vmatmul.bf16.gmra.mxu3 %v14226_v6  ;;  %v14538_v32 = vsel %vm7504_vm9, %v7253_v45, %v7568_v29  ;;  %v10977_v6 = vld [vmem:[#allocation7 + $0xc8] sm:$0xff]  ;;  %8054 = vmatpush.bf16.msra.mxu0 %v10969_v17 }
 0x940   : > { %v7206_v34 = vpop.f32.mrf.mxu0  ;;  %v7676_v21 = vpack.c.bf16 %v14538_v32, %v14536_v55  ;;  %8103 = vmatpush.bf16.msra.mxu1 %v10977_v6  ;;  %v14858_v55 = vld [vmem:[#allocation29_spill] sm:$0xff] }
 0x941   : > { %v7207_v31 = vadd.f32 %v7206_v34, %v7158_v10  ;;  %v7113_v54 = vpop.f32.mrf.mxu2  ;;  %v14859_v32 = vpack.c.bf16 %v14466_v51, %v14858_v55 }
 0x942   : > { %v7114_v24 = vadd.f32 %v7113_v54, %v14461_v36  ;;  %v7162_v50 = vpop.f32.mrf.mxu3 }
 0x943   : > { %v7256_v11 = vadd.f32 %v7255_v19, %v7207_v31  ;;  %v7257_v3 = vpop.f32.mrf.mxu1  ;;  %7401 = vmatmul.bf16.gmra.mxu0 %v14234_v23 }
 0x944   : > { %v7163_v53 = vadd.f32 %v7162_v50, %v7114_v24  ;;  %8055 = vmatpush.bf16.msra.mxu0 %v10968_v61 }
 0x945   : > { %v7572_v10 = vmul.f32 0.2, %v7256_v11  ;;  %vm7508_vm10 = vcmp.gt.f32.partialorder %v7256_v11, 0.0 }
 0x947   : > { %v14548_v23 = vsel %vm7508_vm10, %v7256_v11, %v7572_v10 }
 0x948   : > { %v7208_v28 = vpop.f32.mrf.mxu0 }
 0x949   : > { %v7209_v5 = vadd.f32 %v7208_v28, %v7160_v40  ;;  %v7115_v48 = vpop.f32.mrf.mxu2 }
 0x94a   : > { %v7116_v60 = vadd.f32 %v7115_v48, %v14461_v36  ;;  %v7164_v35 = vpop.f32.mrf.mxu3 }
 0x94b   : > { %v7258_v18 = vadd.f32 %v7257_v3, %v7209_v5  ;;  %v7260_v41 = vpop.f32.mrf.mxu1 }
 0x94c   : > { %v7165_v59 = vadd.f32 %v7164_v35, %v7116_v60  ;;  %v14831_v35 = vpack.c.bf16 %v14385_v1, %v14383_v42 }
 0x94d   : > { %v7576_v45 = vmul.f32 0.2, %v7258_v18  ;;  %vm7512_vm11 = vcmp.gt.f32.partialorder %v7258_v18, 0.0 }
 0x94e   : > { %7455 = vmatmul.bf16.gmra.mxu1 %v14244_v20  ;;  %7313 = vmatmul.bf16.gmra.mxu2 %v14066_v4 }
 0x94f   : > { %7362 = vmatmul.bf16.gmra.mxu3 %v14246_v33  ;;  %v14550_v19 = vsel %vm7512_vm11, %v7258_v18, %v7576_v45  ;;  %v10976_v33 = vld [vmem:[#allocation7 + $0xc0] sm:$0xff] }
 0x950   : > { %v7211_v52 = vpop.f32.mrf.mxu0  ;;  %v7680_v40 = vpack.c.bf16 %v14550_v19, %v14548_v23  ;;  %8104 = vmatpush.bf16.msra.mxu1 %v10976_v33 }
 0x951   : > { %v7212_v29 = vadd.f32 %v7211_v52, %v7163_v53  ;;  %v7118_v34 = vpop.f32.mrf.mxu2 }
 0x952   : > { %v7119_v31 = vadd.f32 %v7118_v34, %v14461_v36  ;;  %v7167_v54 = vpop.f32.mrf.mxu3 }
 0x953   : > { %v7261_v20 = vadd.f32 %v7260_v41, %v7212_v29  ;;  %v7262_v24 = vpop.f32.mrf.mxu1  ;;  %7406 = vmatmul.bf16.gmra.mxu0 %v14252_v27  ;;  %v14830_v27 = vpack.c.bf16 %v14286_v15, %v14284_v7  ;;  %v14572_v15 = vperm.slane %v14458_v2, 3 }
 0x954   : > { %v7168_v4 = vadd.f32 %v7167_v54, %v7119_v31 }
 0x955   : > { %v7580_v28 = vmul.f32 0.2, %v7261_v20  ;;  %vm7516_vm12 = vcmp.gt.f32.partialorder %v7261_v20, 0.0 }
 0x957   : > { %v14564_v10 = vsel %vm7516_vm12, %v7261_v20, %v7580_v28 }
 0x958   : > { %v7213_v50 = vpop.f32.mrf.mxu0 }
 0x959   : > { %v7214_v11 = vadd.f32 %v7213_v50, %v7165_v59  ;;  %v7120_v3 = vpop.f32.mrf.mxu2 }
 0x95a   : > { %v7121_v17 = vadd.f32 %v7120_v3, %v14461_v36  ;;  %v7169_v6 = vpop.f32.mrf.mxu3 }
 0x95b   : > { %v7263_v53 = vadd.f32 %v7262_v24, %v7214_v11  ;;  %v7265_v5 = vpop.f32.mrf.mxu1 }
 0x95c   : > { %v7170_v48 = vadd.f32 %v7169_v6, %v7121_v17 }
 0x95d   : > { %v7584_v60 = vmul.f32 0.2, %v7263_v53  ;;  %vm7520_vm13 = vcmp.gt.f32.partialorder %v7263_v53, 0.0 }
 0x95e   : > { %7460 = vmatmul.bf16.gmra.mxu1 %v14263_v57  ;;  %7958 = vmatmul.bf16.vlgmr.msra.gmra.mxu2 %v14830_v27 }
 0x95f   : > { %8007 = vmatmul.bf16.vlgmr.msra.gmra.mxu3 %v14831_v35  ;;  %v14566_v36 = vsel %vm7520_vm13, %v7263_v53, %v7584_v60 }
 0x960   : > { %v7216_v18 = vpop.f32.mrf.mxu0  ;;  %v7684_v41 = vpack.c.bf16 %v14566_v36, %v14564_v10 }
 0x961   : > { %v7217_v59 = vadd.f32 %v7216_v18, %v7168_v4  ;;  %v7279_v45 = vpop.f32.mrf.mxu2  ;;  %v14832_v4 = vpack.c.bf16 %v14299_v25, %v14297_v9 }
 0x962   : > { %v7328_v52 = vpop.f32.mrf.mxu3  ;;  %v7280_v20 = vadd.f32 %v7279_v45, %v14572_v15 }
 0x963   : > { %v7266_v57 = vadd.f32 %v7265_v5, %v7217_v59  ;;  %v7267_v61 = vpop.f32.mrf.mxu1  ;;  %7411 = vmatmul.bf16.gmra.mxu0 %v14271_v43  ;;  %v14833_v43 = vld [vmem:[#allocation24_spill] sm:$0xff] }
 0x964   : > { %v14834_v33 = vpack.c.bf16 %v14398_v12, %v14833_v43  ;;  %v7329_v17 = vadd.f32 %v7328_v52, %v7280_v20 }
 0x965   : > { %v7588_v34 = vmul.f32 0.2, %v7266_v57  ;;  %vm7524_vm14 = vcmp.gt.f32.partialorder %v7266_v57, 0.0 }
 0x967   : > { %v14581_v2 = vsel %vm7524_vm14, %v7266_v57, %v7588_v34 }
 0x968   : > { %v7218_v7 = vpop.f32.mrf.mxu0 }
 0x969   : > { %v7219_v42 = vadd.f32 %v7218_v7, %v7170_v48  ;;  %v7281_v1 = vpop.f32.mrf.mxu2  ;;  %v14836_v7 = vld [vmem:[#allocation16_spill] sm:$0xff] }
 0x96a   : > { %v7330_v29 = vpop.f32.mrf.mxu3  ;;  %v7282_v53 = vadd.f32 %v7281_v1, %v14572_v15  ;;  %v14839_v1 = vld [vmem:[#allocation25_spill] sm:$0xff] }
 0x96b   : > { %v7268_v31 = vadd.f32 %v7267_v61, %v7219_v42  ;;  %v7426_v54 = vpop.f32.mrf.mxu1  ;;  %v14835_v61 = vld [vmem:[#allocation17_spill] sm:$0xff] }
 0x96c   : > { %v7331_v25 = vadd.f32 %v7330_v29, %v7282_v53  ;;  %v14837_v42 = vpack.c.bf16 %v14835_v61, %v14836_v7 }
 0x96d   : > { %v7592_v24 = vmul.f32 0.2, %v7268_v31  ;;  %vm7528_vm15 = vcmp.gt.f32.partialorder %v7268_v31, 0.0 }
 0x96e   : > { %7963 = vmatmul.bf16.gmra.mxu2 %v14832_v4 }
 0x96f   : > { %8012 = vmatmul.bf16.gmra.mxu3 %v14834_v33  ;;  %v14583_v50 = vsel %vm7528_vm15, %v7268_v31, %v7592_v24 }
 0x970   : > { %v7377_v11 = vpop.f32.mrf.mxu0  ;;  %v7688_v3 = vpack.c.bf16 %v14583_v50, %v14581_v2  ;;  %v14665_v2 = vld [vmem:[%s14863_s17] ss:$0 sm:$0xff] }
 0x971   : > { %v7284_v6 = vpop.f32.mrf.mxu2  ;;  %v7378_v5 = vadd.f32 %v7377_v11, %v7329_v17 }
 0x972   : > { %v7333_v28 = vpop.f32.mrf.mxu3  ;;  %v7285_v52 = vadd.f32 %v7284_v6, %v14572_v15 }
 0x973   : > { %v7428_v9 = vpop.f32.mrf.mxu1  ;;  %8056 = vmatmul.bf16.vlgmr.msra.gmra.mxu0 %v7660_v14  ;;  %v7427_v12 = vadd.f32 %v7426_v54, %v7378_v5  ;;  %v14838_v14 = vld [vmem:[#allocation26_spill] sm:$0xff] }
 0x974   : > { %v14840_v29 = vpack.c.bf16 %v14838_v14, %v14839_v1  ;;  %v7334_v54 = vadd.f32 %v7333_v28, %v7285_v52 }
 0x975   : > { %v7533_v18 = vmul.f32 0.2, %v7427_v12  ;;  %vm7469_vm0 = vcmp.gt.f32.partialorder %v7427_v12, 0.0 }
 0x977   : > { %v7597_v26 = vsel %vm7469_vm0, %v7427_v12, %v7533_v18  ;;  %v14842_v18 = vld [vmem:[#allocation18_spill] sm:$0xff] }
 0x978   : > { %v7379_v48 = vpop.f32.mrf.mxu0 }
 0x979   : > { %v7380_v60 = vadd.f32 %v7379_v48, %v7331_v25  ;;  %v7286_v27 = vpop.f32.mrf.mxu2 }
 0x97a   : > { %v7335_v35 = vpop.f32.mrf.mxu3  ;;  %v7287_v4 = vadd.f32 %v7286_v27, %v14572_v15  ;;  %v14841_v27 = vld [vmem:[#allocation15_spill] sm:$0xff] }
 0x97b   : > { %v7429_v59 = vadd.f32 %v7428_v9, %v7380_v60  ;;  %v7431_v45 = vpop.f32.mrf.mxu1 }
 0x97c   : > { %v7336_v11 = vadd.f32 %v7335_v35, %v7287_v4 }
 0x97d   : > { %vm7473_vm1 = vcmp.gt.f32.partialorder %v7429_v59, 0.0  ;;  %v7537_v57 = vmul.f32 0.2, %v7429_v59 }
 0x97e   : > { %7968 = vmatmul.bf16.gmra.mxu2 %v14837_v42 }
 0x97f   : > { %v7601_v37 = vsel %vm7473_vm1, %v7429_v59, %v7537_v57  ;;  %8017 = vmatmul.bf16.gmra.mxu3 %v14840_v29  ;;  %v14843_v59 = vpack.c.bf16 %v14841_v27, %v14842_v18 }
 0x980   : > { %v7661_v34 = vpack.c.bf16 %v7601_v37, %v7597_v26  ;;  %v7382_v31 = vpop.f32.mrf.mxu0 }
 0x981   : > { %v7289_v20 = vpop.f32.mrf.mxu2  ;;  %v7383_v43 = vadd.f32 %v7382_v31, %v7334_v54 }
 0x982   : > { %v7338_v24 = vpop.f32.mrf.mxu3  ;;  %8105 = vmatmul.bf16.vlgmr.msra.gmra.mxu1 %v7661_v34  ;;  %v7290_v48 = vadd.f32 %v7289_v20, %v14572_v15 }
 0x983   : > { %v7433_v33 = vpop.f32.mrf.mxu1  ;;  %8061 = vmatmul.bf16.gmra.mxu0 %v7664_v0  ;;  %v7432_v17 = vadd.f32 %v7431_v45, %v7383_v43  ;;  %v14846_v0 = vpack.c.bf16 %v14844_v63, %v14845_v16 }
 0x984   : > { %v7339_v61 = vadd.f32 %v7338_v24, %v7290_v48 }
 0x985   : > { %v7541_v25 = vmul.f32 0.2, %v7432_v17  ;;  %vm7477_vm2 = vcmp.gt.f32.partialorder %v7432_v17, 0.0 }
 0x987   : > { %v7605_v35 = vsel %vm7477_vm2, %v7432_v17, %v7541_v25  ;;  %v14847_v17 = vld [vmem:[#allocation13_spill] sm:$0xff] }
 0x988   : > { %v7384_v6 = vpop.f32.mrf.mxu0 }
 0x989   : > { %v7385_v53 = vadd.f32 %v7384_v6, %v7336_v11  ;;  %v7291_v5 = vpop.f32.mrf.mxu2  ;;  %v14848_v6 = vld [vmem:[#allocation14_spill] sm:$0xff] }
 0x98a   : > { %v7340_v9 = vpop.f32.mrf.mxu3  ;;  %v7292_v26 = vadd.f32 %v7291_v5, %v14572_v15 }
 0x98b   : > { %v7434_v12 = vadd.f32 %v7433_v33, %v7385_v53  ;;  %v7436_v28 = vpop.f32.mrf.mxu1  ;;  %v14849_v53 = vpack.c.bf16 %v14847_v17, %v14848_v6 }
 0x98c   : > { %v7341_v1 = vadd.f32 %v7340_v9, %v7292_v26 }
 0x98d   : > { %v7545_v60 = vmul.f32 0.2, %v7434_v12  ;;  %vm7481_vm3 = vcmp.gt.f32.partialorder %v7434_v12, 0.0 }
 0x98e   : > { %7973 = vmatmul.bf16.gmra.mxu2 %v14843_v59 }
 0x98f   : > { %8022 = vmatmul.bf16.gmra.mxu3 %v14846_v0  ;;  %v7609_v45 = vsel %vm7481_vm3, %v7434_v12, %v7545_v60 }
 0x990   : > { %v7387_v52 = vpop.f32.mrf.mxu0  ;;  %v7665_v57 = vpack.c.bf16 %v7609_v45, %v7605_v35 }
 0x991   : > { %v7294_v7 = vpop.f32.mrf.mxu2  ;;  %v7388_v37 = vadd.f32 %v7387_v52, %v7339_v61  ;;  %v14851_v61 = vld [vmem:[#allocation19_spill] sm:$0xff] }
 0x992   : > { %v7343_v42 = vpop.f32.mrf.mxu3  ;;  %8110 = vmatmul.bf16.gmra.mxu1 %v7665_v57  ;;  %v7295_v33 = vadd.f32 %v7294_v7, %v14572_v15  ;;  %v14852_v7 = vld [vmem:[#allocation12_spill] sm:$0xff] }
 0x993   : > { %v7438_v14 = vpop.f32.mrf.mxu1  ;;  %8066 = vmatmul.bf16.gmra.mxu0 %v7668_v62  ;;  %v7437_v29 = vadd.f32 %v7436_v28, %v7388_v37 }
 0x994   : > { %v7344_v25 = vadd.f32 %v7343_v42, %v7295_v33  ;;  %v14853_v42 = vpack.c.bf16 %v14851_v61, %v14852_v7  ;;  %v14860_v61 = vld [vmem:[#allocation23_spill] sm:$0xff]  ;;  %v14861_v7 = vld [vmem:[#allocation22_spill] sm:$0xff] }
 0x995   : > { %v7549_v4 = vmul.f32 0.2, %v7437_v29  ;;  %vm7485_vm4 = vcmp.gt.f32.partialorder %v7437_v29, 0.0 }
 0x997   : > { %v7613_v30 = vsel %vm7485_vm4, %v7437_v29, %v7549_v4 }
 0x998   : > { %v7389_v34 = vpop.f32.mrf.mxu0 }
 0x999   : > { %v7390_v31 = vadd.f32 %v7389_v34, %v7341_v1  ;;  %v7296_v54 = vpop.f32.mrf.mxu2 }
 0x99a   : > { %v7345_v20 = vpop.f32.mrf.mxu3  ;;  %v7297_v48 = vadd.f32 %v7296_v54, %v14572_v15 }
 0x99b   : > { %v7439_v43 = vadd.f32 %v7438_v14, %v7390_v31  ;;  %v7441_v24 = vpop.f32.mrf.mxu1 }
 0x99c   : > { %v7346_v18 = vadd.f32 %v7345_v20, %v7297_v48 }
 0x99d   : > { %v7553_v11 = vmul.f32 0.2, %v7439_v43  ;;  %vm7489_vm5 = vcmp.gt.f32.partialorder %v7439_v43, 0.0 }
 0x99e   : > { %7978 = vmatmul.bf16.gmra.mxu2 %v14849_v53 }
 0x99f   : > { %8027 = vmatmul.bf16.gmra.mxu3 %v14850_v44  ;;  %v7617_v62 = vsel %vm7489_vm5, %v7439_v43, %v7553_v11  ;;  %v14855_v44 = vld [vmem:[#allocation21_spill] sm:$0xff] }
 0x9a0   : > { %v7392_v5 = vpop.f32.mrf.mxu0  ;;  %v7669_v9 = vpack.c.bf16 %v7617_v62, %v7613_v30  ;;  %v14856_v30 = vld [vmem:[#allocation20_spill] sm:$0xff] }
 0x9a1   : > { %v7299_v12 = vpop.f32.mrf.mxu2  ;;  %v7393_v60 = vadd.f32 %v7392_v5, %v7344_v25  ;;  %v14857_v62 = vpack.c.bf16 %v14855_v44, %v14856_v30 }
 0x9a2   : > { %v7348_v28 = vpop.f32.mrf.mxu3  ;;  %8115 = vmatmul.bf16.gmra.mxu1 %v7669_v9  ;;  %v7300_v52 = vadd.f32 %v7299_v12, %v14572_v15 }
 0x9a3   : > { %v7443_v27 = vpop.f32.mrf.mxu1  ;;  %8071 = vmatmul.bf16.gmra.mxu0 %v7672_v47  ;;  %v7442_v59 = vadd.f32 %v7441_v24, %v7393_v60 }
 0x9a4   : > { %v7349_v14 = vadd.f32 %v7348_v28, %v7300_v52 }
 0x9a5   : > { %v7557_v0 = vmul.f32 0.2, %v7442_v59  ;;  %vm7493_vm6 = vcmp.gt.f32.partialorder %v7442_v59, 0.0 }
 0x9a7   : > { %v7621_v56 = vsel %vm7493_vm6, %v7442_v59, %v7557_v0 }
 0x9a8   : > { %v7394_v22 = vpop.f32.mrf.mxu0 }
 0x9a9   : > { %v7395_v39 = vadd.f32 %v7394_v22, %v7346_v18  ;;  %v7301_v63 = vpop.f32.mrf.mxu2 }
 0x9aa   : > { %v7350_v16 = vpop.f32.mrf.mxu3  ;;  %v7302_v34 = vadd.f32 %v7301_v63, %v14572_v15 }
 0x9ab   : > { %v7444_v35 = vadd.f32 %v7443_v27, %v7395_v39  ;;  %v7446_v45 = vpop.f32.mrf.mxu1 }
 0x9ac   : > { %v7351_v20 = vadd.f32 %v7350_v16, %v7302_v34 }
 0x9ad   : > { %v7561_v57 = vmul.f32 0.2, %v7444_v35  ;;  %vm7497_vm7 = vcmp.gt.f32.partialorder %v7444_v35, 0.0 }
 0x9ae   : > { %7983 = vmatmul.bf16.gmra.mxu2 %v14853_v42  ;;  %v14862_v42 = vpack.c.bf16 %v14860_v61, %v14861_v7 }
 0x9af   : > { %8032 = vmatmul.bf16.gmra.mxu3 %v14854_v58  ;;  %v7625_v47 = vsel %vm7497_vm7, %v7444_v35, %v7561_v57 }
 0x9b0   : > { %v7397_v26 = vpop.f32.mrf.mxu0  ;;  %v7673_v37 = vpack.c.bf16 %v7625_v47, %v7621_v56 }
 0x9b1   : > { %v7304_v1 = vpop.f32.mrf.mxu2  ;;  %v7398_v31 = vadd.f32 %v7397_v26, %v7349_v14 }
 0x9b2   : > { %v7353_v29 = vpop.f32.mrf.mxu3  ;;  %8120 = vmatmul.bf16.gmra.mxu1 %v7673_v37  ;;  %v7305_v6 = vadd.f32 %v7304_v1, %v14572_v15 }
 0x9b3   : > { %v7448_v54 = vpop.f32.mrf.mxu1  ;;  %8076 = vmatmul.bf16.gmra.mxu0 %v7676_v21  ;;  %v7447_v4 = vadd.f32 %v7446_v45, %v7398_v31 }
 0x9b4   : > { %v7354_v12 = vadd.f32 %v7353_v29, %v7305_v6 }
 0x9b5   : > { %v7565_v33 = vmul.f32 0.2, %v7447_v4  ;;  %vm7501_vm8 = vcmp.gt.f32.partialorder %v7447_v4, 0.0 }
 0x9b7   : > { %v7629_v21 = vsel %vm7501_vm8, %v7447_v4, %v7565_v33 }
 0x9b8   : > { %v7399_v38 = vpop.f32.mrf.mxu0 }
 0x9b9   : > { %v7400_v13 = vadd.f32 %v7399_v38, %v7351_v20  ;;  %v7306_v43 = vpop.f32.mrf.mxu2 }
 0x9ba   : > { %v7355_v24 = vpop.f32.mrf.mxu3  ;;  %v7307_v60 = vadd.f32 %v7306_v43, %v14572_v15 }
 0x9bb   : > { %v7449_v11 = vadd.f32 %v7448_v54, %v7400_v13  ;;  %v7451_v17 = vpop.f32.mrf.mxu1 }
 0x9bc   : > { %v7356_v59 = vadd.f32 %v7355_v24, %v7307_v60 }
 0x9bd   : > { %vm7505_vm9 = vcmp.gt.f32.partialorder %v7449_v11, 0.0  ;;  %v7569_v53 = vmul.f32 0.2, %v7449_v11 }
 0x9be   : > { %7988 = vmatmul.bf16.gmra.mxu2 %v14857_v62 }
 0x9bf   : > { %8037 = vmatmul.bf16.gmra.mxu3 %v14859_v32  ;;  %v7633_v5 = vsel %vm7505_vm9, %v7449_v11, %v7569_v53 }
 0x9c0   : > { %v7402_v9 = vpop.f32.mrf.mxu0  ;;  %v7677_v25 = vpack.c.bf16 %v7633_v5, %v7629_v21 }
 0x9c1   : > { %v7309_v28 = vpop.f32.mrf.mxu2  ;;  %v7403_v27 = vadd.f32 %v7402_v9, %v7354_v12 }
 0x9c2   : > { %v7358_v48 = vpop.f32.mrf.mxu3  ;;  %8125 = vmatmul.bf16.gmra.mxu1 %v7677_v25  ;;  %v7310_v52 = vadd.f32 %v7309_v28, %v14572_v15 }
 0x9c3   : > { %v7453_v18 = vpop.f32.mrf.mxu1  ;;  %8081 = vmatmul.bf16.gmra.mxu0 %v7680_v40  ;;  %v7452_v22 = vadd.f32 %v7451_v17, %v7403_v27 }
 0x9c4   : > { %v7359_v56 = vadd.f32 %v7358_v48, %v7310_v52 }
 0x9c5   : > { %v7573_v0 = vmul.f32 0.2, %v7452_v22  ;;  %vm7509_vm10 = vcmp.gt.f32.partialorder %v7452_v22, 0.0 }
 0x9c7   : > { %v7637_v23 = vsel %vm7509_vm10, %v7452_v22, %v7573_v0 }
 0x9c8   : > { %v7404_v51 = vpop.f32.mrf.mxu0 }
 0x9c9   : > { %v7405_v39 = vadd.f32 %v7404_v51, %v7356_v59  ;;  %v7311_v63 = vpop.f32.mrf.mxu2 }
 0x9ca   : > { %v7360_v16 = vpop.f32.mrf.mxu3  ;;  %v7312_v37 = vadd.f32 %v7311_v63, %v14572_v15 }
 0x9cb   : > { %v7454_v35 = vadd.f32 %v7453_v18, %v7405_v39  ;;  %v7456_v45 = vpop.f32.mrf.mxu1 }
 0x9cc   : > { %v7361_v29 = vadd.f32 %v7360_v16, %v7312_v37 }
 0x9cd   : > { %vm7513_vm11 = vcmp.gt.f32.partialorder %v7454_v35, 0.0  ;;  %v7577_v57 = vmul.f32 0.2, %v7454_v35 }
 0x9ce   : > { %7993 = vmatmul.bf16.gmra.mxu2 %v14862_v42 }
 0x9cf   : > { %8042 = vmatmul.bf16.gmra.mxu3 %v7687_v8  ;;  %v7641_v19 = vsel %vm7513_vm11, %v7454_v35, %v7577_v57 }
 0x9d0   : > { %v7407_v40 = vpop.f32.mrf.mxu0  ;;  %v7681_v58 = vpack.c.bf16 %v7641_v19, %v7637_v23 }
 0x9d1   : > { %v7314_v47 = vpop.f32.mrf.mxu2  ;;  %v7408_v14 = vadd.f32 %v7407_v40, %v7359_v56 }
 0x9d2   : > { %v7363_v26 = vpop.f32.mrf.mxu3  ;;  %8130 = vmatmul.bf16.gmra.mxu1 %v7681_v58  ;;  %v7315_v4 = vadd.f32 %v7314_v47, %v14572_v15 }
 0x9d3   : > { %8086 = vmatmul.bf16.gmra.mxu0 %v7684_v41  ;;  %v7458_v1 = vpop.f32.mrf.mxu1  ;;  %v7457_v34 = vadd.f32 %v7456_v45, %v7408_v14 }
 0x9d4   : > { %v7364_v36 = vadd.f32 %v7363_v26, %v7315_v4 }
 0x9d5   : > { %v7581_v54 = vmul.f32 0.2, %v7457_v34  ;;  %vm7517_vm12 = vcmp.gt.f32.partialorder %v7457_v34, 0.0 }
 0x9d7   : > { %v7645_v13 = vsel %vm7517_vm12, %v7457_v34, %v7581_v54 }
 0x9d8   : > { %v7409_v49 = vpop.f32.mrf.mxu0 }
 0x9d9   : > { %v7410_v46 = vadd.f32 %v7409_v49, %v7361_v29  ;;  %v7316_v8 = vpop.f32.mrf.mxu2 }
 0x9da   : > { %v7365_v31 = vpop.f32.mrf.mxu3  ;;  %v7317_v17 = vadd.f32 %v7316_v8, %v14572_v15 }
 0x9db   : > { %v7459_v20 = vadd.f32 %v7458_v1, %v7410_v46  ;;  %v7461_v24 = vpop.f32.mrf.mxu1 }
 0x9dc   : > { %v7366_v53 = vadd.f32 %v7365_v31, %v7317_v17 }
 0x9dd   : > { %vm7521_vm13 = vcmp.gt.f32.partialorder %v7459_v20, 0.0  ;;  %v7585_v38 = vmul.f32 0.2, %v7459_v20 }
 0x9df   : > { %v7649_v43 = vsel %vm7521_vm13, %v7459_v20, %v7585_v38 }
 0x9e0   : > { %v7412_v33 = vpop.f32.mrf.mxu0  ;;  %v7685_v10 = vpack.c.bf16 %v7649_v43, %v7645_v13 }
 0x9e1   : > { %v7959_v41 = vpop.f32.mrf.mxu2  ;;  %v7413_v6 = vadd.f32 %v7412_v33, %v7364_v36 }
 0x9e2   : > { %v8008_v11 = vpop.f32.mrf.mxu3  ;;  %8135 = vmatmul.bf16.gmra.mxu1 %v7685_v10  ;;  %v7960_v50 = vadd.f32 %v14665_v2, %v7959_v41 }
 0x9e3   : > { %8091 = vmatmul.bf16.gmra.mxu0 %v7688_v3  ;;  %v7462_v44 = vadd.f32 %v7461_v24, %v7413_v6  ;;  %v7463_v32 = vpop.f32.mrf.mxu1 }
 0x9e4   : > { %v8009_v22 = vadd.f32 %v8008_v11, %v7960_v50 }
 0x9e5   : > { %v7589_v5 = vmul.f32 0.2, %v7462_v44  ;;  %vm7525_vm14 = vcmp.gt.f32.partialorder %v7462_v44, 0.0 }
 0x9e7   : > { %v7653_v12 = vsel %vm7525_vm14, %v7462_v44, %v7589_v5 }
 0x9e8   : > { %v7414_v30 = vpop.f32.mrf.mxu0 }
 0x9e9   : > { %v7415_v62 = vadd.f32 %v7414_v30, %v7366_v53  ;;  %v7961_v55 = vpop.f32.mrf.mxu2 }
 0x9ea   : > { %v8010_v21 = vpop.f32.mrf.mxu3  ;;  %v7962_v63 = vadd.f32 %v14665_v2, %v7961_v55 }
 0x9eb   : > { %v7464_v9 = vadd.f32 %v7463_v32, %v7415_v62 }
 0x9ec   : > { %v8011_v52 = vadd.f32 %v8010_v21, %v7962_v63 }
 0x9ed   : > { %vm7529_vm15 = vcmp.gt.f32.partialorder %v7464_v9, 0.0  ;;  %v7593_v25 = vmul.f32 0.2, %v7464_v9 }
 0x9ef   : > { %v7657_v28 = vsel %vm7529_vm15, %v7464_v9, %v7593_v25 }
 0x9f0   : > { %v8057_v15 = vpop.f32.mrf.mxu0  ;;  %v7689_v48 = vpack.c.bf16 %v7657_v28, %v7653_v12 }
 0x9f1   : > { %v7964_v60 = vpop.f32.mrf.mxu2  ;;  %v8058_v51 = vadd.f32 %v8057_v15, %v8009_v22 }
 0x9f2   : > { %v8013_v27 = vpop.f32.mrf.mxu3  ;;  %8140 = vmatmul.bf16.gmra.mxu1 %v7689_v48  ;;  %v7965_v42 = vadd.f32 %v14665_v2, %v7964_v60 }
 0x9f4   : > { %v8014_v26 = vadd.f32 %v8013_v27, %v7965_v42 }
 0x9f8   : > { %v8059_v3 = vpop.f32.mrf.mxu0 }
 0x9f9   : > { %v7966_v18 = vpop.f32.mrf.mxu2  ;;  %v8060_v61 = vadd.f32 %v8059_v3, %v8011_v52 }
 0x9fa   : > { %v8015_v59 = vpop.f32.mrf.mxu3  ;;  %v7967_v29 = vadd.f32 %v14665_v2, %v7966_v18 }
 0x9fc   : > { %v8016_v4 = vadd.f32 %v8015_v59, %v7967_v29 }
 0x9ff   : > { %v8106_v39 = vpop.f32.mrf.mxu1 }
 0xa00   : > { %v8107_v16 = vadd.f32 %v8106_v39, %v8058_v51  ;;  %v8062_v0 = vpop.f32.mrf.mxu0 }
 0xa01   : > { %v7969_v35 = vpop.f32.mrf.mxu2  ;;  %v8063_v37 = vadd.f32 %v8062_v0, %v8014_v26 }
 0xa02   : > { %v10502_v45 = vmul.f32 -1.442695, %v8107_v16  ;;  %v8018_v57 = vpop.f32.mrf.mxu3  ;;  %v7970_v33 = vadd.f32 %v14665_v2, %v7969_v35 }
 0xa04   : > { %11116 = vpow2.f32 %v10502_v45  ;;  %v8019_v32 = vadd.f32 %v8018_v57, %v7970_v33 }
 0xa07   : > { %v8108_v7 = vpop.f32.mrf.mxu1 }
 0xa08   : > { %v8109_v23 = vadd.f32 %v8108_v7, %v8060_v61  ;;  %v8064_v19 = vpop.f32.mrf.mxu0 }
 0xa09   : > { %v7971_v40 = vpop.f32.mrf.mxu2  ;;  %v8065_v43 = vadd.f32 %v8064_v19, %v8016_v4 }
 0xa0a   : > { %v11117_v58 = vpop.eup %11116  ;;  %v10503_v56 = vmul.f32 -1.442695, %v8109_v23  ;;  %v8020_v14 = vpop.f32.mrf.mxu3  ;;  %v7972_v60 = vadd.f32 %v14665_v2, %v7971_v40 }
 0xa0b   : > { %v8194_v47 = vadd.f32 1.0, %v11117_v58 }
 0xa0c   : > { %11118 = vpow2.f32 %v10503_v56  ;;  %v8021_v35 = vadd.f32 %v8020_v14, %v7972_v60 }
 0xa0d   : > { %11120 = vrcp.f32 %v8194_v47  ;;  %v8221_v24 = vand.u32 2147483648, %v8194_v47  ;;  %v8219_v41 = vand.u32 2147483647, %v8194_v47  ;;  %vm8215_vm1 = vweird.f32 %v8194_v47 }
 0xa0f   : > { %v8111_v1 = vpop.f32.mrf.mxu1  ;;  %v8222_v55 = vor.u32 1.1754944e-38, %v8221_v24  ;;  %vm8220_vm3 = vcmp.eq.f32.partialorder %v8219_v41, 8.507059e+37 }
 0xa10   : > { %v8112_v34 = vadd.f32 %v8111_v1, %v8063_v37  ;;  %v8067_v49 = vpop.f32.mrf.mxu0 }
 0xa11   : > { %v14671_v31 = vpop.f32.mrf.mxu2  ;;  %v8068_v15 = vadd.f32 %v8067_v49, %v8019_v32 }
 0xa12   : > { %v11119_v46 = vpop.eup %11118  ;;  %v10504_v8 = vmul.f32 -1.442695, %v8112_v34  ;;  %v14674_v11 = vpop.f32.mrf.mxu3  ;;  %v7975_v40 = vadd.f32 %v14665_v2, %v14671_v31 }
 0xa13   : > { %v11121_v54 = vpop.eup %11120  ;;  %v8195_v20 = vadd.f32 1.0, %v11119_v46 }
 0xa14   : > { %v8211_v38 = vmul.f32 %v11121_v54, %v8194_v47  ;;  %11122 = vpow2.f32 %v10504_v8  ;;  %vm8216_vm0 = vweird.f32 %v11121_v54  ;;  %v8024_v46 = vadd.f32 %v14674_v11, %v7975_v40 }
 0xa15   : > { %11124 = vrcp.f32 %v8195_v20  ;;  %vm8217_vm2 = vmor %vm8215_vm1, %vm8216_vm0  ;;  %v8236_v48 = vand.u32 2147483648, %v8195_v20  ;;  %v8234_v3 = vand.u32 2147483647, %v8195_v20  ;;  %vm8230_vm5 = vweird.f32 %v8195_v20 }
 0xa16   : > { %v8212_v13 = vsub.f32 1.0, %v8211_v38 }
 0xa17   : > { %v8113_v10 = vpop.f32.mrf.mxu1  ;;  %v8237_v0 = vor.u32 1.1754944e-38, %v8236_v48  ;;  %vm8235_vm7 = vcmp.eq.f32.partialorder %v8234_v3, 8.507059e+37 }
 0xa18   : > { %v8213_v36 = vmul.f32 %v11121_v54, %v8212_v13  ;;  %v8114_v17 = vadd.f32 %v8113_v10, %v8065_v43  ;;  %v8069_v6 = vpop.f32.mrf.mxu0 }
 0xa19   : > { %v7976_v25 = vpop.f32.mrf.mxu2  ;;  %v8070_v42 = vadd.f32 %v8069_v6, %v8021_v35 }
 0xa1a   : > { %v11123_v53 = vpop.eup %11122  ;;  %v8214_v44 = vadd.f32 %v11121_v54, %v8213_v36  ;;  %v10505_v30 = vmul.f32 -1.442695, %v8114_v17  ;;  %v8025_v39 = vpop.f32.mrf.mxu3  ;;  %v7977_v24 = vadd.f32 %v14665_v2, %v7976_v25 }
 0xa1b   : > { %v11125_v62 = vpop.eup %11124  ;;  %v8196_v21 = vadd.f32 1.0, %v11123_v53 }
 0xa1c   : > { %v8218_v5 = vsel %vm8217_vm2, %v11121_v54, %v8214_v44  ;;  %v8226_v9 = vmul.f32 %v11125_v62, %v8195_v20  ;;  %11126 = vpow2.f32 %v10505_v30  ;;  %vm8231_vm4 = vweird.f32 %v11125_v62 }
 0xa1d   : > { %v8223_v12 = vsel %vm8220_vm3, %v8222_v55, %v8218_v5  ;;  %11128 = vrcp.f32 %v8196_v21  ;;  %vm8232_vm6 = vmor %vm8230_vm5, %vm8231_vm4  ;;  %v8251_v19 = vand.u32 2147483648, %v8196_v21  ;;  %v8249_v47 = vand.u32 2147483647, %v8196_v21 }
 0xa1e   : > { %8450 = vst [vmem:[%s14680_s26] sm:$0xff] %v8223_v12  ;;  %v8227_v28 = vsub.f32 1.0, %v8226_v9  ;;  %vm8245_vm9 = vweird.f32 %v8196_v21  ;;  %v8026_v55 = vadd.f32 %v8025_v39, %v7977_v24 }
 0xa1f   : > { %v8116_v27 = vpop.f32.mrf.mxu1  ;;  %v8252_v49 = vor.u32 1.1754944e-38, %v8251_v19  ;;  %vm8250_vm11 = vcmp.eq.f32.partialorder %v8249_v47, 8.507059e+37 }
 0xa20   : > { %v8228_v50 = vmul.f32 %v11125_v62, %v8227_v28  ;;  %v8117_v18 = vadd.f32 %v8116_v27, %v8068_v15  ;;  %v8072_v59 = vpop.f32.mrf.mxu0 }
 0xa21   : > { %v7979_v23 = vpop.f32.mrf.mxu2  ;;  %v8073_v13 = vadd.f32 %v8072_v59, %v8024_v46 }
 0xa22   : > { %v11127_v22 = vpop.eup %11126  ;;  %v8229_v51 = vadd.f32 %v11125_v62, %v8228_v50  ;;  %v10506_v63 = vmul.f32 -1.442695, %v8117_v18  ;;  %v8028_v20 = vpop.f32.mrf.mxu3  ;;  %v7980_v48 = vadd.f32 %v14665_v2, %v7979_v23 }
 0xa23   : > { %v11129_v16 = vpop.eup %11128  ;;  %v8197_v45 = vadd.f32 1.0, %v11127_v22 }
 0xa24   : > { %v8233_v52 = vsel %vm8232_vm6, %v11125_v62, %v8229_v51  ;;  %v8241_v57 = vmul.f32 %v11129_v16, %v8196_v21  ;;  %11130 = vpow2.f32 %v10506_v63  ;;  %vm8246_vm8 = vweird.f32 %v11129_v16 }
 0xa25   : > { %v8238_v61 = vsel %vm8235_vm7, %v8237_v0, %v8233_v52  ;;  %11132 = vrcp.f32 %v8197_v45  ;;  %vm8247_vm10 = vmor %vm8245_vm9, %vm8246_vm8  ;;  %v8266_v43 = vand.u32 2147483648, %v8197_v45  ;;  %v8264_v36 = vand.u32 2147483647, %v8197_v45 }
 0xa26   : > { %8451 = vst [vmem:[%s14680_s26 + $0x8] sm:$0xff] %v8238_v61  ;;  %v8242_v7 = vsub.f32 1.0, %v8241_v57  ;;  %vm8260_vm13 = vweird.f32 %v8197_v45  ;;  %v8029_v0 = vadd.f32 %v8028_v20, %v7980_v48 }
 0xa27   : > { %v8118_v58 = vpop.f32.mrf.mxu1  ;;  %v8267_v62 = vor.u32 1.1754944e-38, %v8266_v43  ;;  %vm8265_vm15 = vcmp.eq.f32.partialorder %v8264_v36, 8.507059e+37 }
 0xa28   : > { %v8243_v56 = vmul.f32 %v11129_v16, %v8242_v7  ;;  %v8119_v26 = vadd.f32 %v8118_v58, %v8070_v42  ;;  %v8074_v37 = vpop.f32.mrf.mxu0 }
 0xa29   : > { %v7981_v41 = vpop.f32.mrf.mxu2  ;;  %v8075_v12 = vadd.f32 %v8074_v37, %v8026_v55 }
 0xa2a   : > { %v11131_v14 = vpop.eup %11130  ;;  %v8244_v1 = vadd.f32 %v11129_v16, %v8243_v56  ;;  %v10507_v29 = vmul.f32 -1.442695, %v8119_v26  ;;  %v8030_v28 = vpop.f32.mrf.mxu3  ;;  %v7982_v23 = vadd.f32 %v14665_v2, %v7981_v41 }
 0xa2b   : > { %v11133_v34 = vpop.eup %11132  ;;  %v8198_v8 = vadd.f32 1.0, %v11131_v14 }
 0xa2c   : > { %v8248_v54 = vsel %vm8247_vm10, %v11129_v16, %v8244_v1  ;;  %v8256_v31 = vmul.f32 %v11133_v34, %v8197_v45  ;;  %11134 = vpow2.f32 %v10507_v29  ;;  %vm8261_vm12 = vweird.f32 %v11133_v34 }
 0xa2d   : > { %v8253_v4 = vsel %vm8250_vm11, %v8252_v49, %v8248_v54  ;;  %11136 = vrcp.f32 %v8198_v8  ;;  %vm8262_vm14 = vmor %vm8260_vm13, %vm8261_vm12  ;;  %v8281_v15 = vand.u32 2147483648, %v8198_v8  ;;  %v8279_v50 = vand.u32 2147483647, %v8198_v8 }
 0xa2e   : > { %8452 = vst [vmem:[%s14680_s26 + $0x10] sm:$0xff] %v8253_v4  ;;  %v8257_v38 = vsub.f32 1.0, %v8256_v31  ;;  %vm8275_vm1 = vweird.f32 %v8198_v8  ;;  %v8031_v49 = vadd.f32 %v8030_v28, %v7982_v23 }
 0xa2f   : > { %v8121_v33 = vpop.f32.mrf.mxu1  ;;  %v8282_v16 = vor.u32 1.1754944e-38, %v8281_v15  ;;  %vm8280_vm3 = vcmp.eq.f32.partialorder %v8279_v50, 8.507059e+37 }
 0xa30   : > { %v8258_v10 = vmul.f32 %v11133_v34, %v8257_v38  ;;  %v8122_v11 = vadd.f32 %v8121_v33, %v8073_v13  ;;  %v8077_v17 = vpop.f32.mrf.mxu0 }
 0xa31   : > { %v7984_v51 = vpop.f32.mrf.mxu2  ;;  %v8078_v7 = vadd.f32 %v8077_v17, %v8029_v0 }
 0xa32   : > { %v11135_v6 = vpop.eup %11134  ;;  %v8259_v53 = vadd.f32 %v11133_v34, %v8258_v10  ;;  %v10508_v44 = vmul.f32 -1.442695, %v8122_v11  ;;  %v8033_v56 = vpop.f32.mrf.mxu3  ;;  %v7985_v43 = vadd.f32 %v14665_v2, %v7984_v51 }
 0xa33   : > { %v11137_v30 = vpop.eup %11136  ;;  %v8199_v32 = vadd.f32 1.0, %v11135_v6 }
 0xa34   : > { %v8263_v21 = vsel %vm8262_vm14, %v11133_v34, %v8259_v53  ;;  %v8271_v5 = vmul.f32 %v11137_v30, %v8198_v8  ;;  %11138 = vpow2.f32 %v10508_v44  ;;  %vm8276_vm0 = vweird.f32 %v11137_v30 }
 0xa35   : > { %v8268_v9 = vsel %vm8265_vm15, %v8267_v62, %v8263_v21  ;;  %11140 = vrcp.f32 %v8199_v32  ;;  %vm8277_vm2 = vmor %vm8275_vm1, %vm8276_vm0  ;;  %v8296_v42 = vand.u32 2147483648, %v8199_v32  ;;  %v8294_v58 = vand.u32 2147483647, %v8199_v32 }
 0xa36   : > { %8453 = vst [vmem:[%s14680_s26 + $0x18] sm:$0xff] %v8268_v9  ;;  %v8272_v25 = vsub.f32 1.0, %v8271_v5  ;;  %vm8290_vm5 = vweird.f32 %v8199_v32 }
 0xa37   : > { %v8123_v60 = vpop.f32.mrf.mxu1  ;;  %v8297_v34 = vor.u32 1.1754944e-38, %v8296_v42  ;;  %vm8295_vm7 = vcmp.eq.f32.partialorder %v8294_v58, 8.507059e+37 }
 0xa38   : > { %v8273_v27 = vmul.f32 %v11137_v30, %v8272_v25  ;;  %v8124_v3 = vadd.f32 %v8123_v60, %v8075_v12  ;;  %v8079_v18 = vpop.f32.mrf.mxu0 }
 0xa39   : > { %v7986_v31 = vpop.f32.mrf.mxu2  ;;  %v8080_v38 = vadd.f32 %v8079_v18, %v8031_v49 }
 0xa3a   : > { %v11139_v59 = vpop.eup %11138  ;;  %v8274_v22 = vadd.f32 %v11137_v30, %v8273_v27  ;;  %v10509_v39 = vmul.f32 -1.442695, %v8124_v3  ;;  %v8035_v17 = vpop.f32.mrf.mxu3  ;;  %v7987_v15 = vadd.f32 %v14665_v2, %v7986_v31 }
 0xa3b   : > { %v11141_v63 = vpop.eup %11140  ;;  %v8200_v35 = vadd.f32 1.0, %v11139_v59 }
 0xa3c   : > { %v8278_v45 = vsel %vm8277_vm2, %v11137_v30, %v8274_v22  ;;  %v8286_v52 = vmul.f32 %v11141_v63, %v8199_v32  ;;  %11142 = vpow2.f32 %v10509_v39  ;;  %vm8291_vm4 = vweird.f32 %v11141_v63 }
 0xa3d   : > { %v8283_v57 = vsel %vm8280_vm3, %v8282_v16, %v8278_v45  ;;  %11144 = vrcp.f32 %v8200_v35  ;;  %vm8292_vm6 = vmor %vm8290_vm5, %vm8291_vm4  ;;  %v8311_v13 = vand.u32 2147483648, %v8200_v35  ;;  %v8309_v10 = vand.u32 2147483647, %v8200_v35 }
 0xa3e   : > { %8454 = vst [vmem:[%s14680_s26 + $0x20] sm:$0xff] %v8283_v57  ;;  %v8287_v61 = vsub.f32 1.0, %v8286_v52  ;;  %vm8305_vm9 = vweird.f32 %v8200_v35  ;;  %v8034_v30 = vadd.f32 %v8033_v56, %v7985_v43  ;;  %v8036_v39 = vadd.f32 %v8035_v17, %v7987_v15 }
 0xa3f   : > { %v8126_v19 = vpop.f32.mrf.mxu1  ;;  %v8312_v44 = vor.u32 1.1754944e-38, %v8311_v13  ;;  %vm8310_vm11 = vcmp.eq.f32.partialorder %v8309_v10, 8.507059e+37 }
 0xa40   : > { %v8288_v40 = vmul.f32 %v11141_v63, %v8287_v61  ;;  %v8127_v47 = vadd.f32 %v8126_v19, %v8078_v7  ;;  %v8082_v26 = vpop.f32.mrf.mxu0 }
 0xa41   : > { %v8083_v25 = vadd.f32 %v8082_v26, %v8034_v30  ;;  %v7989_v12 = vpop.f32.mrf.mxu2 }
 0xa42   : > { %v11143_v37 = vpop.eup %11142  ;;  %v8289_v14 = vadd.f32 %v11141_v63, %v8288_v40  ;;  %v10510_v1 = vmul.f32 -1.442695, %v8127_v47  ;;  %v7990_v42 = vadd.f32 %v14665_v2, %v7989_v12 }
 0xa43   : > { %v11145_v29 = vpop.eup %11144  ;;  %v8201_v46 = vadd.f32 1.0, %v11143_v37 }
 0xa44   : > { %v8293_v8 = vsel %vm8292_vm6, %v11141_v63, %v8289_v14  ;;  %v8301_v54 = vmul.f32 %v11145_v29, %v8200_v35  ;;  %11146 = vpow2.f32 %v10510_v1  ;;  %vm8306_vm8 = vweird.f32 %v11145_v29  ;;  %v8038_v35 = vpop.f32.mrf.mxu3 }
 0xa45   : > { %v8298_v20 = vsel %vm8295_vm7, %v8297_v34, %v8293_v8  ;;  %11148 = vrcp.f32 %v8201_v46  ;;  %vm8307_vm10 = vmor %vm8305_vm9, %vm8306_vm8  ;;  %v8326_v28 = vand.u32 2147483648, %v8201_v46  ;;  %v8324_v27 = vand.u32 2147483647, %v8201_v46 }
 0xa46   : > { %8455 = vst [vmem:[%s14680_s26 + $0x28] sm:$0xff] %v8298_v20  ;;  %v8302_v4 = vsub.f32 1.0, %v8301_v54  ;;  %vm8320_vm13 = vweird.f32 %v8201_v46 }
 0xa47   : > { %v8128_v24 = vpop.f32.mrf.mxu1  ;;  %v8327_v51 = vor.u32 1.1754944e-38, %v8326_v28  ;;  %vm8325_vm15 = vcmp.eq.f32.partialorder %v8324_v27, 8.507059e+37 }
 0xa48   : > { %v8303_v33 = vmul.f32 %v11145_v29, %v8302_v4  ;;  %v8129_v36 = vadd.f32 %v8128_v24, %v8080_v38  ;;  %v8084_v55 = vpop.f32.mrf.mxu0 }
 0xa49   : > { %v8085_v61 = vadd.f32 %v8084_v55, %v8036_v39  ;;  %v7991_v58 = vpop.f32.mrf.mxu2 }
 0xa4a   : > { %v11147_v41 = vpop.eup %11146  ;;  %v8304_v11 = vadd.f32 %v11145_v29, %v8303_v33  ;;  %v10511_v6 = vmul.f32 -1.442695, %v8129_v36  ;;  %v7992_v38 = vadd.f32 %v14665_v2, %v7991_v58 }
 0xa4b   : > { %v11149_v53 = vpop.eup %11148  ;;  %v8202_v62 = vadd.f32 1.0, %v11147_v41 }
 0xa4c   : > { %v8308_v32 = vsel %vm8307_vm10, %v11145_v29, %v8304_v11  ;;  %v8316_v21 = vmul.f32 %v11149_v53, %v8201_v46  ;;  %11150 = vpow2.f32 %v10511_v6  ;;  %vm8321_vm12 = vweird.f32 %v11149_v53  ;;  %v8040_v31 = vpop.f32.mrf.mxu3 }
 0xa4d   : > { %v8313_v5 = vsel %vm8310_vm11, %v8312_v44, %v8308_v32  ;;  %11152 = vrcp.f32 %v8202_v62  ;;  %vm8322_vm14 = vmor %vm8320_vm13, %vm8321_vm12  ;;  %v8341_v7 = vand.u32 2147483648, %v8202_v62  ;;  %v8339_v40 = vand.u32 2147483647, %v8202_v62 }
 0xa4e   : > { %8456 = vst [vmem:[%s14680_s26 + $0x30] sm:$0xff] %v8313_v5  ;;  %v8317_v9 = vsub.f32 1.0, %v8316_v21  ;;  %vm8335_vm1 = vweird.f32 %v8202_v62  ;;  %v8039_v29 = vadd.f32 %v8038_v35, %v7990_v42  ;;  %v8041_v44 = vadd.f32 %v8040_v31, %v7992_v38 }
 0xa4f   : > { %v8131_v48 = vpop.f32.mrf.mxu1  ;;  %v8342_v1 = vor.u32 1.1754944e-38, %v8341_v7  ;;  %vm8340_vm3 = vcmp.eq.f32.partialorder %v8339_v40, 8.507059e+37 }
 0xa50   : > { %v8318_v60 = vmul.f32 %v11149_v53, %v8317_v9  ;;  %v8132_v50 = vadd.f32 %v8131_v48, %v8083_v25  ;;  %v8087_v52 = vpop.f32.mrf.mxu0 }
 0xa51   : > { %v8088_v20 = vadd.f32 %v8087_v52, %v8039_v29  ;;  %v7994_v11 = vpop.f32.mrf.mxu2 }
 0xa52   : > { %v11151_v3 = vpop.eup %11150  ;;  %v8319_v18 = vadd.f32 %v11149_v53, %v8318_v60  ;;  %v10512_v59 = vmul.f32 -1.442695, %v8132_v50  ;;  %v7995_v25 = vadd.f32 %v14665_v2, %v7994_v11 }
 0xa53   : > { %v11153_v22 = vpop.eup %11152  ;;  %v8203_v63 = vadd.f32 1.0, %v11151_v3 }
 0xa54   : > { %v8323_v16 = vsel %vm8322_vm14, %v11149_v53, %v8319_v18  ;;  %v8331_v0 = vmul.f32 %v11153_v22, %v8202_v62  ;;  %11154 = vpow2.f32 %v10512_v59  ;;  %vm8336_vm0 = vweird.f32 %v11153_v22  ;;  %v8043_v48 = vpop.f32.mrf.mxu3 }
 0xa55   : > { %v8328_v45 = vsel %vm8325_vm15, %v8327_v51, %v8323_v16  ;;  %11156 = vrcp.f32 %v8203_v63  ;;  %vm8337_vm2 = vmor %vm8335_vm1, %vm8336_vm0  ;;  %v8356_v4 = vand.u32 2147483648, %v8203_v63  ;;  %v8354_v33 = vand.u32 2147483647, %v8203_v63 }
 0xa56   : > { %8457 = vst [vmem:[%s14680_s26 + $0x38] sm:$0xff] %v8328_v45  ;;  %v8332_v57 = vsub.f32 1.0, %v8331_v0  ;;  %vm8350_vm5 = vweird.f32 %v8203_v63  ;;  %v8044_v51 = vadd.f32 %v8043_v48, %v7995_v25 }
 0xa57   : > { %v8133_v23 = vpop.f32.mrf.mxu1  ;;  %v8357_v53 = vor.u32 1.1754944e-38, %v8356_v4  ;;  %vm8355_vm7 = vcmp.eq.f32.partialorder %v8354_v33, 8.507059e+37 }
 0xa58   : > { %v8333_v19 = vmul.f32 %v11153_v22, %v8332_v57  ;;  %v8134_v56 = vadd.f32 %v8133_v23, %v8085_v61  ;;  %v8089_v13 = vpop.f32.mrf.mxu0 }
 0xa59   : > { %v8090_v5 = vadd.f32 %v8089_v13, %v8041_v44  ;;  %v7996_v0 = vpop.f32.mrf.mxu2 }
 0xa5a   : > { %v11155_v47 = vpop.eup %11154  ;;  %v8334_v26 = vadd.f32 %v11153_v22, %v8333_v19  ;;  %v10513_v37 = vmul.f32 -1.442695, %v8134_v56  ;;  %v7997_v61 = vadd.f32 %v14665_v2, %v7996_v0 }
 0xa5b   : > { %v11157_v14 = vpop.eup %11156  ;;  %v8204_v34 = vadd.f32 1.0, %v11155_v47 }
 0xa5c   : > { %v8338_v49 = vsel %vm8337_vm2, %v11153_v22, %v8334_v26  ;;  %v8346_v46 = vmul.f32 %v11157_v14, %v8203_v63  ;;  %11158 = vpow2.f32 %v10513_v37  ;;  %vm8351_vm4 = vweird.f32 %v11157_v14  ;;  %v8045_v56 = vpop.f32.mrf.mxu3 }
 0xa5d   : > { %v8343_v8 = vsel %vm8340_vm3, %v8342_v1, %v8338_v49  ;;  %11160 = vrcp.f32 %v8204_v34  ;;  %vm8352_vm6 = vmor %vm8350_vm5, %vm8351_vm4  ;;  %v8371_v9 = vand.u32 2147483648, %v8204_v34  ;;  %v8369_v15 = vand.u32 2147483647, %v8204_v34 }
 0xa5e   : > { %8458 = vst [vmem:[%s14680_s26 + $0x40] sm:$0xff] %v8343_v8  ;;  %v8347_v54 = vsub.f32 1.0, %v8346_v46  ;;  %vm8365_vm9 = vweird.f32 %v8204_v34 }
 0xa5f   : > { %v8136_v43 = vpop.f32.mrf.mxu1  ;;  %v8372_v22 = vor.u32 1.1754944e-38, %v8371_v9  ;;  %vm8370_vm11 = vcmp.eq.f32.partialorder %v8369_v15, 8.507059e+37 }
 0xa60   : > { %v8348_v24 = vmul.f32 %v11157_v14, %v8347_v54  ;;  %v8137_v10 = vadd.f32 %v8136_v43, %v8088_v20  ;;  %v8092_v27 = vpop.f32.mrf.mxu0 }
 0xa61   : > { %v8093_v52 = vadd.f32 %v8092_v27, %v8044_v51 }
 0xa62   : > { %v11159_v36 = vpop.eup %11158  ;;  %v8349_v41 = vadd.f32 %v11157_v14, %v8348_v24  ;;  %v10514_v17 = vmul.f32 -1.442695, %v8137_v10 }
 0xa63   : > { %v11161_v6 = vpop.eup %11160  ;;  %v8205_v30 = vadd.f32 1.0, %v11159_v36 }
 0xa64   : > { %v8353_v62 = vsel %vm8352_vm6, %v11157_v14, %v8349_v41  ;;  %v8361_v55 = vmul.f32 %v11161_v6, %v8204_v34  ;;  %11162 = vpow2.f32 %v10514_v17  ;;  %vm8366_vm8 = vweird.f32 %v11161_v6 }
 0xa65   : > { %v8358_v32 = vsel %vm8355_vm7, %v8357_v53, %v8353_v62  ;;  %11164 = vrcp.f32 %v8205_v30  ;;  %vm8367_vm10 = vmor %vm8365_vm9, %vm8366_vm8  ;;  %v8386_v57 = vand.u32 2147483648, %v8205_v30  ;;  %v8384_v23 = vand.u32 2147483647, %v8205_v30 }
 0xa66   : > { %8459 = vst [vmem:[%s14680_s26 + $0x48] sm:$0xff] %v8358_v32  ;;  %v8362_v21 = vsub.f32 1.0, %v8361_v55  ;;  %vm8380_vm13 = vweird.f32 %v8205_v30  ;;  %v8046_v14 = vadd.f32 %v8045_v56, %v7997_v61 }
 0xa67   : > { %v8138_v12 = vpop.f32.mrf.mxu1  ;;  %v8387_v37 = vor.u32 1.1754944e-38, %v8386_v57  ;;  %vm8385_vm15 = vcmp.eq.f32.partialorder %v8384_v23, 8.507059e+37 }
 0xa68   : > { %v8363_v28 = vmul.f32 %v11161_v6, %v8362_v21  ;;  %v8139_v60 = vadd.f32 %v8138_v12, %v8090_v5  ;;  %v8094_v29 = vpop.f32.mrf.mxu0 }
 0xa69   : > { %v8095_v8 = vadd.f32 %v8094_v29, %v8046_v14 }
 0xa6a   : > { %v11163_v50 = vpop.eup %11162  ;;  %v8364_v3 = vadd.f32 %v11161_v6, %v8363_v28  ;;  %v10515_v18 = vmul.f32 -1.442695, %v8139_v60 }
 0xa6b   : > { %v11165_v59 = vpop.eup %11164  ;;  %v8206_v39 = vadd.f32 1.0, %v11163_v50 }
 0xa6c   : > { %v8368_v63 = vsel %vm8367_vm10, %v11161_v6, %v8364_v3  ;;  %v8376_v16 = vmul.f32 %v11165_v59, %v8205_v30  ;;  %11166 = vpow2.f32 %v10515_v18  ;;  %vm8381_vm12 = vweird.f32 %v11165_v59 }
 0xa6d   : > { %v8373_v35 = vsel %vm8370_vm11, %v8372_v22, %v8368_v63  ;;  %11168 = vrcp.f32 %v8206_v39  ;;  %vm8382_vm14 = vmor %vm8380_vm13, %vm8381_vm12  ;;  %v8401_v54 = vand.u32 2147483648, %v8206_v39  ;;  %v8399_v4 = vand.u32 2147483647, %v8206_v39 }
 0xa6e   : > { %8460 = vst [vmem:[%s14680_s26 + $0x50] sm:$0xff] %v8373_v35  ;;  %v8377_v45 = vsub.f32 1.0, %v8376_v16  ;;  %vm8395_vm1 = vweird.f32 %v8206_v39 }
 0xa6f   : > { %v8141_v7 = vpop.f32.mrf.mxu1  ;;  %v8402_v10 = vor.u32 1.1754944e-38, %v8401_v54  ;;  %vm8400_vm3 = vcmp.eq.f32.partialorder %v8399_v4, 8.507059e+37 }
 0xa70   : > { %v8378_v42 = vmul.f32 %v11165_v59, %v8377_v45  ;;  %v8142_v19 = vadd.f32 %v8141_v7, %v8093_v52 }
 0xa72   : > { %v11167_v40 = vpop.eup %11166  ;;  %v8379_v58 = vadd.f32 %v11165_v59, %v8378_v42  ;;  %v10516_v47 = vmul.f32 -1.442695, %v8142_v19 }
 0xa73   : > { %v11169_v26 = vpop.eup %11168  ;;  %v8207_v1 = vadd.f32 1.0, %v11167_v40 }
 0xa74   : > { %v8383_v34 = vsel %vm8382_vm14, %v11165_v59, %v8379_v58  ;;  %v8391_v2 = vmul.f32 %v11169_v26, %v8206_v39  ;;  %11170 = vpow2.f32 %v10516_v47  ;;  %vm8396_vm0 = vweird.f32 %v11169_v26 }
 0xa75   : > { %v8388_v49 = vsel %vm8385_vm15, %v8387_v37, %v8383_v34  ;;  %11172 = vrcp.f32 %v8207_v1  ;;  %vm8397_vm2 = vmor %vm8395_vm1, %vm8396_vm0  ;;  %v8416_v53 = vand.u32 2147483648, %v8207_v1  ;;  %v8414_v30 = vand.u32 2147483647, %v8207_v1 }
 0xa76   : > { %8461 = vst [vmem:[%s14680_s26 + $0x58] sm:$0xff] %v8388_v49  ;;  %v8392_v46 = vsub.f32 1.0, %v8391_v2  ;;  %vm8410_vm5 = vweird.f32 %v8207_v1 }
 0xa77   : > { %v8143_v31 = vpop.f32.mrf.mxu1  ;;  %v8417_v21 = vor.u32 1.1754944e-38, %v8416_v53  ;;  %vm8415_vm7 = vcmp.eq.f32.partialorder %v8414_v30, 8.507059e+37 }
 0xa78   : > { %v8393_v20 = vmul.f32 %v11169_v26, %v8392_v46  ;;  %v8144_v38 = vadd.f32 %v8143_v31, %v8095_v8 }
 0xa7a   : > { %v11171_v13 = vpop.eup %11170  ;;  %v8394_v43 = vadd.f32 %v11169_v26, %v8393_v20  ;;  %v10517_v24 = vmul.f32 -1.442695, %v8144_v38 }
 0xa7b   : > { %v11173_v33 = vpop.eup %11172  ;;  %v8208_v36 = vadd.f32 1.0, %v11171_v13 }
 0xa7c   : > { %v8398_v41 = vsel %vm8397_vm2, %v11169_v26, %v8394_v43  ;;  %v8406_v11 = vmul.f32 %v11173_v33, %v8207_v1  ;;  %11174 = vpow2.f32 %v10517_v24  ;;  %vm8411_vm4 = vweird.f32 %v11173_v33 }
 0xa7d   : > { %v8403_v17 = vsel %vm8400_vm3, %v8402_v10, %v8398_v41  ;;  %11176 = vrcp.f32 %v8208_v36  ;;  %vm8412_vm6 = vmor %vm8410_vm5, %vm8411_vm4  ;;  %v8431_v15 = vand.u32 2147483648, %v8208_v36  ;;  %v8429_v60 = vand.u32 2147483647, %v8208_v36 }
 0xa7e   : > { %8462 = vst [vmem:[%s14680_s26 + $0x60] sm:$0xff] %v8403_v17  ;;  %v8407_v6 = vsub.f32 1.0, %v8406_v11  ;;  %vm8425_vm9 = vweird.f32 %v8208_v36 }
 0xa7f   : > { %v8432_v3 = vor.u32 1.1754944e-38, %v8431_v15  ;;  %vm8430_vm11 = vcmp.eq.f32.partialorder %v8429_v60, 8.507059e+37 }
 0xa80   : > { %v8408_v44 = vmul.f32 %v11173_v33, %v8407_v6 }
 0xa82   : > { %v11175_v62 = vpop.eup %11174  ;;  %v8409_v55 = vadd.f32 %v11173_v33, %v8408_v44 }
 0xa83   : > { %v11177_v32 = vpop.eup %11176  ;;  %v8209_v5 = vadd.f32 1.0, %v11175_v62 }
 0xa84   : > { %v8413_v9 = vsel %vm8412_vm6, %v11173_v33, %v8409_v55  ;;  %v8421_v25 = vmul.f32 %v11177_v32, %v8208_v36  ;;  %vm8426_vm8 = vweird.f32 %v11177_v32 }
 0xa85   : > { %v8418_v12 = vsel %vm8415_vm7, %v8417_v21, %v8413_v9  ;;  %11178 = vrcp.f32 %v8209_v5  ;;  %vm8427_vm10 = vmor %vm8425_vm9, %vm8426_vm8  ;;  %v8446_v39 = vand.u32 2147483648, %v8209_v5  ;;  %v8444_v16 = vand.u32 2147483647, %v8209_v5 }
 0xa86   : > { %8463 = vst [vmem:[%s14680_s26 + $0x68] sm:$0xff] %v8418_v12  ;;  %v8422_v28 = vsub.f32 1.0, %v8421_v25  ;;  %vm8440_vm13 = vweird.f32 %v8209_v5 }
 0xa87   : > { %v8447_v35 = vor.u32 1.1754944e-38, %v8446_v39  ;;  %vm8445_vm15 = vcmp.eq.f32.partialorder %v8444_v16, 8.507059e+37 }
 0xa88   : > { %v8423_v48 = vmul.f32 %v11177_v32, %v8422_v28 }
 0xa8a   : > { %v8424_v27 = vadd.f32 %v11177_v32, %v8423_v48 }
 0xa8b   : > { %v11179_v50 = vpop.eup %11178 }
 0xa8c   : > { %v8428_v18 = vsel %vm8427_vm10, %v11177_v32, %v8424_v27  ;;  %v8436_v59 = vmul.f32 %v11179_v50, %v8209_v5  ;;  %vm8441_vm12 = vweird.f32 %v11179_v50 }
 0xa8d   : > { %v8433_v22 = vsel %vm8430_vm11, %v8432_v3, %v8428_v18  ;;  %vm8442_vm14 = vmor %vm8440_vm13, %vm8441_vm12 }
 0xa8e   : > { %8464 = vst [vmem:[%s14680_s26 + $0x70] sm:$0xff] %v8433_v22  ;;  %v8437_v51 = vsub.f32 1.0, %v8436_v59 }
 0xa90   : > { %v8438_v63 = vmul.f32 %v11179_v50, %v8437_v51 }
 0xa92   : > { %v8439_v0 = vadd.f32 %v11179_v50, %v8438_v63 }
 0xa94   : > { %v8443_v45 = vsel %vm8442_vm14, %v11179_v50, %v8439_v0 }
 0xa95   : > { %v8448_v52 = vsel %vm8445_vm15, %v8447_v35, %v8443_v45 }
 0xa96   : > { %8465 = vst [vmem:[%s14680_s26 + $0x78] sm:$0xff] %v8448_v52 }
 0xa97 PF: > { %s33_s0 = sadd.s32 1, %s11321_s0  }
 0xa98   : > { %p30_p7 = scmp.ge.s32.totalorder %s33_s0, 4  }
 0xa9a   :  { %32 = sbr.rel (!%p30_p7) target bundleno = 13 (0xd), region = 154 }
 0xa9f   :  { %8521 = vsyncpa [#allocation3], 1 }
 0xaa0   :  { %8523 = vsyncpa [#allocation3 + $0x1], 1 }
 0xaa1   :  { %8524 = vsyncpa [#allocation5], 1 }
 0xaa2   :  { %8525 = vsyncpa [#allocation8], 1 }

</bundles_post_ra>
